<compile_context>
chip_gen: v6e
topology: v6e:2x2x1
jax: 0.10.0
libtpu: 0.0.40
codegen_flags: <defaults>
</compile_context>

<pallas_src>
import functools

import jax
import jax.numpy as jnp
from jax.experimental import pallas as pl
from jax.experimental.pallas import tpu as pltpu


# Adjacency dtype: bf16 halves the dominant HBM traffic (v5e/v6e especially)
# and uses the bf16 MXU path; set to jnp.float32 for bit-closer torch parity.
ADJ_DTYPE = jnp.bfloat16

# Raise the scoped-VMEM limit above the 16/32 MiB defaults so big row tiles can
# be double-buffered; 48 MiB stays safely under v7x's 64 MiB physical VMEM.
VMEM_LIMIT_BYTES = 48 * 1024 * 1024

# Rows of adjacency per block (~half of what a v5e/v6e-only plan would use,
# so double-buffering survives v7x's smaller VMEM).
_ROW_TILE_TARGET = 256


def _row_tile(n, target=_ROW_TILE_TARGET):
    """Largest row tile <= target that divides n and is a multiple of 8 (else n)."""
    if n <= target:
        return n
    t = (target // 8) * 8
    while t >= 8:
        if n % t == 0:
            return t
        t -= 8
    return n


# ----------------------------- Pallas kernels -----------------------------

def _gcn_layer_kernel(adj_ref, x_ref, w_ref, out_ref, *, apply_relu, xw_first):
    """One GraphConv layer for one (view, row-tile) grid point.

    adj_ref : [1, tm, N]   row block of the normalized adjacency (ADJ_DTYPE)
    x_ref   : [1, N, Fin]  full node features of this view (resident; small)
    w_ref   : [1, Fin, Fout]
    out_ref : [1, tm, Fout]
    """
    adj = adj_ref[0]
    x = x_ref[0]
    w = w_ref[0]
    if xw_first:
        # Fout < Fin: A @ (X @ W) keeps the N^2-scale matmul at width Fout.
        xw = jnp.dot(x, w, preferred_element_type=jnp.float32)
        h = jnp.dot(adj, xw.astype(adj.dtype), preferred_element_type=jnp.float32)
    else:
        # Fin <= Fout: (A @ X) @ W keeps the N^2-scale matmul at width Fin.
        ax = jnp.dot(adj, x.astype(adj.dtype), preferred_element_type=jnp.float32)
        h = jnp.dot(ax, w, preferred_element_type=jnp.float32)
    if apply_relu:
        h = jnp.maximum(h, 0.0)
    out_ref[0] = h.astype(out_ref.dtype)


def _last_view_layer_fusion_kernel(adj_ref, h_ref, wc_ref, xh_ref):
    """Last per-view GCN layer + FeatureFusion, fused, for one row tile.

    adj_ref : [V, tm, N]   row blocks of all view adjacencies (ADJ_DTYPE)
    h_ref   : [V, N, F]    full penultimate activations of all views
    wc_ref  : [V, F, Ff]   wc[v] = W_last[v] @ W_fusion[v] (folded in wrapper)
    xh_ref  : [tm, Ff]

    t = sum_v (A_v @ h_v) @ wc[v]  ==  sum_v h_last_v @ W_fusion[v]
    xh = softmax(t, dim=1); relu(softmax(.)) == softmax(.) so it is dropped.
    """
    n_views = adj_ref.shape[0]
    t = jnp.zeros(xh_ref.shape, jnp.float32)
    for v in range(n_views):
        adj = adj_ref[v]
        ah = jnp.dot(adj, h_ref[v].astype(adj.dtype),
                     preferred_element_type=jnp.float32)
        t = t + jnp.dot(ah, wc_ref[v], preferred_element_type=jnp.float32)
    t = t - jnp.max(t, axis=1, keepdims=True)
    e = jnp.exp(t)
    xh_ref[...] = (e / jnp.sum(e, axis=1, keepdims=True)).astype(xh_ref.dtype)


def _decoder_kernel(z_ref, zt_ref, adj_ref):
    """InnerProductDecoder (identity activation): one row block of Z @ Z^T.

    z_ref : [tm, F], zt_ref : [F, N] (Z^T materialized once in the wrapper, so
    no per-tile XLU transpose), adj_ref : [tm, N] (lane-dense output block).
    The reference also computes z @ self.weight and discards it (dead); dropped.
    """
    adj_ref[...] = jnp.dot(z_ref[...], zt_ref[...],
                           preferred_element_type=jnp.float32).astype(adj_ref.dtype)


# ------------------------------ JAX wrappers -------------------------------

def gcn_layer(adj_s, x_s, w_s, *, apply_relu):
    """Batched GraphConv: out[v] = act(A_v X_v W_v), grid=(views, row_tiles)."""
    n_views, n, _ = adj_s.shape
    f_in, f_out = w_s.shape[1], w_s.shape[2]
    tm = _row_tile(n)
    kernel = functools.partial(_gcn_layer_kernel,
                               apply_relu=apply_relu, xw_first=f_out < f_in)
    return pl.pallas_call(
        kernel,
        out_shape=jax.ShapeDtypeStruct((n_views, n, f_out), jnp.float32),
        grid=(n_views, n // tm),
        in_specs=[
            pl.BlockSpec((1, tm, n), lambda v, i: (v, i, 0)),
            pl.BlockSpec((1, n, f_in), lambda v, i: (v, 0, 0)),
            pl.BlockSpec((1, f_in, f_out), lambda v, i: (v, 0, 0)),
        ],
        out_specs=pl.BlockSpec((1, tm, f_out), lambda v, i: (v, i, 0)),
        compiler_params=pltpu.CompilerParams(
            dimension_semantics=("parallel", "parallel"),
            vmem_limit_bytes=VMEM_LIMIT_BYTES),
    )(adj_s, x_s, w_s)


def last_view_layer_plus_fusion(adj_s, h_s, wc_s):
    """Fused (last per-view GCN layer + FeatureFusion softmax), grid=(row_tiles,)."""
    n_views, n, _ = adj_s.shape
    f_prev = h_s.shape[-1]
    f_out = wc_s.shape[-1]
    tm = _row_tile(n)
    return pl.pallas_call(
        _last_view_layer_fusion_kernel,
        out_shape=jax.ShapeDtypeStruct((n, f_out), jnp.float32),
        grid=(n // tm,),
        in_specs=[
            pl.BlockSpec((n_views, tm, n), lambda i: (0, i, 0)),
            pl.BlockSpec((n_views, n, f_prev), lambda i: (0, 0, 0)),
            pl.BlockSpec((n_views, f_prev, f_out), lambda i: (0, 0, 0)),
        ],
        out_specs=pl.BlockSpec((tm, f_out), lambda i: (i, 0)),
        compiler_params=pltpu.CompilerParams(
            dimension_semantics=("parallel",),
            vmem_limit_bytes=VMEM_LIMIT_BYTES),
    )(adj_s, h_s, wc_s)


def inner_product_decoder(z):
    """adj_rec = Z Z^T, row-tiled with lane-dense [tm, N] output blocks."""
    n, f = z.shape
    tm = _row_tile(n)
    zt = z.T  # tiny [F, N] transpose done once in XLA, not per tile in-kernel
    return pl.pallas_call(
        _decoder_kernel,
        out_shape=jax.ShapeDtypeStruct((n, n), jnp.float32),
        grid=(n // tm,),
        in_specs=[
            pl.BlockSpec((tm, f), lambda i: (i, 0)),
            pl.BlockSpec((f, n), lambda i: (0, 0)),
        ],
        out_specs=pl.BlockSpec((tm, n), lambda i: (i, 0)),
        compiler_params=pltpu.CompilerParams(
            dimension_semantics=("parallel",),
            vmem_limit_bytes=VMEM_LIMIT_BYTES),
    )(z, zt)


# ------------------------------ GAE forward --------------------------------

def xavier_uniform(key, fan_in, fan_out):
    limit = jnp.sqrt(6.0 / (fan_in + fan_out))
    return jax.random.uniform(key, (fan_in, fan_out), jnp.float32, -limit, limit)


def sym_normalize(adj):
    deg = jnp.sum(adj, axis=1)
    d_inv_sqrt = jnp.where(deg > 0, 1.0 / jnp.sqrt(deg), 0.0)
    return adj * d_inv_sqrt[:, None] * d_inv_sqrt[None, :]


def gae_forward(params, graph0, graph1, graph2, feat0, feat1, feat2, graph,
                *, views):
    # Batched per-view stacks require identical per-view shapes (true here).
    for i in range(len(params["layer0"])):
        assert (params["layer0"][i].shape == params["layer1"][i].shape
                == params["layer2"][i].shape)
    assert feat0.shape == feat1.shape == feat2.shape

    adj_s = jnp.stack([graph0, graph1, graph2]).astype(ADJ_DTYPE)   # [3, N, N]
    x_s = jnp.stack([feat0, feat1, feat2])                          # [3, N, Fin]
    w_view = [jnp.stack([params["layer0"][i],
                         params["layer1"][i],
                         params["layer2"][i]])
              for i in range(len(params["layer0"]))]                # [3, Fi, Fo]

    # Per-view GCN stack: all layers except the last (relu activation).
    h = x_s
    for w in w_view[:-1]:
        h = gcn_layer(adj_s, h, w, apply_relu=True)

    # Last view layer (identity activation) + FeatureFusion, fused.
    #   xh = softmax(sum_v (A_v @ h_v) @ (W_last_v @ Wfusion_v))
    # (The reference's torch.cat([h0,h1,h2],1) is dead and never materialized.)
    wf_s = jnp.stack([params["fusion_w0"],
                      params["fusion_w1"],
                      params["fusion_w2"]])                         # [3, F, F]
    wc_s = jnp.einsum("vij,vjk->vik", w_view[-1], wf_s)             # fold weights
    xh = last_view_layer_plus_fusion(adj_s, h, wc_s)                # [N, F]

    # Main GCN stack on add_self_loop(graph), sym-normalized (relu except last).
    adj_m = sym_normalize(graph + jnp.eye(graph.shape[0], dtype=graph.dtype))
    adj_m_b = adj_m.astype(ADJ_DTYPE)[None]                         # [1, N, N]
    n_main = len(params["layer_m"])
    for li, w in enumerate(params["layer_m"]):
        xh = gcn_layer(adj_m_b, xh[None], w[None],
                       apply_relu=(li != n_main - 1))[0]

    # InnerProductDecoder: adj_rec = Z Z^T, identical for every view entry.
    adj_rec_arr = inner_product_decoder(xh)
    adj_rec = {i: adj_rec_arr for i in range(views)}
    return adj_rec, xh


# ----------------------- pure-JAX reference (for checking) ------------------

def _reference_forward(params, adjs_f32, feats, adj_m_f32):
    hs = []
    for v in range(3):
        hv = feats[v]
        ws = params[f"layer{v}"]
        for li, w in enumerate(ws):
            hv = adjs_f32[v] @ (hv @ w)
            if li != len(ws) - 1:
                hv = jnp.maximum(hv, 0.0)
        hs.append(hv)
    t = (hs[0] @ params["fusion_w0"] + hs[1] @ params["fusion_w1"]
         + hs[2] @ params["fusion_w2"])
    xh = jax.nn.softmax(t, axis=1)          # relu(softmax) == softmax
    for li, w in enumerate(params["layer_m"]):
        xh = adj_m_f32 @ (xh @ w)
        if li != len(params["layer_m"]) - 1:
            xh = jnp.maximum(xh, 0.0)
    return xh @ xh.T, xh


# --------------------------------- main -------------------------------------

if __name__ == "__main__":
    key = jax.random.PRNGKey(0)
    N = 512                    # nodes (multiple row tiles: tm=256 -> 2 tiles)
    in_dim = [16, 16, 16]      # per-view input feature dims
    hidden_dims_v = [32, 32]   # per-view GCN stack
    hidden_dims = [32, 16]     # main GCN stack
    views = 3

    keys = jax.random.split(key, 32)
    kiter = iter(keys)

    def make_stack(dims):
        return [xavier_uniform(next(kiter), dims[i], dims[i + 1])
                for i in range(len(dims) - 1)]

    params = {
        "layer0": make_stack([in_dim[0]] + hidden_dims_v),
        "layer1": make_stack([in_dim[1]] + hidden_dims_v),
        "layer2": make_stack([in_dim[2]] + hidden_dims_v),
        "layer_m": make_stack([hidden_dims_v[-1]] + hidden_dims),
        "fusion_w0": xavier_uniform(next(kiter), hidden_dims_v[-1], hidden_dims_v[-1]),
        "fusion_w1": xavier_uniform(next(kiter), hidden_dims_v[-1], hidden_dims_v[-1]),
        "fusion_w2": xavier_uniform(next(kiter), hidden_dims_v[-1], hidden_dims_v[-1]),
        # Unused: mirrors the reference decoder's dead `z @ weight` matmul.
        "dec_w": xavier_uniform(next(kiter), hidden_dims[-1], hidden_dims[-1]),
    }

    def make_graph(k):
        a = (jax.random.uniform(k, (N, N)) < 0.05).astype(jnp.float32)
        a = jnp.maximum(a, a.T)
        a = a * (1.0 - jnp.eye(N))   # no self loops in the raw graph
        return a

    g0_raw = make_graph(next(kiter))
    g1_raw = make_graph(next(kiter))
    g2_raw = make_graph(next(kiter))
    g_raw = make_graph(next(kiter))

    graph0 = sym_normalize(g0_raw + jnp.eye(N))   # GraphConv-style normalized adj
    graph1 = sym_normalize(g1_raw + jnp.eye(N))
    graph2 = sym_normalize(g2_raw + jnp.eye(N))

    feat0 = jax.random.normal(next(kiter), (N, in_dim[0]), jnp.float32)
    feat1 = jax.random.normal(next(kiter), (N, in_dim[1]), jnp.float32)
    feat2 = jax.random.normal(next(kiter), (N, in_dim[2]), jnp.float32)

    fwd = jax.jit(gae_forward, static_argnames=("views",))
    adj_rec, xh = fwd(params, graph0, graph1, graph2,
                      feat0, feat1, feat2, g_raw, views=views)

    jax.block_until_ready(xh)
    for i in range(views):
        jax.block_until_ready(adj_rec[i])

    # Shape / finiteness checks.
    assert xh.shape == (N, hidden_dims[-1])
    for i in range(views):
        assert adj_rec[i].shape == (N, N)
    assert bool(jnp.all(jnp.isfinite(xh)))
    assert bool(jnp.all(jnp.isfinite(adj_rec[0])))

    # Numerical check against a pure-JAX reference (same bf16-rounded adjacency,
    # f32 math); relative-to-peak tolerance absorbs bf16 operand casts.
    adjs_ref = [a.astype(ADJ_DTYPE).astype(jnp.float32)
                for a in (graph0, graph1, graph2)]
    adj_m_ref = sym_normalize(g_raw + jnp.eye(N)).astype(ADJ_DTYPE).astype(jnp.float32)
    adj_rec_ref, xh_ref = _reference_forward(
        params, adjs_ref, [feat0, feat1, feat2], adj_m_ref)

    def rel_to_peak(a, b):
        return float(jnp.max(jnp.abs(a - b)) / (jnp.max(jnp.abs(b)) + 1e-12))

    assert rel_to_peak(xh, xh_ref) < 5e-2
    assert rel_to_peak(adj_rec[0], adj_rec_ref) < 5e-2
    # Z Z^T must be (numerically) symmetric.
    sym_err = float(jnp.max(jnp.abs(adj_rec[0] - adj_rec[0].T)))
    assert sym_err < 1e-3 * (float(jnp.max(jnp.abs(adj_rec[0]))) + 1e-12)

    print("KERNEL_OK")
</pallas_src>

<mosaic_0001>
module attributes {stable_mosaic.version = 11 : i64} {
  func.func @_gcn_layer_kernel(%arg0: i32, %arg1: i32, %arg2: memref<1x256x512xbf16, #tpu.memory_space<vmem>>, %arg3: memref<1x512x16xf32, #tpu.memory_space<vmem>>, %arg4: memref<1x16x32xf32, #tpu.memory_space<vmem>>, %arg5: memref<1x256x32xf32, #tpu.memory_space<vmem>>) attributes {dimension_semantics = [#tpu.dimension_semantics<parallel>, #tpu.dimension_semantics<parallel>], iteration_bounds = array<i64: 3, 2>, scalar_prefetch = 0 : i64, scratch_operands = 0 : i64, tpu.core_type = #tpu.core_type<tc>, window_params = [{transform_indices = @transform_0, window_bounds = array<i64: 1, 256, 512>}, {transform_indices = @transform_1, window_bounds = array<i64: 1, 512, 16>}, {transform_indices = @transform_2, window_bounds = array<i64: 1, 16, 32>}, {transform_indices = @transform_3, window_bounds = array<i64: 1, 256, 32>}]} {
    %c0 = arith.constant 0 : index
    %c0_0 = arith.constant 0 : index
    %c0_1 = arith.constant 0 : index
    %0 = vector.load %arg2[%c0, %c0_0, %c0_1] : memref<1x256x512xbf16, #tpu.memory_space<vmem>>, vector<1x256x512xbf16>
    %1 = vector.shape_cast %0 : vector<1x256x512xbf16> to vector<256x512xbf16>
    %c0_2 = arith.constant 0 : index
    %c0_3 = arith.constant 0 : index
    %c0_4 = arith.constant 0 : index
    %2 = vector.load %arg3[%c0_2, %c0_3, %c0_4] : memref<1x512x16xf32, #tpu.memory_space<vmem>>, vector<1x512x16xf32>
    %3 = vector.shape_cast %2 : vector<1x512x16xf32> to vector<512x16xf32>
    %c0_5 = arith.constant 0 : index
    %c0_6 = arith.constant 0 : index
    %c0_7 = arith.constant 0 : index
    %4 = vector.load %arg4[%c0_5, %c0_6, %c0_7] : memref<1x16x32xf32, #tpu.memory_space<vmem>>, vector<1x16x32xf32>
    %5 = vector.shape_cast %4 : vector<1x16x32xf32> to vector<16x32xf32>
    %6 = arith.truncf %3 : vector<512x16xf32> to vector<512x16xbf16>
    %cst = arith.constant dense<0.000000e+00> : vector<256x16xf32>
    %7 = tpu.matmul %1, %6, %cst {dimension_numbers = #tpu.dot_dimension_numbers<[1], [0], [0], [1], [0, 0, 1, 1], [], []>} : vector<256x512xbf16>, vector<512x16xbf16>, vector<256x16xf32> -> vector<256x16xf32>
    %cst_8 = arith.constant dense<0.000000e+00> : vector<256x32xf32>
    %8 = tpu.matmul %7, %5, %cst_8 {dimension_numbers = #tpu.dot_dimension_numbers<[1], [0], [0], [1], [0, 0, 1, 1], [], []>} : vector<256x16xf32>, vector<16x32xf32>, vector<256x32xf32> -> vector<256x32xf32>
    %cst_9 = arith.constant 0.000000e+00 : f32
    %9 = vector.broadcast %cst_9 : f32 to vector<256x32xf32>
    %10 = arith.maximumf %8, %9 : vector<256x32xf32>
    %c0_10 = arith.constant 0 : index
    %c0_11 = arith.constant 0 : index
    %c0_12 = arith.constant 0 : index
    %11 = vector.load %arg5[%c0_10, %c0_11, %c0_12] : memref<1x256x32xf32, #tpu.memory_space<vmem>>, vector<1x256x32xf32>
    %12 = vector.shape_cast %11 : vector<1x256x32xf32> to vector<256x32xf32>
    %13 = vector.shape_cast %10 : vector<256x32xf32> to vector<1x256x32xf32>
    tpu.vector_store %arg5[%c0_10, %c0_11, %c0_12], %13 {strides = array<i32>} : memref<1x256x32xf32, #tpu.memory_space<vmem>>, vector<1x256x32xf32>,
    return
  }
  func.func @transform_0(%arg0: i32, %arg1: i32) -> (i32, i32, i32) {
    %c0_i32 = arith.constant 0 : i32
    %c0_i32_0 = arith.constant 0 : i32
    return %arg0, %arg1, %c0_i32 : i32, i32, i32
  }
  func.func @transform_1(%arg0: i32, %arg1: i32) -> (i32, i32, i32) {
    %c0_i32 = arith.constant 0 : i32
    %c0_i32_0 = arith.constant 0 : i32
    %c0_i32_1 = arith.constant 0 : i32
    return %arg0, %c0_i32, %c0_i32_0 : i32, i32, i32
  }
  func.func @transform_2(%arg0: i32, %arg1: i32) -> (i32, i32, i32) {
    %c0_i32 = arith.constant 0 : i32
    %c0_i32_0 = arith.constant 0 : i32
    %c0_i32_1 = arith.constant 0 : i32
    return %arg0, %c0_i32, %c0_i32_0 : i32, i32, i32
  }
  func.func @transform_3(%arg0: i32, %arg1: i32) -> (i32, i32, i32) {
    %c0_i32 = arith.constant 0 : i32
    %c0_i32_0 = arith.constant 0 : i32
    return %arg0, %arg1, %c0_i32 : i32, i32, i32
  }
}

module attributes {stable_mosaic.version = 11 : i64} {
  func.func @_last_view_layer_fusion_kernel(%arg0: i32, %arg1: memref<3x256x512xbf16, #tpu.memory_space<vmem>>, %arg2: memref<3x512x32xf32, #tpu.memory_space<vmem>>, %arg3: memref<3x32x32xf32, #tpu.memory_space<vmem>>, %arg4: memref<256x32xf32, #tpu.memory_space<vmem>>) attributes {dimension_semantics = [#tpu.dimension_semantics<parallel>], iteration_bounds = array<i64: 2>, scalar_prefetch = 0 : i64, scratch_operands = 0 : i64, tpu.core_type = #tpu.core_type<tc>, window_params = [{transform_indices = @transform_0, window_bounds = array<i64: 3, 256, 512>}, {pipeline_mode = #tpu.pipeline_mode<synchronous>, transform_indices = @transform_1, window_bounds = array<i64: 3, 512, 32>}, {pipeline_mode = #tpu.pipeline_mode<synchronous>, transform_indices = @transform_2, window_bounds = array<i64: 3, 32, 32>}, {transform_indices = @transform_3, window_bounds = array<i64: 256, 32>}]} {
    %cst = arith.constant 0.000000e+00 : f32
    %0 = vector.broadcast %cst : f32 to vector<256x32xf32>
    %c0 = arith.constant 0 : index
    %c0_0 = arith.constant 0 : index
    %c0_1 = arith.constant 0 : index
    %1 = vector.load %arg1[%c0, %c0_0, %c0_1] : memref<3x256x512xbf16, #tpu.memory_space<vmem>>, vector<1x256x512xbf16>
    %2 = vector.shape_cast %1 : vector<1x256x512xbf16> to vector<256x512xbf16>
    %c0_2 = arith.constant 0 : index
    %c0_3 = arith.constant 0 : index
    %c0_4 = arith.constant 0 : index
    %3 = vector.load %arg2[%c0_2, %c0_3, %c0_4] : memref<3x512x32xf32, #tpu.memory_space<vmem>>, vector<1x512x32xf32>
    %4 = vector.shape_cast %3 : vector<1x512x32xf32> to vector<512x32xf32>
    %5 = arith.truncf %4 : vector<512x32xf32> to vector<512x32xbf16>
    %cst_5 = arith.constant dense<0.000000e+00> : vector<256x32xf32>
    %6 = tpu.matmul %2, %5, %cst_5 {dimension_numbers = #tpu.dot_dimension_numbers<[1], [0], [0], [1], [0, 0, 1, 1], [], []>} : vector<256x512xbf16>, vector<512x32xbf16>, vector<256x32xf32> -> vector<256x32xf32>
    %c0_6 = arith.constant 0 : index
    %c0_7 = arith.constant 0 : index
    %c0_8 = arith.constant 0 : index
    %7 = vector.load %arg3[%c0_6, %c0_7, %c0_8] : memref<3x32x32xf32, #tpu.memory_space<vmem>>, vector<1x32x32xf32>
    %8 = vector.shape_cast %7 : vector<1x32x32xf32> to vector<32x32xf32>
    %cst_9 = arith.constant dense<0.000000e+00> : vector<256x32xf32>
    %9 = tpu.matmul %6, %8, %cst_9 {dimension_numbers = #tpu.dot_dimension_numbers<[1], [0], [0], [1], [0, 0, 1, 1], [], []>} : vector<256x32xf32>, vector<32x32xf32>, vector<256x32xf32> -> vector<256x32xf32>
    %10 = arith.addf %0, %9 : vector<256x32xf32>
    %c1 = arith.constant 1 : index
    %c0_10 = arith.constant 0 : index
    %c0_11 = arith.constant 0 : index
    %11 = vector.load %arg1[%c1, %c0_10, %c0_11] : memref<3x256x512xbf16, #tpu.memory_space<vmem>>, vector<1x256x512xbf16>
    %12 = vector.shape_cast %11 : vector<1x256x512xbf16> to vector<256x512xbf16>
    %c1_12 = arith.constant 1 : index
    %c0_13 = arith.constant 0 : index
    %c0_14 = arith.constant 0 : index
    %13 = vector.load %arg2[%c1_12, %c0_13, %c0_14] : memref<3x512x32xf32, #tpu.memory_space<vmem>>, vector<1x512x32xf32>
    %14 = vector.shape_cast %13 : vector<1x512x32xf32> to vector<512x32xf32>
    %15 = arith.truncf %14 : vector<512x32xf32> to vector<512x32xbf16>
    %cst_15 = arith.constant dense<0.000000e+00> : vector<256x32xf32>
    %16 = tpu.matmul %12, %15, %cst_15 {dimension_numbers = #tpu.dot_dimension_numbers<[1], [0], [0], [1], [0, 0, 1, 1], [], []>} : vector<256x512xbf16>, vector<512x32xbf16>, vector<256x32xf32> -> vector<256x32xf32>
    %c1_16 = arith.constant 1 : index
    %c0_17 = arith.constant 0 : index
    %c0_18 = arith.constant 0 : index
    %17 = vector.load %arg3[%c1_16, %c0_17, %c0_18] : memref<3x32x32xf32, #tpu.memory_space<vmem>>, vector<1x32x32xf32>
    %18 = vector.shape_cast %17 : vector<1x32x32xf32> to vector<32x32xf32>
    %cst_19 = arith.constant dense<0.000000e+00> : vector<256x32xf32>
    %19 = tpu.matmul %16, %18, %cst_19 {dimension_numbers = #tpu.dot_dimension_numbers<[1], [0], [0], [1], [0, 0, 1, 1], [], []>} : vector<256x32xf32>, vector<32x32xf32>, vector<256x32xf32> -> vector<256x32xf32>
    %20 = arith.addf %10, %19 : vector<256x32xf32>
    %c2 = arith.constant 2 : index
    %c0_20 = arith.constant 0 : index
    %c0_21 = arith.constant 0 : index
    %21 = vector.load %arg1[%c2, %c0_20, %c0_21] : memref<3x256x512xbf16, #tpu.memory_space<vmem>>, vector<1x256x512xbf16>
    %22 = vector.shape_cast %21 : vector<1x256x512xbf16> to vector<256x512xbf16>
    %c2_22 = arith.constant 2 : index
    %c0_23 = arith.constant 0 : index
    %c0_24 = arith.constant 0 : index
    %23 = vector.load %arg2[%c2_22, %c0_23, %c0_24] : memref<3x512x32xf32, #tpu.memory_space<vmem>>, vector<1x512x32xf32>
    %24 = vector.shape_cast %23 : vector<1x512x32xf32> to vector<512x32xf32>
    %25 = arith.truncf %24 : vector<512x32xf32> to vector<512x32xbf16>
    %cst_25 = arith.constant dense<0.000000e+00> : vector<256x32xf32>
    %26 = tpu.matmul %22, %25, %cst_25 {dimension_numbers = #tpu.dot_dimension_numbers<[1], [0], [0], [1], [0, 0, 1, 1], [], []>} : vector<256x512xbf16>, vector<512x32xbf16>, vector<256x32xf32> -> vector<256x32xf32>
    %c2_26 = arith.constant 2 : index
    %c0_27 = arith.constant 0 : index
    %c0_28 = arith.constant 0 : index
    %27 = vector.load %arg3[%c2_26, %c0_27, %c0_28] : memref<3x32x32xf32, #tpu.memory_space<vmem>>, vector<1x32x32xf32>
    %28 = vector.shape_cast %27 : vector<1x32x32xf32> to vector<32x32xf32>
    %cst_29 = arith.constant dense<0.000000e+00> : vector<256x32xf32>
    %29 = tpu.matmul %26, %28, %cst_29 {dimension_numbers = #tpu.dot_dimension_numbers<[1], [0], [0], [1], [0, 0, 1, 1], [], []>} : vector<256x32xf32>, vector<32x32xf32>, vector<256x32xf32> -> vector<256x32xf32>
    %30 = arith.addf %20, %29 : vector<256x32xf32>
    %cst_30 = arith.constant dense<0xFF800000> : vector<256xf32>
    %31 = vector.multi_reduction <maximumf>, %30, %cst_30 [1] : vector<256x32xf32> to vector<256xf32>
    %32 = vector.shape_cast %31 : vector<256xf32> to vector<256x1xf32>
    %33 = vector.broadcast %32 : vector<256x1xf32> to vector<256x32xf32>
    %34 = arith.subf %30, %33 : vector<256x32xf32>
    %35 = math.exp %34 : vector<256x32xf32>
    %cst_31 = arith.constant dense<0.000000e+00> : vector<256xf32>
    %36 = vector.multi_reduction <add>, %35, %cst_31 [1] : vector<256x32xf32> to vector<256xf32>
    %37 = vector.shape_cast %36 : vector<256xf32> to vector<256x1xf32>
    %38 = vector.broadcast %37 : vector<256x1xf32> to vector<256x32xf32>
    %39 = arith.divf %35, %38 : vector<256x32xf32>
    %c0_32 = arith.constant 0 : index
    %c0_33 = arith.constant 0 : index
    %40 = vector.load %arg4[%c0_32, %c0_33] : memref<256x32xf32, #tpu.memory_space<vmem>>, vector<256x32xf32>
    tpu.vector_store %arg4[%c0_32, %c0_33], %39 {strides = array<i32>} : memref<256x32xf32, #tpu.memory_space<vmem>>, vector<256x32xf32>,
    return
  }
  func.func @transform_0(%arg0: i32) -> (i32, i32, i32) {
    %c0_i32 = arith.constant 0 : i32
    %c0_i32_0 = arith.constant 0 : i32
    %c0_i32_1 = arith.constant 0 : i32
    return %c0_i32, %arg0, %c0_i32_0 : i32, i32, i32
  }
  func.func @transform_1(%arg0: i32) -> (i32, i32, i32) {
    %c0_i32 = arith.constant 0 : i32
    %c0_i32_0 = arith.constant 0 : i32
    %c0_i32_1 = arith.constant 0 : i32
    %c0_i32_2 = arith.constant 0 : i32
    return %c0_i32, %c0_i32_0, %c0_i32_1 : i32, i32, i32
  }
  func.func @transform_2(%arg0: i32) -> (i32, i32, i32) {
    %c0_i32 = arith.constant 0 : i32
    %c0_i32_0 = arith.constant 0 : i32
    %c0_i32_1 = arith.constant 0 : i32
    %c0_i32_2 = arith.constant 0 : i32
    return %c0_i32, %c0_i32_0, %c0_i32_1 : i32, i32, i32
  }
  func.func @transform_3(%arg0: i32) -> (i32, i32) {
    %c0_i32 = arith.constant 0 : i32
    %c0_i32_0 = arith.constant 0 : i32
    return %arg0, %c0_i32 : i32, i32
  }
}

module attributes {stable_mosaic.version = 11 : i64} {
  func.func @_gcn_layer_kernel(%arg0: i32, %arg1: i32, %arg2: memref<1x256x512xbf16, #tpu.memory_space<vmem>>, %arg3: memref<1x512x32xf32, #tpu.memory_space<vmem>>, %arg4: memref<1x32x32xf32, #tpu.memory_space<vmem>>, %arg5: memref<1x256x32xf32, #tpu.memory_space<vmem>>) attributes {dimension_semantics = [#tpu.dimension_semantics<parallel>, #tpu.dimension_semantics<parallel>], iteration_bounds = array<i64: 1, 2>, scalar_prefetch = 0 : i64, scratch_operands = 0 : i64, tpu.core_type = #tpu.core_type<tc>, window_params = [{transform_indices = @transform_0, window_bounds = array<i64: 1, 256, 512>}, {transform_indices = @transform_1, window_bounds = array<i64: 1, 512, 32>}, {transform_indices = @transform_2, window_bounds = array<i64: 1, 32, 32>}, {transform_indices = @transform_3, window_bounds = array<i64: 1, 256, 32>}]} {
    %c0 = arith.constant 0 : index
    %c0_0 = arith.constant 0 : index
    %c0_1 = arith.constant 0 : index
    %0 = vector.load %arg2[%c0, %c0_0, %c0_1] : memref<1x256x512xbf16, #tpu.memory_space<vmem>>, vector<1x256x512xbf16>
    %1 = vector.shape_cast %0 : vector<1x256x512xbf16> to vector<256x512xbf16>
    %c0_2 = arith.constant 0 : index
    %c0_3 = arith.constant 0 : index
    %c0_4 = arith.constant 0 : index
    %2 = vector.load %arg3[%c0_2, %c0_3, %c0_4] : memref<1x512x32xf32, #tpu.memory_space<vmem>>, vector<1x512x32xf32>
    %3 = vector.shape_cast %2 : vector<1x512x32xf32> to vector<512x32xf32>
    %c0_5 = arith.constant 0 : index
    %c0_6 = arith.constant 0 : index
    %c0_7 = arith.constant 0 : index
    %4 = vector.load %arg4[%c0_5, %c0_6, %c0_7] : memref<1x32x32xf32, #tpu.memory_space<vmem>>, vector<1x32x32xf32>
    %5 = vector.shape_cast %4 : vector<1x32x32xf32> to vector<32x32xf32>
    %6 = arith.truncf %3 : vector<512x32xf32> to vector<512x32xbf16>
    %cst = arith.constant dense<0.000000e+00> : vector<256x32xf32>
    %7 = tpu.matmul %1, %6, %cst {dimension_numbers = #tpu.dot_dimension_numbers<[1], [0], [0], [1], [0, 0, 1, 1], [], []>} : vector<256x512xbf16>, vector<512x32xbf16>, vector<256x32xf32> -> vector<256x32xf32>
    %cst_8 = arith.constant dense<0.000000e+00> : vector<256x32xf32>
    %8 = tpu.matmul %7, %5, %cst_8 {dimension_numbers = #tpu.dot_dimension_numbers<[1], [0], [0], [1], [0, 0, 1, 1], [], []>} : vector<256x32xf32>, vector<32x32xf32>, vector<256x32xf32> -> vector<256x32xf32>
    %cst_9 = arith.constant 0.000000e+00 : f32
    %9 = vector.broadcast %cst_9 : f32 to vector<256x32xf32>
    %10 = arith.maximumf %8, %9 : vector<256x32xf32>
    %c0_10 = arith.constant 0 : index
    %c0_11 = arith.constant 0 : index
    %c0_12 = arith.constant 0 : index
    %11 = vector.load %arg5[%c0_10, %c0_11, %c0_12] : memref<1x256x32xf32, #tpu.memory_space<vmem>>, vector<1x256x32xf32>
    %12 = vector.shape_cast %11 : vector<1x256x32xf32> to vector<256x32xf32>
    %13 = vector.shape_cast %10 : vector<256x32xf32> to vector<1x256x32xf32>
    tpu.vector_store %arg5[%c0_10, %c0_11, %c0_12], %13 {strides = array<i32>} : memref<1x256x32xf32, #tpu.memory_space<vmem>>, vector<1x256x32xf32>,
    return
  }
  func.func @transform_0(%arg0: i32, %arg1: i32) -> (i32, i32, i32) {
    %c0_i32 = arith.constant 0 : i32
    %c0_i32_0 = arith.constant 0 : i32
    return %arg0, %arg1, %c0_i32 : i32, i32, i32
  }
  func.func @transform_1(%arg0: i32, %arg1: i32) -> (i32, i32, i32) {
    %c0_i32 = arith.constant 0 : i32
    %c0_i32_0 = arith.constant 0 : i32
    %c0_i32_1 = arith.constant 0 : i32
    return %arg0, %c0_i32, %c0_i32_0 : i32, i32, i32
  }
  func.func @transform_2(%arg0: i32, %arg1: i32) -> (i32, i32, i32) {
    %c0_i32 = arith.constant 0 : i32
    %c0_i32_0 = arith.constant 0 : i32
    %c0_i32_1 = arith.constant 0 : i32
    return %arg0, %c0_i32, %c0_i32_0 : i32, i32, i32
  }
  func.func @transform_3(%arg0: i32, %arg1: i32) -> (i32, i32, i32) {
    %c0_i32 = arith.constant 0 : i32
    %c0_i32_0 = arith.constant 0 : i32
    return %arg0, %arg1, %c0_i32 : i32, i32, i32
  }
}

module attributes {stable_mosaic.version = 11 : i64} {
  func.func @_gcn_layer_kernel(%arg0: i32, %arg1: i32, %arg2: memref<1x256x512xbf16, #tpu.memory_space<vmem>>, %arg3: memref<1x512x32xf32, #tpu.memory_space<vmem>>, %arg4: memref<1x32x16xf32, #tpu.memory_space<vmem>>, %arg5: memref<1x256x16xf32, #tpu.memory_space<vmem>>) attributes {dimension_semantics = [#tpu.dimension_semantics<parallel>, #tpu.dimension_semantics<parallel>], iteration_bounds = array<i64: 1, 2>, scalar_prefetch = 0 : i64, scratch_operands = 0 : i64, tpu.core_type = #tpu.core_type<tc>, window_params = [{transform_indices = @transform_0, window_bounds = array<i64: 1, 256, 512>}, {transform_indices = @transform_1, window_bounds = array<i64: 1, 512, 32>}, {transform_indices = @transform_2, window_bounds = array<i64: 1, 32, 16>}, {transform_indices = @transform_3, window_bounds = array<i64: 1, 256, 16>}]} {
    %c0 = arith.constant 0 : index
    %c0_0 = arith.constant 0 : index
    %c0_1 = arith.constant 0 : index
    %0 = vector.load %arg2[%c0, %c0_0, %c0_1] : memref<1x256x512xbf16, #tpu.memory_space<vmem>>, vector<1x256x512xbf16>
    %1 = vector.shape_cast %0 : vector<1x256x512xbf16> to vector<256x512xbf16>
    %c0_2 = arith.constant 0 : index
    %c0_3 = arith.constant 0 : index
    %c0_4 = arith.constant 0 : index
    %2 = vector.load %arg3[%c0_2, %c0_3, %c0_4] : memref<1x512x32xf32, #tpu.memory_space<vmem>>, vector<1x512x32xf32>
    %3 = vector.shape_cast %2 : vector<1x512x32xf32> to vector<512x32xf32>
    %c0_5 = arith.constant 0 : index
    %c0_6 = arith.constant 0 : index
    %c0_7 = arith.constant 0 : index
    %4 = vector.load %arg4[%c0_5, %c0_6, %c0_7] : memref<1x32x16xf32, #tpu.memory_space<vmem>>, vector<1x32x16xf32>
    %5 = vector.shape_cast %4 : vector<1x32x16xf32> to vector<32x16xf32>
    %cst = arith.constant dense<0.000000e+00> : vector<512x16xf32>
    %6 = tpu.matmul %3, %5, %cst {dimension_numbers = #tpu.dot_dimension_numbers<[1], [0], [0], [1], [0, 0, 1, 1], [], []>} : vector<512x32xf32>, vector<32x16xf32>, vector<512x16xf32> -> vector<512x16xf32>
    %7 = arith.truncf %6 : vector<512x16xf32> to vector<512x16xbf16>
    %cst_8 = arith.constant dense<0.000000e+00> : vector<256x16xf32>
    %8 = tpu.matmul %1, %7, %cst_8 {dimension_numbers = #tpu.dot_dimension_numbers<[1], [0], [0], [1], [0, 0, 1, 1], [], []>} : vector<256x512xbf16>, vector<512x16xbf16>, vector<256x16xf32> -> vector<256x16xf32>
    %c0_9 = arith.constant 0 : index
    %c0_10 = arith.constant 0 : index
    %c0_11 = arith.constant 0 : index
    %9 = vector.load %arg5[%c0_9, %c0_10, %c0_11] : memref<1x256x16xf32, #tpu.memory_space<vmem>>, vector<1x256x16xf32>
    %10 = vector.shape_cast %9 : vector<1x256x16xf32> to vector<256x16xf32>
    %11 = vector.shape_cast %8 : vector<256x16xf32> to vector<1x256x16xf32>
    tpu.vector_store %arg5[%c0_9, %c0_10, %c0_11], %11 {strides = array<i32>} : memref<1x256x16xf32, #tpu.memory_space<vmem>>, vector<1x256x16xf32>,
    return
  }
  func.func @transform_0(%arg0: i32, %arg1: i32) -> (i32, i32, i32) {
    %c0_i32 = arith.constant 0 : i32
    %c0_i32_0 = arith.constant 0 : i32
    return %arg0, %arg1, %c0_i32 : i32, i32, i32
  }
  func.func @transform_1(%arg0: i32, %arg1: i32) -> (i32, i32, i32) {
    %c0_i32 = arith.constant 0 : i32
    %c0_i32_0 = arith.constant 0 : i32
    %c0_i32_1 = arith.constant 0 : i32
    return %arg0, %c0_i32, %c0_i32_0 : i32, i32, i32
  }
  func.func @transform_2(%arg0: i32, %arg1: i32) -> (i32, i32, i32) {
    %c0_i32 = arith.constant 0 : i32
    %c0_i32_0 = arith.constant 0 : i32
    %c0_i32_1 = arith.constant 0 : i32
    return %arg0, %c0_i32, %c0_i32_0 : i32, i32, i32
  }
  func.func @transform_3(%arg0: i32, %arg1: i32) -> (i32, i32, i32) {
    %c0_i32 = arith.constant 0 : i32
    %c0_i32_0 = arith.constant 0 : i32
    return %arg0, %arg1, %c0_i32 : i32, i32, i32
  }
}

module attributes {stable_mosaic.version = 11 : i64} {
  func.func @_decoder_kernel(%arg0: i32, %arg1: memref<256x16xf32, #tpu.memory_space<vmem>>, %arg2: memref<16x512xf32, #tpu.memory_space<vmem>>, %arg3: memref<256x512xf32, #tpu.memory_space<vmem>>) attributes {dimension_semantics = [#tpu.dimension_semantics<parallel>], iteration_bounds = array<i64: 2>, scalar_prefetch = 0 : i64, scratch_operands = 0 : i64, tpu.core_type = #tpu.core_type<tc>, window_params = [{transform_indices = @transform_0, window_bounds = array<i64: 256, 16>}, {pipeline_mode = #tpu.pipeline_mode<synchronous>, transform_indices = @transform_1, window_bounds = array<i64: 16, 512>}, {transform_indices = @transform_2, window_bounds = array<i64: 256, 512>}]} {
    %c0 = arith.constant 0 : index
    %c0_0 = arith.constant 0 : index
    %0 = vector.load %arg1[%c0, %c0_0] : memref<256x16xf32, #tpu.memory_space<vmem>>, vector<256x16xf32>
    %c0_1 = arith.constant 0 : index
    %c0_2 = arith.constant 0 : index
    %1 = vector.load %arg2[%c0_1, %c0_2] : memref<16x512xf32, #tpu.memory_space<vmem>>, vector<16x512xf32>
    %cst = arith.constant dense<0.000000e+00> : vector<256x512xf32>
    %2 = tpu.matmul %0, %1, %cst {dimension_numbers = #tpu.dot_dimension_numbers<[1], [0], [0], [1], [0, 0, 1, 1], [], []>} : vector<256x16xf32>, vector<16x512xf32>, vector<256x512xf32> -> vector<256x512xf32>
    %c0_3 = arith.constant 0 : index
    %c0_4 = arith.constant 0 : index
    %3 = vector.load %arg3[%c0_3, %c0_4] : memref<256x512xf32, #tpu.memory_space<vmem>>, vector<256x512xf32>
    tpu.vector_store %arg3[%c0_3, %c0_4], %2 {strides = array<i32>} : memref<256x512xf32, #tpu.memory_space<vmem>>, vector<256x512xf32>,
    return
  }
  func.func @transform_0(%arg0: i32) -> (i32, i32) {
    %c0_i32 = arith.constant 0 : i32
    %c0_i32_0 = arith.constant 0 : i32
    return %arg0, %c0_i32 : i32, i32
  }
  func.func @transform_1(%arg0: i32) -> (i32, i32) {
    %c0_i32 = arith.constant 0 : i32
    %c0_i32_0 = arith.constant 0 : i32
    %c0_i32_1 = arith.constant 0 : i32
    return %c0_i32, %c0_i32_0 : i32, i32
  }
  func.func @transform_2(%arg0: i32) -> (i32, i32) {
    %c0_i32 = arith.constant 0 : i32
    %c0_i32_0 = arith.constant 0 : i32
    return %arg0, %c0_i32 : i32, i32
  }
}

</mosaic_0001>

<bundles_post_ra>
// kernel: gae_forward.5
= control target key start
LH: loop header
LB: loop body
LE: loop exit
PB: predicated region body
PF: predicated region fallthrough
CT: control target
= control target key end

     0   :  { %s2200_s12 = smov 0   ;;  %s2202_s13 = smov 0   ;;  %s2533_s0 = inlined_call_operand.vmem [shape: bf16[3,512,512], index: 0, kind: input, shape index: {}]   ;;  %s2534_s1 = inlined_call_operand.vmem [shape: f32[3,512,16], index: 1, kind: input, shape index: {}]   ;;  %s2535_s2 = inlined_call_operand.vmem [shape: f32[3,16,32], index: 2, kind: input, shape index: {}]   ;;  %s2536_s3 = inlined_call_operand.vmem [shape: f32[3,512,32], index: 3, kind: output, shape index: {}]  }
   0x1   :  { %s2204_s14 = smov 0   ;;  %s2206_s15 = smov 0  }
   0x2   :  { %s2208_s16 = smov 0  }
   0x3 LB: > { %s22_s17 = sadd.s32 1, %s2170_s14  ;;  %s25_s18 = sadd.s32 1, %s2174_s15  ;;  %s2178_s16 = sphi %s2208_s16, %s13_s16   ;;  %s2174_s15 = sphi %s2206_s15, %s2540_s15   ;;  %s2170_s14 = sphi %s2204_s14, %s2539_s14   ;;  %s2166_s13 = sphi %s2202_s13, %s2538_s13   ;;  %s2162_s12 = sphi %s2200_s12, %s2537_s12  }
   0x4   : > { %p23_p0 = scmp.ge.s32.totalorder %s22_s17, 2  ;;  %p1566_p1 = scmp.ge.s32.totalorder %s2178_s16, 1 }
   0x5   : > { %p179_p2 = scmp.lt.s32.totalorder %s2178_s16, 7 }
   0x6   : > { %s2542_s17 = smov (%p23_p0, %s22_s17), 0  ;;  %s2544_s18 = smov (!%p23_p0, %s25_s18), %s2174_s15 }
   0x7   : > { %p180_p3 = pnand %p1566_p1, %p179_p2  ;;  %p27_p4 = scmp.ge.s32.totalorder %s2544_s18, 3 }
   0x8   : > { %p223_p5 = scmp.lt.s32.totalorder (!%p180_p3), %s2166_s13, 2  ;;  %s1567_s19 = sshll.u32 (!%p180_p3), %s2162_s12, 5 }
   0x9   : > { %s2546_s18 = smov (%p27_p4, %s2544_s18), 0  ;;  %183 = sbr.rel (%p180_p3) target bundleno = 605 (0x25d), region = 32 }
   0xa   : > { %p225_p6 = scmp.lt.s32.totalorder (!%p180_p3), %s1567_s19, 63 }
   0xe   : > { %s2548_s13 = smov (!%p223_p5, %s2166_s13), 2  ;;  %s2550_s19 = smov (!%p225_p6, %s1567_s19), 63  ;;  %vm1058_vm0 = vcmask 130048   ;;  %vm1412_vm1 = vcmask 261120  }
   0xf   : > { %s1676_s20 = sshll.u32 %s2548_s13, 9  ;;  %s1569_s21 = sshll.u32 %s2548_s13, 8 }
  0x10   : > { %s2239_s24 = scalar_lea.vmem %s2534_s1, %s1676_s20  ;;  %s1568_s25 = sshll.u32 %s2550_s19, 2 }
  0x11   : > { %v348_v0 = vld [vmem:[%s2239_s24 + $0xf0] sm:$0xff]  ;;  %v349_v1 = vld [vmem:[%s2239_s24 + $0xf8] sm:$0xff]  ;;  %v346_v5 = vld [vmem:[%s2239_s24 + $0xe0] sm:$0xff]  ;;  %s229_s26 = sadd.s32 %s1569_s21, %s1568_s25  ;;  %s1677_s4 = sshll.u32 %s2548_s13, 4 }
  0x12   : > { %v332_v2 = vld [vmem:[%s2239_s24 + $0x70] sm:$0xff]  ;;  %v399_v3 = vpack.c.bf16 %v349_v1, %v348_v0  ;;  %v333_v4 = vld [vmem:[%s2239_s24 + $0x78] sm:$0xff]  ;;  %v347_v6 = vld [vmem:[%s2239_s24 + $0xe8] sm:$0xff]  ;;  %s1570_s27 = sshll.u32 %s229_s26, 2  ;;  %s242_s7 = scalar_lea.vmem %s2535_s2, %s1677_s4 }
  0x13   : > { %v391_v7 = vpack.c.bf16 %v333_v4, %v332_v2  ;;  %v398_v8 = vpack.c.bf16 %v347_v6, %v346_v5  ;;  %v330_v9 = vld [vmem:[%s2239_s24 + $0x60] sm:$0xff]  ;;  %v331_v10 = vld [vmem:[%s2239_s24 + $0x68] sm:$0xff]  ;;  %v344_v11 = vld [vmem:[%s2239_s24 + $0xd0] sm:$0xff]  ;;  %s2259_s30 = scalar_lea.vmem %s2533_s0, %s1570_s27  ;;  %s1576_s8 = sshll.u32 %s2548_s13, 6 }
  0x14   : > { %1988 = vmatprep.subr.bf16.mxu1 %v399_v3  ;;  %v345_v12 = vld [vmem:[%s2239_s24 + $0xd8] sm:$0xff]  ;;  %1678 = vmatprep.subr.bf16.mxu0 %v399_v3  ;;  %v390_v13 = vpack.c.bf16 %v331_v10, %v330_v9  ;;  %v328_v15 = vld [vmem:[%s2239_s24 + $0x50] sm:$0xff]  ;;  %v342_v17 = vld [vmem:[%s2239_s24 + $0xc0] sm:$0xff]  ;;  %s249_s9 = sadd.s32 %s1576_s8, %s2550_s19 }
  0x15   : > { %1996 = vmatpush3.bf16.msra.mxu1 %v391_v7  ;;  %1679 = vmatpush3.bf16.msra.mxu0 %v391_v7  ;;  %v397_v14 = vpack.c.bf16 %v345_v12, %v344_v11  ;;  %v329_v16 = vld [vmem:[%s2239_s24 + $0x58] sm:$0xff]  ;;  %v343_v18 = vld [vmem:[%s2239_s24 + $0xc8] sm:$0xff]  ;;  %v326_v21 = vld [vmem:[%s2239_s24 + $0x40] sm:$0xff]  ;;  %s1577_s10 = sshll.u32 %s249_s9, 3 }
  0x16   : > { %1989 = vmatprep.subr.bf16.mxu1 %v398_v8  ;;  %1680 = vmatprep.subr.bf16.mxu0 %v398_v8  ;;  %v389_v19 = vpack.c.bf16 %v329_v16, %v328_v15  ;;  %v396_v20 = vpack.c.bf16 %v343_v18, %v342_v17  ;;  %v327_v22 = vld [vmem:[%s2239_s24 + $0x48] sm:$0xff]  ;;  %v340_v23 = vld [vmem:[%s2239_s24 + $0xb0] sm:$0xff]  ;;  %v341_v24 = vld [vmem:[%s2239_s24 + $0xb8] sm:$0xff]  ;;  %s2452_s20 = scalar_lea.vmem %s2536_s3, %s1577_s10 }
  0x17   : > { %v2046_v25 = vld [vmem:[%s2259_s30 + $0x184] ss:$16 sps:$4 sm:$0xff]   ;;  %v388_v26 = vpack.c.bf16 %v327_v22, %v326_v21  ;;  %v395_v27 = vpack.c.bf16 %v341_v24, %v340_v23  ;;  %v325_v29 = vld [vmem:[%s2239_s24 + $0x38] sm:$0xff]  ;;  %v339_v31 = vld [vmem:[%s2239_s24 + $0xa8] sm:$0xff] }
  0x18   : > { %v324_v28 = vld [vmem:[%s2239_s24 + $0x30] sm:$0xff]  ;;  %864 = vmatprep.mubr.bf16.mxu1 %v2046_v25  ;;  %v338_v30 = vld [vmem:[%s2239_s24 + $0xa0] sm:$0xff]  ;;  %v323_v35 = vld [vmem:[%s2239_s24 + $0x28] sm:$0xff] }
  0x19   : > { %1997 = vmatpush3.bf16.msra.mxu1 %v390_v13  ;;  %1681 = vmatpush3.bf16.msra.mxu0 %v390_v13  ;;  %v387_v32 = vpack.c.bf16 %v325_v29, %v324_v28  ;;  %v394_v33 = vpack.c.bf16 %v339_v31, %v338_v30  ;;  %v322_v34 = vld [vmem:[%s2239_s24 + $0x20] sm:$0xff]  ;;  %v336_v36 = vld [vmem:[%s2239_s24 + $0x90] sm:$0xff]  ;;  %v337_v37 = vld [vmem:[%s2239_s24 + $0x98] sm:$0xff] }
  0x1a   : > { %1990 = vmatprep.subr.bf16.mxu1 %v397_v14  ;;  %1682 = vmatprep.subr.bf16.mxu0 %v397_v14  ;;  %v386_v38 = vpack.c.bf16 %v323_v35, %v322_v34  ;;  %v393_v39 = vpack.c.bf16 %v337_v37, %v336_v36  ;;  %v320_v40 = vld [vmem:[%s2239_s24 + $0x10] sm:$0xff]  ;;  %v321_v41 = vld [vmem:[%s2239_s24 + $0x18] sm:$0xff]  ;;  %v334_v42 = vld [vmem:[%s2239_s24 + $0x80] sm:$0xff] }
  0x1b   : > { %v335_v43 = vld [vmem:[%s2239_s24 + $0x88] sm:$0xff]  ;;  %v385_v44 = vpack.c.bf16 %v321_v41, %v320_v40  ;;  %v318_v46 = vld [vmem:[%s2239_s24] sm:$0xff]  ;;  %v380_v48 = vld [vmem:[%s2239_s24 + $0x1f0] sm:$0xff] }
  0x1c   : > { %v392_v45 = vpack.c.bf16 %v335_v43, %v334_v42  ;;  %v319_v47 = vld [vmem:[%s2239_s24 + $0x8] sm:$0xff]  ;;  %v381_v49 = vld [vmem:[%s2239_s24 + $0x1f8] sm:$0xff]  ;;  %v364_v50 = vld [vmem:[%s2239_s24 + $0x170] sm:$0xff] }
  0x1d   : > { %1998 = vmatpush3.bf16.msra.mxu1 %v389_v19  ;;  %1683 = vmatpush3.bf16.msra.mxu0 %v389_v19  ;;  %v2058_v51 = vld [vmem:[%s2259_s30 + $0x4] ss:$16 sps:$4 sm:$0xff]   ;;  %v384_v52 = vpack.c.bf16 %v319_v47, %v318_v46  ;;  %v365_v53 = vld [vmem:[%s2239_s24 + $0x178] sm:$0xff]  ;;  %v2044_v54 = vld [vmem:[%s2259_s30 + $0x180] ss:$16 sps:$4 sm:$0xff]   ;;  %v415_v55 = vpack.c.bf16 %v381_v49, %v380_v48 }
  0x1e   : > { %1991 = vmatprep.subr.bf16.mxu1 %v396_v20  ;;  %1684 = vmatprep.subr.bf16.mxu0 %v396_v20  ;;  %v378_v56 = vld [vmem:[%s2239_s24 + $0x1e0] sm:$0xff]  ;;  %v379_v57 = vld [vmem:[%s2239_s24 + $0x1e8] sm:$0xff]  ;;  %v407_v61 = vpack.c.bf16 %v365_v53, %v364_v50  ;;  %v376_v1 = vld [vmem:[%s2239_s24 + $0x1d0] sm:$0xff] }
  0x1f   : > { %768 = vmatprep.mubr.bf16.mxu0 %v2058_v51  ;;  %v362_v58 = vld [vmem:[%s2239_s24 + $0x160] sm:$0xff]  ;;  %v363_v59 = vld [vmem:[%s2239_s24 + $0x168] sm:$0xff]  ;;  %v414_v63 = vpack.c.bf16 %v379_v57, %v378_v56  ;;  %v377_v2 = vld [vmem:[%s2239_s24 + $0x1d8] sm:$0xff] }
  0x20   : > { %v2056_v60 = vld [vmem:[%s2259_s30] ss:$16 sps:$4 sm:$0xff]   ;;  %v2047_v62 = vld [vmem:[%s2259_s30 + $0x1a4] ss:$16 sps:$4 sm:$0xff]   ;;  %v406_v3 = vpack.c.bf16 %v363_v59, %v362_v58  ;;  %v361_v5 = vld [vmem:[%s2239_s24 + $0x158] sm:$0xff]  ;;  %v413_v7 = vpack.c.bf16 %v377_v2, %v376_v1 }
  0x21   : > { %1999 = vmatpush3.bf16.msra.mxu1 %v388_v26  ;;  %1685 = vmatpush3.bf16.msra.mxu0 %v388_v26  ;;  %v2062_v0 = vld [vmem:[%s2259_s30 + $0x24] ss:$16 sps:$4 sm:$0xff]   ;;  %v2049_v6 = vld [vmem:[%s2259_s30 + $0x1a0] ss:$16 sps:$4 sm:$0xff]   ;;  %v375_v9 = vld [vmem:[%s2239_s24 + $0x1c8] sm:$0xff] }
  0x22   : > { %1992 = vmatprep.subr.bf16.mxu1 %v395_v27  ;;  %1686 = vmatprep.subr.bf16.mxu0 %v395_v27  ;;  %v360_v4 = vld [vmem:[%s2239_s24 + $0x150] sm:$0xff]  ;;  %v374_v8 = vld [vmem:[%s2239_s24 + $0x1c0] sm:$0xff]  ;;  %v359_v11 = vld [vmem:[%s2239_s24 + $0x148] sm:$0xff] }
  0x23   : > { %v358_v10 = vld [vmem:[%s2239_s24 + $0x140] sm:$0xff]  ;;  %v405_v13 = vpack.c.bf16 %v361_v5, %v360_v4  ;;  %v412_v15 = vpack.c.bf16 %v375_v9, %v374_v8  ;;  %v372_v17 = vld [vmem:[%s2239_s24 + $0x1b0] sm:$0xff]  ;;  %v373_v18 = vld [vmem:[%s2239_s24 + $0x1b8] sm:$0xff] }
  0x24   : > { %v2066_v12 = vld [vmem:[%s2259_s30 + $0x20] ss:$16 sps:$4 sm:$0xff]   ;;  %v2050_v14 = vld [vmem:[%s2259_s30 + $0x1c4] ss:$16 sps:$4 sm:$0xff]   ;;  %v404_v19 = vpack.c.bf16 %v359_v11, %v358_v10  ;;  %v357_v21 = vld [vmem:[%s2239_s24 + $0x138] sm:$0xff]  ;;  %v411_v23 = vpack.c.bf16 %v373_v18, %v372_v17 }
  0x25   : > { %2000 = vmatpush3.bf16.msra.mxu1 %v387_v32  ;;  %1687 = vmatpush3.bf16.msra.mxu0 %v387_v32  ;;  %v2068_v16 = vld [vmem:[%s2259_s30 + $0x44] ss:$16 sps:$4 sm:$0xff]   ;;  %v2052_v22 = vld [vmem:[%s2259_s30 + $0x1c0] ss:$16 sps:$4 sm:$0xff]   ;;  %v371_v25 = vld [vmem:[%s2239_s24 + $0x1a8] sm:$0xff] }
  0x26   : > { %1993 = vmatprep.subr.bf16.mxu1 %v394_v33  ;;  %1688 = vmatprep.subr.bf16.mxu0 %v394_v33  ;;  %v356_v20 = vld [vmem:[%s2239_s24 + $0x130] sm:$0xff]  ;;  %v370_v24 = vld [vmem:[%s2239_s24 + $0x1a0] sm:$0xff]  ;;  %v355_v27 = vld [vmem:[%s2239_s24 + $0x128] sm:$0xff] }
  0x27   : > { %v354_v26 = vld [vmem:[%s2239_s24 + $0x120] sm:$0xff]  ;;  %v403_v29 = vpack.c.bf16 %v357_v21, %v356_v20  ;;  %v410_v31 = vpack.c.bf16 %v371_v25, %v370_v24  ;;  %v368_v33 = vld [vmem:[%s2239_s24 + $0x190] sm:$0xff]  ;;  %v369_v34 = vld [vmem:[%s2239_s24 + $0x198] sm:$0xff] }
  0x28   : > { %v2072_v28 = vld [vmem:[%s2259_s30 + $0x40] ss:$16 sps:$4 sm:$0xff]   ;;  %v2053_v30 = vld [vmem:[%s2259_s30 + $0x1e4] ss:$16 sps:$4 sm:$0xff]   ;;  %v402_v35 = vpack.c.bf16 %v355_v27, %v354_v26  ;;  %v353_v37 = vld [vmem:[%s2239_s24 + $0x118] sm:$0xff] }
  0x29   : > { %2001 = vmatpush3.bf16.msra.mxu1 %v386_v38  ;;  %1689 = vmatpush3.bf16.msra.mxu0 %v386_v38  ;;  %v2074_v32 = vld [vmem:[%s2259_s30 + $0x64] ss:$16 sps:$4 sm:$0xff]   ;;  %v2055_v38 = vld [vmem:[%s2259_s30 + $0x1e0] ss:$16 sps:$4 sm:$0xff]   ;;  %v367_v41 = vld [vmem:[%s2239_s24 + $0x188] sm:$0xff] }
  0x2a   : > { %1994 = vmatprep.subr.bf16.mxu1 %v393_v39  ;;  %1690 = vmatprep.subr.bf16.mxu0 %v393_v39  ;;  %v352_v36 = vld [vmem:[%s2239_s24 + $0x110] sm:$0xff]  ;;  %v409_v39 = vpack.c.bf16 %v369_v34, %v368_v33  ;;  %v366_v40 = vld [vmem:[%s2239_s24 + $0x180] sm:$0xff]  ;;  %v351_v43 = vld [vmem:[%s2239_s24 + $0x108] sm:$0xff] }
  0x2b   : > { %v350_v42 = vld [vmem:[%s2239_s24 + $0x100] sm:$0xff]  ;;  %v2061_v46 = vld [vmem:[%s2259_s30 + $0xc] ss:$16 sps:$4 sm:$0xff]   ;;  %v408_v47 = vpack.c.bf16 %v367_v41, %v366_v40  ;;  %v2059_v50 = vld [vmem:[%s2259_s30 + $0x8] ss:$16 sps:$4 sm:$0xff]  }
  0x2c   : > { %v2080_v48 = vld [vmem:[%s2259_s30 + $0x84] ss:$16 sps:$4 sm:$0xff]   ;;  %v400_v49 = vpack.c.bf16 %v351_v43, %v350_v42  ;;  %v2084_v51 = vld [vmem:[%s2259_s30 + $0x80] ss:$16 sps:$4 sm:$0xff]   ;;  %v2070_v56 = vld [vmem:[%s2259_s30 + $0x4c] ss:$16 sps:$4 sm:$0xff]  }
  0x2d   : > { %2002 = vmatpush3.bf16.msra.mxu1 %v385_v44  ;;  %1691 = vmatpush3.bf16.msra.mxu0 %v385_v44  ;;  %v2078_v44 = vld [vmem:[%s2259_s30 + $0x60] ss:$16 sps:$4 sm:$0xff]   ;;  %v2086_v53 = vld [vmem:[%s2259_s30 + $0xa4] ss:$16 sps:$4 sm:$0xff]   ;;  %v2073_v58 = vld [vmem:[%s2259_s30 + $0x48] ss:$16 sps:$4 sm:$0xff]  }
  0x2e   : > { %1995 = vmatprep.subr.bf16.mxu1 %v392_v45  ;;  %1692 = vmatprep.subr.bf16.mxu0 %v392_v45  ;;  %v401_v45 = vpack.c.bf16 %v353_v37, %v352_v36  ;;  %v2092_v57 = vld [vmem:[%s2259_s30 + $0xc4] ss:$16 sps:$4 sm:$0xff]   ;;  %v2096_v59 = vld [vmem:[%s2259_s30 + $0xc0] ss:$16 sps:$4 sm:$0xff]   ;;  %v2085_v2 = vld [vmem:[%s2259_s30 + $0x88] ss:$16 sps:$4 sm:$0xff]  }
  0x2f   : > { %v2104_v1 = vld [vmem:[%s2259_s30 + $0x104] ss:$16 sps:$4 sm:$0xff]   ;;  %v2088_v4 = vld [vmem:[%s2259_s30 + $0xac] ss:$16 sps:$4 sm:$0xff]   ;;  %v2097_v11 = vld [vmem:[%s2259_s30 + $0xc8] ss:$16 sps:$4 sm:$0xff]  }
  0x30   : > { %v2110_v5 = vld [vmem:[%s2259_s30 + $0x124] ss:$16 sps:$4 sm:$0xff]   ;;  %v2094_v8 = vld [vmem:[%s2259_s30 + $0xcc] ss:$16 sps:$4 sm:$0xff]   ;;  %v2109_v18 = vld [vmem:[%s2259_s30 + $0x108] ss:$16 sps:$4 sm:$0xff]  }
  0x31   : > { %2003 = vmatpush3.bf16.msra.mxu1 %v384_v52  ;;  %1693 = vmatpush3.bf16.msra.mxu0 %v384_v52  ;;  %v2064_v52 = vld [vmem:[%s2259_s30 + $0x2c] ss:$16 sps:$4 sm:$0xff]   ;;  %v2116_v9 = vld [vmem:[%s2259_s30 + $0x144] ss:$16 sps:$4 sm:$0xff]   ;;  %v2115_v20 = vld [vmem:[%s2259_s30 + $0x128] ss:$16 sps:$4 sm:$0xff]  }
  0x32   : > { %1790 = vmatprep.subr.bf16.mxu1 %v415_v55  ;;  %v2090_v55 = vld [vmem:[%s2259_s30 + $0xa0] ss:$16 sps:$4 sm:$0xff]   ;;  %v383_v10 = vld [vmem:[%s242_s7 + $0x8] sm:$0xff] }
  0x33   : > { %1936 = vmatprep.subr.mxu0 %v383_v10  ;;  %v2106_v17 = vld [vmem:[%s2259_s30 + $0x10c] ss:$16 sps:$4 sm:$0xff]   ;;  %v2127_v25 = vld [vmem:[%s2259_s30 + $0x168] ss:$16 sps:$4 sm:$0xff]  }
  0x34   : > { %865 = vmatmul.mubr.bf16.vlgmr.msra.gmra.mxu1 %v2044_v54  ;;  %769 = vmatmul.mubr.bf16.vlgmr.msra.gmra.mxu0 %v2056_v60  ;;  %v2067_v54 = vld [vmem:[%s2259_s30 + $0x28] ss:$16 sps:$4 sm:$0xff]   ;;  %v2076_v60 = vld [vmem:[%s2259_s30 + $0x6c] ss:$16 sps:$4 sm:$0xff]  }
  0x35   : > { %1791 = vmatpush3.bf16.msra.mxu1 %v407_v61  ;;  %872 = vmatprep.mubr.bf16.mxu1 %v2047_v62  ;;  %v2098_v61 = vld [vmem:[%s2259_s30 + $0xe4] ss:$16 sps:$4 sm:$0xff]   ;;  %v2079_v62 = vld [vmem:[%s2259_s30 + $0x68] ss:$16 sps:$4 sm:$0xff]   ;;  %v2118_v21 = vld [vmem:[%s2259_s30 + $0x14c] ss:$16 sps:$4 sm:$0xff]  }
  0x36   : > { %1792 = vmatprep.subr.bf16.mxu1 %v414_v63  ;;  %776 = vmatprep.mubr.bf16.mxu0 %v2062_v0  ;;  %v2102_v63 = vld [vmem:[%s2259_s30 + $0xe0] ss:$16 sps:$4 sm:$0xff]   ;;  %v2082_v0 = vld [vmem:[%s2259_s30 + $0x8c] ss:$16 sps:$4 sm:$0xff]   ;;  %v2130_v27 = vld [vmem:[%s2259_s30 + $0x188] ss:$16 sps:$4 sm:$0xff]  }
  0x37   : > { %1937 = vmatpush3.msra.mxu0 %v383_v10  ;;  %v2124_v24 = vld [vmem:[%s2259_s30 + $0x16c] ss:$16 sps:$4 sm:$0xff]   ;;  %v2139_v33 = vld [vmem:[%s2259_s30 + $0x1e8] ss:$16 sps:$4 sm:$0xff]  }
  0x38   : > { %v2128_v26 = vld [vmem:[%s2259_s30 + $0x18c] ss:$16 sps:$4 sm:$0xff]  }
  0x39   : > { %1793 = vmatpush3.bf16.msra.mxu1 %v406_v3  ;;  %v2108_v3 = vld [vmem:[%s2259_s30 + $0x100] ss:$16 sps:$4 sm:$0xff]  }
  0x3a   : > { %1794 = vmatprep.subr.bf16.mxu1 %v413_v7  ;;  %v2114_v7 = vld [vmem:[%s2259_s30 + $0x120] ss:$16 sps:$4 sm:$0xff]  }
  0x3c   : > { %873 = vmatmul.mubr.bf16.gmra.mxu1 %v2049_v6  ;;  %777 = vmatmul.mubr.bf16.gmra.mxu0 %v2066_v12  ;;  %v2091_v6 = vld [vmem:[%s2259_s30 + $0xa8] ss:$16 sps:$4 sm:$0xff]   ;;  %v2120_v12 = vld [vmem:[%s2259_s30 + $0x140] ss:$16 sps:$4 sm:$0xff]  }
  0x3d   : > { %1795 = vmatpush3.bf16.msra.mxu1 %v405_v13  ;;  %880 = vmatprep.mubr.bf16.mxu1 %v2050_v14  ;;  %v2100_v13 = vld [vmem:[%s2259_s30 + $0xec] ss:$16 sps:$4 sm:$0xff]   ;;  %v2122_v14 = vld [vmem:[%s2259_s30 + $0x164] ss:$16 sps:$4 sm:$0xff]  }
  0x3e   : > { %1796 = vmatprep.subr.bf16.mxu1 %v412_v15  ;;  %784 = vmatprep.mubr.bf16.mxu0 %v2068_v16  ;;  %v2103_v15 = vld [vmem:[%s2259_s30 + $0xe8] ss:$16 sps:$4 sm:$0xff]   ;;  %v2126_v16 = vld [vmem:[%s2259_s30 + $0x160] ss:$16 sps:$4 sm:$0xff]  }
  0x41   : > { %1797 = vmatpush3.bf16.msra.mxu1 %v404_v19  ;;  %v2112_v19 = vld [vmem:[%s2259_s30 + $0x12c] ss:$16 sps:$4 sm:$0xff]  }
  0x42   : > { %1798 = vmatprep.subr.bf16.mxu1 %v411_v23  ;;  %v2121_v23 = vld [vmem:[%s2259_s30 + $0x148] ss:$16 sps:$4 sm:$0xff]  }
  0x44   : > { %881 = vmatmul.mubr.bf16.gmra.mxu1 %v2052_v22  ;;  %785 = vmatmul.mubr.bf16.gmra.mxu0 %v2072_v28  ;;  %v382_v22 = vld [vmem:[%s242_s7] sm:$0xff]  ;;  %v2131_v28 = vld [vmem:[%s2259_s30 + $0x1ac] ss:$16 sps:$4 sm:$0xff]  }
  0x45   : > { %1799 = vmatpush3.bf16.msra.mxu1 %v403_v29  ;;  %888 = vmatprep.mubr.bf16.mxu1 %v2053_v30  ;;  %v2133_v29 = vld [vmem:[%s2259_s30 + $0x1a8] ss:$16 sps:$4 sm:$0xff]   ;;  %v2134_v30 = vld [vmem:[%s2259_s30 + $0x1cc] ss:$16 sps:$4 sm:$0xff]  }
  0x46   : > { %1800 = vmatprep.subr.bf16.mxu1 %v410_v31  ;;  %792 = vmatprep.mubr.bf16.mxu0 %v2074_v32  ;;  %v2136_v31 = vld [vmem:[%s2259_s30 + $0x1c8] ss:$16 sps:$4 sm:$0xff]   ;;  %v2137_v32 = vld [vmem:[%s2259_s30 + $0x1ec] ss:$16 sps:$4 sm:$0xff]  }
  0x47   : > { %1938 = vmatprep.subr.mxu0 %v382_v22 }
  0x48   : > { %1939 = vmatpush3.msra.mxu0 %v382_v22 }
  0x49   : > { %1801 = vmatpush3.bf16.msra.mxu1 %v402_v35 }
  0x4a   : > { %1802 = vmatprep.subr.bf16.mxu1 %v409_v39 }
  0x4c   : > { %889 = vmatmul.mubr.bf16.gmra.mxu1 %v2055_v38  ;;  %793 = vmatmul.mubr.bf16.gmra.mxu0 %v2078_v44 }
  0x4d   : > { %1803 = vmatpush3.bf16.msra.mxu1 %v401_v45  ;;  %929 = vmatprep.mubr.bf16.mxu1 %v2061_v46 }
  0x4e   : > { %1804 = vmatprep.subr.bf16.mxu1 %v408_v47  ;;  %800 = vmatprep.mubr.bf16.mxu0 %v2080_v48 }
  0x51   : > { %1805 = vmatpush3.bf16.msra.mxu1 %v400_v49 }
  0x54   : > { %930 = vmatmul.mubr.bf16.vlgmr.msra.gmra.mxu1 %v2059_v50  ;;  %801 = vmatmul.mubr.bf16.gmra.mxu0 %v2084_v51 }
  0x55   : > { %937 = vmatprep.mubr.bf16.mxu1 %v2064_v52  ;;  %808 = vmatprep.mubr.bf16.mxu0 %v2086_v53 }
  0x5c   : > { %938 = vmatmul.mubr.bf16.gmra.mxu1 %v2067_v54  ;;  %809 = vmatmul.mubr.bf16.gmra.mxu0 %v2090_v55 }
  0x5d   : > { %945 = vmatprep.mubr.bf16.mxu1 %v2070_v56  ;;  %816 = vmatprep.mubr.bf16.mxu0 %v2092_v57 }
  0x64   : > { %946 = vmatmul.mubr.bf16.gmra.mxu1 %v2073_v58  ;;  %817 = vmatmul.mubr.bf16.gmra.mxu0 %v2096_v59 }
  0x65   : > { %953 = vmatprep.mubr.bf16.mxu1 %v2076_v60  ;;  %824 = vmatprep.mubr.bf16.mxu0 %v2098_v61 }
  0x6c   : > { %954 = vmatmul.mubr.bf16.gmra.mxu1 %v2079_v62  ;;  %825 = vmatmul.mubr.bf16.gmra.mxu0 %v2102_v63 }
  0x6d   : > { %961 = vmatprep.mubr.bf16.mxu1 %v2082_v0  ;;  %832 = vmatprep.mubr.bf16.mxu0 %v2104_v1 }
  0x74   : > { %962 = vmatmul.mubr.bf16.gmra.mxu1 %v2085_v2  ;;  %833 = vmatmul.mubr.bf16.gmra.mxu0 %v2108_v3 }
  0x75   : > { %969 = vmatprep.mubr.bf16.mxu1 %v2088_v4  ;;  %840 = vmatprep.mubr.bf16.mxu0 %v2110_v5 }
  0x7c   : > { %970 = vmatmul.mubr.bf16.gmra.mxu1 %v2091_v6  ;;  %841 = vmatmul.mubr.bf16.gmra.mxu0 %v2114_v7 }
  0x7d   : > { %977 = vmatprep.mubr.bf16.mxu1 %v2094_v8  ;;  %848 = vmatprep.mubr.bf16.mxu0 %v2116_v9 }
  0x84   : > { %978 = vmatmul.mubr.bf16.gmra.mxu1 %v2097_v11  ;;  %849 = vmatmul.mubr.bf16.gmra.mxu0 %v2120_v12 }
  0x85   : > { %985 = vmatprep.mubr.bf16.mxu1 %v2100_v13  ;;  %856 = vmatprep.mubr.bf16.mxu0 %v2122_v14 }
  0x8c   : > { %986 = vmatmul.mubr.bf16.gmra.mxu1 %v2103_v15  ;;  %857 = vmatmul.mubr.bf16.gmra.mxu0 %v2126_v16 }
  0x8d   : > { %993 = vmatprep.mubr.bf16.mxu1 %v2106_v17 }
  0x94   : > { %994 = vmatmul.mubr.bf16.gmra.mxu1 %v2109_v18 }
  0x95   : > { %1001 = vmatprep.mubr.bf16.mxu1 %v2112_v19 }
  0x9c   : > { %1002 = vmatmul.mubr.bf16.gmra.mxu1 %v2115_v20 }
  0x9d   : > { %1009 = vmatprep.mubr.bf16.mxu1 %v2118_v21 }
  0xa4   : > { %1010 = vmatmul.mubr.bf16.gmra.mxu1 %v2121_v23 }
  0xa5   : > { %1017 = vmatprep.mubr.bf16.mxu1 %v2124_v24 }
  0xac   : > { %1018 = vmatmul.mubr.bf16.gmra.mxu1 %v2127_v25 }
  0xad   : > { %1025 = vmatprep.mubr.bf16.mxu1 %v2128_v26 }
  0xb4   : > { %1026 = vmatmul.mubr.bf16.gmra.mxu1 %v2130_v27 }
  0xb5   : > { %1033 = vmatprep.mubr.bf16.mxu1 %v2131_v28 }
  0xbc   : > { %1034 = vmatmul.mubr.bf16.gmra.mxu1 %v2133_v29 }
  0xbd   : > { %1041 = vmatprep.mubr.bf16.mxu1 %v2134_v30 }
  0xc4   : > { %1042 = vmatmul.mubr.bf16.gmra.mxu1 %v2136_v31 }
  0xc5   : > { %1049 = vmatprep.mubr.bf16.mxu1 %v2137_v32 }
  0xcc   : > { %1050 = vmatmul.mubr.bf16.gmra.mxu1 %v2139_v33 }
  0xf4   : > { %v1766_v34 = vpop.f32.mrf.mxu1  ;;  %v1694_v35 = vpop.f32.mrf.mxu0 }
  0xf6   : > { %v1767_v36 = vpop.f32.mrf.mxu1  ;;  %v1695_v37 = vpop.f32.mrf.mxu0 }
  0xf7   : > { %v2379_v38 = vadd.f32 %v1767_v36, %v1766_v34  ;;  %v1696_v12 = vadd.f32 %v1695_v37, %v1694_v35 }
  0xf8   : > { %v1769_v39 = vpop.f32.mrf.mxu1  ;;  %v1697_v40 = vpop.f32.mrf.mxu0 }
  0xfa   : > { %v1770_v41 = vpop.f32.mrf.mxu1  ;;  %v1698_v42 = vpop.f32.mrf.mxu0 }
  0xfb   : > { %v2381_v43 = vadd.f32 %v1770_v41, %v1769_v39  ;;  %v1699_v19 = vadd.f32 %v1698_v42, %v1697_v40 }
  0xfc   : > { %v1772_v44 = vpop.f32.mrf.mxu1  ;;  %v1700_v45 = vpop.f32.mrf.mxu0 }
  0xfe   : > { %v1773_v46 = vpop.f32.mrf.mxu1  ;;  %v1701_v47 = vpop.f32.mrf.mxu0 }
  0xff   : > { %v2383_v48 = vadd.f32 %v1773_v46, %v1772_v44  ;;  %v1702_v26 = vadd.f32 %v1701_v47, %v1700_v45 }
 0x100   : > { %v1775_v49 = vpop.f32.mrf.mxu1  ;;  %v1703_v50 = vpop.f32.mrf.mxu0 }
 0x102   : > { %v1776_v51 = vpop.f32.mrf.mxu1  ;;  %v1704_v52 = vpop.f32.mrf.mxu0 }
 0x103   : > { %v2385_v53 = vadd.f32 %v1776_v51, %v1775_v49  ;;  %v1705_v33 = vadd.f32 %v1704_v52, %v1703_v50 }
 0x104   : > { %v1778_v54 = vpop.f32.mrf.mxu1  ;;  %v1706_v55 = vpop.f32.mrf.mxu0 }
 0x106   : > { %v1779_v56 = vpop.f32.mrf.mxu1  ;;  %v1707_v57 = vpop.f32.mrf.mxu0 }
 0x107   : > { %v2387_v58 = vadd.f32 %v1779_v56, %v1778_v54  ;;  %v1708_v41 = vadd.f32 %v1707_v57, %v1706_v55 }
 0x108   : > { %v1781_v59 = vpop.f32.mrf.mxu1  ;;  %v1709_v60 = vpop.f32.mrf.mxu0 }
 0x10a   : > { %v1782_v61 = vpop.f32.mrf.mxu1  ;;  %v1710_v62 = vpop.f32.mrf.mxu0 }
 0x10b   : > { %v2389_v63 = vadd.f32 %v1782_v61, %v1781_v59  ;;  %v1711_v51 = vadd.f32 %v1710_v62, %v1709_v60 }
 0x10c   : > { %v1784_v0 = vpop.f32.mrf.mxu1  ;;  %v1712_v1 = vpop.f32.mrf.mxu0 }
 0x10e   : > { %v1785_v2 = vpop.f32.mrf.mxu1  ;;  %v1713_v3 = vpop.f32.mrf.mxu0 }
 0x10f   : > { %v2391_v4 = vadd.f32 %v1785_v2, %v1784_v0  ;;  %v1714_v0 = vadd.f32 %v1713_v3, %v1712_v1 }
 0x110   : > { %v1787_v5 = vpop.f32.mrf.mxu1  ;;  %v1715_v6 = vpop.f32.mrf.mxu0 }
 0x112   : > { %v1788_v7 = vpop.f32.mrf.mxu1  ;;  %v1716_v8 = vpop.f32.mrf.mxu0 }
 0x113   : > { %v2393_v9 = vadd.f32 %v1788_v7, %v1787_v5 }
 0x114   : > { %v1806_v10 = vpop.f32.mrf.mxu1  ;;  %v2395_v11 = vpop.f32.mrf.mxu0 }
 0x116   : > { %v1807_v13 = vpop.f32.mrf.mxu1  ;;  %v1719_v14 = vpop.f32.mrf.mxu0 }
 0x117   : > { %v1808_v15 = vadd.f32 %v1807_v13, %v1806_v10 }
 0x118   : > { %v1809_v16 = vpop.f32.mrf.mxu1  ;;  %v2397_v17 = vpop.f32.mrf.mxu0 }
 0x119   : > { %v932_v18 = vadd.f32 %v1808_v15, %v1696_v12  ;;  %v1717_v12 = vadd.f32 %v1716_v8, %v1715_v6 }
 0x11a   : > { %v1810_v20 = vpop.f32.mrf.mxu1  ;;  %v1722_v21 = vpop.f32.mrf.mxu0 }
 0x11b   : > { %v1811_v22 = vadd.f32 %v1810_v20, %v1809_v16  ;;  %1940 = vmatprep.mubr.msk.f32.mxu0 %vm1058_vm0, %v932_v18 }
 0x11c   : > { %v1812_v23 = vpop.f32.mrf.mxu1  ;;  %v2400_v24 = vpop.f32.mrf.mxu0 }
 0x11d   : > { %v935_v25 = vadd.f32 %v1811_v22, %v1699_v19  ;;  %v1720_v19 = vadd.f32 %v1719_v14, %v2395_v11 }
 0x11e   : > { %v1813_v27 = vpop.f32.mrf.mxu1  ;;  %v1725_v28 = vpop.f32.mrf.mxu0 }
 0x11f   : > { %v1814_v29 = vadd.f32 %v1813_v27, %v1812_v23  ;;  %1941 = vmatmul.mubr.msk.f32.vlgmr.msra.gmra.mxu0 %vm1058_vm0, %v935_v25  ;;  %v1723_v25 = vadd.f32 %v1722_v21, %v2397_v17 }
 0x120   : > { %v1815_v30 = vpop.f32.mrf.mxu1  ;;  %v2403_v31 = vpop.f32.mrf.mxu0 }
 0x121   : > { %v940_v32 = vadd.f32 %v1814_v29, %v1702_v26 }
 0x122   : > { %v1816_v34 = vpop.f32.mrf.mxu1  ;;  %v1728_v35 = vpop.f32.mrf.mxu0 }
 0x123   : > { %v1817_v36 = vadd.f32 %v1816_v34, %v1815_v30  ;;  %1943 = vmatprep.mubr.msk.f32.mxu0 %vm1058_vm0, %v940_v32  ;;  %v1726_v30 = vadd.f32 %v1725_v28, %v2400_v24 }
 0x124   : > { %v1818_v37 = vpop.f32.mrf.mxu1  ;;  %v1730_v39 = vpop.f32.mrf.mxu0 }
 0x125   : > { %v943_v40 = vadd.f32 %v1817_v36, %v1705_v33  ;;  %v1729_v36 = vadd.f32 %v1728_v35, %v2403_v31 }
 0x126   : > { %v1819_v42 = vpop.f32.mrf.mxu1  ;;  %v1731_v44 = vpop.f32.mrf.mxu0 }
 0x127   : > { %v1820_v45 = vadd.f32 %v1819_v42, %v1818_v37  ;;  %1944 = vmatmul.mubr.msk.f32.gmra.mxu0 %vm1058_vm0, %v943_v40  ;;  %v1732_v42 = vadd.f32 %v1731_v44, %v1730_v39 }
 0x128   : > { %v1821_v46 = vpop.f32.mrf.mxu1  ;;  %v1733_v47 = vpop.f32.mrf.mxu0 }
 0x129   : > { %v948_v49 = vadd.f32 %v1820_v45, %v1708_v41 }
 0x12a   : > { %v1822_v54 = vpop.f32.mrf.mxu1  ;;  %v1734_v50 = vpop.f32.mrf.mxu0 }
 0x12b   : > { %v1823_v52 = vadd.f32 %v1822_v54, %v1821_v46  ;;  %1946 = vmatprep.mubr.msk.f32.mxu0 %vm1058_vm0, %v948_v49 }
 0x12c   : > { %v1824_v56 = vpop.f32.mrf.mxu1  ;;  %v1736_v59 = vpop.f32.mrf.mxu0 }
 0x12d   : > { %v951_v61 = vadd.f32 %v1823_v52, %v1711_v51  ;;  %v1735_v51 = vadd.f32 %v1734_v50, %v1733_v47 }
 0x12e   : > { %v1825_v2 = vpop.f32.mrf.mxu1  ;;  %v1737_v55 = vpop.f32.mrf.mxu0 }
 0x12f   : > { %v1826_v57 = vadd.f32 %v1825_v2, %v1824_v56  ;;  %1947 = vmatmul.mubr.msk.f32.gmra.mxu0 %vm1058_vm0, %v951_v61  ;;  %v1738_v61 = vadd.f32 %v1737_v55, %v1736_v59 }
 0x130   : > { %v1827_v5 = vpop.f32.mrf.mxu1  ;;  %v1739_v7 = vpop.f32.mrf.mxu0 }
 0x131   : > { %v956_v10 = vadd.f32 %v1826_v57, %v1714_v0 }
 0x132   : > { %v1828_v13 = vpop.f32.mrf.mxu1  ;;  %v1740_v60 = vpop.f32.mrf.mxu0 }
 0x133   : > { %v1829_v62 = vadd.f32 %v1828_v13, %v1827_v5  ;;  %1949 = vmatprep.mubr.msk.f32.mxu0 %vm1058_vm0, %v956_v10  ;;  %v1741_v5 = vadd.f32 %v1740_v60, %v1739_v7 }
 0x134   : > { %v1830_v15 = vpop.f32.mrf.mxu1  ;;  %v1742_v16 = vpop.f32.mrf.mxu0 }
 0x135   : > { %v959_v18 = vadd.f32 %v1829_v62, %v1717_v12 }
 0x136   : > { %v1831_v1 = vpop.f32.mrf.mxu1  ;;  %v1743_v3 = vpop.f32.mrf.mxu0 }
 0x137   : > { %v1832_v20 = vadd.f32 %v1831_v1, %v1830_v15  ;;  %1950 = vmatmul.mubr.msk.f32.gmra.mxu0 %vm1058_vm0, %v959_v18  ;;  %v1744_v62 = vadd.f32 %v1743_v3, %v1742_v16 }
 0x138   : > { %v1833_v22 = vpop.f32.mrf.mxu1  ;;  %v1745_v8 = vpop.f32.mrf.mxu0 }
 0x139   : > { %v964_v23 = vadd.f32 %v1832_v20, %v1720_v19 }
 0x13a   : > { %v1834_v6 = vpop.f32.mrf.mxu1  ;;  %v1746_v11 = vpop.f32.mrf.mxu0 }
 0x13b   : > { %v1835_v26 = vadd.f32 %v1834_v6, %v1833_v22  ;;  %1952 = vmatprep.mubr.msk.f32.mxu0 %vm1058_vm0, %v964_v23  ;;  %v1747_v1 = vadd.f32 %v1746_v11, %v1745_v8 }
 0x13c   : > { %v1836_v27 = vpop.f32.mrf.mxu1  ;;  %v1748_v17 = vpop.f32.mrf.mxu0 }
 0x13d   : > { %v967_v29 = vadd.f32 %v1835_v26, %v1723_v25 }
 0x13e   : > { %v1837_v32 = vpop.f32.mrf.mxu1  ;;  %v1749_v46 = vpop.f32.mrf.mxu0 }
 0x13f   : > { %v1838_v14 = vadd.f32 %v1837_v32, %v1836_v27  ;;  %1953 = vmatmul.mubr.msk.f32.gmra.mxu0 %vm1058_vm0, %v967_v29  ;;  %v1750_v25 = vadd.f32 %v1749_v46, %v1748_v17 }
 0x140   : > { %v1839_v33 = vpop.f32.mrf.mxu1  ;;  %v1751_v52 = vpop.f32.mrf.mxu0 }
 0x141   : > { %v972_v34 = vadd.f32 %v1838_v14, %v1726_v30 }
 0x142   : > { %v1840_v37 = vpop.f32.mrf.mxu1  ;;  %v1752_v2 = vpop.f32.mrf.mxu0 }
 0x143   : > { %v1841_v21 = vadd.f32 %v1840_v37, %v1839_v33  ;;  %1955 = vmatprep.mubr.msk.f32.mxu0 %vm1058_vm0, %v972_v34  ;;  %v1753_v29 = vadd.f32 %v1752_v2, %v1751_v52 }
 0x144   : > { %v1842_v40 = vpop.f32.mrf.mxu1  ;;  %v1754_v12 = vpop.f32.mrf.mxu0 }
 0x145   : > { %v975_v41 = vadd.f32 %v1841_v21, %v1729_v36 }
 0x146   : > { %v1843_v45 = vpop.f32.mrf.mxu1  ;;  %v1755_v18 = vpop.f32.mrf.mxu0 }
 0x147   : > { %v1844_v24 = vadd.f32 %v1843_v45, %v1842_v40  ;;  %1956 = vmatmul.mubr.msk.f32.gmra.mxu0 %vm1058_vm0, %v975_v41  ;;  %v1756_v33 = vadd.f32 %v1755_v18, %v1754_v12 }
 0x148   : > { %v1845_v28 = vpop.f32.mrf.mxu1  ;;  %v1757_v22 = vpop.f32.mrf.mxu0 }
 0x149   : > { %v980_v49 = vadd.f32 %v1844_v24, %v1732_v42 }
 0x14a   : > { %v1846_v54 = vpop.f32.mrf.mxu1  ;;  %v1758_v26 = vpop.f32.mrf.mxu0 }
 0x14b   : > { %v1847_v56 = vadd.f32 %v1846_v54, %v1845_v28  ;;  %1958 = vmatprep.mubr.msk.f32.mxu0 %vm1058_vm0, %v980_v49  ;;  %v1759_v40 = vadd.f32 %v1758_v26, %v1757_v22 }
 0x14c   : > { %v1848_v31 = vpop.f32.mrf.mxu1  ;;  %v1760_v32 = vpop.f32.mrf.mxu0 }
 0x14d   : > { %v983_v35 = vadd.f32 %v1847_v56, %v1735_v51 }
 0x14e   : > { %v1849_v0 = vpop.f32.mrf.mxu1  ;;  %v1761_v36 = vpop.f32.mrf.mxu0 }
 0x14f   : > { %v1850_v57 = vadd.f32 %v1849_v0, %v1848_v31  ;;  %1959 = vmatmul.mubr.msk.f32.gmra.mxu0 %vm1058_vm0, %v983_v35  ;;  %v1762_v28 = vadd.f32 %v1761_v36, %v1760_v32 }
 0x150   : > { %v1851_v39 = vpop.f32.mrf.mxu1  ;;  %v1763_v42 = vpop.f32.mrf.mxu0 }
 0x151   : > { %v988_v44 = vadd.f32 %v1850_v57, %v1738_v61 }
 0x152   : > { %v1852_v10 = vpop.f32.mrf.mxu1  ;;  %v1764_v51 = vpop.f32.mrf.mxu0 }
 0x153   : > { %v1853_v13 = vadd.f32 %v1852_v10, %v1851_v39  ;;  %1961 = vmatprep.mubr.msk.f32.mxu0 %vm1058_vm0, %v988_v44  ;;  %v1765_v31 = vadd.f32 %v1764_v51, %v1763_v42 }
 0x154   : > { %v1854_v47 = vpop.f32.mrf.mxu1 }
 0x155   : > { %v991_v50 = vadd.f32 %v1853_v13, %v1741_v5 }
 0x156   : > { %v1855_v15 = vpop.f32.mrf.mxu1 }
 0x157   : > { %v1856_v19 = vadd.f32 %v1855_v15, %v1854_v47  ;;  %1962 = vmatmul.mubr.msk.f32.gmra.mxu0 %vm1058_vm0, %v991_v50 }
 0x158   : > { %v1857_v59 = vpop.f32.mrf.mxu1 }
 0x159   : > { %v996_v55 = vadd.f32 %v1856_v19, %v1744_v62 }
 0x15a   : > { %v1858_v20 = vpop.f32.mrf.mxu1 }
 0x15b   : > { %v1859_v23 = vadd.f32 %v1858_v20, %v1857_v59  ;;  %1964 = vmatprep.mubr.msk.f32.mxu0 %vm1058_vm0, %v996_v55 }
 0x15c   : > { %v1860_v7 = vpop.f32.mrf.mxu1 }
 0x15d   : > { %v999_v60 = vadd.f32 %v1859_v23, %v1747_v1 }
 0x15e   : > { %v1861_v6 = vpop.f32.mrf.mxu1 }
 0x15f   : > { %v1862_v27 = vadd.f32 %v1861_v6, %v1860_v7  ;;  %1965 = vmatmul.mubr.msk.f32.gmra.mxu0 %vm1058_vm0, %v999_v60 }
 0x160   : > { %v1863_v16 = vpop.f32.mrf.mxu1 }
 0x161   : > { %v1004_v3 = vadd.f32 %v1862_v27, %v1750_v25 }
 0x162   : > { %v1864_v30 = vpop.f32.mrf.mxu1 }
 0x163   : > { %v1865_v14 = vadd.f32 %v1864_v30, %v1863_v16  ;;  %1967 = vmatprep.mubr.msk.f32.mxu0 %vm1058_vm0, %v1004_v3 }
 0x164   : > { %v1866_v8 = vpop.f32.mrf.mxu1 }
 0x165   : > { %v1007_v11 = vadd.f32 %v1865_v14, %v1753_v29 }
 0x166   : > { %v1867_v34 = vpop.f32.mrf.mxu1 }
 0x167   : > { %v1868_v37 = vadd.f32 %v1867_v34, %v1866_v8  ;;  %1968 = vmatmul.mubr.msk.f32.gmra.mxu0 %vm1058_vm0, %v1007_v11 }
 0x168   : > { %v1869_v17 = vpop.f32.mrf.mxu1 }
 0x169   : > { %v1012_v21 = vadd.f32 %v1868_v37, %v1756_v33 }
 0x16a   : > { %v1870_v41 = vpop.f32.mrf.mxu1 }
 0x16b   : > { %v1871_v45 = vadd.f32 %v1870_v41, %v1869_v17  ;;  %1970 = vmatprep.mubr.msk.f32.mxu0 %vm1058_vm0, %v1012_v21 }
 0x16c   : > { %v1872_v46 = vpop.f32.mrf.mxu1 }
 0x16d   : > { %v1015_v24 = vadd.f32 %v1871_v45, %v1759_v40 }
 0x16e   : > { %v1873_v49 = vpop.f32.mrf.mxu1 }
 0x16f   : > { %v1874_v54 = vadd.f32 %v1873_v49, %v1872_v46  ;;  %1971 = vmatmul.mubr.msk.f32.gmra.mxu0 %vm1058_vm0, %v1015_v24 }
 0x170   : > { %v1875_v52 = vpop.f32.mrf.mxu1 }
 0x171   : > { %v1020_v56 = vadd.f32 %v1874_v54, %v1762_v28 }
 0x172   : > { %v1876_v35 = vpop.f32.mrf.mxu1 }
 0x173   : > { %v1877_v61 = vadd.f32 %v1876_v35, %v1875_v52  ;;  %1973 = vmatprep.mubr.msk.f32.mxu0 %vm1058_vm0, %v1020_v56 }
 0x174   : > { %v1878_v0 = vpop.f32.mrf.mxu1 }
 0x175   : > { %v1023_v2 = vadd.f32 %v1877_v61, %v1765_v31 }
 0x176   : > { %v1879_v57 = vpop.f32.mrf.mxu1 }
 0x177   : > { %v1880_v39 = vadd.f32 %v1879_v57, %v1878_v0  ;;  %1974 = vmatmul.mubr.msk.f32.gmra.mxu0 %vm1058_vm0, %v1023_v2 }
 0x178   : > { %v1881_v44 = vpop.f32.mrf.mxu1 }
 0x179   : > { %v1028_v5 = vadd.f32 %v1880_v39, %v2379_v38 }
 0x17a   : > { %v1882_v10 = vpop.f32.mrf.mxu1 }
 0x17b   : > { %v1883_v12 = vadd.f32 %v1882_v10, %v1881_v44  ;;  %1976 = vmatprep.mubr.msk.f32.mxu0 %vm1058_vm0, %v1028_v5 }
 0x17c   : > { %v1884_v13 = vpop.f32.mrf.mxu1 }
 0x17d   : > { %v1031_v47 = vadd.f32 %v1883_v12, %v2381_v43 }
 0x17e   : > { %v1885_v50 = vpop.f32.mrf.mxu1 }
 0x17f   : > { %v1886_v62 = vadd.f32 %v1885_v50, %v1884_v13  ;;  %1977 = vmatmul.mubr.msk.f32.gmra.mxu0 %vm1058_vm0, %v1031_v47 }
 0x180   : > { %v1887_v15 = vpop.f32.mrf.mxu1 }
 0x181   : > { %v1036_v18 = vadd.f32 %v1886_v62, %v2383_v48 }
 0x182   : > { %v1888_v19 = vpop.f32.mrf.mxu1 }
 0x183   : > { %v1889_v59 = vadd.f32 %v1888_v19, %v1887_v15  ;;  %1979 = vmatprep.mubr.msk.f32.mxu0 %vm1058_vm0, %v1036_v18 }
 0x184   : > { %v1890_v55 = vpop.f32.mrf.mxu1 }
 0x185   : > { %v1039_v38 = vadd.f32 %v1889_v59, %v2385_v53 }
 0x186   : > { %v1891_v1 = vpop.f32.mrf.mxu1 }
 0x187   : > { %v1892_v20 = vadd.f32 %v1891_v1, %v1890_v55  ;;  %1980 = vmatmul.mubr.msk.f32.gmra.mxu0 %vm1058_vm0, %v1039_v38 }
 0x188   : > { %v1893_v22 = vpop.f32.mrf.mxu1 }
 0x189   : > { %v1044_v43 = vadd.f32 %v1892_v20, %v2387_v58 }
 0x18a   : > { %v1894_v23 = vpop.f32.mrf.mxu1 }
 0x18b   : > { %v1895_v7 = vadd.f32 %v1894_v23, %v1893_v22  ;;  %1982 = vmatprep.mubr.msk.f32.mxu0 %vm1058_vm0, %v1044_v43 }
 0x18c   : > { %v1896_v48 = vpop.f32.mrf.mxu1 }
 0x18d   : > { %v1047_v60 = vadd.f32 %v1895_v7, %v2389_v63 }
 0x18e   : > { %v1897_v25 = vpop.f32.mrf.mxu1 }
 0x18f   : > { %v1898_v6 = vadd.f32 %v1897_v25, %v1896_v48  ;;  %1983 = vmatmul.mubr.msk.f32.gmra.mxu0 %vm1058_vm0, %v1047_v60 }
 0x190   : > { %v1899_v53 = vpop.f32.mrf.mxu1 }
 0x191   : > { %v1052_v26 = vadd.f32 %v1898_v6, %v2391_v4 }
 0x192   : > { %v1900_v27 = vpop.f32.mrf.mxu1 }
 0x193   : > { %v1901_v16 = vadd.f32 %v1900_v27, %v1899_v53  ;;  %1985 = vmatprep.mubr.msk.f32.mxu0 %vm1058_vm0, %v1052_v26 }
 0x195   : > { %v1055_v58 = vadd.f32 %v1901_v16, %v2393_v9 }
 0x197   : > { %1986 = vmatmul.mubr.msk.f32.gmra.mxu0 %vm1058_vm0, %v1055_v58 }
 0x1df   : > { %v1942_v63 = vpop.f32.mrf.mxu0 }
 0x1e0   : > { %v1381_v4 = vmax.f32 %v1942_v63, 0.0 }
 0x1e1   : > { %v1221_v9 = vpop.f32.mrf.mxu0 }
 0x1e2   : > { %1414 = vst.msk [vmem:[%s2452_s20 + $0x8] sm:$0xff] %vm1412_vm1, %v1381_v4  ;;  %v1380_v3 = vmax.f32 %v1221_v9, 0.0 }
 0x1e4   : > { %1413 = vst.msk [vmem:[%s2452_s20] sm:$0xff] %vm1412_vm1, %v1380_v3 }
 0x1e7   : > { %v1945_v29 = vpop.f32.mrf.mxu0 }
 0x1e8   : > { %v1383_v30 = vmax.f32 %v1945_v29, 0.0 }
 0x1e9   : > { %v1231_v32 = vpop.f32.mrf.mxu0 }
 0x1ea   : > { %1416 = vst.msk [vmem:[%s2452_s20 + $0x18] sm:$0xff] %vm1412_vm1, %v1383_v30  ;;  %v1382_v14 = vmax.f32 %v1231_v32, 0.0 }
 0x1ec   : > { %1415 = vst.msk [vmem:[%s2452_s20 + $0x10] sm:$0xff] %vm1412_vm1, %v1382_v14 }
 0x1ef   : > { %v1948_v8 = vpop.f32.mrf.mxu0 }
 0x1f0   : > { %v1385_v11 = vmax.f32 %v1948_v8, 0.0 }
 0x1f1   : > { %v1241_v33 = vpop.f32.mrf.mxu0 }
 0x1f2   : > { %1418 = vst.msk [vmem:[%s2452_s20 + $0x28] sm:$0xff] %vm1412_vm1, %v1385_v11  ;;  %v1384_v34 = vmax.f32 %v1241_v33, 0.0 }
 0x1f4   : > { %1417 = vst.msk [vmem:[%s2452_s20 + $0x20] sm:$0xff] %vm1412_vm1, %v1384_v34 }
 0x1f7   : > { %v1951_v36 = vpop.f32.mrf.mxu0 }
 0x1f8   : > { %v1387_v37 = vmax.f32 %v1951_v36, 0.0 }
 0x1f9   : > { %v1251_v17 = vpop.f32.mrf.mxu0 }
 0x1fa   : > { %1420 = vst.msk [vmem:[%s2452_s20 + $0x38] sm:$0xff] %vm1412_vm1, %v1387_v37  ;;  %v1386_v21 = vmax.f32 %v1251_v17, 0.0 }
 0x1fc   : > { %1419 = vst.msk [vmem:[%s2452_s20 + $0x30] sm:$0xff] %vm1412_vm1, %v1386_v21 }
 0x1ff   : > { %v1954_v40 = vpop.f32.mrf.mxu0 }
 0x200   : > { %v1389_v41 = vmax.f32 %v1954_v40, 0.0 }
 0x201   : > { %v1261_v42 = vpop.f32.mrf.mxu0 }
 0x202   : > { %1422 = vst.msk [vmem:[%s2452_s20 + $0x48] sm:$0xff] %vm1412_vm1, %v1389_v41  ;;  %v1388_v45 = vmax.f32 %v1261_v42, 0.0 }
 0x204   : > { %1421 = vst.msk [vmem:[%s2452_s20 + $0x40] sm:$0xff] %vm1412_vm1, %v1388_v45 }
 0x207   : > { %v1957_v46 = vpop.f32.mrf.mxu0 }
 0x208   : > { %v1391_v24 = vmax.f32 %v1957_v46, 0.0 }
 0x209   : > { %v1271_v28 = vpop.f32.mrf.mxu0 }
 0x20a   : > { %1424 = vst.msk [vmem:[%s2452_s20 + $0x58] sm:$0xff] %vm1412_vm1, %v1391_v24  ;;  %v1390_v49 = vmax.f32 %v1271_v28, 0.0 }
 0x20c   : > { %1423 = vst.msk [vmem:[%s2452_s20 + $0x50] sm:$0xff] %vm1412_vm1, %v1390_v49 }
 0x20f   : > { %v1960_v51 = vpop.f32.mrf.mxu0 }
 0x210   : > { %v1393_v54 = vmax.f32 %v1960_v51, 0.0 }
 0x211   : > { %v1281_v52 = vpop.f32.mrf.mxu0 }
 0x212   : > { %1426 = vst.msk [vmem:[%s2452_s20 + $0x68] sm:$0xff] %vm1412_vm1, %v1393_v54  ;;  %v1392_v56 = vmax.f32 %v1281_v52, 0.0 }
 0x214   : > { %1425 = vst.msk [vmem:[%s2452_s20 + $0x60] sm:$0xff] %vm1412_vm1, %v1392_v56 }
 0x217   : > { %v1963_v31 = vpop.f32.mrf.mxu0 }
 0x218   : > { %v1395_v35 = vmax.f32 %v1963_v31, 0.0 }
 0x219   : > { %v1291_v61 = vpop.f32.mrf.mxu0 }
 0x21a   : > { %1428 = vst.msk [vmem:[%s2452_s20 + $0x78] sm:$0xff] %vm1412_vm1, %v1395_v35  ;;  %v1394_v0 = vmax.f32 %v1291_v61, 0.0 }
 0x21c   : > { %1427 = vst.msk [vmem:[%s2452_s20 + $0x70] sm:$0xff] %vm1412_vm1, %v1394_v0 }
 0x21f   : > { %v1966_v2 = vpop.f32.mrf.mxu0 }
 0x220   : > { %v1397_v57 = vmax.f32 %v1966_v2, 0.0 }
 0x221   : > { %v1301_v39 = vpop.f32.mrf.mxu0 }
 0x222   : > { %1430 = vst.msk [vmem:[%s2452_s20 + $0x88] sm:$0xff] %vm1412_vm1, %v1397_v57  ;;  %v1396_v44 = vmax.f32 %v1301_v39, 0.0 }
 0x224   : > { %1429 = vst.msk [vmem:[%s2452_s20 + $0x80] sm:$0xff] %vm1412_vm1, %v1396_v44 }
 0x227   : > { %v1969_v5 = vpop.f32.mrf.mxu0 }
 0x228   : > { %v1399_v10 = vmax.f32 %v1969_v5, 0.0 }
 0x229   : > { %v1311_v12 = vpop.f32.mrf.mxu0 }
 0x22a   : > { %1432 = vst.msk [vmem:[%s2452_s20 + $0x98] sm:$0xff] %vm1412_vm1, %v1399_v10  ;;  %v1398_v13 = vmax.f32 %v1311_v12, 0.0 }
 0x22c   : > { %1431 = vst.msk [vmem:[%s2452_s20 + $0x90] sm:$0xff] %vm1412_vm1, %v1398_v13 }
 0x22f   : > { %v1972_v47 = vpop.f32.mrf.mxu0 }
 0x230   : > { %v1401_v50 = vmax.f32 %v1972_v47, 0.0 }
 0x231   : > { %v1321_v62 = vpop.f32.mrf.mxu0 }
 0x232   : > { %1434 = vst.msk [vmem:[%s2452_s20 + $0xa8] sm:$0xff] %vm1412_vm1, %v1401_v50  ;;  %v1400_v15 = vmax.f32 %v1321_v62, 0.0 }
 0x234   : > { %1433 = vst.msk [vmem:[%s2452_s20 + $0xa0] sm:$0xff] %vm1412_vm1, %v1400_v15 }
 0x237   : > { %v1975_v18 = vpop.f32.mrf.mxu0 }
 0x238   : > { %v1403_v19 = vmax.f32 %v1975_v18, 0.0 }
 0x239   : > { %v1331_v59 = vpop.f32.mrf.mxu0 }
 0x23a   : > { %1436 = vst.msk [vmem:[%s2452_s20 + $0xb8] sm:$0xff] %vm1412_vm1, %v1403_v19  ;;  %v1402_v55 = vmax.f32 %v1331_v59, 0.0 }
 0x23c   : > { %1435 = vst.msk [vmem:[%s2452_s20 + $0xb0] sm:$0xff] %vm1412_vm1, %v1402_v55 }
 0x23f   : > { %v1978_v38 = vpop.f32.mrf.mxu0 }
 0x240   : > { %v1405_v1 = vmax.f32 %v1978_v38, 0.0 }
 0x241   : > { %v1341_v20 = vpop.f32.mrf.mxu0 }
 0x242   : > { %1438 = vst.msk [vmem:[%s2452_s20 + $0xc8] sm:$0xff] %vm1412_vm1, %v1405_v1  ;;  %v1404_v22 = vmax.f32 %v1341_v20, 0.0 }
 0x244   : > { %1437 = vst.msk [vmem:[%s2452_s20 + $0xc0] sm:$0xff] %vm1412_vm1, %v1404_v22 }
 0x247   : > { %v1981_v43 = vpop.f32.mrf.mxu0 }
 0x248   : > { %v1407_v23 = vmax.f32 %v1981_v43, 0.0 }
 0x249   : > { %v1351_v7 = vpop.f32.mrf.mxu0 }
 0x24a   : > { %1440 = vst.msk [vmem:[%s2452_s20 + $0xd8] sm:$0xff] %vm1412_vm1, %v1407_v23  ;;  %v1406_v48 = vmax.f32 %v1351_v7, 0.0 }
 0x24c   : > { %1439 = vst.msk [vmem:[%s2452_s20 + $0xd0] sm:$0xff] %vm1412_vm1, %v1406_v48 }
 0x24f   : > { %v1984_v60 = vpop.f32.mrf.mxu0 }
 0x250   : > { %v1409_v25 = vmax.f32 %v1984_v60, 0.0 }
 0x251   : > { %v1361_v6 = vpop.f32.mrf.mxu0 }
 0x252   : > { %1442 = vst.msk [vmem:[%s2452_s20 + $0xe8] sm:$0xff] %vm1412_vm1, %v1409_v25  ;;  %v1408_v53 = vmax.f32 %v1361_v6, 0.0 }
 0x254   : > { %1441 = vst.msk [vmem:[%s2452_s20 + $0xe0] sm:$0xff] %vm1412_vm1, %v1408_v53 }
 0x257   : > { %v1987_v26 = vpop.f32.mrf.mxu0 }
 0x258   : > { %v1411_v27 = vmax.f32 %v1987_v26, 0.0 }
 0x259   : > { %v1371_v16 = vpop.f32.mrf.mxu0 }
 0x25a   : > { %1444 = vst.msk [vmem:[%s2452_s20 + $0xf8] sm:$0xff] %vm1412_vm1, %v1411_v27  ;;  %v1410_v58 = vmax.f32 %v1371_v16, 0.0 }
 0x25c   : > { %1443 = vst.msk [vmem:[%s2452_s20 + $0xf0] sm:$0xff] %vm1412_vm1, %v1410_v58 }
 0x25d PF: > { %s13_s16 = sadd.s32 1, %s2178_s16   ;;  %s2537_s12 = smov %s2170_s14 }
 0x25e   : > { %p10_p7 = scmp.ge.s32.totalorder %s13_s16, 8   ;;  %s2538_s13 = smov %s2174_s15 }
 0x25f   : > { %s2539_s14 = smov %s2542_s17  ;;  %s2540_s15 = smov %s2546_s18 }
 0x260   :  { %12 = sbr.rel (!%p10_p7) target bundleno = 3 (0x3), region = 68 }

// kernel: gae_forward.6
= control target key start
LH: loop header
LB: loop body
LE: loop exit
PB: predicated region body
PF: predicated region fallthrough
CT: control target
= control target key end

     0   :  { %s6459_s12 = smov 0   ;;  %s6461_s13 = smov 0   ;;  %s8964_s0 = inlined_call_operand.vmem [shape: bf16[3,512,512], index: 0, kind: input, shape index: {}]   ;;  %s8965_s1 = inlined_call_operand.vmem [shape: f32[3,512,32], index: 1, kind: input, shape index: {}]   ;;  %s8966_s2 = inlined_call_operand.vmem [shape: f32[3,32,32], index: 2, kind: input, shape index: {}]   ;;  %s8967_s3 = inlined_call_operand.vmem [shape: f32[512,32], index: 3, kind: output, shape index: {}]  }
   0x1   :  { %s6463_s14 = smov 0  }
   0x2 LB: > { %s4443_s15 = sadd.s32 4294967295, %s6437_s14   ;;  %s6476_s16 = sadd.s32 1, %s6437_s14   ;;  %s6437_s14 = sphi %s6463_s14, %s9112_s14   ;;  %s6433_s13 = sphi %s6461_s13, %s9111_s13   ;;  %s6429_s12 = sphi %s6459_s12, %s9110_s12  }
   0x3   : > { %s17_s17 = ssub.s32 %s6437_s14, %s6476_s16  ;;  %s20_s18 = sadd.s32 1, %s6433_s13 }
   0x4   : > { %p18_p0 = scmp.eq.s32.totalorder %s17_s17, 0  ;;  %p27_p1 = scmp.ne.s32.totalorder %s6433_s13, %s6429_s12 }
   0x5   : > { %p28_p2 = scmp.eq.s32.totalorder %s6437_s14, 0  ;;  %p4446_p4 = scmp.ge.s32.totalorder %s6437_s14, 2 }
   0x6   : > { %s6485_s19 = scalar_select %p18_p0, %s6433_s13, %s20_s18  }
   0x7   : > { %p29_p3 = por %p28_p2, %p27_p1  ;;  %127 = sbr.rel (%p4446_p4) target bundleno = 113 (0x71), region = 24 }
   0xc   : > { %130 = sbr.rel (!%p29_p3) target bundleno = 113 (0x71), region = 28  ;;  %s132_s20 = sand.u32 (%p29_p3), 1, %s6433_s13  }
   0xd   : > { %s5008_s21 = sshll.u32 (%p29_p3), %s6437_s14, 9  ;;  %s5973_s22 = smul.u32 (%p29_p3), 1536, %s132_s20 }
   0xe   : > { %s6493_s25 = scalar_lea.vmem (%p29_p3), %s8964_s0, %s5008_s21 }
   0xf   : > { %v151_v0 = vld [vmem:[%s6493_s25] sm:$0xff] (%p29_p3)  ;;  %v153_v1 = vld [vmem:[%s6493_s25 + $0x8] sm:$0xff] (%p29_p3)  ;;  %v155_v2 = vld [vmem:[%s6493_s25 + $0x10] sm:$0xff] (%p29_p3)  ;;  %s6501_s26 = scalar_lea.vmem (%p29_p3), [#allocation2], %s5973_s22 }
  0x10   : > { %v157_v3 = vld [vmem:[%s6493_s25 + $0x18] sm:$0xff] (%p29_p3)  ;;  %v159_v4 = vld [vmem:[%s6493_s25 + $0x20] sm:$0xff] (%p29_p3)  ;;  %v161_v5 = vld [vmem:[%s6493_s25 + $0x28] sm:$0xff] (%p29_p3)  ;;  %152 = vst [vmem:[%s6501_s26] sm:$0xff] (%p29_p3), %v151_v0 }
  0x11   : > { %154 = vst [vmem:[%s6501_s26 + $0x8] sm:$0xff] %v153_v1  ;;  %156 = vst [vmem:[%s6501_s26 + $0x10] sm:$0xff] %v155_v2  ;;  %v163_v6 = vld [vmem:[%s6493_s25 + $0x30] sm:$0xff]  ;;  %v165_v7 = vld [vmem:[%s6493_s25 + $0x38] sm:$0xff] }
  0x12   : > { %158 = vst [vmem:[%s6501_s26 + $0x18] sm:$0xff] %v157_v3  ;;  %160 = vst [vmem:[%s6501_s26 + $0x20] sm:$0xff] %v159_v4  ;;  %v167_v8 = vld [vmem:[%s6493_s25 + $0x40] sm:$0xff]  ;;  %v169_v9 = vld [vmem:[%s6493_s25 + $0x48] sm:$0xff] }
  0x13   : > { %162 = vst [vmem:[%s6501_s26 + $0x28] sm:$0xff] %v161_v5  ;;  %164 = vst [vmem:[%s6501_s26 + $0x30] sm:$0xff] %v163_v6  ;;  %v171_v10 = vld [vmem:[%s6493_s25 + $0x50] sm:$0xff]  ;;  %v173_v11 = vld [vmem:[%s6493_s25 + $0x58] sm:$0xff] }
  0x14   : > { %166 = vst [vmem:[%s6501_s26 + $0x38] sm:$0xff] %v165_v7  ;;  %168 = vst [vmem:[%s6501_s26 + $0x40] sm:$0xff] %v167_v8  ;;  %v175_v12 = vld [vmem:[%s6493_s25 + $0x60] sm:$0xff]  ;;  %v177_v13 = vld [vmem:[%s6493_s25 + $0x68] sm:$0xff] }
  0x15   : > { %170 = vst [vmem:[%s6501_s26 + $0x48] sm:$0xff] %v169_v9  ;;  %172 = vst [vmem:[%s6501_s26 + $0x50] sm:$0xff] %v171_v10  ;;  %v179_v14 = vld [vmem:[%s6493_s25 + $0x70] sm:$0xff]  ;;  %v181_v15 = vld [vmem:[%s6493_s25 + $0x78] sm:$0xff] }
  0x16   : > { %174 = vst [vmem:[%s6501_s26 + $0x58] sm:$0xff] %v173_v11  ;;  %176 = vst [vmem:[%s6501_s26 + $0x60] sm:$0xff] %v175_v12  ;;  %v183_v16 = vld [vmem:[%s6493_s25 + $0x80] sm:$0xff]  ;;  %v185_v17 = vld [vmem:[%s6493_s25 + $0x88] sm:$0xff] }
  0x17   : > { %178 = vst [vmem:[%s6501_s26 + $0x68] sm:$0xff] %v177_v13  ;;  %180 = vst [vmem:[%s6501_s26 + $0x70] sm:$0xff] %v179_v14  ;;  %v187_v18 = vld [vmem:[%s6493_s25 + $0x90] sm:$0xff]  ;;  %v189_v19 = vld [vmem:[%s6493_s25 + $0x98] sm:$0xff] }
  0x18   : > { %182 = vst [vmem:[%s6501_s26 + $0x78] sm:$0xff] %v181_v15  ;;  %184 = vst [vmem:[%s6501_s26 + $0x80] sm:$0xff] %v183_v16  ;;  %v191_v20 = vld [vmem:[%s6493_s25 + $0xa0] sm:$0xff]  ;;  %v193_v21 = vld [vmem:[%s6493_s25 + $0xa8] sm:$0xff] }
  0x19   : > { %186 = vst [vmem:[%s6501_s26 + $0x88] sm:$0xff] %v185_v17  ;;  %188 = vst [vmem:[%s6501_s26 + $0x90] sm:$0xff] %v187_v18  ;;  %v195_v22 = vld [vmem:[%s6493_s25 + $0xb0] sm:$0xff]  ;;  %v197_v23 = vld [vmem:[%s6493_s25 + $0xb8] sm:$0xff] }
  0x1a   : > { %190 = vst [vmem:[%s6501_s26 + $0x98] sm:$0xff] %v189_v19  ;;  %192 = vst [vmem:[%s6501_s26 + $0xa0] sm:$0xff] %v191_v20  ;;  %v199_v24 = vld [vmem:[%s6493_s25 + $0xc0] sm:$0xff]  ;;  %v201_v25 = vld [vmem:[%s6493_s25 + $0xc8] sm:$0xff] }
  0x1b   : > { %194 = vst [vmem:[%s6501_s26 + $0xa8] sm:$0xff] %v193_v21  ;;  %196 = vst [vmem:[%s6501_s26 + $0xb0] sm:$0xff] %v195_v22  ;;  %v203_v26 = vld [vmem:[%s6493_s25 + $0xd0] sm:$0xff]  ;;  %v205_v27 = vld [vmem:[%s6493_s25 + $0xd8] sm:$0xff] }
  0x1c   : > { %198 = vst [vmem:[%s6501_s26 + $0xb8] sm:$0xff] %v197_v23  ;;  %200 = vst [vmem:[%s6501_s26 + $0xc0] sm:$0xff] %v199_v24  ;;  %v207_v28 = vld [vmem:[%s6493_s25 + $0xe0] sm:$0xff]  ;;  %v209_v29 = vld [vmem:[%s6493_s25 + $0xe8] sm:$0xff] }
  0x1d   : > { %202 = vst [vmem:[%s6501_s26 + $0xc8] sm:$0xff] %v201_v25  ;;  %204 = vst [vmem:[%s6501_s26 + $0xd0] sm:$0xff] %v203_v26  ;;  %v211_v30 = vld [vmem:[%s6493_s25 + $0xf0] sm:$0xff]  ;;  %v213_v31 = vld [vmem:[%s6493_s25 + $0xf8] sm:$0xff] }
  0x1e   : > { %206 = vst [vmem:[%s6501_s26 + $0xd8] sm:$0xff] %v205_v27  ;;  %208 = vst [vmem:[%s6501_s26 + $0xe0] sm:$0xff] %v207_v28  ;;  %v215_v32 = vld [vmem:[%s6493_s25 + $0x100] sm:$0xff]  ;;  %v217_v33 = vld [vmem:[%s6493_s25 + $0x108] sm:$0xff] }
  0x1f   : > { %210 = vst [vmem:[%s6501_s26 + $0xe8] sm:$0xff] %v209_v29  ;;  %212 = vst [vmem:[%s6501_s26 + $0xf0] sm:$0xff] %v211_v30  ;;  %v219_v34 = vld [vmem:[%s6493_s25 + $0x110] sm:$0xff]  ;;  %v221_v35 = vld [vmem:[%s6493_s25 + $0x118] sm:$0xff] }
  0x20   : > { %214 = vst [vmem:[%s6501_s26 + $0xf8] sm:$0xff] %v213_v31  ;;  %216 = vst [vmem:[%s6501_s26 + $0x100] sm:$0xff] %v215_v32  ;;  %v223_v36 = vld [vmem:[%s6493_s25 + $0x120] sm:$0xff]  ;;  %v225_v37 = vld [vmem:[%s6493_s25 + $0x128] sm:$0xff] }
  0x21   : > { %218 = vst [vmem:[%s6501_s26 + $0x108] sm:$0xff] %v217_v33  ;;  %220 = vst [vmem:[%s6501_s26 + $0x110] sm:$0xff] %v219_v34  ;;  %v227_v38 = vld [vmem:[%s6493_s25 + $0x130] sm:$0xff]  ;;  %v229_v39 = vld [vmem:[%s6493_s25 + $0x138] sm:$0xff] }
  0x22   : > { %222 = vst [vmem:[%s6501_s26 + $0x118] sm:$0xff] %v221_v35  ;;  %224 = vst [vmem:[%s6501_s26 + $0x120] sm:$0xff] %v223_v36  ;;  %v231_v40 = vld [vmem:[%s6493_s25 + $0x140] sm:$0xff]  ;;  %v233_v41 = vld [vmem:[%s6493_s25 + $0x148] sm:$0xff] }
  0x23   : > { %226 = vst [vmem:[%s6501_s26 + $0x128] sm:$0xff] %v225_v37  ;;  %228 = vst [vmem:[%s6501_s26 + $0x130] sm:$0xff] %v227_v38  ;;  %v235_v42 = vld [vmem:[%s6493_s25 + $0x150] sm:$0xff]  ;;  %v237_v43 = vld [vmem:[%s6493_s25 + $0x158] sm:$0xff] }
  0x24   : > { %230 = vst [vmem:[%s6501_s26 + $0x138] sm:$0xff] %v229_v39  ;;  %232 = vst [vmem:[%s6501_s26 + $0x140] sm:$0xff] %v231_v40  ;;  %v239_v44 = vld [vmem:[%s6493_s25 + $0x160] sm:$0xff]  ;;  %v241_v45 = vld [vmem:[%s6493_s25 + $0x168] sm:$0xff] }
  0x25   : > { %234 = vst [vmem:[%s6501_s26 + $0x148] sm:$0xff] %v233_v41  ;;  %236 = vst [vmem:[%s6501_s26 + $0x150] sm:$0xff] %v235_v42  ;;  %v243_v46 = vld [vmem:[%s6493_s25 + $0x170] sm:$0xff]  ;;  %v245_v47 = vld [vmem:[%s6493_s25 + $0x178] sm:$0xff] }
  0x26   : > { %238 = vst [vmem:[%s6501_s26 + $0x158] sm:$0xff] %v237_v43  ;;  %240 = vst [vmem:[%s6501_s26 + $0x160] sm:$0xff] %v239_v44  ;;  %v247_v48 = vld [vmem:[%s6493_s25 + $0x180] sm:$0xff]  ;;  %v249_v49 = vld [vmem:[%s6493_s25 + $0x188] sm:$0xff] }
  0x27   : > { %242 = vst [vmem:[%s6501_s26 + $0x168] sm:$0xff] %v241_v45  ;;  %244 = vst [vmem:[%s6501_s26 + $0x170] sm:$0xff] %v243_v46  ;;  %v251_v50 = vld [vmem:[%s6493_s25 + $0x190] sm:$0xff]  ;;  %v253_v51 = vld [vmem:[%s6493_s25 + $0x198] sm:$0xff] }
  0x28   : > { %246 = vst [vmem:[%s6501_s26 + $0x178] sm:$0xff] %v245_v47  ;;  %248 = vst [vmem:[%s6501_s26 + $0x180] sm:$0xff] %v247_v48  ;;  %v255_v52 = vld [vmem:[%s6493_s25 + $0x1a0] sm:$0xff]  ;;  %v257_v53 = vld [vmem:[%s6493_s25 + $0x1a8] sm:$0xff] }
  0x29   : > { %250 = vst [vmem:[%s6501_s26 + $0x188] sm:$0xff] %v249_v49  ;;  %252 = vst [vmem:[%s6501_s26 + $0x190] sm:$0xff] %v251_v50  ;;  %v259_v54 = vld [vmem:[%s6493_s25 + $0x1b0] sm:$0xff]  ;;  %v261_v55 = vld [vmem:[%s6493_s25 + $0x1b8] sm:$0xff] }
  0x2a   : > { %254 = vst [vmem:[%s6501_s26 + $0x198] sm:$0xff] %v253_v51  ;;  %256 = vst [vmem:[%s6501_s26 + $0x1a0] sm:$0xff] %v255_v52  ;;  %v263_v56 = vld [vmem:[%s6493_s25 + $0x1c0] sm:$0xff]  ;;  %v265_v57 = vld [vmem:[%s6493_s25 + $0x1c8] sm:$0xff] }
  0x2b   : > { %258 = vst [vmem:[%s6501_s26 + $0x1a8] sm:$0xff] %v257_v53  ;;  %260 = vst [vmem:[%s6501_s26 + $0x1b0] sm:$0xff] %v259_v54  ;;  %v267_v58 = vld [vmem:[%s6493_s25 + $0x1d0] sm:$0xff]  ;;  %v269_v59 = vld [vmem:[%s6493_s25 + $0x1d8] sm:$0xff] }
  0x2c   : > { %262 = vst [vmem:[%s6501_s26 + $0x1b8] sm:$0xff] %v261_v55  ;;  %264 = vst [vmem:[%s6501_s26 + $0x1c0] sm:$0xff] %v263_v56  ;;  %v271_v60 = vld [vmem:[%s6493_s25 + $0x1e0] sm:$0xff]  ;;  %v273_v61 = vld [vmem:[%s6493_s25 + $0x1e8] sm:$0xff] }
  0x2d   : > { %266 = vst [vmem:[%s6501_s26 + $0x1c8] sm:$0xff] %v265_v57  ;;  %268 = vst [vmem:[%s6501_s26 + $0x1d0] sm:$0xff] %v267_v58  ;;  %v275_v62 = vld [vmem:[%s6493_s25 + $0x1f0] sm:$0xff]  ;;  %v277_v63 = vld [vmem:[%s6493_s25 + $0x1f8] sm:$0xff] }
  0x2e   : > { %270 = vst [vmem:[%s6501_s26 + $0x1d8] sm:$0xff] %v269_v59  ;;  %272 = vst [vmem:[%s6501_s26 + $0x1e0] sm:$0xff] %v271_v60  ;;  %v279_v0 = vld [vmem:[%s6493_s25 + $0x400] sm:$0xff]  ;;  %v281_v1 = vld [vmem:[%s6493_s25 + $0x408] sm:$0xff] }
  0x2f   : > { %274 = vst [vmem:[%s6501_s26 + $0x1e8] sm:$0xff] %v273_v61  ;;  %276 = vst [vmem:[%s6501_s26 + $0x1f0] sm:$0xff] %v275_v62  ;;  %v283_v2 = vld [vmem:[%s6493_s25 + $0x410] sm:$0xff]  ;;  %v285_v3 = vld [vmem:[%s6493_s25 + $0x418] sm:$0xff] }
  0x30   : > { %278 = vst [vmem:[%s6501_s26 + $0x1f8] sm:$0xff] %v277_v63  ;;  %280 = vst [vmem:[%s6501_s26 + $0x200] sm:$0xff] %v279_v0  ;;  %v287_v4 = vld [vmem:[%s6493_s25 + $0x420] sm:$0xff]  ;;  %v289_v5 = vld [vmem:[%s6493_s25 + $0x428] sm:$0xff] }
  0x31   : > { %282 = vst [vmem:[%s6501_s26 + $0x208] sm:$0xff] %v281_v1  ;;  %284 = vst [vmem:[%s6501_s26 + $0x210] sm:$0xff] %v283_v2  ;;  %v291_v6 = vld [vmem:[%s6493_s25 + $0x430] sm:$0xff]  ;;  %v293_v7 = vld [vmem:[%s6493_s25 + $0x438] sm:$0xff] }
  0x32   : > { %286 = vst [vmem:[%s6501_s26 + $0x218] sm:$0xff] %v285_v3  ;;  %288 = vst [vmem:[%s6501_s26 + $0x220] sm:$0xff] %v287_v4  ;;  %v295_v8 = vld [vmem:[%s6493_s25 + $0x440] sm:$0xff]  ;;  %v297_v9 = vld [vmem:[%s6493_s25 + $0x448] sm:$0xff] }
  0x33   : > { %290 = vst [vmem:[%s6501_s26 + $0x228] sm:$0xff] %v289_v5  ;;  %292 = vst [vmem:[%s6501_s26 + $0x230] sm:$0xff] %v291_v6  ;;  %v299_v10 = vld [vmem:[%s6493_s25 + $0x450] sm:$0xff]  ;;  %v301_v11 = vld [vmem:[%s6493_s25 + $0x458] sm:$0xff] }
  0x34   : > { %294 = vst [vmem:[%s6501_s26 + $0x238] sm:$0xff] %v293_v7  ;;  %296 = vst [vmem:[%s6501_s26 + $0x240] sm:$0xff] %v295_v8  ;;  %v303_v12 = vld [vmem:[%s6493_s25 + $0x460] sm:$0xff]  ;;  %v305_v13 = vld [vmem:[%s6493_s25 + $0x468] sm:$0xff] }
  0x35   : > { %298 = vst [vmem:[%s6501_s26 + $0x248] sm:$0xff] %v297_v9  ;;  %300 = vst [vmem:[%s6501_s26 + $0x250] sm:$0xff] %v299_v10  ;;  %v307_v14 = vld [vmem:[%s6493_s25 + $0x470] sm:$0xff]  ;;  %v309_v15 = vld [vmem:[%s6493_s25 + $0x478] sm:$0xff] }
  0x36   : > { %302 = vst [vmem:[%s6501_s26 + $0x258] sm:$0xff] %v301_v11  ;;  %304 = vst [vmem:[%s6501_s26 + $0x260] sm:$0xff] %v303_v12  ;;  %v311_v16 = vld [vmem:[%s6493_s25 + $0x480] sm:$0xff]  ;;  %v313_v17 = vld [vmem:[%s6493_s25 + $0x488] sm:$0xff] }
  0x37   : > { %306 = vst [vmem:[%s6501_s26 + $0x268] sm:$0xff] %v305_v13  ;;  %308 = vst [vmem:[%s6501_s26 + $0x270] sm:$0xff] %v307_v14  ;;  %v315_v18 = vld [vmem:[%s6493_s25 + $0x490] sm:$0xff]  ;;  %v317_v19 = vld [vmem:[%s6493_s25 + $0x498] sm:$0xff] }
  0x38   : > { %310 = vst [vmem:[%s6501_s26 + $0x278] sm:$0xff] %v309_v15  ;;  %312 = vst [vmem:[%s6501_s26 + $0x280] sm:$0xff] %v311_v16  ;;  %v319_v20 = vld [vmem:[%s6493_s25 + $0x4a0] sm:$0xff]  ;;  %v321_v21 = vld [vmem:[%s6493_s25 + $0x4a8] sm:$0xff] }
  0x39   : > { %314 = vst [vmem:[%s6501_s26 + $0x288] sm:$0xff] %v313_v17  ;;  %316 = vst [vmem:[%s6501_s26 + $0x290] sm:$0xff] %v315_v18  ;;  %v323_v22 = vld [vmem:[%s6493_s25 + $0x4b0] sm:$0xff]  ;;  %v325_v23 = vld [vmem:[%s6493_s25 + $0x4b8] sm:$0xff] }
  0x3a   : > { %318 = vst [vmem:[%s6501_s26 + $0x298] sm:$0xff] %v317_v19  ;;  %320 = vst [vmem:[%s6501_s26 + $0x2a0] sm:$0xff] %v319_v20  ;;  %v327_v24 = vld [vmem:[%s6493_s25 + $0x4c0] sm:$0xff]  ;;  %v329_v25 = vld [vmem:[%s6493_s25 + $0x4c8] sm:$0xff] }
  0x3b   : > { %322 = vst [vmem:[%s6501_s26 + $0x2a8] sm:$0xff] %v321_v21  ;;  %324 = vst [vmem:[%s6501_s26 + $0x2b0] sm:$0xff] %v323_v22  ;;  %v331_v26 = vld [vmem:[%s6493_s25 + $0x4d0] sm:$0xff]  ;;  %v333_v27 = vld [vmem:[%s6493_s25 + $0x4d8] sm:$0xff] }
  0x3c   : > { %326 = vst [vmem:[%s6501_s26 + $0x2b8] sm:$0xff] %v325_v23  ;;  %328 = vst [vmem:[%s6501_s26 + $0x2c0] sm:$0xff] %v327_v24  ;;  %v335_v28 = vld [vmem:[%s6493_s25 + $0x4e0] sm:$0xff]  ;;  %v337_v29 = vld [vmem:[%s6493_s25 + $0x4e8] sm:$0xff] }
  0x3d   : > { %330 = vst [vmem:[%s6501_s26 + $0x2c8] sm:$0xff] %v329_v25  ;;  %332 = vst [vmem:[%s6501_s26 + $0x2d0] sm:$0xff] %v331_v26  ;;  %v339_v30 = vld [vmem:[%s6493_s25 + $0x4f0] sm:$0xff]  ;;  %v341_v31 = vld [vmem:[%s6493_s25 + $0x4f8] sm:$0xff] }
  0x3e   : > { %334 = vst [vmem:[%s6501_s26 + $0x2d8] sm:$0xff] %v333_v27  ;;  %336 = vst [vmem:[%s6501_s26 + $0x2e0] sm:$0xff] %v335_v28  ;;  %v343_v32 = vld [vmem:[%s6493_s25 + $0x500] sm:$0xff]  ;;  %v345_v33 = vld [vmem:[%s6493_s25 + $0x508] sm:$0xff] }
  0x3f   : > { %338 = vst [vmem:[%s6501_s26 + $0x2e8] sm:$0xff] %v337_v29  ;;  %340 = vst [vmem:[%s6501_s26 + $0x2f0] sm:$0xff] %v339_v30  ;;  %v347_v34 = vld [vmem:[%s6493_s25 + $0x510] sm:$0xff]  ;;  %v349_v35 = vld [vmem:[%s6493_s25 + $0x518] sm:$0xff] }
  0x40   : > { %342 = vst [vmem:[%s6501_s26 + $0x2f8] sm:$0xff] %v341_v31  ;;  %344 = vst [vmem:[%s6501_s26 + $0x300] sm:$0xff] %v343_v32  ;;  %v351_v36 = vld [vmem:[%s6493_s25 + $0x520] sm:$0xff]  ;;  %v353_v37 = vld [vmem:[%s6493_s25 + $0x528] sm:$0xff] }
  0x41   : > { %346 = vst [vmem:[%s6501_s26 + $0x308] sm:$0xff] %v345_v33  ;;  %348 = vst [vmem:[%s6501_s26 + $0x310] sm:$0xff] %v347_v34  ;;  %v355_v38 = vld [vmem:[%s6493_s25 + $0x530] sm:$0xff]  ;;  %v357_v39 = vld [vmem:[%s6493_s25 + $0x538] sm:$0xff] }
  0x42   : > { %350 = vst [vmem:[%s6501_s26 + $0x318] sm:$0xff] %v349_v35  ;;  %352 = vst [vmem:[%s6501_s26 + $0x320] sm:$0xff] %v351_v36  ;;  %v359_v40 = vld [vmem:[%s6493_s25 + $0x540] sm:$0xff]  ;;  %v361_v41 = vld [vmem:[%s6493_s25 + $0x548] sm:$0xff] }
  0x43   : > { %354 = vst [vmem:[%s6501_s26 + $0x328] sm:$0xff] %v353_v37  ;;  %356 = vst [vmem:[%s6501_s26 + $0x330] sm:$0xff] %v355_v38  ;;  %v363_v42 = vld [vmem:[%s6493_s25 + $0x550] sm:$0xff]  ;;  %v365_v43 = vld [vmem:[%s6493_s25 + $0x558] sm:$0xff] }
  0x44   : > { %358 = vst [vmem:[%s6501_s26 + $0x338] sm:$0xff] %v357_v39  ;;  %360 = vst [vmem:[%s6501_s26 + $0x340] sm:$0xff] %v359_v40  ;;  %v367_v44 = vld [vmem:[%s6493_s25 + $0x560] sm:$0xff]  ;;  %v369_v45 = vld [vmem:[%s6493_s25 + $0x568] sm:$0xff] }
  0x45   : > { %362 = vst [vmem:[%s6501_s26 + $0x348] sm:$0xff] %v361_v41  ;;  %364 = vst [vmem:[%s6501_s26 + $0x350] sm:$0xff] %v363_v42  ;;  %v371_v46 = vld [vmem:[%s6493_s25 + $0x570] sm:$0xff]  ;;  %v373_v47 = vld [vmem:[%s6493_s25 + $0x578] sm:$0xff] }
  0x46   : > { %366 = vst [vmem:[%s6501_s26 + $0x358] sm:$0xff] %v365_v43  ;;  %368 = vst [vmem:[%s6501_s26 + $0x360] sm:$0xff] %v367_v44  ;;  %v375_v48 = vld [vmem:[%s6493_s25 + $0x580] sm:$0xff]  ;;  %v377_v49 = vld [vmem:[%s6493_s25 + $0x588] sm:$0xff] }
  0x47   : > { %370 = vst [vmem:[%s6501_s26 + $0x368] sm:$0xff] %v369_v45  ;;  %372 = vst [vmem:[%s6501_s26 + $0x370] sm:$0xff] %v371_v46  ;;  %v379_v50 = vld [vmem:[%s6493_s25 + $0x590] sm:$0xff]  ;;  %v381_v51 = vld [vmem:[%s6493_s25 + $0x598] sm:$0xff] }
  0x48   : > { %374 = vst [vmem:[%s6501_s26 + $0x378] sm:$0xff] %v373_v47  ;;  %376 = vst [vmem:[%s6501_s26 + $0x380] sm:$0xff] %v375_v48  ;;  %v383_v52 = vld [vmem:[%s6493_s25 + $0x5a0] sm:$0xff]  ;;  %v385_v53 = vld [vmem:[%s6493_s25 + $0x5a8] sm:$0xff] }
  0x49   : > { %378 = vst [vmem:[%s6501_s26 + $0x388] sm:$0xff] %v377_v49  ;;  %380 = vst [vmem:[%s6501_s26 + $0x390] sm:$0xff] %v379_v50  ;;  %v387_v54 = vld [vmem:[%s6493_s25 + $0x5b0] sm:$0xff]  ;;  %v389_v55 = vld [vmem:[%s6493_s25 + $0x5b8] sm:$0xff] }
  0x4a   : > { %382 = vst [vmem:[%s6501_s26 + $0x398] sm:$0xff] %v381_v51  ;;  %384 = vst [vmem:[%s6501_s26 + $0x3a0] sm:$0xff] %v383_v52  ;;  %v391_v56 = vld [vmem:[%s6493_s25 + $0x5c0] sm:$0xff]  ;;  %v393_v57 = vld [vmem:[%s6493_s25 + $0x5c8] sm:$0xff] }
  0x4b   : > { %386 = vst [vmem:[%s6501_s26 + $0x3a8] sm:$0xff] %v385_v53  ;;  %388 = vst [vmem:[%s6501_s26 + $0x3b0] sm:$0xff] %v387_v54  ;;  %v395_v58 = vld [vmem:[%s6493_s25 + $0x5d0] sm:$0xff]  ;;  %v397_v59 = vld [vmem:[%s6493_s25 + $0x5d8] sm:$0xff] }
  0x4c   : > { %390 = vst [vmem:[%s6501_s26 + $0x3b8] sm:$0xff] %v389_v55  ;;  %392 = vst [vmem:[%s6501_s26 + $0x3c0] sm:$0xff] %v391_v56  ;;  %v399_v60 = vld [vmem:[%s6493_s25 + $0x5e0] sm:$0xff]  ;;  %v401_v61 = vld [vmem:[%s6493_s25 + $0x5e8] sm:$0xff] }
  0x4d   : > { %394 = vst [vmem:[%s6501_s26 + $0x3c8] sm:$0xff] %v393_v57  ;;  %396 = vst [vmem:[%s6501_s26 + $0x3d0] sm:$0xff] %v395_v58  ;;  %v403_v62 = vld [vmem:[%s6493_s25 + $0x5f0] sm:$0xff]  ;;  %v405_v63 = vld [vmem:[%s6493_s25 + $0x5f8] sm:$0xff] }
  0x4e   : > { %398 = vst [vmem:[%s6501_s26 + $0x3d8] sm:$0xff] %v397_v59  ;;  %400 = vst [vmem:[%s6501_s26 + $0x3e0] sm:$0xff] %v399_v60  ;;  %v407_v0 = vld [vmem:[%s6493_s25 + $0x800] sm:$0xff]  ;;  %v409_v1 = vld [vmem:[%s6493_s25 + $0x808] sm:$0xff] }
  0x4f   : > { %402 = vst [vmem:[%s6501_s26 + $0x3e8] sm:$0xff] %v401_v61  ;;  %404 = vst [vmem:[%s6501_s26 + $0x3f0] sm:$0xff] %v403_v62  ;;  %v411_v2 = vld [vmem:[%s6493_s25 + $0x810] sm:$0xff]  ;;  %v413_v3 = vld [vmem:[%s6493_s25 + $0x818] sm:$0xff] }
  0x50   : > { %406 = vst [vmem:[%s6501_s26 + $0x3f8] sm:$0xff] %v405_v63  ;;  %408 = vst [vmem:[%s6501_s26 + $0x400] sm:$0xff] %v407_v0  ;;  %v415_v4 = vld [vmem:[%s6493_s25 + $0x820] sm:$0xff]  ;;  %v417_v5 = vld [vmem:[%s6493_s25 + $0x828] sm:$0xff] }
  0x51   : > { %410 = vst [vmem:[%s6501_s26 + $0x408] sm:$0xff] %v409_v1  ;;  %412 = vst [vmem:[%s6501_s26 + $0x410] sm:$0xff] %v411_v2  ;;  %v419_v6 = vld [vmem:[%s6493_s25 + $0x830] sm:$0xff]  ;;  %v421_v7 = vld [vmem:[%s6493_s25 + $0x838] sm:$0xff] }
  0x52   : > { %414 = vst [vmem:[%s6501_s26 + $0x418] sm:$0xff] %v413_v3  ;;  %416 = vst [vmem:[%s6501_s26 + $0x420] sm:$0xff] %v415_v4  ;;  %v423_v8 = vld [vmem:[%s6493_s25 + $0x840] sm:$0xff]  ;;  %v425_v9 = vld [vmem:[%s6493_s25 + $0x848] sm:$0xff] }
  0x53   : > { %418 = vst [vmem:[%s6501_s26 + $0x428] sm:$0xff] %v417_v5  ;;  %420 = vst [vmem:[%s6501_s26 + $0x430] sm:$0xff] %v419_v6  ;;  %v427_v10 = vld [vmem:[%s6493_s25 + $0x850] sm:$0xff]  ;;  %v429_v11 = vld [vmem:[%s6493_s25 + $0x858] sm:$0xff] }
  0x54   : > { %422 = vst [vmem:[%s6501_s26 + $0x438] sm:$0xff] %v421_v7  ;;  %424 = vst [vmem:[%s6501_s26 + $0x440] sm:$0xff] %v423_v8  ;;  %v431_v12 = vld [vmem:[%s6493_s25 + $0x860] sm:$0xff]  ;;  %v433_v13 = vld [vmem:[%s6493_s25 + $0x868] sm:$0xff] }
  0x55   : > { %426 = vst [vmem:[%s6501_s26 + $0x448] sm:$0xff] %v425_v9  ;;  %428 = vst [vmem:[%s6501_s26 + $0x450] sm:$0xff] %v427_v10  ;;  %v435_v14 = vld [vmem:[%s6493_s25 + $0x870] sm:$0xff]  ;;  %v437_v15 = vld [vmem:[%s6493_s25 + $0x878] sm:$0xff] }
  0x56   : > { %430 = vst [vmem:[%s6501_s26 + $0x458] sm:$0xff] %v429_v11  ;;  %432 = vst [vmem:[%s6501_s26 + $0x460] sm:$0xff] %v431_v12  ;;  %v439_v16 = vld [vmem:[%s6493_s25 + $0x880] sm:$0xff]  ;;  %v441_v17 = vld [vmem:[%s6493_s25 + $0x888] sm:$0xff] }
  0x57   : > { %434 = vst [vmem:[%s6501_s26 + $0x468] sm:$0xff] %v433_v13  ;;  %436 = vst [vmem:[%s6501_s26 + $0x470] sm:$0xff] %v435_v14  ;;  %v443_v18 = vld [vmem:[%s6493_s25 + $0x890] sm:$0xff]  ;;  %v445_v19 = vld [vmem:[%s6493_s25 + $0x898] sm:$0xff] }
  0x58   : > { %438 = vst [vmem:[%s6501_s26 + $0x478] sm:$0xff] %v437_v15  ;;  %440 = vst [vmem:[%s6501_s26 + $0x480] sm:$0xff] %v439_v16  ;;  %v447_v20 = vld [vmem:[%s6493_s25 + $0x8a0] sm:$0xff]  ;;  %v449_v21 = vld [vmem:[%s6493_s25 + $0x8a8] sm:$0xff] }
  0x59   : > { %442 = vst [vmem:[%s6501_s26 + $0x488] sm:$0xff] %v441_v17  ;;  %444 = vst [vmem:[%s6501_s26 + $0x490] sm:$0xff] %v443_v18  ;;  %v451_v22 = vld [vmem:[%s6493_s25 + $0x8b0] sm:$0xff]  ;;  %v453_v23 = vld [vmem:[%s6493_s25 + $0x8b8] sm:$0xff] }
  0x5a   : > { %446 = vst [vmem:[%s6501_s26 + $0x498] sm:$0xff] %v445_v19  ;;  %448 = vst [vmem:[%s6501_s26 + $0x4a0] sm:$0xff] %v447_v20  ;;  %v455_v24 = vld [vmem:[%s6493_s25 + $0x8c0] sm:$0xff]  ;;  %v457_v25 = vld [vmem:[%s6493_s25 + $0x8c8] sm:$0xff] }
  0x5b   : > { %450 = vst [vmem:[%s6501_s26 + $0x4a8] sm:$0xff] %v449_v21  ;;  %452 = vst [vmem:[%s6501_s26 + $0x4b0] sm:$0xff] %v451_v22  ;;  %v459_v26 = vld [vmem:[%s6493_s25 + $0x8d0] sm:$0xff]  ;;  %v461_v27 = vld [vmem:[%s6493_s25 + $0x8d8] sm:$0xff] }
  0x5c   : > { %454 = vst [vmem:[%s6501_s26 + $0x4b8] sm:$0xff] %v453_v23  ;;  %456 = vst [vmem:[%s6501_s26 + $0x4c0] sm:$0xff] %v455_v24  ;;  %v463_v28 = vld [vmem:[%s6493_s25 + $0x8e0] sm:$0xff]  ;;  %v465_v29 = vld [vmem:[%s6493_s25 + $0x8e8] sm:$0xff] }
  0x5d   : > { %458 = vst [vmem:[%s6501_s26 + $0x4c8] sm:$0xff] %v457_v25  ;;  %460 = vst [vmem:[%s6501_s26 + $0x4d0] sm:$0xff] %v459_v26  ;;  %v467_v30 = vld [vmem:[%s6493_s25 + $0x8f0] sm:$0xff]  ;;  %v469_v31 = vld [vmem:[%s6493_s25 + $0x8f8] sm:$0xff] }
  0x5e   : > { %462 = vst [vmem:[%s6501_s26 + $0x4d8] sm:$0xff] %v461_v27  ;;  %464 = vst [vmem:[%s6501_s26 + $0x4e0] sm:$0xff] %v463_v28  ;;  %v471_v32 = vld [vmem:[%s6493_s25 + $0x900] sm:$0xff]  ;;  %v473_v33 = vld [vmem:[%s6493_s25 + $0x908] sm:$0xff] }
  0x5f   : > { %466 = vst [vmem:[%s6501_s26 + $0x4e8] sm:$0xff] %v465_v29  ;;  %468 = vst [vmem:[%s6501_s26 + $0x4f0] sm:$0xff] %v467_v30  ;;  %v475_v34 = vld [vmem:[%s6493_s25 + $0x910] sm:$0xff]  ;;  %v477_v35 = vld [vmem:[%s6493_s25 + $0x918] sm:$0xff] }
  0x60   : > { %470 = vst [vmem:[%s6501_s26 + $0x4f8] sm:$0xff] %v469_v31  ;;  %472 = vst [vmem:[%s6501_s26 + $0x500] sm:$0xff] %v471_v32  ;;  %v479_v36 = vld [vmem:[%s6493_s25 + $0x920] sm:$0xff]  ;;  %v481_v37 = vld [vmem:[%s6493_s25 + $0x928] sm:$0xff] }
  0x61   : > { %474 = vst [vmem:[%s6501_s26 + $0x508] sm:$0xff] %v473_v33  ;;  %476 = vst [vmem:[%s6501_s26 + $0x510] sm:$0xff] %v475_v34  ;;  %v483_v38 = vld [vmem:[%s6493_s25 + $0x930] sm:$0xff]  ;;  %v485_v39 = vld [vmem:[%s6493_s25 + $0x938] sm:$0xff] }
  0x62   : > { %478 = vst [vmem:[%s6501_s26 + $0x518] sm:$0xff] %v477_v35  ;;  %480 = vst [vmem:[%s6501_s26 + $0x520] sm:$0xff] %v479_v36  ;;  %v487_v40 = vld [vmem:[%s6493_s25 + $0x940] sm:$0xff]  ;;  %v489_v41 = vld [vmem:[%s6493_s25 + $0x948] sm:$0xff] }
  0x63   : > { %482 = vst [vmem:[%s6501_s26 + $0x528] sm:$0xff] %v481_v37  ;;  %484 = vst [vmem:[%s6501_s26 + $0x530] sm:$0xff] %v483_v38  ;;  %v491_v42 = vld [vmem:[%s6493_s25 + $0x950] sm:$0xff]  ;;  %v493_v43 = vld [vmem:[%s6493_s25 + $0x958] sm:$0xff] }
  0x64   : > { %486 = vst [vmem:[%s6501_s26 + $0x538] sm:$0xff] %v485_v39  ;;  %488 = vst [vmem:[%s6501_s26 + $0x540] sm:$0xff] %v487_v40  ;;  %v495_v44 = vld [vmem:[%s6493_s25 + $0x960] sm:$0xff]  ;;  %v497_v45 = vld [vmem:[%s6493_s25 + $0x968] sm:$0xff] }
  0x65   : > { %490 = vst [vmem:[%s6501_s26 + $0x548] sm:$0xff] %v489_v41  ;;  %492 = vst [vmem:[%s6501_s26 + $0x550] sm:$0xff] %v491_v42  ;;  %v499_v46 = vld [vmem:[%s6493_s25 + $0x970] sm:$0xff]  ;;  %v501_v47 = vld [vmem:[%s6493_s25 + $0x978] sm:$0xff] }
  0x66   : > { %494 = vst [vmem:[%s6501_s26 + $0x558] sm:$0xff] %v493_v43  ;;  %496 = vst [vmem:[%s6501_s26 + $0x560] sm:$0xff] %v495_v44  ;;  %v503_v48 = vld [vmem:[%s6493_s25 + $0x980] sm:$0xff]  ;;  %v505_v49 = vld [vmem:[%s6493_s25 + $0x988] sm:$0xff] }
  0x67   : > { %498 = vst [vmem:[%s6501_s26 + $0x568] sm:$0xff] %v497_v45  ;;  %500 = vst [vmem:[%s6501_s26 + $0x570] sm:$0xff] %v499_v46  ;;  %v507_v50 = vld [vmem:[%s6493_s25 + $0x990] sm:$0xff]  ;;  %v509_v51 = vld [vmem:[%s6493_s25 + $0x998] sm:$0xff] }
  0x68   : > { %502 = vst [vmem:[%s6501_s26 + $0x578] sm:$0xff] %v501_v47  ;;  %504 = vst [vmem:[%s6501_s26 + $0x580] sm:$0xff] %v503_v48  ;;  %v511_v52 = vld [vmem:[%s6493_s25 + $0x9a0] sm:$0xff]  ;;  %v513_v53 = vld [vmem:[%s6493_s25 + $0x9a8] sm:$0xff] }
  0x69   : > { %506 = vst [vmem:[%s6501_s26 + $0x588] sm:$0xff] %v505_v49  ;;  %508 = vst [vmem:[%s6501_s26 + $0x590] sm:$0xff] %v507_v50  ;;  %v515_v54 = vld [vmem:[%s6493_s25 + $0x9b0] sm:$0xff]  ;;  %v517_v55 = vld [vmem:[%s6493_s25 + $0x9b8] sm:$0xff] }
  0x6a   : > { %510 = vst [vmem:[%s6501_s26 + $0x598] sm:$0xff] %v509_v51  ;;  %512 = vst [vmem:[%s6501_s26 + $0x5a0] sm:$0xff] %v511_v52  ;;  %v519_v56 = vld [vmem:[%s6493_s25 + $0x9c0] sm:$0xff]  ;;  %v521_v57 = vld [vmem:[%s6493_s25 + $0x9c8] sm:$0xff] }
  0x6b   : > { %514 = vst [vmem:[%s6501_s26 + $0x5a8] sm:$0xff] %v513_v53  ;;  %516 = vst [vmem:[%s6501_s26 + $0x5b0] sm:$0xff] %v515_v54  ;;  %v523_v58 = vld [vmem:[%s6493_s25 + $0x9d0] sm:$0xff]  ;;  %v525_v59 = vld [vmem:[%s6493_s25 + $0x9d8] sm:$0xff] }
  0x6c   : > { %518 = vst [vmem:[%s6501_s26 + $0x5b8] sm:$0xff] %v517_v55  ;;  %520 = vst [vmem:[%s6501_s26 + $0x5c0] sm:$0xff] %v519_v56  ;;  %v527_v60 = vld [vmem:[%s6493_s25 + $0x9e0] sm:$0xff]  ;;  %v529_v61 = vld [vmem:[%s6493_s25 + $0x9e8] sm:$0xff] }
  0x6d   : > { %522 = vst [vmem:[%s6501_s26 + $0x5c8] sm:$0xff] %v521_v57  ;;  %524 = vst [vmem:[%s6501_s26 + $0x5d0] sm:$0xff] %v523_v58  ;;  %v531_v62 = vld [vmem:[%s6493_s25 + $0x9f0] sm:$0xff]  ;;  %v533_v63 = vld [vmem:[%s6493_s25 + $0x9f8] sm:$0xff] }
  0x6e   : > { %526 = vst [vmem:[%s6501_s26 + $0x5d8] sm:$0xff] %v525_v59  ;;  %528 = vst [vmem:[%s6501_s26 + $0x5e0] sm:$0xff] %v527_v60 }
  0x6f   : > { %530 = vst [vmem:[%s6501_s26 + $0x5e8] sm:$0xff] %v529_v61  ;;  %532 = vst [vmem:[%s6501_s26 + $0x5f0] sm:$0xff] %v531_v62 }
  0x70   : > { %534 = vst [vmem:[%s6501_s26 + $0x5f8] sm:$0xff] %v533_v63 }
  0x71 PF: > { %p4450_p5 = scmp.ge.s32.totalorder %s6437_s14, 1  ;;  %p539_p6 = scmp.lt.s32.totalorder %s6437_s14, 3 }
  0x73   : > { %p540_p7 = pnand %p4450_p5, %p539_p6 }
  0x75   : > { %543 = sbr.rel (%p540_p7) target bundleno = 1477 (0x5c5), region = 51 }
  0x7a   : > { %v671_v0 = vld [vmem:[%s8965_s1 + $0xf0] sm:$0xff]  ;;  %v672_v1 = vld [vmem:[%s8965_s1 + $0xf8] sm:$0xff]  ;;  %v669_v5 = vld [vmem:[%s8965_s1 + $0xe0] sm:$0xff]  ;;  %s546_s17 = sand.u32 1, %s6429_s12   ;;  %vm2192_vm0 = vcmask 261120  }
  0x7b   : > { %v655_v2 = vld [vmem:[%s8965_s1 + $0x70] sm:$0xff]  ;;  %v720_v3 = vpack.c.bf16 %v672_v1, %v671_v0  ;;  %v656_v4 = vld [vmem:[%s8965_s1 + $0x78] sm:$0xff]  ;;  %v670_v6 = vld [vmem:[%s8965_s1 + $0xe8] sm:$0xff]  ;;  %s5974_s12 = smul.u32 1536, %s546_s17 }
  0x7c   : > { %v712_v7 = vpack.c.bf16 %v656_v4, %v655_v2  ;;  %v719_v8 = vpack.c.bf16 %v670_v6, %v669_v5  ;;  %v653_v9 = vld [vmem:[%s8965_s1 + $0x60] sm:$0xff]  ;;  %v654_v10 = vld [vmem:[%s8965_s1 + $0x68] sm:$0xff]  ;;  %v667_v11 = vld [vmem:[%s8965_s1 + $0xd0] sm:$0xff] }
  0x7d   : > { %5957 = vmatprep.subr.bf16.mxu1 %v720_v3  ;;  %v668_v12 = vld [vmem:[%s8965_s1 + $0xd8] sm:$0xff]  ;;  %5009 = vmatprep.subr.bf16.mxu0 %v720_v3  ;;  %v711_v13 = vpack.c.bf16 %v654_v10, %v653_v9  ;;  %v651_v15 = vld [vmem:[%s8965_s1 + $0x50] sm:$0xff]  ;;  %v665_v17 = vld [vmem:[%s8965_s1 + $0xc0] sm:$0xff]  ;;  %s6938_s22 = scalar_lea.vmem [#allocation2], %s5974_s12 }
  0x7e   : > { %5965 = vmatpush3.bf16.msra.mxu1 %v712_v7  ;;  %5010 = vmatpush3.bf16.msra.mxu0 %v712_v7  ;;  %v718_v14 = vpack.c.bf16 %v668_v12, %v667_v11  ;;  %v652_v16 = vld [vmem:[%s8965_s1 + $0x58] sm:$0xff]  ;;  %v666_v18 = vld [vmem:[%s8965_s1 + $0xc8] sm:$0xff]  ;;  %v649_v21 = vld [vmem:[%s8965_s1 + $0x40] sm:$0xff] }
  0x7f   : > { %5958 = vmatprep.subr.bf16.mxu1 %v719_v8  ;;  %5011 = vmatprep.subr.bf16.mxu0 %v719_v8  ;;  %v710_v19 = vpack.c.bf16 %v652_v16, %v651_v15  ;;  %v717_v20 = vpack.c.bf16 %v666_v18, %v665_v17  ;;  %v650_v22 = vld [vmem:[%s8965_s1 + $0x48] sm:$0xff]  ;;  %v663_v23 = vld [vmem:[%s8965_s1 + $0xb0] sm:$0xff]  ;;  %v664_v24 = vld [vmem:[%s8965_s1 + $0xb8] sm:$0xff] }
  0x80   : > { %v6001_v25 = vld [vmem:[%s6938_s22 + $0x184] ss:$16 sps:$4 sm:$0xff]   ;;  %v709_v26 = vpack.c.bf16 %v650_v22, %v649_v21  ;;  %v716_v27 = vpack.c.bf16 %v664_v24, %v663_v23  ;;  %v648_v29 = vld [vmem:[%s8965_s1 + $0x38] sm:$0xff]  ;;  %v662_v31 = vld [vmem:[%s8965_s1 + $0xa8] sm:$0xff] }
  0x81   : > { %v647_v28 = vld [vmem:[%s8965_s1 + $0x30] sm:$0xff]  ;;  %1185 = vmatprep.mubr.bf16.mxu1 %v6001_v25  ;;  %v661_v30 = vld [vmem:[%s8965_s1 + $0xa0] sm:$0xff]  ;;  %v646_v35 = vld [vmem:[%s8965_s1 + $0x28] sm:$0xff] }
  0x82   : > { %5966 = vmatpush3.bf16.msra.mxu1 %v711_v13  ;;  %5012 = vmatpush3.bf16.msra.mxu0 %v711_v13  ;;  %v708_v32 = vpack.c.bf16 %v648_v29, %v647_v28  ;;  %v715_v33 = vpack.c.bf16 %v662_v31, %v661_v30  ;;  %v645_v34 = vld [vmem:[%s8965_s1 + $0x20] sm:$0xff]  ;;  %v659_v36 = vld [vmem:[%s8965_s1 + $0x90] sm:$0xff]  ;;  %v660_v37 = vld [vmem:[%s8965_s1 + $0x98] sm:$0xff] }
  0x83   : > { %5959 = vmatprep.subr.bf16.mxu1 %v718_v14  ;;  %5013 = vmatprep.subr.bf16.mxu0 %v718_v14  ;;  %v707_v38 = vpack.c.bf16 %v646_v35, %v645_v34  ;;  %v714_v39 = vpack.c.bf16 %v660_v37, %v659_v36  ;;  %v643_v40 = vld [vmem:[%s8965_s1 + $0x10] sm:$0xff]  ;;  %v644_v41 = vld [vmem:[%s8965_s1 + $0x18] sm:$0xff]  ;;  %v657_v42 = vld [vmem:[%s8965_s1 + $0x80] sm:$0xff] }
  0x84   : > { %v658_v43 = vld [vmem:[%s8965_s1 + $0x88] sm:$0xff]  ;;  %v706_v44 = vpack.c.bf16 %v644_v41, %v643_v40  ;;  %v641_v46 = vld [vmem:[%s8965_s1] sm:$0xff]  ;;  %v703_v48 = vld [vmem:[%s8965_s1 + $0x1f0] sm:$0xff] }
  0x85   : > { %v713_v45 = vpack.c.bf16 %v658_v43, %v657_v42  ;;  %v642_v47 = vld [vmem:[%s8965_s1 + $0x8] sm:$0xff]  ;;  %v704_v49 = vld [vmem:[%s8965_s1 + $0x1f8] sm:$0xff]  ;;  %v6013_v50 = vld [vmem:[%s6938_s22 + $0x4] ss:$16 sps:$4 sm:$0xff]  }
  0x86   : > { %5967 = vmatpush3.bf16.msra.mxu1 %v710_v19  ;;  %5014 = vmatpush3.bf16.msra.mxu0 %v710_v19  ;;  %v705_v51 = vpack.c.bf16 %v642_v47, %v641_v46  ;;  %v5999_v52 = vld [vmem:[%s6938_s22 + $0x180] ss:$16 sps:$4 sm:$0xff]   ;;  %v736_v53 = vpack.c.bf16 %v704_v49, %v703_v48  ;;  %v688_v55 = vld [vmem:[%s8965_s1 + $0x178] sm:$0xff]  ;;  %v702_v57 = vld [vmem:[%s8965_s1 + $0x1e8] sm:$0xff] }
  0x87   : > { %5960 = vmatprep.subr.bf16.mxu1 %v717_v20  ;;  %5015 = vmatprep.subr.bf16.mxu0 %v717_v20  ;;  %v687_v54 = vld [vmem:[%s8965_s1 + $0x170] sm:$0xff]  ;;  %v701_v56 = vld [vmem:[%s8965_s1 + $0x1e0] sm:$0xff]  ;;  %v686_v59 = vld [vmem:[%s8965_s1 + $0x168] sm:$0xff] }
  0x88   : > { %1089 = vmatprep.mubr.bf16.mxu0 %v6013_v50  ;;  %v685_v58 = vld [vmem:[%s8965_s1 + $0x160] sm:$0xff]  ;;  %v728_v61 = vpack.c.bf16 %v688_v55, %v687_v54  ;;  %v699_v63 = vld [vmem:[%s8965_s1 + $0x1d0] sm:$0xff]  ;;  %v735_v0 = vpack.c.bf16 %v702_v57, %v701_v56  ;;  %v700_v2 = vld [vmem:[%s8965_s1 + $0x1d8] sm:$0xff] }
  0x89   : > { %v6011_v60 = vld [vmem:[%s6938_s22] ss:$16 sps:$4 sm:$0xff]   ;;  %v6002_v62 = vld [vmem:[%s6938_s22 + $0x1a4] ss:$16 sps:$4 sm:$0xff]   ;;  %v727_v3 = vpack.c.bf16 %v686_v59, %v685_v58  ;;  %v684_v5 = vld [vmem:[%s8965_s1 + $0x158] sm:$0xff]  ;;  %v734_v7 = vpack.c.bf16 %v700_v2, %v699_v63 }
  0x8a   : > { %5968 = vmatpush3.bf16.msra.mxu1 %v709_v26  ;;  %5016 = vmatpush3.bf16.msra.mxu0 %v709_v26  ;;  %v6017_v1 = vld [vmem:[%s6938_s22 + $0x24] ss:$16 sps:$4 sm:$0xff]   ;;  %v6004_v6 = vld [vmem:[%s6938_s22 + $0x1a0] ss:$16 sps:$4 sm:$0xff]   ;;  %v698_v9 = vld [vmem:[%s8965_s1 + $0x1c8] sm:$0xff] }
  0x8b   : > { %5961 = vmatprep.subr.bf16.mxu1 %v716_v27  ;;  %5017 = vmatprep.subr.bf16.mxu0 %v716_v27  ;;  %v683_v4 = vld [vmem:[%s8965_s1 + $0x150] sm:$0xff]  ;;  %v697_v8 = vld [vmem:[%s8965_s1 + $0x1c0] sm:$0xff]  ;;  %v682_v11 = vld [vmem:[%s8965_s1 + $0x148] sm:$0xff] }
  0x8c   : > { %v681_v10 = vld [vmem:[%s8965_s1 + $0x140] sm:$0xff]  ;;  %v726_v13 = vpack.c.bf16 %v684_v5, %v683_v4  ;;  %v733_v15 = vpack.c.bf16 %v698_v9, %v697_v8  ;;  %v695_v17 = vld [vmem:[%s8965_s1 + $0x1b0] sm:$0xff]  ;;  %v696_v18 = vld [vmem:[%s8965_s1 + $0x1b8] sm:$0xff] }
  0x8d   : > { %v6021_v12 = vld [vmem:[%s6938_s22 + $0x20] ss:$16 sps:$4 sm:$0xff]   ;;  %v6005_v14 = vld [vmem:[%s6938_s22 + $0x1c4] ss:$16 sps:$4 sm:$0xff]   ;;  %v4612_v21 = vld [vmem:[%s8965_s1 + $0x2f8] sm:$0xff]  ;;  %v725_v22 = vpack.c.bf16 %v682_v11, %v681_v10  ;;  %v732_v28 = vpack.c.bf16 %v696_v18, %v695_v17 }
  0x8e   : > { %5969 = vmatpush3.bf16.msra.mxu1 %v708_v32  ;;  %5018 = vmatpush3.bf16.msra.mxu0 %v708_v32  ;;  %v6023_v16 = vld [vmem:[%s6938_s22 + $0x44] ss:$16 sps:$4 sm:$0xff]   ;;  %v680_v23 = vld [vmem:[%s8965_s1 + $0x138] sm:$0xff]  ;;  %v6007_v27 = vld [vmem:[%s6938_s22 + $0x1c0] ss:$16 sps:$4 sm:$0xff]  }
  0x8f   : > { %5962 = vmatprep.subr.bf16.mxu1 %v715_v33  ;;  %5019 = vmatprep.subr.bf16.mxu0 %v715_v33  ;;  %v4611_v19 = vld [vmem:[%s8965_s1 + $0x2f0] sm:$0xff]  ;;  %v4596_v26 = vld [vmem:[%s8965_s1 + $0x278] sm:$0xff]  ;;  %v693_v29 = vld [vmem:[%s8965_s1 + $0x1a0] sm:$0xff] }
  0x90   : > { %v679_v20 = vld [vmem:[%s8965_s1 + $0x130] sm:$0xff]  ;;  %v1528_v24 = vpack.c.bf16 %v4612_v21, %v4611_v19  ;;  %v694_v31 = vld [vmem:[%s8965_s1 + $0x1a8] sm:$0xff]  ;;  %v677_v32 = vld [vmem:[%s8965_s1 + $0x120] sm:$0xff] }
  0x91   : > { %v4595_v25 = vld [vmem:[%s8965_s1 + $0x270] sm:$0xff]  ;;  %v678_v33 = vld [vmem:[%s8965_s1 + $0x128] sm:$0xff]  ;;  %v724_v37 = vpack.c.bf16 %v680_v23, %v679_v20  ;;  %v4593_v41 = vld [vmem:[%s8965_s1 + $0x260] sm:$0xff]  ;;  %v731_v42 = vpack.c.bf16 %v694_v31, %v693_v29 }
  0x92   : > { %5970 = vmatpush3.bf16.msra.mxu1 %v707_v38  ;;  %5020 = vmatpush3.bf16.msra.mxu0 %v707_v38  ;;  %v1520_v30 = vpack.c.bf16 %v4596_v26, %v4595_v25  ;;  %v6008_v34 = vld [vmem:[%s6938_s22 + $0x1e4] ss:$16 sps:$4 sm:$0xff]   ;;  %v6027_v35 = vld [vmem:[%s6938_s22 + $0x40] ss:$16 sps:$4 sm:$0xff]   ;;  %v4610_v40 = vld [vmem:[%s8965_s1 + $0x2e8] sm:$0xff]  ;;  %v723_v47 = vpack.c.bf16 %v678_v33, %v677_v32 }
  0x93   : > { %5963 = vmatprep.subr.bf16.mxu1 %v714_v39  ;;  %5021 = vmatprep.subr.bf16.mxu0 %v714_v39  ;;  %v6029_v36 = vld [vmem:[%s6938_s22 + $0x64] ss:$16 sps:$4 sm:$0xff]   ;;  %v4594_v43 = vld [vmem:[%s8965_s1 + $0x268] sm:$0xff]  ;;  %v676_v49 = vld [vmem:[%s8965_s1 + $0x118] sm:$0xff] }
  0x94   : > { %v691_v38 = vld [vmem:[%s8965_s1 + $0x190] sm:$0xff]  ;;  %v4609_v39 = vld [vmem:[%s8965_s1 + $0x2e0] sm:$0xff]  ;;  %v1519_v46 = vpack.c.bf16 %v4594_v43, %v4593_v41  ;;  %v674_v55 = vld [vmem:[%s8965_s1 + $0x108] sm:$0xff] }
  0x95   : > { %v675_v48 = vld [vmem:[%s8965_s1 + $0x110] sm:$0xff]  ;;  %v673_v54 = vld [vmem:[%s8965_s1 + $0x100] sm:$0xff]  ;;  %v6016_v56 = vld [vmem:[%s6938_s22 + $0xc] ss:$16 sps:$4 sm:$0xff]  }
  0x96   : > { %5971 = vmatpush3.bf16.msra.mxu1 %v706_v44  ;;  %5022 = vmatpush3.bf16.msra.mxu0 %v706_v44  ;;  %v692_v44 = vld [vmem:[%s8965_s1 + $0x198] sm:$0xff]  ;;  %v6010_v50 = vld [vmem:[%s6938_s22 + $0x1e0] ss:$16 sps:$4 sm:$0xff]   ;;  %v6035_v58 = vld [vmem:[%s6938_s22 + $0x84] ss:$16 sps:$4 sm:$0xff]   ;;  %v722_v59 = vpack.c.bf16 %v676_v49, %v675_v48  ;;  %v721_v5 = vpack.c.bf16 %v674_v55, %v673_v54 }
  0x97   : > { %5964 = vmatprep.subr.bf16.mxu1 %v713_v45  ;;  %5023 = vmatprep.subr.bf16.mxu0 %v713_v45  ;;  %v1527_v45 = vpack.c.bf16 %v4610_v40, %v4609_v39  ;;  %v6033_v57 = vld [vmem:[%s6938_s22 + $0x60] ss:$16 sps:$4 sm:$0xff]   ;;  %v4644_v2 = vld [vmem:[%s8965_s1 + $0x3f8] sm:$0xff]  ;;  %v4642_v11 = vld [vmem:[%s8965_s1 + $0x3e8] sm:$0xff] }
  0x98   : > { %v4591_v63 = vld [vmem:[%s8965_s1 + $0x250] sm:$0xff]  ;;  %v4641_v8 = vld [vmem:[%s8965_s1 + $0x3e0] sm:$0xff]  ;;  %v6014_v9 = vld [vmem:[%s6938_s22 + $0x8] ss:$16 sps:$4 sm:$0xff]  }
  0x99   : > { %v4589_v17 = vld [vmem:[%s8965_s1 + $0x240] sm:$0xff]  ;;  %v4590_v19 = vld [vmem:[%s8965_s1 + $0x248] sm:$0xff]  ;;  %v1543_v23 = vpack.c.bf16 %v4642_v11, %v4641_v8  ;;  %v4640_v25 = vld [vmem:[%s8965_s1 + $0x3d8] sm:$0xff] }
  0x9a   : > { %5972 = vmatpush3.bf16.msra.mxu1 %v705_v51  ;;  %5024 = vmatpush3.bf16.msra.mxu0 %v705_v51  ;;  %v730_v51 = vpack.c.bf16 %v692_v44, %v691_v38  ;;  %v4625_v18 = vld [vmem:[%s8965_s1 + $0x360] sm:$0xff]  ;;  %v4626_v21 = vld [vmem:[%s8965_s1 + $0x368] sm:$0xff]  ;;  %v1517_v26 = vpack.c.bf16 %v4590_v19, %v4589_v17  ;;  %v4624_v29 = vld [vmem:[%s8965_s1 + $0x358] sm:$0xff] }
  0x9b   : > { %5121 = vmatprep.subr.bf16.mxu1 %v736_v53  ;;  %5233 = vmatprep.subr.bf16.mxu0 %v1528_v24  ;;  %v690_v53 = vld [vmem:[%s8965_s1 + $0x188] sm:$0xff]  ;;  %v6041_v24 = vld [vmem:[%s6938_s22 + $0xa4] ss:$16 sps:$4 sm:$0xff]   ;;  %v4604_v31 = vld [vmem:[%s8965_s1 + $0x2b8] sm:$0xff] }
  0x9c   : > { %v6022_v32 = vld [vmem:[%s6938_s22 + $0x28] ss:$16 sps:$4 sm:$0xff]   ;;  %v6025_v38 = vld [vmem:[%s6938_s22 + $0x4c] ss:$16 sps:$4 sm:$0xff]   ;;  %v4637_v39 = vld [vmem:[%s8965_s1 + $0x3c0] sm:$0xff] }
  0x9d   : > { %1186 = vmatmul.mubr.bf16.vlgmr.msra.gmra.mxu1 %v5999_v52  ;;  %1090 = vmatmul.mubr.bf16.vlgmr.msra.gmra.mxu0 %v6011_v60  ;;  %v689_v52 = vld [vmem:[%s8965_s1 + $0x180] sm:$0xff]  ;;  %v4643_v60 = vld [vmem:[%s8965_s1 + $0x3f0] sm:$0xff]  ;;  %v4638_v40 = vld [vmem:[%s8965_s1 + $0x3c8] sm:$0xff] }
  0x9e   : > { %5122 = vmatpush3.bf16.msra.mxu1 %v728_v61  ;;  %1193 = vmatprep.mubr.bf16.mxu1 %v6002_v62  ;;  %v4607_v61 = vld [vmem:[%s8965_s1 + $0x2d0] sm:$0xff]  ;;  %v4608_v62 = vld [vmem:[%s8965_s1 + $0x2d8] sm:$0xff]  ;;  %v1544_v10 = vpack.c.bf16 %v4644_v2, %v4643_v60  ;;  %v4621_v43 = vld [vmem:[%s8965_s1 + $0x340] sm:$0xff] }
  0x9f   : > { %5123 = vmatprep.subr.bf16.mxu1 %v735_v0  ;;  %1097 = vmatprep.mubr.bf16.mxu0 %v6017_v1  ;;  %v729_v0 = vpack.c.bf16 %v690_v53, %v689_v52  ;;  %v4592_v1 = vld [vmem:[%s8965_s1 + $0x258] sm:$0xff]  ;;  %v4601_v49 = vld [vmem:[%s8965_s1 + $0x2a0] sm:$0xff]  ;;  %v4586_v53 = vld [vmem:[%s8965_s1 + $0x228] sm:$0xff] }
  0xa0   : > { %5234 = vmatpush3.bf16.msra.mxu0 %v1520_v30  ;;  %v1518_v4 = vpack.c.bf16 %v4592_v1, %v4591_v63  ;;  %v4603_v30 = vld [vmem:[%s8965_s1 + $0x2b0] sm:$0xff]  ;;  %v4636_v48 = vld [vmem:[%s8965_s1 + $0x3b8] sm:$0xff]  ;;  %v4585_v52 = vld [vmem:[%s8965_s1 + $0x220] sm:$0xff] }
  0xa1   : > { %5235 = vmatprep.subr.bf16.mxu0 %v1527_v45  ;;  %v4622_v45 = vld [vmem:[%s8965_s1 + $0x348] sm:$0xff]  ;;  %v1515_v54 = vpack.c.bf16 %v4586_v53, %v4585_v52  ;;  %v4620_v60 = vld [vmem:[%s8965_s1 + $0x338] sm:$0xff]  ;;  %v4583_v2 = vld [vmem:[%s8965_s1 + $0x210] sm:$0xff] }
  0xa2   : > { %5124 = vmatpush3.bf16.msra.mxu1 %v727_v3  ;;  %v1526_v3 = vpack.c.bf16 %v4608_v62, %v4607_v61  ;;  %v1533_v55 = vpack.c.bf16 %v4622_v45, %v4621_v43  ;;  %v6031_v61 = vld [vmem:[%s6938_s22 + $0x6c] ss:$16 sps:$4 sm:$0xff]   ;;  %v4633_v62 = vld [vmem:[%s8965_s1 + $0x3a0] sm:$0xff]  ;;  %v4631_v11 = vld [vmem:[%s8965_s1 + $0x390] sm:$0xff] }
  0xa3   : > { %5125 = vmatprep.subr.bf16.mxu1 %v734_v7  ;;  %v4628_v7 = vld [vmem:[%s8965_s1 + $0x378] sm:$0xff]  ;;  %v4634_v63 = vld [vmem:[%s8965_s1 + $0x3a8] sm:$0xff]  ;;  %v6057_v19 = vld [vmem:[%s6938_s22 + $0xe0] ss:$16 sps:$4 sm:$0xff]  }
  0xa4   : > { %5236 = vmatpush3.bf16.msra.mxu0 %v1519_v46  ;;  %v4635_v46 = vld [vmem:[%s8965_s1 + $0x3b0] sm:$0xff]  ;;  %v4600_v1 = vld [vmem:[%s8965_s1 + $0x298] sm:$0xff]  ;;  %v4618_v8 = vld [vmem:[%s8965_s1 + $0x328] sm:$0xff] }
  0xa5   : > { %1194 = vmatmul.mubr.bf16.gmra.mxu1 %v6004_v6  ;;  %1098 = vmatmul.mubr.bf16.gmra.mxu0 %v6021_v12  ;;  %v4627_v6 = vld [vmem:[%s8965_s1 + $0x370] sm:$0xff]  ;;  %v4605_v12 = vld [vmem:[%s8965_s1 + $0x2c0] sm:$0xff]  ;;  %v6067_v52 = vld [vmem:[%s6938_s22 + $0x12c] ss:$16 sps:$4 sm:$0xff]  }
  0xa6   : > { %5126 = vmatpush3.bf16.msra.mxu1 %v726_v13  ;;  %1201 = vmatprep.mubr.bf16.mxu1 %v6005_v14  ;;  %v4606_v13 = vld [vmem:[%s8965_s1 + $0x2c8] sm:$0xff]  ;;  %v1536_v20 = vpack.c.bf16 %v4628_v7, %v4627_v6  ;;  %v4617_v7 = vld [vmem:[%s8965_s1 + $0x320] sm:$0xff] }
  0xa7   : > { %5127 = vmatprep.subr.bf16.mxu1 %v733_v15  ;;  %1105 = vmatprep.mubr.bf16.mxu0 %v6023_v16  ;;  %v6019_v14 = vld [vmem:[%s6938_s22 + $0x2c] ss:$16 sps:$4 sm:$0xff]   ;;  %v6039_v15 = vld [vmem:[%s6938_s22 + $0x80] ss:$16 sps:$4 sm:$0xff]   ;;  %v1525_v16 = vpack.c.bf16 %v4606_v13, %v4605_v12  ;;  %v6077_v45 = vld [vmem:[%s6938_s22 + $0x164] ss:$16 sps:$4 sm:$0xff]  }
  0xa8   : > { %5237 = vmatprep.subr.bf16.mxu0 %v1526_v3  ;;  %v4584_v3 = vld [vmem:[%s8965_s1 + $0x218] sm:$0xff]  ;;  %v4597_v13 = vld [vmem:[%s8965_s1 + $0x280] sm:$0xff] }
  0xa9   : > { %5238 = vmatpush3.bf16.msra.mxu0 %v1518_v4  ;;  %v6053_v4 = vld [vmem:[%s6938_s22 + $0xe4] ss:$16 sps:$4 sm:$0xff]   ;;  %v4632_v12 = vld [vmem:[%s8965_s1 + $0x398] sm:$0xff]  ;;  %v6075_v43 = vld [vmem:[%s6938_s22 + $0x140] ss:$16 sps:$4 sm:$0xff]  }
  0xaa   : > { %5128 = vmatpush3.bf16.msra.mxu1 %v725_v22  ;;  %v4639_v22 = vld [vmem:[%s8965_s1 + $0x3d0] sm:$0xff]  ;;  %5239 = vmatprep.subr.bf16.mxu0 %v1525_v16  ;;  %v4582_v16 = vld [vmem:[%s8965_s1 + $0x208] sm:$0xff] }
  0xab   : > { %5129 = vmatprep.subr.bf16.mxu1 %v732_v28  ;;  %v1535_v28 = vpack.c.bf16 %v4626_v21, %v4625_v18  ;;  %v1542_v33 = vpack.c.bf16 %v4640_v25, %v4639_v22  ;;  %v6034_v18 = vld [vmem:[%s6938_s22 + $0x68] ss:$16 sps:$4 sm:$0xff]   ;;  %v6037_v22 = vld [vmem:[%s6938_s22 + $0x8c] ss:$16 sps:$4 sm:$0xff]   ;;  %v6101_v53 = vld [vmem:[%s6938_s22 + $0x224] ss:$16 sps:$4 sm:$0xff]  }
  0xac   : > { %v4616_v25 = vld [vmem:[%s8965_s1 + $0x318] sm:$0xff] }
  0xad   : > { %1202 = vmatmul.mubr.bf16.gmra.mxu1 %v6007_v27  ;;  %1106 = vmatmul.mubr.bf16.gmra.mxu0 %v6027_v35  ;;  %v4623_v27 = vld [vmem:[%s8965_s1 + $0x350] sm:$0xff]  ;;  %v1524_v35 = vpack.c.bf16 %v4604_v31, %v4603_v30  ;;  %v4613_v31 = vld [vmem:[%s8965_s1 + $0x300] sm:$0xff] }
  0xae   : > { %5130 = vmatpush3.bf16.msra.mxu1 %v724_v37  ;;  %1209 = vmatprep.mubr.bf16.mxu1 %v6008_v34  ;;  %v6045_v34 = vld [vmem:[%s6938_s22 + $0xa0] ss:$16 sps:$4 sm:$0xff]   ;;  %v4588_v37 = vld [vmem:[%s8965_s1 + $0x238] sm:$0xff]  ;;  %v1534_v44 = vpack.c.bf16 %v4624_v29, %v4623_v27  ;;  %v4630_v27 = vld [vmem:[%s8965_s1 + $0x388] sm:$0xff] }
  0xaf   : > { %5131 = vmatprep.subr.bf16.mxu1 %v731_v42  ;;  %1113 = vmatprep.mubr.bf16.mxu0 %v6029_v36  ;;  %v4587_v36 = vld [vmem:[%s8965_s1 + $0x230] sm:$0xff] }
  0xb0   : > { %5240 = vmatpush3.bf16.msra.mxu0 %v1517_v26  ;;  %v1516_v41 = vpack.c.bf16 %v4588_v37, %v4587_v36  ;;  %v6047_v42 = vld [vmem:[%s6938_s22 + $0xc4] ss:$16 sps:$4 sm:$0xff]   ;;  %v6063_v36 = vld [vmem:[%s6938_s22 + $0x100] ss:$16 sps:$4 sm:$0xff]  }
  0xb1   : > { %5241 = vmatprep.subr.bf16.mxu0 %v1524_v35  ;;  %v4629_v26 = vld [vmem:[%s8965_s1 + $0x380] sm:$0xff]  ;;  %v6043_v35 = vld [vmem:[%s6938_s22 + $0xac] ss:$16 sps:$4 sm:$0xff]  }
  0xb2   : > { %5132 = vmatpush3.bf16.msra.mxu1 %v723_v47  ;;  %v1541_v47 = vpack.c.bf16 %v4638_v40, %v4637_v39  ;;  %v1537_v30 = vpack.c.bf16 %v4630_v27, %v4629_v26  ;;  %v6065_v37 = vld [vmem:[%s6938_s22 + $0x124] ss:$16 sps:$4 sm:$0xff]   ;;  %v6069_v39 = vld [vmem:[%s6938_s22 + $0x120] ss:$16 sps:$4 sm:$0xff]   ;;  %v6049_v40 = vld [vmem:[%s6938_s22 + $0xcc] ss:$16 sps:$4 sm:$0xff]  }
  0xb3   : > { %5133 = vmatprep.subr.bf16.mxu1 %v730_v51  ;;  %v6151_v26 = vld [vmem:[%s6938_s22 + $0x320] ss:$16 sps:$4 sm:$0xff]  }
  0xb4   : > { %5242 = vmatpush3.bf16.msra.mxu0 %v1516_v41  ;;  %v6071_v41 = vld [vmem:[%s6938_s22 + $0x144] ss:$16 sps:$4 sm:$0xff]  }
  0xb5   : > { %1210 = vmatmul.mubr.bf16.gmra.mxu1 %v6010_v50  ;;  %1114 = vmatmul.mubr.bf16.gmra.mxu0 %v6033_v57  ;;  %v4602_v50 = vld [vmem:[%s8965_s1 + $0x2a8] sm:$0xff]  ;;  %v1379_v27 = vld [vmem:[%s8966_s2] sm:$0xff] }
  0xb6   : > { %5134 = vmatpush3.bf16.msra.mxu1 %v722_v59  ;;  %1250 = vmatprep.mubr.bf16.mxu1 %v6016_v56  ;;  %v1523_v51 = vpack.c.bf16 %v4602_v50, %v4601_v49  ;;  %v4619_v56 = vld [vmem:[%s8965_s1 + $0x330] sm:$0xff]  ;;  %v6028_v57 = vld [vmem:[%s6938_s22 + $0x48] ss:$16 sps:$4 sm:$0xff]   ;;  %v1540_v59 = vpack.c.bf16 %v4636_v48, %v4635_v46  ;;  %v6061_v48 = vld [vmem:[%s6938_s22 + $0x10c] ss:$16 sps:$4 sm:$0xff]  }
  0xb7   : > { %5135 = vmatprep.subr.bf16.mxu1 %v729_v0  ;;  %1121 = vmatprep.mubr.bf16.mxu0 %v6035_v58  ;;  %v6051_v58 = vld [vmem:[%s6938_s22 + $0xc0] ss:$16 sps:$4 sm:$0xff]   ;;  %v1532_v6 = vpack.c.bf16 %v4620_v60, %v4619_v56  ;;  %v6058_v46 = vld [vmem:[%s6938_s22 + $0xe8] ss:$16 sps:$4 sm:$0xff]   ;;  %v6097_v49 = vld [vmem:[%s6938_s22 + $0x204] ss:$16 sps:$4 sm:$0xff]  }
  0xb8   : > { %5243 = vmatprep.subr.bf16.mxu0 %v1523_v51  ;;  %v4599_v0 = vld [vmem:[%s8965_s1 + $0x290] sm:$0xff]  ;;  %v6064_v50 = vld [vmem:[%s6938_s22 + $0x108] ss:$16 sps:$4 sm:$0xff]   ;;  %v6073_v56 = vld [vmem:[%s6938_s22 + $0x14c] ss:$16 sps:$4 sm:$0xff]  }
  0xb9   : > { %5244 = vmatpush3.bf16.msra.mxu0 %v1515_v54  ;;  %v6095_v51 = vld [vmem:[%s6938_s22 + $0x200] ss:$16 sps:$4 sm:$0xff]   ;;  %v6070_v54 = vld [vmem:[%s6938_s22 + $0x128] ss:$16 sps:$4 sm:$0xff]   ;;  %v6079_v60 = vld [vmem:[%s6938_s22 + $0x16c] ss:$16 sps:$4 sm:$0xff]  }
  0xba   : > { %5136 = vmatpush3.bf16.msra.mxu1 %v721_v5  ;;  %v1522_v5 = vpack.c.bf16 %v4600_v1, %v4599_v0  ;;  %v6083_v0 = vld [vmem:[%s6938_s22 + $0x18c] ss:$16 sps:$4 sm:$0xff]   ;;  %v6119_v1 = vld [vmem:[%s6938_s22 + $0x284] ss:$16 sps:$4 sm:$0xff]  }
  0xbb   : > { %5345 = vmatprep.subr.bf16.mxu1 %v1544_v10  ;;  %v1539_v10 = vpack.c.bf16 %v4634_v63, %v4633_v62  ;;  %v6082_v62 = vld [vmem:[%s6938_s22 + $0x168] ss:$16 sps:$4 sm:$0xff]   ;;  %v6115_v63 = vld [vmem:[%s6938_s22 + $0x260] ss:$16 sps:$4 sm:$0xff]  }
  0xbc   : > { %5245 = vmatprep.subr.bf16.mxu0 %v1522_v5  ;;  %v6125_v5 = vld [vmem:[%s6938_s22 + $0x2a4] ss:$16 sps:$4 sm:$0xff]  }
  0xbd   : > { %1251 = vmatmul.mubr.bf16.vlgmr.msra.gmra.mxu1 %v6014_v9  ;;  %1122 = vmatmul.mubr.bf16.gmra.mxu0 %v6039_v15  ;;  %v1514_v9 = vpack.c.bf16 %v4584_v3, %v4583_v2  ;;  %v4581_v15 = vld [vmem:[%s8965_s1 + $0x200] sm:$0xff]  ;;  %v6085_v2 = vld [vmem:[%s6938_s22 + $0x188] ss:$16 sps:$4 sm:$0xff]  }
  0xbe   : > { %5346 = vmatpush3.bf16.msra.mxu1 %v1536_v20  ;;  %1258 = vmatprep.mubr.bf16.mxu1 %v6019_v14  ;;  %v4598_v14 = vld [vmem:[%s8965_s1 + $0x288] sm:$0xff]  ;;  %v1531_v20 = vpack.c.bf16 %v4618_v8, %v4617_v7  ;;  %v1513_v21 = vpack.c.bf16 %v4582_v16, %v4581_v15  ;;  %v6121_v3 = vld [vmem:[%s6938_s22 + $0x280] ss:$16 sps:$4 sm:$0xff]  }
  0xbf   : > { %5347 = vmatprep.subr.bf16.mxu1 %v1543_v23  ;;  %1129 = vmatprep.mubr.bf16.mxu0 %v6041_v24  ;;  %v1521_v17 = vpack.c.bf16 %v4598_v14, %v4597_v13  ;;  %v1538_v23 = vpack.c.bf16 %v4632_v12, %v4631_v11  ;;  %v4615_v24 = vld [vmem:[%s8965_s1 + $0x310] sm:$0xff]  ;;  %v6089_v8 = vld [vmem:[%s6938_s22 + $0x1cc] ss:$16 sps:$4 sm:$0xff]   ;;  %v6094_v14 = vld [vmem:[%s6938_s22 + $0x1e8] ss:$16 sps:$4 sm:$0xff]  }
  0xc0   : > { %5246 = vmatpush3.bf16.msra.mxu0 %v1514_v9  ;;  %v1530_v29 = vpack.c.bf16 %v4616_v25, %v4615_v24  ;;  %v6127_v7 = vld [vmem:[%s6938_s22 + $0x2a0] ss:$16 sps:$4 sm:$0xff]   ;;  %v6131_v9 = vld [vmem:[%s6938_s22 + $0x2c4] ss:$16 sps:$4 sm:$0xff]   ;;  %v6092_v12 = vld [vmem:[%s6938_s22 + $0x1ec] ss:$16 sps:$4 sm:$0xff]  }
  0xc1   : > { %5247 = vmatprep.subr.bf16.mxu0 %v1521_v17  ;;  %v6133_v11 = vld [vmem:[%s6938_s22 + $0x2c0] ss:$16 sps:$4 sm:$0xff]   ;;  %v6137_v13 = vld [vmem:[%s6938_s22 + $0x2e4] ss:$16 sps:$4 sm:$0xff]   ;;  %v6100_v16 = vld [vmem:[%s6938_s22 + $0x20c] ss:$16 sps:$4 sm:$0xff]  }
  0xc2   : > { %5348 = vmatpush3.bf16.msra.mxu1 %v1535_v28  ;;  %v6059_v28 = vld [vmem:[%s6938_s22 + $0x104] ss:$16 sps:$4 sm:$0xff]   ;;  %v6139_v15 = vld [vmem:[%s6938_s22 + $0x2e0] ss:$16 sps:$4 sm:$0xff]   ;;  %v1380_v24 = vld [vmem:[%s8966_s2 + $0x8] sm:$0xff] }
  0xc3   : > { %5349 = vmatprep.subr.bf16.mxu1 %v1542_v33  ;;  %v6143_v17 = vld [vmem:[%s6938_s22 + $0x304] ss:$16 sps:$4 sm:$0xff]   ;;  %v6106_v25 = vld [vmem:[%s6938_s22 + $0x228] ss:$16 sps:$4 sm:$0xff]  }
  0xc4   : > { %5248 = vmatpush3.bf16.msra.mxu0 %v1513_v21  ;;  %v6104_v21 = vld [vmem:[%s6938_s22 + $0x22c] ss:$16 sps:$4 sm:$0xff]  }
  0xc5   : > { %1259 = vmatmul.mubr.bf16.gmra.mxu1 %v6022_v32  ;;  %1130 = vmatmul.mubr.bf16.gmra.mxu0 %v6045_v34  ;;  %v4614_v32 = vld [vmem:[%s8965_s1 + $0x308] sm:$0xff] }
  0xc6   : > { %1266 = vmatprep.mubr.bf16.mxu1 %v6025_v38  ;;  %5350 = vmatpush3.bf16.msra.mxu1 %v1534_v44  ;;  %v1529_v33 = vpack.c.bf16 %v4614_v32, %v4613_v31  ;;  %v6040_v34 = vld [vmem:[%s6938_s22 + $0x88] ss:$16 sps:$4 sm:$0xff]   ;;  %v6055_v44 = vld [vmem:[%s6938_s22 + $0xec] ss:$16 sps:$4 sm:$0xff]   ;;  %v6157_v32 = vld [vmem:[%s6938_s22 + $0x340] ss:$16 sps:$4 sm:$0xff]  }
  0xc7   : > { %1137 = vmatprep.mubr.bf16.mxu0 %v6047_v42  ;;  %5351 = vmatprep.subr.bf16.mxu1 %v1541_v47  ;;  %v6046_v38 = vld [vmem:[%s6938_s22 + $0xa8] ss:$16 sps:$4 sm:$0xff]   ;;  %v6081_v47 = vld [vmem:[%s6938_s22 + $0x160] ss:$16 sps:$4 sm:$0xff]  }
  0xc8   : > { %v6052_v42 = vld [vmem:[%s6938_s22 + $0xc8] ss:$16 sps:$4 sm:$0xff]  }
  0xc9   : > { %v6112_v31 = vld [vmem:[%s6938_s22 + $0x248] ss:$16 sps:$4 sm:$0xff]  }
  0xca   : > { %5352 = vmatpush3.bf16.msra.mxu1 %v1533_v55  ;;  %v6103_v55 = vld [vmem:[%s6938_s22 + $0x220] ss:$16 sps:$4 sm:$0xff]  }
  0xcb   : > { %5353 = vmatprep.subr.bf16.mxu1 %v1540_v59  ;;  %v6109_v59 = vld [vmem:[%s6938_s22 + $0x240] ss:$16 sps:$4 sm:$0xff]  }
  0xcd   : > { %1267 = vmatmul.mubr.bf16.gmra.mxu1 %v6028_v57  ;;  %1138 = vmatmul.mubr.bf16.gmra.mxu0 %v6051_v58  ;;  %v6107_v57 = vld [vmem:[%s6938_s22 + $0x244] ss:$16 sps:$4 sm:$0xff]   ;;  %v6076_v58 = vld [vmem:[%s6938_s22 + $0x148] ss:$16 sps:$4 sm:$0xff]  }
  0xce   : > { %1274 = vmatprep.mubr.bf16.mxu1 %v6031_v61  ;;  %1145 = vmatprep.mubr.bf16.mxu0 %v6053_v4  ;;  %v6113_v61 = vld [vmem:[%s6938_s22 + $0x264] ss:$16 sps:$4 sm:$0xff]   ;;  %v6086_v4 = vld [vmem:[%s6938_s22 + $0x1ac] ss:$16 sps:$4 sm:$0xff]  }
  0xcf   : > { %5354 = vmatpush3.bf16.msra.mxu1 %v1532_v6  ;;  %v6088_v6 = vld [vmem:[%s6938_s22 + $0x1a8] ss:$16 sps:$4 sm:$0xff]  }
  0xd0   : > { %5355 = vmatprep.subr.bf16.mxu1 %v1539_v10  ;;  %v6091_v10 = vld [vmem:[%s6938_s22 + $0x1c8] ss:$16 sps:$4 sm:$0xff]  }
  0xd3   : > { %5356 = vmatpush3.bf16.msra.mxu1 %v1531_v20  ;;  %v6145_v20 = vld [vmem:[%s6938_s22 + $0x300] ss:$16 sps:$4 sm:$0xff]  }
  0xd4   : > { %5357 = vmatprep.subr.bf16.mxu1 %v1538_v23  ;;  %v1381_v23 = vld [vmem:[%s8966_s2 + $0x10] sm:$0xff] }
  0xd5   : > { %1275 = vmatmul.mubr.bf16.gmra.mxu1 %v6034_v18  ;;  %1146 = vmatmul.mubr.bf16.gmra.mxu0 %v6057_v19  ;;  %v1382_v18 = vld [vmem:[%s8966_s2 + $0x18] sm:$0xff] }
  0xd6   : > { %1282 = vmatprep.mubr.bf16.mxu1 %v6037_v22  ;;  %1153 = vmatprep.mubr.bf16.mxu0 %v6059_v28  ;;  %v6098_v19 = vld [vmem:[%s6938_s22 + $0x208] ss:$16 sps:$4 sm:$0xff]   ;;  %v6149_v22 = vld [vmem:[%s6938_s22 + $0x324] ss:$16 sps:$4 sm:$0xff]   ;;  %v6110_v28 = vld [vmem:[%s6938_s22 + $0x24c] ss:$16 sps:$4 sm:$0xff]  }
  0xd7   : > { %5358 = vmatpush3.bf16.msra.mxu1 %v1530_v29  ;;  %v6155_v29 = vld [vmem:[%s6938_s22 + $0x344] ss:$16 sps:$4 sm:$0xff]  }
  0xd8   : > { %5359 = vmatprep.subr.bf16.mxu1 %v1537_v30  ;;  %v4712_v30 = vld [vmem:[%s8966_s2 + $0x38] sm:$0xff] }
  0xd9   : > { %5789 = vmatprep.subr.mxu0 %v4712_v30 }
  0xdb   : > { %5360 = vmatpush3.bf16.msra.mxu1 %v1529_v33  ;;  %v6116_v33 = vld [vmem:[%s6938_s22 + $0x26c] ss:$16 sps:$4 sm:$0xff]  }
  0xdc   : > { %5845 = vmatprep.subr.mxu1 %v1382_v18 }
  0xdd   : > { %1283 = vmatmul.mubr.bf16.gmra.mxu1 %v6040_v34  ;;  %1154 = vmatmul.mubr.bf16.gmra.mxu0 %v6063_v36  ;;  %v6161_v34 = vld [vmem:[%s6938_s22 + $0x364] ss:$16 sps:$4 sm:$0xff]   ;;  %v6163_v36 = vld [vmem:[%s6938_s22 + $0x360] ss:$16 sps:$4 sm:$0xff]  }
  0xde   : > { %1290 = vmatprep.mubr.bf16.mxu1 %v6043_v35  ;;  %1161 = vmatprep.mubr.bf16.mxu0 %v6065_v37  ;;  %v6118_v35 = vld [vmem:[%s6938_s22 + $0x268] ss:$16 sps:$4 sm:$0xff]   ;;  %v6122_v37 = vld [vmem:[%s6938_s22 + $0x28c] ss:$16 sps:$4 sm:$0xff]  }
  0xe5   : > { %1291 = vmatmul.mubr.bf16.gmra.mxu1 %v6046_v38  ;;  %1162 = vmatmul.mubr.bf16.gmra.mxu0 %v6069_v39  ;;  %v6167_v38 = vld [vmem:[%s6938_s22 + $0x384] ss:$16 sps:$4 sm:$0xff]   ;;  %v6124_v39 = vld [vmem:[%s6938_s22 + $0x288] ss:$16 sps:$4 sm:$0xff]  }
  0xe6   : > { %1298 = vmatprep.mubr.bf16.mxu1 %v6049_v40  ;;  %1169 = vmatprep.mubr.bf16.mxu0 %v6071_v41  ;;  %v6169_v40 = vld [vmem:[%s6938_s22 + $0x380] ss:$16 sps:$4 sm:$0xff]   ;;  %v6128_v41 = vld [vmem:[%s6938_s22 + $0x2ac] ss:$16 sps:$4 sm:$0xff]  }
  0xed   : > { %1299 = vmatmul.mubr.bf16.gmra.mxu1 %v6052_v42  ;;  %1170 = vmatmul.mubr.bf16.gmra.mxu0 %v6075_v43  ;;  %v6173_v42 = vld [vmem:[%s6938_s22 + $0x3a4] ss:$16 sps:$4 sm:$0xff]  }
  0xee   : > { %1306 = vmatprep.mubr.bf16.mxu1 %v6055_v44  ;;  %1177 = vmatprep.mubr.bf16.mxu0 %v6077_v45 }
  0xf5   : > { %1307 = vmatmul.mubr.bf16.gmra.mxu1 %v6058_v46  ;;  %1178 = vmatmul.mubr.bf16.gmra.mxu0 %v6081_v47 }
  0xf6   : > { %1314 = vmatprep.mubr.bf16.mxu1 %v6061_v48  ;;  %1897 = vmatprep.mubr.bf16.mxu0 %v6097_v49  ;;  %v6130_v49 = vld [vmem:[%s6938_s22 + $0x2a8] ss:$16 sps:$4 sm:$0xff]  }
  0xfd   : > { %1315 = vmatmul.mubr.bf16.gmra.mxu1 %v6064_v50  ;;  %1898 = vmatmul.mubr.bf16.vlgmr.msra.gmra.mxu0 %v6095_v51  ;;  %v6175_v51 = vld [vmem:[%s6938_s22 + $0x3a0] ss:$16 sps:$4 sm:$0xff]  }
  0xfe   : > { %1322 = vmatprep.mubr.bf16.mxu1 %v6067_v52  ;;  %1905 = vmatprep.mubr.bf16.mxu0 %v6101_v53  ;;  %v6134_v52 = vld [vmem:[%s6938_s22 + $0x2cc] ss:$16 sps:$4 sm:$0xff]   ;;  %v6179_v53 = vld [vmem:[%s6938_s22 + $0x3c4] ss:$16 sps:$4 sm:$0xff]  }
  0xff   : > { %5790 = vmatpush3.msra.mxu0 %v4712_v30 }
 0x105   : > { %1323 = vmatmul.mubr.bf16.gmra.mxu1 %v6070_v54  ;;  %1906 = vmatmul.mubr.bf16.gmra.mxu0 %v6103_v55 }
 0x106   : > { %1330 = vmatprep.mubr.bf16.mxu1 %v6073_v56  ;;  %1913 = vmatprep.mubr.bf16.mxu0 %v6107_v57 }
 0x10d   : > { %1331 = vmatmul.mubr.bf16.gmra.mxu1 %v6076_v58  ;;  %1914 = vmatmul.mubr.bf16.gmra.mxu0 %v6109_v59  ;;  %v4711_v59 = vld [vmem:[%s8966_s2 + $0x30] sm:$0xff] }
 0x10e   : > { %1338 = vmatprep.mubr.bf16.mxu1 %v6079_v60  ;;  %1921 = vmatprep.mubr.bf16.mxu0 %v6113_v61 }
 0x10f   : > { %5791 = vmatprep.subr.mxu0 %v4711_v59 }
 0x110   : > { %5792 = vmatpush3.msra.mxu0 %v4711_v59  ;;  %v6166_v59 = vld [vmem:[%s6938_s22 + $0x36c] ss:$16 sps:$4 sm:$0xff]  }
 0x115   : > { %1339 = vmatmul.mubr.bf16.gmra.mxu1 %v6082_v62  ;;  %1922 = vmatmul.mubr.bf16.gmra.mxu0 %v6115_v63 }
 0x116   : > { %1346 = vmatprep.mubr.bf16.mxu1 %v6083_v0  ;;  %1929 = vmatprep.mubr.bf16.mxu0 %v6119_v1  ;;  %v6136_v0 = vld [vmem:[%s6938_s22 + $0x2c8] ss:$16 sps:$4 sm:$0xff]  }
 0x11d   : > { %1347 = vmatmul.mubr.bf16.gmra.mxu1 %v6085_v2  ;;  %1930 = vmatmul.mubr.bf16.gmra.mxu0 %v6121_v3  ;;  %v6181_v2 = vld [vmem:[%s6938_s22 + $0x3c0] ss:$16 sps:$4 sm:$0xff]   ;;  %v6140_v3 = vld [vmem:[%s6938_s22 + $0x2ec] ss:$16 sps:$4 sm:$0xff]  }
 0x11e   : > { %1354 = vmatprep.mubr.bf16.mxu1 %v6086_v4  ;;  %1937 = vmatprep.mubr.bf16.mxu0 %v6125_v5  ;;  %v6185_v4 = vld [vmem:[%s6938_s22 + $0x3e4] ss:$16 sps:$4 sm:$0xff]  }
 0x125   : > { %1355 = vmatmul.mubr.bf16.gmra.mxu1 %v6088_v6  ;;  %1938 = vmatmul.mubr.bf16.gmra.mxu0 %v6127_v7 }
 0x126   : > { %1362 = vmatprep.mubr.bf16.mxu1 %v6089_v8  ;;  %1945 = vmatprep.mubr.bf16.mxu0 %v6131_v9 }
 0x12d   : > { %1363 = vmatmul.mubr.bf16.gmra.mxu1 %v6091_v10  ;;  %1946 = vmatmul.mubr.bf16.gmra.mxu0 %v6133_v11 }
 0x12e   : > { %1370 = vmatprep.mubr.bf16.mxu1 %v6092_v12  ;;  %1953 = vmatprep.mubr.bf16.mxu0 %v6137_v13 }
 0x135   : > { %1371 = vmatmul.mubr.bf16.gmra.mxu1 %v6094_v14  ;;  %1954 = vmatmul.mubr.bf16.gmra.mxu0 %v6139_v15  ;;  %v6142_v14 = vld [vmem:[%s6938_s22 + $0x2e8] ss:$16 sps:$4 sm:$0xff]  }
 0x136   : > { %2058 = vmatprep.mubr.bf16.mxu1 %v6100_v16  ;;  %1961 = vmatprep.mubr.bf16.mxu0 %v6143_v17  ;;  %v6187_v16 = vld [vmem:[%s6938_s22 + $0x3e0] ss:$16 sps:$4 sm:$0xff]   ;;  %v6148_v17 = vld [vmem:[%s6938_s22 + $0x30c] ss:$16 sps:$4 sm:$0xff]  }
 0x13d   : > { %2059 = vmatmul.mubr.bf16.vlgmr.msra.gmra.mxu1 %v6098_v19  ;;  %1962 = vmatmul.mubr.bf16.gmra.mxu0 %v6145_v20 }
 0x13e   : > { %2066 = vmatprep.mubr.bf16.mxu1 %v6104_v21  ;;  %1969 = vmatprep.mubr.bf16.mxu0 %v6149_v22 }
 0x13f   : > { %5846 = vmatpush3.msra.mxu1 %v1382_v18 }
 0x140   : > { %5847 = vmatprep.subr.mxu1 %v1381_v23 }
 0x141   : > { %5848 = vmatpush3.msra.mxu1 %v1381_v23 }
 0x142   : > { %5849 = vmatprep.subr.mxu1 %v1380_v24 }
 0x143   : > { %5850 = vmatpush3.msra.mxu1 %v1380_v24 }
 0x144   : > { %5851 = vmatprep.subr.mxu1 %v1379_v27 }
 0x145   : > { %2067 = vmatmul.mubr.bf16.gmra.mxu1 %v6106_v25  ;;  %1970 = vmatmul.mubr.bf16.gmra.mxu0 %v6151_v26 }
 0x146   : > { %2074 = vmatprep.mubr.bf16.mxu1 %v6110_v28  ;;  %1977 = vmatprep.mubr.bf16.mxu0 %v6155_v29  ;;  %v6154_v29 = vld [vmem:[%s6938_s22 + $0x32c] ss:$16 sps:$4 sm:$0xff]  }
 0x147   : > { %5852 = vmatpush3.msra.mxu1 %v1379_v27  ;;  %v6146_v27 = vld [vmem:[%s6938_s22 + $0x308] ss:$16 sps:$4 sm:$0xff]  }
 0x14d   : > { %2075 = vmatmul.mubr.bf16.gmra.mxu1 %v6112_v31  ;;  %1978 = vmatmul.mubr.bf16.gmra.mxu0 %v6157_v32 }
 0x14e   : > { %2082 = vmatprep.mubr.bf16.mxu1 %v6116_v33  ;;  %1985 = vmatprep.mubr.bf16.mxu0 %v6161_v34 }
 0x155   : > { %2083 = vmatmul.mubr.bf16.gmra.mxu1 %v6118_v35  ;;  %1986 = vmatmul.mubr.bf16.gmra.mxu0 %v6163_v36 }
 0x156   : > { %2090 = vmatprep.mubr.bf16.mxu1 %v6122_v37  ;;  %1993 = vmatprep.mubr.bf16.mxu0 %v6167_v38  ;;  %v6152_v38 = vld [vmem:[%s6938_s22 + $0x328] ss:$16 sps:$4 sm:$0xff]  }
 0x15d   : > { %v5097_v43 = vpop.f32.mrf.mxu1  ;;  %2091 = vmatmul.mubr.bf16.gmra.mxu1 %v6124_v39  ;;  %v7387_v44 = vpop.f32.mrf.mxu0  ;;  %1994 = vmatmul.mubr.bf16.gmra.mxu0 %v6169_v40  ;;  %v6160_v40 = vld [vmem:[%s6938_s22 + $0x34c] ss:$16 sps:$4 sm:$0xff]  }
 0x15e   : > { %2098 = vmatprep.mubr.bf16.mxu1 %v6128_v41  ;;  %2001 = vmatprep.mubr.bf16.mxu0 %v6173_v42 }
 0x15f   : > { %v5098_v45 = vpop.f32.mrf.mxu1  ;;  %v7389_v46 = vpop.f32.mrf.mxu0 }
 0x160   : > { %v7391_v47 = vadd.f32 %v5098_v45, %v5097_v43  ;;  %v4710_v43 = vld [vmem:[%s8966_s2 + $0x28] sm:$0xff] }
 0x161   : > { %v5100_v48 = vpop.f32.mrf.mxu1  ;;  %v7394_v50 = vpop.f32.mrf.mxu0  ;;  %5793 = vmatprep.subr.mxu0 %v4710_v43 }
 0x162   : > { %8968 = vst [vmem:[#allocation3_spill] sm:$0xff] %v7391_v47  ;;  %5794 = vmatpush3.msra.mxu0 %v4710_v43  ;;  %v6182_v47 = vld [vmem:[%s6938_s22 + $0x3c8] ss:$16 sps:$4 sm:$0xff]  }
 0x163   : > { %v5101_v54 = vpop.f32.mrf.mxu1  ;;  %v7399_v55 = vpop.f32.mrf.mxu0 }
 0x164   : > { %v7401_v56 = vadd.f32 %v5101_v54, %v5100_v48  ;;  %v6158_v54 = vld [vmem:[%s6938_s22 + $0x348] ss:$16 sps:$4 sm:$0xff]  }
 0x165   : > { %v5103_v57 = vpop.f32.mrf.mxu1  ;;  %2099 = vmatmul.mubr.bf16.gmra.mxu1 %v6130_v49  ;;  %v7403_v58 = vpop.f32.mrf.mxu0  ;;  %2002 = vmatmul.mubr.bf16.gmra.mxu0 %v6175_v51  ;;  %v4709_v49 = vld [vmem:[%s8966_s2 + $0x20] sm:$0xff] }
 0x166   : > { %8969 = vst [vmem:[#allocation4_spill] sm:$0xff] %v7401_v56  ;;  %2106 = vmatprep.mubr.bf16.mxu1 %v6134_v52  ;;  %2009 = vmatprep.mubr.bf16.mxu0 %v6179_v53 }
 0x167   : > { %v5104_v60 = vpop.f32.mrf.mxu1  ;;  %v7408_v61 = vpop.f32.mrf.mxu0  ;;  %5795 = vmatprep.subr.mxu0 %v4709_v49 }
 0x168   : > { %v7410_v62 = vadd.f32 %v5104_v60, %v5103_v57  ;;  %5796 = vmatpush3.msra.mxu0 %v4709_v49 }
 0x169   : > { %v5106_v63 = vpop.f32.mrf.mxu1  ;;  %v7413_v1 = vpop.f32.mrf.mxu0 }
 0x16a   : > { %8970 = vst [vmem:[#allocation5_spill] sm:$0xff] %v7410_v62 }
 0x16b   : > { %v5107_v5 = vpop.f32.mrf.mxu1  ;;  %v7418_v6 = vpop.f32.mrf.mxu0 }
 0x16c   : > { %v7420_v7 = vadd.f32 %v5107_v5, %v5106_v63 }
 0x16d   : > { %v5109_v8 = vpop.f32.mrf.mxu1  ;;  %2107 = vmatmul.mubr.bf16.gmra.mxu1 %v6136_v0  ;;  %v7422_v9 = vpop.f32.mrf.mxu0  ;;  %2010 = vmatmul.mubr.bf16.gmra.mxu0 %v6181_v2 }
 0x16e   : > { %8971 = vst [vmem:[#allocation6_spill] sm:$0xff] %v7420_v7  ;;  %2114 = vmatprep.mubr.bf16.mxu1 %v6140_v3  ;;  %2017 = vmatprep.mubr.bf16.mxu0 %v6185_v4 }
 0x16f   : > { %v5110_v10 = vpop.f32.mrf.mxu1  ;;  %v7424_v11 = vpop.f32.mrf.mxu0 }
 0x170   : > { %v7426_v12 = vadd.f32 %v5110_v10, %v5109_v8  ;;  %v6164_v8 = vld [vmem:[%s6938_s22 + $0x368] ss:$16 sps:$4 sm:$0xff]  }
 0x171   : > { %v5112_v13 = vpop.f32.mrf.mxu1  ;;  %v7429_v15 = vpop.f32.mrf.mxu0 }
 0x172   : > { %8972 = vst [vmem:[#allocation7_spill] sm:$0xff] %v7426_v12 }
 0x173   : > { %v5113_v18 = vpop.f32.mrf.mxu1  ;;  %v7433_v19 = vpop.f32.mrf.mxu0 }
 0x174   : > { %v7435_v20 = vadd.f32 %v5113_v18, %v5112_v13  ;;  %v6172_v13 = vld [vmem:[%s6938_s22 + $0x38c] ss:$16 sps:$4 sm:$0xff]  }
 0x175   : > { %v5115_v21 = vpop.f32.mrf.mxu1  ;;  %2115 = vmatmul.mubr.bf16.gmra.mxu1 %v6142_v14  ;;  %v7437_v22 = vpop.f32.mrf.mxu0  ;;  %2018 = vmatmul.mubr.bf16.gmra.mxu0 %v6187_v16 }
 0x176   : > { %8973 = vst [vmem:[#allocation8_spill] sm:$0xff] %v7435_v20  ;;  %2122 = vmatprep.mubr.bf16.mxu1 %v6148_v17 }
 0x177   : > { %v5116_v23 = vpop.f32.mrf.mxu1  ;;  %v7439_v24 = vpop.f32.mrf.mxu0 }
 0x178   : > { %v7441_v25 = vadd.f32 %v5116_v23, %v5115_v21 }
 0x179   : > { %v5118_v26 = vpop.f32.mrf.mxu1  ;;  %v7444_v28 = vpop.f32.mrf.mxu0 }
 0x17a   : > { %8974 = vst [vmem:[#allocation9_spill] sm:$0xff] %v7441_v25  ;;  %v6184_v25 = vld [vmem:[%s6938_s22 + $0x3cc] ss:$16 sps:$4 sm:$0xff]  }
 0x17b   : > { %v5119_v30 = vpop.f32.mrf.mxu1  ;;  %v7447_v31 = vpop.f32.mrf.mxu0 }
 0x17c   : > { %v7449_v32 = vadd.f32 %v5119_v30, %v5118_v26  ;;  %v6178_v30 = vld [vmem:[%s6938_s22 + $0x3ac] ss:$16 sps:$4 sm:$0xff]  }
 0x17d   : > { %v7451_v33 = vpop.f32.mrf.mxu1  ;;  %2123 = vmatmul.mubr.bf16.gmra.mxu1 %v6146_v27  ;;  %v7453_v34 = vpop.f32.mrf.mxu0  ;;  %v6170_v27 = vld [vmem:[%s6938_s22 + $0x388] ss:$16 sps:$4 sm:$0xff]  }
 0x17e   : > { %8975 = vst [vmem:[#allocation10_spill] sm:$0xff] %v7449_v32  ;;  %2130 = vmatprep.mubr.bf16.mxu1 %v6154_v29 }
 0x17f   : > { %v7455_v35 = vpop.f32.mrf.mxu1  ;;  %v7457_v36 = vpop.f32.mrf.mxu0 }
 0x181   : > { %v7459_v37 = vpop.f32.mrf.mxu1  ;;  %v7462_v39 = vpop.f32.mrf.mxu0 }
 0x183   : > { %v7465_v41 = vpop.f32.mrf.mxu1  ;;  %v7467_v42 = vpop.f32.mrf.mxu0 }
 0x185   : > { %v7472_v45 = vpop.f32.mrf.mxu1  ;;  %2131 = vmatmul.mubr.bf16.gmra.mxu1 %v6152_v38  ;;  %v7474_v48 = vpop.f32.mrf.mxu0 }
 0x186   : > { %2138 = vmatprep.mubr.bf16.mxu1 %v6160_v40 }
 0x187   : > { %v7479_v51 = vpop.f32.mrf.mxu1  ;;  %v7481_v52 = vpop.f32.mrf.mxu0 }
 0x189   : > { %v7483_v53 = vpop.f32.mrf.mxu1  ;;  %v7486_v57 = vpop.f32.mrf.mxu0 }
 0x18b   : > { %v7489_v60 = vpop.f32.mrf.mxu1  ;;  %v7491_v63 = vpop.f32.mrf.mxu0 }
 0x18d   : > { %v7493_v0 = vpop.f32.mrf.mxu1  ;;  %2139 = vmatmul.mubr.bf16.gmra.mxu1 %v6158_v54  ;;  %v7495_v2 = vpop.f32.mrf.mxu0 }
 0x18e   : > { %2146 = vmatprep.mubr.bf16.mxu1 %v6166_v59 }
 0x18f   : > { %v7497_v3 = vpop.f32.mrf.mxu1  ;;  %v7499_v4 = vpop.f32.mrf.mxu0 }
 0x191   : > { %v7501_v5 = vpop.f32.mrf.mxu1  ;;  %v7504_v10 = vpop.f32.mrf.mxu0 }
 0x193   : > { %v7507_v14 = vpop.f32.mrf.mxu1  ;;  %v7509_v16 = vpop.f32.mrf.mxu0 }
 0x195   : > { %v7511_v17 = vpop.f32.mrf.mxu1  ;;  %2147 = vmatmul.mubr.bf16.gmra.mxu1 %v6164_v8  ;;  %v7513_v18 = vpop.f32.mrf.mxu0 }
 0x196   : > { %8976 = vst [vmem:[#allocation11_spill] sm:$0xff] %v7513_v18  ;;  %2154 = vmatprep.mubr.bf16.mxu1 %v6172_v13  ;;  %v6176_v13 = vld [vmem:[%s6938_s22 + $0x3a8] ss:$16 sps:$4 sm:$0xff]  }
 0x197   : > { %v7515_v21 = vpop.f32.mrf.mxu1  ;;  %v7517_v23 = vpop.f32.mrf.mxu0 }
 0x198   : > { %8977 = vst [vmem:[#allocation12_spill] sm:$0xff] %v7517_v23  ;;  %v6188_v23 = vld [vmem:[%s6938_s22 + $0x3e8] ss:$16 sps:$4 sm:$0xff]  }
 0x199   : > { %v7519_v26 = vpop.f32.mrf.mxu1  ;;  %v7522_v29 = vpop.f32.mrf.mxu0 }
 0x19a   : > { %8978 = vst [vmem:[#allocation13_spill] sm:$0xff] %v7522_v29 }
 0x19b   : > { %v7525_v38 = vpop.f32.mrf.mxu1  ;;  %v7527_v40 = vpop.f32.mrf.mxu0 }
 0x19c   : > { %8979 = vst [vmem:[#allocation14_spill] sm:$0xff] %v7527_v40 }
 0x19d   : > { %v7529_v43 = vpop.f32.mrf.mxu1  ;;  %2155 = vmatmul.mubr.bf16.gmra.mxu1 %v6170_v27  ;;  %v7531_v49 = vpop.f32.mrf.mxu0 }
 0x19e   : > { %8980 = vst [vmem:[#allocation15_spill] sm:$0xff] %v7531_v49  ;;  %2162 = vmatprep.mubr.bf16.mxu1 %v6178_v30 }
 0x19f   : > { %v7533_v54 = vpop.f32.mrf.mxu1  ;;  %v7535_v59 = vpop.f32.mrf.mxu0 }
 0x1a0   : > { %8981 = vst [vmem:[#allocation16_spill] sm:$0xff] %v7535_v59  ;;  %v6190_v59 = vld [vmem:[%s6938_s22 + $0x3ec] ss:$16 sps:$4 sm:$0xff]  }
 0x1a1   : > { %v7537_v8 = vpop.f32.mrf.mxu1  ;;  %v7540_v32 = vpop.f32.mrf.mxu0 }
 0x1a2   : > { %8982 = vst [vmem:[#allocation17_spill] sm:$0xff] %v7540_v32 }
 0x1a3   : > { %v7543_v20 = vpop.f32.mrf.mxu1  ;;  %v7545_v12 = vpop.f32.mrf.mxu0 }
 0x1a4   : > { %8983 = vst [vmem:[#allocation18_spill] sm:$0xff] %v7545_v12 }
 0x1a5   : > { %v7547_v27 = vpop.f32.mrf.mxu1  ;;  %2163 = vmatmul.mubr.bf16.gmra.mxu1 %v6176_v13  ;;  %v7549_v30 = vpop.f32.mrf.mxu0 }
 0x1a6   : > { %8984 = vst [vmem:[#allocation19_spill] sm:$0xff] %v7549_v30  ;;  %2170 = vmatprep.mubr.bf16.mxu1 %v6184_v25  ;;  %v5027_v30 = vadd.f32 %v7389_v46, %v7387_v44  ;;  %v5030_v44 = vadd.f32 %v7399_v55, %v7394_v50  ;;  %v5142_v46 = vadd.f32 %v7465_v41, %v7459_v37 }
 0x1a7   : > { %v7551_v7 = vpop.f32.mrf.mxu1  ;;  %v7553_v62 = vpop.f32.mrf.mxu0  ;;  %v5036_v50 = vadd.f32 %v7418_v6, %v7413_v1  ;;  %v5148_v55 = vadd.f32 %v7489_v60, %v7483_v53  ;;  %v5042_v6 = vadd.f32 %v7433_v19, %v7429_v15  ;;  %v5154_v53 = vadd.f32 %v7507_v14, %v7501_v5 }
 0x1a8   : > { %8985 = vst [vmem:[#allocation20_spill] sm:$0xff] %v7553_v62  ;;  %v5048_v19 = vadd.f32 %v7447_v31, %v7444_v28  ;;  %v5160_v5 = vadd.f32 %v7525_v38, %v7519_v26  ;;  %v4871_v28 = vld [vmem:[%s8965_s1 + $0x4f0] sm:$0xff]  ;;  %v4872_v31 = vld [vmem:[%s8965_s1 + $0x4f8] sm:$0xff]  ;;  %v5054_v26 = vadd.f32 %v7467_v42, %v7462_v39  ;;  %v5166_v38 = vadd.f32 %v7543_v20, %v7537_v8 }
 0x1a9   : > { %v7555_v56 = vpop.f32.mrf.mxu1  ;;  %v7558_v32 = vpop.f32.mrf.mxu0  ;;  %v1264_v1 = vadd.f32 %v5148_v55, %v5036_v50  ;;  %v1272_v15 = vadd.f32 %v5154_v53, %v5042_v6  ;;  %v5057_v55 = vadd.f32 %v7481_v52, %v7474_v48  ;;  %v4887_v20 = vld [vmem:[%s8965_s1 + $0x570] sm:$0xff]  ;;  %v4888_v42 = vld [vmem:[%s8965_s1 + $0x578] sm:$0xff]  ;;  %v5060_v52 = vadd.f32 %v7491_v63, %v7486_v57 }
 0x1aa   : > { %8986 = vst [vmem:[#allocation21_spill] sm:$0xff] %v7558_v32  ;;  %v5139_v32 = vadd.f32 %v7455_v35, %v7451_v33  ;;  %v2988_v48 = vpack.c.bf16 %v4888_v42, %v4887_v20  ;;  %v8998_v42 = vld [vmem:[#allocation17_spill] sm:$0xff] }
 0x1ab   : > { %v7561_v49 = vpop.f32.mrf.mxu1  ;;  %v7563_v12 = vpop.f32.mrf.mxu0 }
 0x1ac   : > { %8987 = vst [vmem:[#allocation22_spill] sm:$0xff] %v7563_v12 }
 0x1ad   : > { %v7565_v40 = vpop.f32.mrf.mxu1  ;;  %2171 = vmatmul.mubr.bf16.gmra.mxu1 %v6182_v47  ;;  %v7567_v13 = vpop.f32.mrf.mxu0 }
 0x1ae   : > { %8988 = vst [vmem:[#allocation23_spill] sm:$0xff] %v7567_v13  ;;  %2178 = vmatprep.mubr.bf16.mxu1 %v6190_v59  ;;  %v1253_v59 = vadd.f32 %v5139_v32, %v5027_v30  ;;  %v5033_v32 = vadd.f32 %v7408_v61, %v7403_v58  ;;  %v5039_v58 = vadd.f32 %v7424_v11, %v7422_v9 }
 0x1af   : > { %v7569_v25 = vpop.f32.mrf.mxu1  ;;  %v7571_v62 = vpop.f32.mrf.mxu0  ;;  %v5151_v61 = vadd.f32 %v7497_v3, %v7493_v0  ;;  %v5045_v0 = vadd.f32 %v7439_v24, %v7437_v22  ;;  %v5157_v3 = vadd.f32 %v7515_v21, %v7511_v17  ;;  %v5051_v17 = vadd.f32 %v7457_v36, %v7453_v34  ;;  %v4903_v34 = vld [vmem:[%s8965_s1 + $0x5f0] sm:$0xff] }
 0x1b0   : > { %8989 = vst [vmem:[#allocation24_spill] sm:$0xff] %v7571_v62  ;;  %v5163_v21 = vadd.f32 %v7533_v54, %v7529_v43  ;;  %v1280_v36 = vadd.f32 %v5160_v5, %v5048_v19  ;;  %v8992_v19 = vld [vmem:[#allocation11_spill] sm:$0xff]  ;;  %v8993_v5 = vld [vmem:[#allocation12_spill] sm:$0xff] }
 0x1b1   : > { %v7577_v29 = vpop.f32.mrf.mxu1  ;;  %v7580_v12 = vpop.f32.mrf.mxu0  ;;  %v1269_v11 = vadd.f32 %v5151_v61, %v5039_v58  ;;  %v1277_v24 = vadd.f32 %v5157_v3, %v5045_v0  ;;  %v5169_v58 = vadd.f32 %v7551_v7, %v7547_v27  ;;  %v1288_v7 = vadd.f32 %v5166_v38, %v5054_v26 }
 0x1b2   : > { %v1285_v50 = vadd.f32 %v5163_v21, %v5051_v17  ;;  %v5172_v27 = vadd.f32 %v7561_v49, %v7555_v56  ;;  %v5175_v0 = vadd.f32 %v7569_v25, %v7565_v40  ;;  %v4901_v56 = vld [vmem:[%s8965_s1 + $0x5e0] sm:$0xff]  ;;  %v5066_v49 = vadd.f32 %v7509_v16, %v7504_v10  ;;  %v4902_v25 = vld [vmem:[%s8965_s1 + $0x5e8] sm:$0xff] }
 0x1b3   : > { %v7582_v18 = vpop.f32.mrf.mxu1  ;;  %v7584_v47 = vpop.f32.mrf.mxu0  ;;  %v1293_v53 = vadd.f32 %v5169_v58, %v5057_v55  ;;  %v2995_v21 = vpack.c.bf16 %v4902_v25, %v4901_v56  ;;  %v4885_v10 = vld [vmem:[%s8965_s1 + $0x560] sm:$0xff]  ;;  %v4886_v16 = vld [vmem:[%s8965_s1 + $0x568] sm:$0xff] }
 0x1b4   : > { %v1296_v63 = vadd.f32 %v5172_v27, %v5060_v52 }
 0x1b5   : > { %v7586_v13 = vpop.f32.mrf.mxu1  ;;  %2179 = vmatmul.mubr.bf16.gmra.mxu1 %v6188_v23  ;;  %v7588_v62 = vpop.f32.mrf.mxu0  ;;  %v5145_v23 = vadd.f32 %v7479_v51, %v7472_v45 }
 0x1b6   : > { %8990 = vst [vmem:[#allocation25_spill] sm:$0xff] %v7588_v62  ;;  %5853 = vmatprep.mubr.msk.f32.mxu1 %vm2192_vm0, %v1253_v59  ;;  %v1256_v59 = vadd.f32 %v5142_v46, %v5030_v44 }
 0x1b7   : > { %v7595_v33 = vpop.f32.mrf.mxu1  ;;  %v7597_v35 = vpop.f32.mrf.mxu0 }
 0x1b8   : > { %8991 = vst [vmem:[#allocation26_spill] sm:$0xff] %v7597_v35  ;;  %v1261_v35 = vadd.f32 %v5145_v23, %v5033_v32  ;;  %v2980_v23 = vpack.c.bf16 %v4872_v31, %v4871_v28  ;;  %v5181_v17 = vadd.f32 %v7595_v33, %v7586_v13  ;;  %v2987_v28 = vpack.c.bf16 %v4886_v16, %v4885_v10  ;;  %v8994_v13 = vld [vmem:[#allocation13_spill] sm:$0xff]  ;;  %v8995_v33 = vld [vmem:[#allocation14_spill] sm:$0xff]  ;;  %v9004_v16 = vld [vmem:[#allocation23_spill] sm:$0xff] }
 0x1b9   : > { %v7603_v30 = vpop.f32.mrf.mxu1  ;;  %v7605_v62 = vpop.f32.mrf.mxu0 }
 0x1ba   : > { %5529 = vmatprep.subr.bf16.mxu0 %v2980_v23 }
 0x1bb   : > { %v7611_v37 = vpop.f32.mrf.mxu1  ;;  %v7613_v41 = vpop.f32.mrf.mxu0 }
 0x1bd   : > { %v7619_v45 = vpop.f32.mrf.mxu1  ;;  %5854 = vmatmul.mubr.msk.f32.vlgmr.msra.gmra.mxu1 %vm2192_vm0, %v1256_v59  ;;  %v7622_v51 = vpop.f32.mrf.mxu0  ;;  %v4904_v59 = vld [vmem:[%s8965_s1 + $0x5f8] sm:$0xff] }
 0x1be   : > { %5856 = vmatprep.mubr.msk.f32.mxu1 %vm2192_vm0, %v1261_v35  ;;  %v2996_v39 = vpack.c.bf16 %v4904_v59, %v4903_v34  ;;  %v5072_v34 = vadd.f32 %v8995_v33, %v8994_v13  ;;  %v8996_v59 = vld [vmem:[#allocation15_spill] sm:$0xff] }
 0x1bf   : > { %v7629_v60 = vpop.f32.mrf.mxu1  ;;  %v7631_v9 = vpop.f32.mrf.mxu0 }
 0x1c0   : > { %5641 = vmatprep.subr.bf16.mxu1 %v2996_v39  ;;  %v5187_v58 = vadd.f32 %v7629_v60, %v7619_v45  ;;  %v4900_v60 = vld [vmem:[%s8965_s1 + $0x5d8] sm:$0xff] }
 0x1c1   : > { %v7637_v44 = vpop.f32.mrf.mxu1  ;;  %5857 = vmatmul.mubr.msk.f32.gmra.mxu1 %vm2192_vm0, %v1264_v1  ;;  %v7640_v46 = vpop.f32.mrf.mxu0 }
 0x1c2   : > { %5859 = vmatprep.mubr.msk.f32.mxu1 %vm2192_vm0, %v1269_v11  ;;  %5642 = vmatpush3.bf16.msra.mxu1 %v2988_v48  ;;  %v5063_v11 = vadd.f32 %v7499_v4, %v7495_v2  ;;  %v5178_v2 = vadd.f32 %v7582_v18, %v7577_v29  ;;  %v8999_v48 = vld [vmem:[#allocation18_spill] sm:$0xff] }
 0x1c3   : > { %v7647_v14 = vpop.f32.mrf.mxu1  ;;  %v7649_v22 = vpop.f32.mrf.mxu0  ;;  %5643 = vmatprep.subr.bf16.mxu1 %v2995_v21 }
 0x1c4   : > { %v1304_v31 = vadd.f32 %v5178_v2, %v5066_v49  ;;  %v5190_v52 = vadd.f32 %v7647_v14, %v7637_v44  ;;  %v4883_v2 = vld [vmem:[%s8965_s1 + $0x550] sm:$0xff]  ;;  %v4884_v44 = vld [vmem:[%s8965_s1 + $0x558] sm:$0xff] }
 0x1c5   : > { %v7655_v35 = vpop.f32.mrf.mxu1  ;;  %5860 = vmatmul.mubr.msk.f32.gmra.mxu1 %vm2192_vm0, %v1272_v15  ;;  %v7658_v32 = vpop.f32.mrf.mxu0  ;;  %v1301_v15 = vadd.f32 %v5175_v0, %v5063_v11  ;;  %v9000_v11 = vld [vmem:[#allocation19_spill] sm:$0xff]  ;;  %v9001_v0 = vld [vmem:[#allocation20_spill] sm:$0xff] }
 0x1c6   : > { %5862 = vmatprep.mubr.msk.f32.mxu1 %vm2192_vm0, %v1277_v24  ;;  %v5069_v24 = vadd.f32 %v8993_v5, %v8992_v19  ;;  %5644 = vmatpush3.bf16.msra.mxu1 %v2987_v28  ;;  %v5081_v56 = vadd.f32 %v9001_v0, %v9000_v11  ;;  %v9005_v28 = vld [vmem:[#allocation24_spill] sm:$0xff] }
 0x1c7   : > { %v7674_v43 = vpop.f32.mrf.mxu1  ;;  %v7676_v54 = vpop.f32.mrf.mxu0 }
 0x1c8   : > { %v1309_v23 = vadd.f32 %v5181_v17, %v5069_v24 }
 0x1c9   : > { %v7691_v8 = vpop.f32.mrf.mxu1  ;;  %5863 = vmatmul.mubr.msk.f32.gmra.mxu1 %vm2192_vm0, %v1280_v36  ;;  %v7694_v61 = vpop.f32.mrf.mxu0  ;;  %v5184_v36 = vadd.f32 %v7611_v37, %v7603_v30  ;;  %v4899_v30 = vld [vmem:[%s8965_s1 + $0x5d0] sm:$0xff] }
 0x1ca   : > { %5865 = vmatprep.mubr.msk.f32.mxu1 %vm2192_vm0, %v1285_v50  ;;  %v8997_v50 = vld [vmem:[#allocation16_spill] sm:$0xff]  ;;  %v2994_v49 = vpack.c.bf16 %v4900_v60, %v4899_v30 }
 0x1cb   : > { %v7701_v1 = vpop.f32.mrf.mxu1  ;;  %v7703_v6 = vpop.f32.mrf.mxu0  ;;  %v5075_v55 = vadd.f32 %v8997_v50, %v8996_v59  ;;  %v1312_v37 = vadd.f32 %v5184_v36, %v5072_v34  ;;  %v5090_v36 = vadd.f32 %v7584_v47, %v7580_v12  ;;  %v4882_v12 = vld [vmem:[%s8965_s1 + $0x548] sm:$0xff] }
 0x1cc   : > { %5645 = vmatprep.subr.bf16.mxu1 %v2994_v49  ;;  %v5196_v24 = vadd.f32 %v7701_v1, %v7691_v8  ;;  %v4897_v8 = vld [vmem:[%s8965_s1 + $0x5c0] sm:$0xff] }
 0x1cd   : > { %v7709_v3 = vpop.f32.mrf.mxu1  ;;  %5866 = vmatmul.mubr.msk.f32.gmra.mxu1 %vm2192_vm0, %v1288_v7  ;;  %v7712_v57 = vpop.f32.mrf.mxu0  ;;  %v5078_v7 = vadd.f32 %v8999_v48, %v8998_v42  ;;  %v4881_v48 = vld [vmem:[%s8965_s1 + $0x540] sm:$0xff] }
 0x1ce   : > { %5868 = vmatprep.mubr.msk.f32.mxu1 %vm2192_vm0, %v1293_v53  ;;  %v1317_v53 = vadd.f32 %v5187_v58, %v5075_v55  ;;  %v9006_v55 = vld [vmem:[#allocation25_spill] sm:$0xff]  ;;  %v9007_v58 = vld [vmem:[#allocation26_spill] sm:$0xff] }
 0x1cf   : > { %v5198_v4 = vpop.f32.mrf.mxu1  ;;  %v7722_v40 = vpop.f32.mrf.mxu0  ;;  %v1320_v19 = vadd.f32 %v5190_v52, %v5078_v7  ;;  %v5093_v30 = vadd.f32 %v9007_v58, %v9006_v55 }
 0x1d0   : > { %v5199_v13 = vadd.f32 %v5198_v4, %v7709_v3  ;;  %v4898_v3 = vld [vmem:[%s8965_s1 + $0x5c8] sm:$0xff] }
 0x1d1   : > { %v5200_v18 = vpop.f32.mrf.mxu1  ;;  %5869 = vmatmul.mubr.msk.f32.gmra.mxu1 %vm2192_vm0, %v1296_v63  ;;  %v7738_v29 = vpop.f32.mrf.mxu0  ;;  %v5193_v63 = vadd.f32 %v7674_v43, %v7655_v35  ;;  %v9002_v35 = vld [vmem:[#allocation21_spill] sm:$0xff]  ;;  %v9003_v43 = vld [vmem:[#allocation22_spill] sm:$0xff]  ;;  %v2993_v42 = vpack.c.bf16 %v4898_v3, %v4897_v8 }
 0x1d2   : > { %5871 = vmatprep.mubr.msk.f32.mxu1 %vm2192_vm0, %v1301_v15  ;;  %v2986_v15 = vpack.c.bf16 %v4884_v44, %v4883_v2  ;;  %v5084_v5 = vadd.f32 %v9003_v43, %v9002_v35  ;;  %v4896_v44 = vld [vmem:[%s8965_s1 + $0x5b8] sm:$0xff]  ;;  %v4879_v43 = vld [vmem:[%s8965_s1 + $0x530] sm:$0xff] }
 0x1d3   : > { %v5201_v26 = vpop.f32.mrf.mxu1  ;;  %v7745_v38 = vpop.f32.mrf.mxu0  ;;  %v1325_v10 = vadd.f32 %v5193_v63, %v5081_v56  ;;  %v4895_v63 = vld [vmem:[%s8965_s1 + $0x5b0] sm:$0xff] }
 0x1d4   : > { %5646 = vmatpush3.bf16.msra.mxu1 %v2986_v15  ;;  %v1328_v1 = vadd.f32 %v5196_v24, %v5084_v5  ;;  %v2992_v35 = vpack.c.bf16 %v4896_v44, %v4895_v63  ;;  %v4880_v5 = vld [vmem:[%s8965_s1 + $0x538] sm:$0xff] }
 0x1d5   : > { %v5203_v39 = vpop.f32.mrf.mxu1  ;;  %5872 = vmatmul.mubr.msk.f32.gmra.mxu1 %vm2192_vm0, %v1304_v31  ;;  %v7752_v20 = vpop.f32.mrf.mxu0  ;;  %v5087_v31 = vadd.f32 %v9005_v28, %v9004_v16  ;;  %5647 = vmatprep.subr.bf16.mxu1 %v2993_v42  ;;  %v9009_v16 = vld [vmem:[#allocation4_spill] sm:$0xff] }
 0x1d6   : > { %5874 = vmatprep.mubr.msk.f32.mxu1 %vm2192_vm0, %v1309_v23  ;;  %v5202_v23 = vadd.f32 %v5201_v26, %v5200_v18  ;;  %v2985_v26 = vpack.c.bf16 %v4882_v12, %v4881_v48  ;;  %v4877_v48 = vld [vmem:[%s8965_s1 + $0x520] sm:$0xff]  ;;  %v4878_v12 = vld [vmem:[%s8965_s1 + $0x528] sm:$0xff] }
 0x1d7   : > { %v5204_v27 = vpop.f32.mrf.mxu1  ;;  %v7762_v45 = vpop.f32.mrf.mxu0  ;;  %v1333_v4 = vadd.f32 %v5199_v13, %v5087_v31 }
 0x1d8   : > { %v1336_v7 = vadd.f32 %v5202_v23, %v5090_v36  ;;  %5648 = vmatpush3.bf16.msra.mxu1 %v2985_v26 }
 0x1d9   : > { %v5206_v14 = vpop.f32.mrf.mxu1  ;;  %5875 = vmatmul.mubr.msk.f32.gmra.mxu1 %vm2192_vm0, %v1312_v37  ;;  %v7778_v25 = vpop.f32.mrf.mxu0  ;;  %v5205_v37 = vadd.f32 %v5204_v27, %v5203_v39  ;;  %v5096_v39 = vadd.f32 %v7613_v41, %v7605_v62  ;;  %5649 = vmatprep.subr.bf16.mxu1 %v2992_v35 }
 0x1da   : > { %5877 = vmatprep.mubr.msk.f32.mxu1 %vm2192_vm0, %v1317_v53 }
 0x1db   : > { %v5207_v17 = vpop.f32.mrf.mxu1  ;;  %v7785_v21 = vpop.f32.mrf.mxu0  ;;  %v1341_v53 = vadd.f32 %v5205_v37, %v5093_v30  ;;  %v4894_v30 = vld [vmem:[%s8965_s1 + $0x5a8] sm:$0xff] }
 0x1dc   : > { %v5208_v52 = vadd.f32 %v5207_v17, %v5206_v14  ;;  %v9008_v14 = vld [vmem:[#allocation3_spill] sm:$0xff] }
 0x1dd   : > { %v5209_v33 = vpop.f32.mrf.mxu1  ;;  %5878 = vmatmul.mubr.msk.f32.gmra.mxu1 %vm2192_vm0, %v1320_v19  ;;  %v7791_v34 = vpop.f32.mrf.mxu0 }
 0x1de   : > { %5880 = vmatprep.mubr.msk.f32.mxu1 %vm2192_vm0, %v1325_v10  ;;  %v1344_v49 = vadd.f32 %v5208_v52, %v5096_v39  ;;  %v2984_v10 = vpack.c.bf16 %v4880_v5, %v4879_v43  ;;  %v9012_v39 = vld [vmem:[#allocation7_spill] sm:$0xff] }
 0x1df   : > { %v5210_v59 = vpop.f32.mrf.mxu1  ;;  %v7799_v50 = vpop.f32.mrf.mxu0 }
 0x1e0   : > { %v5211_v11 = vadd.f32 %v5210_v59, %v5209_v33  ;;  %5650 = vmatpush3.bf16.msra.mxu1 %v2984_v10  ;;  %v9010_v33 = vld [vmem:[#allocation5_spill] sm:$0xff]  ;;  %v9011_v59 = vld [vmem:[#allocation6_spill] sm:$0xff]  ;;  %v4890_v10 = vld [vmem:[%s8965_s1 + $0x588] sm:$0xff] }
 0x1e1   : > { %v5212_v47 = vpop.f32.mrf.mxu1  ;;  %5881 = vmatmul.mubr.msk.f32.gmra.mxu1 %vm2192_vm0, %v1328_v1  ;;  %v7813_v18 = vpop.f32.mrf.mxu0 }
 0x1e2   : > { %5883 = vmatprep.mubr.msk.f32.mxu1 %vm2192_vm0, %v1333_v4  ;;  %v1349_v15 = vadd.f32 %v5211_v11, %v9008_v14  ;;  %v4893_v4 = vld [vmem:[%s8965_s1 + $0x5a0] sm:$0xff]  ;;  %v4891_v11 = vld [vmem:[%s8965_s1 + $0x590] sm:$0xff] }
 0x1e3   : > { %v5213_v27 = vpop.f32.mrf.mxu1  ;;  %v7818_v60 = vpop.f32.mrf.mxu0  ;;  %v2991_v42 = vpack.c.bf16 %v4894_v30, %v4893_v4 }
 0x1e4   : > { %v5214_v62 = vadd.f32 %v5213_v27, %v5212_v47 }
 0x1e5   : > { %v5215_v0 = vpop.f32.mrf.mxu1  ;;  %5884 = vmatmul.mubr.msk.f32.gmra.mxu1 %vm2192_vm0, %v1336_v7  ;;  %v7821_v56 = vpop.f32.mrf.mxu0  ;;  %v2983_v7 = vpack.c.bf16 %v4878_v12, %v4877_v48  ;;  %5651 = vmatprep.subr.bf16.mxu1 %v2991_v42  ;;  %v6193_v48 = vld [vmem:[%s6938_s22 + $0x40c] ss:$16 sps:$4 sm:$0xff]  }
 0x1e6   : > { %5886 = vmatprep.mubr.msk.f32.mxu1 %vm2192_vm0, %v1341_v53  ;;  %v1352_v28 = vadd.f32 %v5214_v62, %v9009_v16  ;;  %v4875_v62 = vld [vmem:[%s8965_s1 + $0x510] sm:$0xff]  ;;  %v9015_v12 = vld [vmem:[#allocation10_spill] sm:$0xff] }
 0x1e7   : > { %v5216_v41 = vpop.f32.mrf.mxu1  ;;  %v7827_v2 = vpop.f32.mrf.mxu0  ;;  %5652 = vmatpush3.bf16.msra.mxu1 %v2983_v7 }
 0x1e8   : > { %v5217_v19 = vadd.f32 %v5216_v41, %v5215_v0  ;;  %v4892_v0 = vld [vmem:[%s8965_s1 + $0x598] sm:$0xff] }
 0x1e9   : > { %v5218_v24 = vpop.f32.mrf.mxu1  ;;  %5887 = vmatmul.mubr.msk.f32.gmra.mxu1 %vm2192_vm0, %v1344_v49  ;;  %v7840_v17 = vpop.f32.mrf.mxu0  ;;  %v2990_v49 = vpack.c.bf16 %v4892_v0, %v4891_v11  ;;  %v4876_v41 = vld [vmem:[%s8965_s1 + $0x518] sm:$0xff] }
 0x1ea   : > { %5889 = vmatprep.mubr.msk.f32.mxu1 %vm2192_vm0, %v1349_v15  ;;  %v1357_v8 = vadd.f32 %v5217_v19, %v9010_v33  ;;  %v2982_v15 = vpack.c.bf16 %v4876_v41, %v4875_v62  ;;  %v9013_v19 = vld [vmem:[#allocation8_spill] sm:$0xff]  ;;  %v4856_v62 = vld [vmem:[%s8965_s1 + $0x478] sm:$0xff] }
 0x1eb   : > { %v5219_v31 = vpop.f32.mrf.mxu1  ;;  %v7844_v13 = vpop.f32.mrf.mxu0  ;;  %5653 = vmatprep.subr.bf16.mxu1 %v2990_v49  ;;  %v4874_v33 = vld [vmem:[%s8965_s1 + $0x508] sm:$0xff]  ;;  %v4855_v49 = vld [vmem:[%s8965_s1 + $0x470] sm:$0xff] }
 0x1ec   : > { %v5220_v1 = vadd.f32 %v5219_v31, %v5218_v24  ;;  %5654 = vmatpush3.bf16.msra.mxu1 %v2982_v15  ;;  %v4889_v24 = vld [vmem:[%s8965_s1 + $0x580] sm:$0xff]  ;;  %v5254_v15 = vadd.f32 %v7649_v22, %v7640_v46  ;;  %v4854_v46 = vld [vmem:[%s8965_s1 + $0x468] sm:$0xff] }
 0x1ed   : > { %v5221_v36 = vpop.f32.mrf.mxu1  ;;  %5890 = vmatmul.mubr.msk.f32.gmra.mxu1 %vm2192_vm0, %v1352_v28  ;;  %v7848_v23 = vpop.f32.mrf.mxu0  ;;  %v2989_v28 = vpack.c.bf16 %v4890_v10, %v4889_v24  ;;  %v4873_v31 = vld [vmem:[%s8965_s1 + $0x500] sm:$0xff]  ;;  %v2972_v24 = vpack.c.bf16 %v4856_v62, %v4855_v49 }
 0x1ee   : > { %v1360_v3 = vadd.f32 %v5220_v1, %v9011_v59  ;;  %5892 = vmatprep.mubr.msk.f32.mxu1 %vm2192_vm0, %v1357_v8  ;;  %v9014_v59 = vld [vmem:[#allocation9_spill] sm:$0xff] }
 0x1ef   : > { %v5222_v55 = vpop.f32.mrf.mxu1  ;;  %v7855_v58 = vpop.f32.mrf.mxu0  ;;  %5655 = vmatprep.subr.bf16.mxu1 %v2989_v28  ;;  %v4853_v28 = vld [vmem:[%s8965_s1 + $0x460] sm:$0xff] }
 0x1f0   : > { %v5223_v37 = vadd.f32 %v5222_v55, %v5221_v36  ;;  %v2981_v36 = vpack.c.bf16 %v4874_v33, %v4873_v31  ;;  %v4867_v31 = vld [vmem:[%s8965_s1 + $0x4d0] sm:$0xff]  ;;  %v4868_v33 = vld [vmem:[%s8965_s1 + $0x4d8] sm:$0xff] }
 0x1f1   : > { %v5224_v47 = vpop.f32.mrf.mxu1  ;;  %5893 = vmatmul.mubr.msk.f32.gmra.mxu1 %vm2192_vm0, %v1360_v3  ;;  %v7867_v26 = vpop.f32.mrf.mxu0 }
 0x1f2   : > { %v1365_v52 = vadd.f32 %v5223_v37, %v9012_v39  ;;  %5656 = vmatpush3.bf16.msra.mxu1 %v2981_v36  ;;  %v5251_v39 = vadd.f32 %v7631_v9, %v7622_v51  ;;  %v4869_v51 = vld [vmem:[%s8965_s1 + $0x4e0] sm:$0xff]  ;;  %v4870_v9 = vld [vmem:[%s8965_s1 + $0x4e8] sm:$0xff] }
 0x1f3   : > { %v5225_v27 = vpop.f32.mrf.mxu1  ;;  %v7870_v53 = vpop.f32.mrf.mxu0 }
 0x1f4   : > { %v5226_v63 = vadd.f32 %v5225_v27, %v5224_v47  ;;  %5895 = vmatprep.mubr.msk.f32.mxu1 %vm2192_vm0, %v1365_v52  ;;  %v6191_v27 = vld [vmem:[%s6938_s22 + $0x408] ss:$16 sps:$4 sm:$0xff]  }
 0x1f5   : > { %v5227_v44 = vpop.f32.mrf.mxu1  ;;  %v7885_v14 = vpop.f32.mrf.mxu0 }
 0x1f6   : > { %v1368_v35 = vadd.f32 %v5226_v63, %v9013_v19 }
 0x1f7   : > { %v5228_v43 = vpop.f32.mrf.mxu1  ;;  %v7888_v5 = vpop.f32.mrf.mxu0 }
 0x1f8   : > { %v5229_v16 = vadd.f32 %v5228_v43, %v5227_v44  ;;  %5896 = vmatmul.mubr.msk.f32.gmra.mxu1 %vm2192_vm0, %v1368_v35  ;;  %v6199_v44 = vld [vmem:[%s6938_s22 + $0x42c] ss:$16 sps:$4 sm:$0xff]  }
 0x1f9   : > { %v5230_v8 = vpop.f32.mrf.mxu1  ;;  %v7903_v1 = vpop.f32.mrf.mxu0 }
 0x1fa   : > { %v1373_v3 = vadd.f32 %v5229_v16, %v9014_v59  ;;  %v2979_v16 = vpack.c.bf16 %v4870_v9, %v4869_v51  ;;  %v6197_v59 = vld [vmem:[%s6938_s22 + $0x428] ss:$16 sps:$4 sm:$0xff]   ;;  %v4849_v51 = vld [vmem:[%s8965_s1 + $0x440] sm:$0xff]  ;;  %v4863_v9 = vld [vmem:[%s8965_s1 + $0x4b0] sm:$0xff] }
 0x1fb   : > { %v5231_v4 = vpop.f32.mrf.mxu1  ;;  %v7906_v55 = vpop.f32.mrf.mxu0 }
 0x1fc   : > { %v5232_v30 = vadd.f32 %v5231_v4, %v5230_v8  ;;  %5898 = vmatprep.mubr.msk.f32.mxu1 %vm2192_vm0, %v1373_v3  ;;  %v5257_v8 = vadd.f32 %v7676_v54, %v7658_v32  ;;  %v4852_v32 = vld [vmem:[%s8965_s1 + $0x458] sm:$0xff] }
 0x1fd   : > { %v5361_v37 = vpop.f32.mrf.mxu1  ;;  %v7909_v42 = vpop.f32.mrf.mxu0 }
 0x1fe   : > { %v1376_v47 = vadd.f32 %v5232_v30, %v9015_v12  ;;  %v2971_v30 = vpack.c.bf16 %v4854_v46, %v4853_v28  ;;  %v4851_v12 = vld [vmem:[%s8965_s1 + $0x450] sm:$0xff] }
 0x1ff   : > { %v5362_v7 = vpop.f32.mrf.mxu1  ;;  %v7917_v0 = vpop.f32.mrf.mxu0  ;;  %v2970_v49 = vpack.c.bf16 %v4852_v32, %v4851_v12  ;;  %v4845_v32 = vld [vmem:[%s8965_s1 + $0x420] sm:$0xff] }
 0x200   : > { %v5363_v52 = vadd.f32 %v5362_v7, %v5361_v37  ;;  %5899 = vmatmul.mubr.msk.f32.gmra.mxu1 %vm2192_vm0, %v1376_v47  ;;  %v4865_v47 = vld [vmem:[%s8965_s1 + $0x4c0] sm:$0xff]  ;;  %v4866_v7 = vld [vmem:[%s8965_s1 + $0x4c8] sm:$0xff] }
 0x201   : > { %v5364_v11 = vpop.f32.mrf.mxu1  ;;  %3510 = vmatprep.mubr.bf16.mxu1 %v6193_v48  ;;  %v7935_v43 = vpop.f32.mrf.mxu0  ;;  %v2978_v48 = vpack.c.bf16 %v4868_v33, %v4867_v31  ;;  %v4861_v31 = vld [vmem:[%s8965_s1 + $0x4a0] sm:$0xff]  ;;  %v4862_v33 = vld [vmem:[%s8965_s1 + $0x4a8] sm:$0xff] }
 0x202   : > { %v2061_v63 = vadd.f32 %v5363_v52, %v5251_v39  ;;  %v6205_v39 = vld [vmem:[%s6938_s22 + $0x44c] ss:$16 sps:$4 sm:$0xff]   ;;  %v5260_v52 = vadd.f32 %v7703_v6, %v7694_v61  ;;  %v2975_v12 = vpack.c.bf16 %v4862_v33, %v4861_v31 }
 0x203   : > { %v5365_v41 = vpop.f32.mrf.mxu1  ;;  %v7953_v4 = vpop.f32.mrf.mxu0  ;;  %v4850_v61 = vld [vmem:[%s8965_s1 + $0x448] sm:$0xff] }
 0x204   : > { %v5366_v19 = vadd.f32 %v5365_v41, %v5364_v11  ;;  %5797 = vmatprep.mubr.msk.f32.mxu0 %vm2192_vm0, %v2061_v63  ;;  %3511 = vmatmul.mubr.bf16.vlgmr.msra.gmra.mxu1 %v6191_v27  ;;  %v2977_v41 = vpack.c.bf16 %v4866_v7, %v4865_v47  ;;  %v4860_v47 = vld [vmem:[%s8965_s1 + $0x498] sm:$0xff]  ;;  %v5269_v7 = vadd.f32 %v7762_v45, %v7752_v20 }
 0x205   : > { %v5367_v35 = vpop.f32.mrf.mxu1  ;;  %3518 = vmatprep.mubr.bf16.mxu1 %v6199_v44  ;;  %v7971_v63 = vpop.f32.mrf.mxu0  ;;  %v4864_v44 = vld [vmem:[%s8965_s1 + $0x4b8] sm:$0xff] }
 0x206   : > { %v2064_v10 = vadd.f32 %v5366_v19, %v5254_v15  ;;  %v5263_v15 = vadd.f32 %v7722_v40, %v7712_v57  ;;  %v2976_v46 = vpack.c.bf16 %v4864_v44, %v4863_v9  ;;  %v4848_v57 = vld [vmem:[%s8965_s1 + $0x438] sm:$0xff]  ;;  %v5272_v44 = vadd.f32 %v7785_v21, %v7778_v25  ;;  %v4842_v25 = vld [vmem:[%s8965_s1 + $0x408] sm:$0xff] }
 0x207   : > { %v5368_v22 = vpop.f32.mrf.mxu1  ;;  %v4844_v20 = vld [vmem:[%s8965_s1 + $0x418] sm:$0xff] }
 0x208   : > { %v5369_v36 = vadd.f32 %v5368_v22, %v5367_v35  ;;  %5798 = vmatmul.mubr.msk.f32.vlgmr.msra.gmra.mxu0 %vm2192_vm0, %v2064_v10  ;;  %v6203_v35 = vld [vmem:[%s6938_s22 + $0x448] ss:$16 sps:$4 sm:$0xff]   ;;  %v7989_v10 = vpop.f32.mrf.mxu0  ;;  %v4847_v22 = vld [vmem:[%s8965_s1 + $0x430] sm:$0xff]  ;;  %v6217_v9 = vld [vmem:[%s6938_s22 + $0x48c] ss:$16 sps:$4 sm:$0xff]  }
 0x209   : > { %v5370_v3 = vpop.f32.mrf.mxu1  ;;  %5530 = vmatpush3.bf16.msra.mxu0 %v2972_v24 }
 0x20a   : > { %v2069_v37 = vadd.f32 %v5369_v36, %v5257_v8  ;;  %5531 = vmatprep.subr.bf16.mxu0 %v2979_v16  ;;  %v2969_v16 = vpack.c.bf16 %v4850_v61, %v4849_v51  ;;  %v6211_v8 = vld [vmem:[%s6938_s22 + $0x46c] ss:$16 sps:$4 sm:$0xff]   ;;  %v5266_v36 = vadd.f32 %v7745_v38, %v7738_v29  ;;  %v4843_v51 = vld [vmem:[%s8965_s1 + $0x410] sm:$0xff]  ;;  %v4857_v61 = vld [vmem:[%s8965_s1 + $0x480] sm:$0xff] }
 0x20b   : > { %v5371_v54 = vpop.f32.mrf.mxu1  ;;  %v4846_v29 = vld [vmem:[%s8965_s1 + $0x428] sm:$0xff] }
 0x20c   : > { %v5372_v27 = vadd.f32 %v5371_v54, %v5370_v3  ;;  %5800 = vmatprep.mubr.msk.f32.mxu0 %vm2192_vm0, %v2069_v37  ;;  %3519 = vmatmul.mubr.bf16.gmra.mxu1 %v6197_v59  ;;  %v2968_v37 = vpack.c.bf16 %v4848_v57, %v4847_v22  ;;  %v4859_v54 = vld [vmem:[%s8965_s1 + $0x490] sm:$0xff]  ;;  %v5275_v22 = vadd.f32 %v7799_v50, %v7791_v34 }
 0x20d   : > { %v5373_v11 = vpop.f32.mrf.mxu1  ;;  %5532 = vmatpush3.bf16.msra.mxu0 %v2971_v30  ;;  %3526 = vmatprep.mubr.bf16.mxu1 %v6205_v39  ;;  %v8007_v30 = vpop.f32.mrf.mxu0 }
 0x20e   : > { %v2072_v62 = vadd.f32 %v5372_v27, %v5260_v52  ;;  %5533 = vmatprep.subr.bf16.mxu0 %v2978_v48  ;;  %v6209_v52 = vld [vmem:[%s6938_s22 + $0x468] ss:$16 sps:$4 sm:$0xff]  }
 0x20f   : > { %v5374_v6 = vpop.f32.mrf.mxu1 }
 0x210   : > { %v5375_v19 = vadd.f32 %v5374_v6, %v5373_v11  ;;  %5801 = vmatmul.mubr.msk.f32.gmra.mxu0 %vm2192_vm0, %v2072_v62  ;;  %v8025_v11 = vpop.f32.mrf.mxu0  ;;  %v4858_v6 = vld [vmem:[%s8965_s1 + $0x488] sm:$0xff] }
 0x211   : > { %v5376_v24 = vpop.f32.mrf.mxu1  ;;  %5534 = vmatpush3.bf16.msra.mxu0 %v2970_v49  ;;  %v2967_v49 = vpack.c.bf16 %v4846_v29, %v4845_v32  ;;  %v5281_v29 = vadd.f32 %v7827_v2, %v7821_v56 }
 0x212   : > { %v2077_v28 = vadd.f32 %v5375_v19, %v5263_v15  ;;  %5535 = vmatprep.subr.bf16.mxu0 %v2977_v41  ;;  %v2974_v41 = vpack.c.bf16 %v4860_v47, %v4859_v54  ;;  %v6221_v54 = vld [vmem:[%s6938_s22 + $0x4a8] ss:$16 sps:$4 sm:$0xff]  }
 0x213   : > { %v5377_v40 = vpop.f32.mrf.mxu1 }
 0x214   : > { %v5378_v59 = vadd.f32 %v5377_v40, %v5376_v24  ;;  %5803 = vmatprep.mubr.msk.f32.mxu0 %vm2192_vm0, %v2077_v28  ;;  %3527 = vmatmul.mubr.bf16.gmra.mxu1 %v6203_v35  ;;  %v8043_v35 = vpop.f32.mrf.mxu0  ;;  %v2966_v24 = vpack.c.bf16 %v4844_v20, %v4843_v51  ;;  %v2973_v28 = vpack.c.bf16 %v4858_v6, %v4857_v61  ;;  %v6215_v40 = vld [vmem:[%s6938_s22 + $0x488] ss:$16 sps:$4 sm:$0xff]   ;;  %v6235_v6 = vld [vmem:[%s6938_s22 + $0x4ec] ss:$16 sps:$4 sm:$0xff]  }
 0x215   : > { %v5379_v3 = vpop.f32.mrf.mxu1  ;;  %5536 = vmatpush3.bf16.msra.mxu0 %v2969_v16  ;;  %3534 = vmatprep.mubr.bf16.mxu1 %v6211_v8  ;;  %v6227_v20 = vld [vmem:[%s6938_s22 + $0x4c8] ss:$16 sps:$4 sm:$0xff]  }
 0x216   : > { %v2080_v48 = vadd.f32 %v5378_v59, %v5266_v36  ;;  %5537 = vmatprep.subr.bf16.mxu0 %v2976_v46  ;;  %v4841_v46 = vld [vmem:[%s8965_s1 + $0x400] sm:$0xff]  ;;  %v8055_v33 = vpop.f32.mrf.mxu0 }
 0x217   : > { %v5380_v38 = vpop.f32.mrf.mxu1  ;;  %v2965_v8 = vpack.c.bf16 %v4842_v25, %v4841_v46 }
 0x218   : > { %v5381_v39 = vadd.f32 %v5380_v38, %v5379_v3  ;;  %5804 = vmatmul.mubr.msk.f32.gmra.mxu0 %vm2192_vm0, %v2080_v48  ;;  %v6223_v3 = vld [vmem:[%s6938_s22 + $0x4ac] ss:$16 sps:$4 sm:$0xff]   ;;  %v8061_v50 = vpop.f32.mrf.mxu0 }
 0x219   : > { %v5382_v27 = vpop.f32.mrf.mxu1  ;;  %5538 = vmatpush3.bf16.msra.mxu0 %v2968_v37  ;;  %v5278_v37 = vadd.f32 %v7818_v60, %v7813_v18 }
 0x21a   : > { %v2085_v62 = vadd.f32 %v5381_v39, %v5269_v7  ;;  %5539 = vmatprep.subr.bf16.mxu0 %v2975_v12  ;;  %v8067_v60 = vpop.f32.mrf.mxu0  ;;  %v6229_v39 = vld [vmem:[%s6938_s22 + $0x4cc] ss:$16 sps:$4 sm:$0xff]  }
 0x21b   : > { %v5383_v45 = vpop.f32.mrf.mxu1 }
 0x21c   : > { %v5384_v15 = vadd.f32 %v5383_v45, %v5382_v27  ;;  %5806 = vmatprep.mubr.msk.f32.mxu0 %vm2192_vm0, %v2085_v62  ;;  %3535 = vmatmul.mubr.bf16.gmra.mxu1 %v6209_v52  ;;  %v5284_v52 = vadd.f32 %v7844_v13, %v7840_v17  ;;  %v8073_v2 = vpop.f32.mrf.mxu0 }
 0x21d   : > { %v5385_v19 = vpop.f32.mrf.mxu1  ;;  %5540 = vmatpush3.bf16.msra.mxu0 %v2967_v49  ;;  %3542 = vmatprep.mubr.bf16.mxu1 %v6217_v9  ;;  %v5290_v9 = vadd.f32 %v7870_v53, %v7867_v26 }
 0x21e   : > { %v2088_v16 = vadd.f32 %v5384_v15, %v5272_v44  ;;  %5541 = vmatprep.subr.bf16.mxu0 %v2974_v41  ;;  %v5287_v41 = vadd.f32 %v7855_v58, %v7848_v23  ;;  %v8079_v17 = vpop.f32.mrf.mxu0 }
 0x21f   : > { %v5386_v21 = vpop.f32.mrf.mxu1 }
 0x220   : > { %v5387_v57 = vadd.f32 %v5386_v21, %v5385_v19  ;;  %5807 = vmatmul.mubr.msk.f32.gmra.mxu0 %vm2192_vm0, %v2088_v16  ;;  %v8085_v58 = vpop.f32.mrf.mxu0  ;;  %v6241_v21 = vld [vmem:[%s6938_s22 + $0x50c] ss:$16 sps:$4 sm:$0xff]  }
 0x221   : > { %v5388_v31 = vpop.f32.mrf.mxu1  ;;  %5542 = vmatpush3.bf16.msra.mxu0 %v2966_v24  ;;  %v5293_v24 = vadd.f32 %v7888_v5, %v7885_v14 }
 0x222   : > { %v2093_v36 = vadd.f32 %v5387_v57, %v5275_v22  ;;  %5543 = vmatprep.subr.bf16.mxu0 %v2973_v28  ;;  %v6233_v28 = vld [vmem:[%s6938_s22 + $0x4e8] ss:$16 sps:$4 sm:$0xff]   ;;  %v8091_v26 = vpop.f32.mrf.mxu0  ;;  %v5296_v22 = vadd.f32 %v7906_v55, %v7903_v1 }
 0x223   : > { %v5389_v59 = vpop.f32.mrf.mxu1 }
 0x224   : > { %v5390_v48 = vadd.f32 %v5389_v59, %v5388_v31  ;;  %5809 = vmatprep.mubr.msk.f32.mxu0 %vm2192_vm0, %v2093_v36  ;;  %3543 = vmatmul.mubr.bf16.gmra.mxu1 %v6215_v40  ;;  %v8097_v5 = vpop.f32.mrf.mxu0  ;;  %v6239_v59 = vld [vmem:[%s6938_s22 + $0x508] ss:$16 sps:$4 sm:$0xff]  }
 0x225   : > { %v5391_v34 = vpop.f32.mrf.mxu1  ;;  %5544 = vmatpush3.bf16.msra.mxu0 %v2965_v8  ;;  %3550 = vmatprep.mubr.bf16.mxu1 %v6223_v3  ;;  %v5299_v8 = vadd.f32 %v7917_v0, %v7909_v42 }
 0x226   : > { %v2096_v12 = vadd.f32 %v5390_v48, %v5278_v37  ;;  %v8103_v1 = vpop.f32.mrf.mxu0  ;;  %v6247_v48 = vld [vmem:[%s6938_s22 + $0x52c] ss:$16 sps:$4 sm:$0xff]  }
 0x227   : > { %v5392_v32 = vpop.f32.mrf.mxu1 }
 0x228   : > { %v5393_v38 = vadd.f32 %v5392_v32, %v5391_v34  ;;  %5810 = vmatmul.mubr.msk.f32.gmra.mxu0 %vm2192_vm0, %v2096_v12  ;;  %v5302_v34 = vadd.f32 %v7953_v4, %v7935_v43  ;;  %v8109_v0 = vpop.f32.mrf.mxu0 }
 0x229   : > { %v5394_v18 = vpop.f32.mrf.mxu1 }
 0x22a   : > { %v2101_v47 = vadd.f32 %v5393_v38, %v5281_v29  ;;  %v5305_v38 = vadd.f32 %v7989_v10, %v7971_v63  ;;  %v5325_v43 = vpop.f32.mrf.mxu0 }
 0x22b   : > { %v5395_v7 = vpop.f32.mrf.mxu1 }
 0x22c   : > { %v5396_v27 = vadd.f32 %v5395_v7, %v5394_v18  ;;  %5812 = vmatprep.mubr.msk.f32.mxu0 %vm2192_vm0, %v2101_v47  ;;  %3551 = vmatmul.mubr.bf16.gmra.mxu1 %v6221_v54  ;;  %v6245_v18 = vld [vmem:[%s6938_s22 + $0x528] ss:$16 sps:$4 sm:$0xff]   ;;  %v5327_v63 = vpop.f32.mrf.mxu0 }
 0x22d   : > { %v5397_v56 = vpop.f32.mrf.mxu1  ;;  %3558 = vmatprep.mubr.bf16.mxu1 %v6229_v39  ;;  %v6253_v39 = vld [vmem:[%s6938_s22 + $0x54c] ss:$16 sps:$4 sm:$0xff]  }
 0x22e   : > { %v2104_v49 = vadd.f32 %v5396_v27, %v5284_v52  ;;  %v5308_v52 = vadd.f32 %v8025_v11, %v8007_v30 }
 0x22f   : > { %v5398_v62 = vpop.f32.mrf.mxu1 }
 0x230   : > { %v5399_v51 = vadd.f32 %v5398_v62, %v5397_v56  ;;  %5813 = vmatmul.mubr.msk.f32.gmra.mxu0 %vm2192_vm0, %v2104_v49  ;;  %v5311_v62 = vadd.f32 %v8055_v33, %v8043_v35 }
 0x231   : > { %v5400_v45 = vpop.f32.mrf.mxu1 }
 0x232   : > { %v2109_v13 = vadd.f32 %v5399_v51, %v5287_v41  ;;  %v6251_v51 = vld [vmem:[%s6938_s22 + $0x548] ss:$16 sps:$4 sm:$0xff]  }
 0x233   : > { %v5401_v61 = vpop.f32.mrf.mxu1 }
 0x234   : > { %v5402_v44 = vadd.f32 %v5401_v61, %v5400_v45  ;;  %5815 = vmatprep.mubr.msk.f32.mxu0 %vm2192_vm0, %v2109_v13  ;;  %3559 = vmatmul.mubr.bf16.gmra.mxu1 %v6227_v20  ;;  %v5328_v45 = vpop.f32.mrf.mxu0  ;;  %v6259_v13 = vld [vmem:[%s6938_s22 + $0x56c] ss:$16 sps:$4 sm:$0xff]   ;;  %v5314_v61 = vadd.f32 %v8067_v60, %v8061_v50 }
 0x235   : > { %v5403_v23 = vpop.f32.mrf.mxu1  ;;  %3566 = vmatprep.mubr.bf16.mxu1 %v6235_v6 }
 0x236   : > { %v2112_v15 = vadd.f32 %v5402_v44, %v5290_v9  ;;  %v5330_v35 = vpop.f32.mrf.mxu0 }
 0x237   : > { %v5404_v19 = vpop.f32.mrf.mxu1 }
 0x238   : > { %v5405_v16 = vadd.f32 %v5404_v19, %v5403_v23  ;;  %5816 = vmatmul.mubr.msk.f32.gmra.mxu0 %vm2192_vm0, %v2112_v15  ;;  %v5317_v23 = vadd.f32 %v8079_v17, %v8073_v2  ;;  %v6257_v19 = vld [vmem:[%s6938_s22 + $0x568] ss:$16 sps:$4 sm:$0xff]  }
 0x239   : > { %v5406_v46 = vpop.f32.mrf.mxu1 }
 0x23a   : > { %v2117_v53 = vadd.f32 %v5405_v16, %v5293_v24  ;;  %v5331_v16 = vpop.f32.mrf.mxu0 }
 0x23b   : > { %v5407_v25 = vpop.f32.mrf.mxu1 }
 0x23c   : > { %v5408_v57 = vadd.f32 %v5407_v25, %v5406_v46  ;;  %5818 = vmatprep.mubr.msk.f32.mxu0 %vm2192_vm0, %v2117_v53  ;;  %3567 = vmatmul.mubr.bf16.gmra.mxu1 %v6233_v28  ;;  %v6265_v28 = vld [vmem:[%s6938_s22 + $0x58c] ss:$16 sps:$4 sm:$0xff]   ;;  %v5320_v46 = vadd.f32 %v8091_v26, %v8085_v58  ;;  %v5333_v2 = vpop.f32.mrf.mxu0 }
 0x23d   : > { %v5409_v14 = vpop.f32.mrf.mxu1  ;;  %3574 = vmatprep.mubr.bf16.mxu1 %v6241_v21 }
 0x23e   : > { %v2120_v40 = vadd.f32 %v5408_v57, %v5296_v22  ;;  %v5323_v22 = vadd.f32 %v8103_v1, %v8097_v5 }
 0x23f   : > { %v5410_v31 = vpop.f32.mrf.mxu1 }
 0x240   : > { %v5411_v36 = vadd.f32 %v5410_v31, %v5409_v14  ;;  %5819 = vmatmul.mubr.msk.f32.gmra.mxu0 %vm2192_vm0, %v2120_v40  ;;  %v6263_v14 = vld [vmem:[%s6938_s22 + $0x588] ss:$16 sps:$4 sm:$0xff]   ;;  %v5334_v31 = vpop.f32.mrf.mxu0 }
 0x241   : > { %v5412_v3 = vpop.f32.mrf.mxu1 }
 0x242   : > { %v2125_v55 = vadd.f32 %v5411_v36, %v5299_v8  ;;  %v6271_v8 = vld [vmem:[%s6938_s22 + $0x5ac] ss:$16 sps:$4 sm:$0xff]   ;;  %v5326_v36 = vadd.f32 %v5325_v43, %v8109_v0 }
 0x243   : > { %v5413_v37 = vpop.f32.mrf.mxu1 }
 0x244   : > { %v5414_v12 = vadd.f32 %v5413_v37, %v5412_v3  ;;  %5821 = vmatprep.mubr.msk.f32.mxu0 %vm2192_vm0, %v2125_v55  ;;  %3575 = vmatmul.mubr.bf16.gmra.mxu1 %v6239_v59  ;;  %v5336_v55 = vpop.f32.mrf.mxu0  ;;  %v5329_v37 = vadd.f32 %v5328_v45, %v5327_v63 }
 0x245   : > { %v5415_v42 = vpop.f32.mrf.mxu1  ;;  %3582 = vmatprep.mubr.bf16.mxu1 %v6247_v48 }
 0x246   : > { %v2128_v32 = vadd.f32 %v5414_v12, %v5302_v34  ;;  %v6269_v34 = vld [vmem:[%s6938_s22 + $0x5a8] ss:$16 sps:$4 sm:$0xff]  }
 0x247   : > { %v5416_v29 = vpop.f32.mrf.mxu1 }
 0x248   : > { %v5417_v54 = vadd.f32 %v5416_v29, %v5415_v42  ;;  %5822 = vmatmul.mubr.msk.f32.gmra.mxu0 %vm2192_vm0, %v2128_v32  ;;  %v5337_v42 = vpop.f32.mrf.mxu0  ;;  %v6277_v29 = vld [vmem:[%s6938_s22 + $0x5cc] ss:$16 sps:$4 sm:$0xff]  }
 0x249   : > { %v5418_v47 = vpop.f32.mrf.mxu1 }
 0x24a   : > { %v2133_v4 = vadd.f32 %v5417_v54, %v5305_v38  ;;  %v5332_v38 = vadd.f32 %v5331_v16, %v5330_v35 }
 0x24b   : > { %v5419_v7 = vpop.f32.mrf.mxu1 }
 0x24c   : > { %v5420_v27 = vadd.f32 %v5419_v7, %v5418_v47  ;;  %5824 = vmatprep.mubr.msk.f32.mxu0 %vm2192_vm0, %v2133_v4  ;;  %3583 = vmatmul.mubr.bf16.gmra.mxu1 %v6245_v18  ;;  %v5339_v47 = vpop.f32.mrf.mxu0  ;;  %v5335_v7 = vadd.f32 %v5334_v31, %v5333_v2  ;;  %v6200_v2 = vld [vmem:[%s6938_s22 + $0x420] ss:$16 sps:$4 sm:$0xff]  }
 0x24d   : > { %v5421_v56 = vpop.f32.mrf.mxu1  ;;  %3590 = vmatprep.mubr.bf16.mxu1 %v6253_v39  ;;  %v6206_v31 = vld [vmem:[%s6938_s22 + $0x440] ss:$16 sps:$4 sm:$0xff]  }
 0x24e   : > { %v2136_v10 = vadd.f32 %v5420_v27, %v5308_v52  ;;  %v6275_v52 = vld [vmem:[%s6938_s22 + $0x5c8] ss:$16 sps:$4 sm:$0xff]  }
 0x24f   : > { %v5422_v49 = vpop.f32.mrf.mxu1 }
 0x250   : > { %v5423_v41 = vadd.f32 %v5422_v49, %v5421_v56  ;;  %5825 = vmatmul.mubr.msk.f32.gmra.mxu0 %vm2192_vm0, %v2136_v10  ;;  %v5340_v56 = vpop.f32.mrf.mxu0  ;;  %v6283_v49 = vld [vmem:[%s6938_s22 + $0x5ec] ss:$16 sps:$4 sm:$0xff]  }
 0x251   : > { %v5424_v20 = vpop.f32.mrf.mxu1 }
 0x252   : > { %v2141_v30 = vadd.f32 %v5423_v41, %v5311_v62  ;;  %v5338_v62 = vadd.f32 %v5337_v42, %v5336_v55  ;;  %v6226_v42 = vld [vmem:[%s6938_s22 + $0x4a4] ss:$16 sps:$4 sm:$0xff]  }
 0x253   : > { %v5425_v11 = vpop.f32.mrf.mxu1 }
 0x254   : > { %v5426_v6 = vadd.f32 %v5425_v11, %v5424_v20  ;;  %5827 = vmatprep.mubr.msk.f32.mxu0 %vm2192_vm0, %v2141_v30  ;;  %3591 = vmatmul.mubr.bf16.gmra.mxu1 %v6251_v51  ;;  %v5342_v51 = vpop.f32.mrf.mxu0  ;;  %v5341_v11 = vadd.f32 %v5340_v56, %v5339_v47  ;;  %v4971_v47 = vld [vmem:[%s8966_s2 + $0x50] sm:$0xff] }
 0x255   : > { %v5427_v9 = vpop.f32.mrf.mxu1  ;;  %3598 = vmatprep.mubr.bf16.mxu1 %v6259_v13 }
 0x256   : > { %v2144_v33 = vadd.f32 %v5426_v6, %v5314_v61  ;;  %v6281_v61 = vld [vmem:[%s6938_s22 + $0x5e8] ss:$16 sps:$4 sm:$0xff]   ;;  %v5343_v6 = vpop.f32.mrf.mxu0 }
 0x257   : > { %v5428_v44 = vpop.f32.mrf.mxu1 }
 0x258   : > { %v5429_v15 = vadd.f32 %v5428_v44, %v5427_v9  ;;  %5828 = vmatmul.mubr.msk.f32.gmra.mxu0 %vm2192_vm0, %v2144_v33  ;;  %v5344_v44 = vadd.f32 %v5343_v6, %v5342_v51  ;;  %v6242_v51 = vld [vmem:[%s6938_s22 + $0x500] ss:$16 sps:$4 sm:$0xff]   ;;  %v4970_v6 = vld [vmem:[%s8966_s2 + $0x48] sm:$0xff] }
 0x259   : > { %v5430_v24 = vpop.f32.mrf.mxu1 }
 0x25a   : > { %v2149_v50 = vadd.f32 %v5429_v15, %v5317_v23 }
 0x25b   : > { %v5431_v60 = vpop.f32.mrf.mxu1 }
 0x25c   : > { %v5432_v53 = vadd.f32 %v5431_v60, %v5430_v24  ;;  %5830 = vmatprep.mubr.msk.f32.mxu0 %vm2192_vm0, %v2149_v50  ;;  %3599 = vmatmul.mubr.bf16.gmra.mxu1 %v6257_v19  ;;  %v6196_v19 = vld [vmem:[%s6938_s22 + $0x404] ss:$16 sps:$4 sm:$0xff]   ;;  %v6194_v50 = vld [vmem:[%s6938_s22 + $0x400] ss:$16 sps:$4 sm:$0xff]  }
 0x25d   : > { %v5433_v25 = vpop.f32.mrf.mxu1  ;;  %3606 = vmatprep.mubr.bf16.mxu1 %v6265_v28  ;;  %v6202_v28 = vld [vmem:[%s6938_s22 + $0x424] ss:$16 sps:$4 sm:$0xff]  }
 0x25e   : > { %v2152_v17 = vadd.f32 %v5432_v53, %v5320_v46 }
 0x25f   : > { %v5434_v21 = vpop.f32.mrf.mxu1 }
 0x260   : > { %v5435_v57 = vadd.f32 %v5434_v21, %v5433_v25  ;;  %5831 = vmatmul.mubr.msk.f32.gmra.mxu0 %vm2192_vm0, %v2152_v17  ;;  %v6208_v21 = vld [vmem:[%s6938_s22 + $0x444] ss:$16 sps:$4 sm:$0xff]  }
 0x261   : > { %v5436_v40 = vpop.f32.mrf.mxu1 }
 0x262   : > { %v2157_v58 = vadd.f32 %v5435_v57, %v5323_v22  ;;  %v4972_v22 = vld [vmem:[%s8966_s2 + $0x58] sm:$0xff] }
 0x263   : > { %v5437_v26 = vpop.f32.mrf.mxu1  ;;  %5901 = vmatprep.subr.mxu0 %v4972_v22 }
 0x264   : > { %v5438_v59 = vadd.f32 %v5437_v26, %v5436_v40  ;;  %5833 = vmatprep.mubr.msk.f32.mxu0 %vm2192_vm0, %v2157_v58  ;;  %3607 = vmatmul.mubr.bf16.gmra.mxu1 %v6263_v14  ;;  %v6214_v26 = vld [vmem:[%s6938_s22 + $0x464] ss:$16 sps:$4 sm:$0xff]  }
 0x265   : > { %v5439_v3 = vpop.f32.mrf.mxu1  ;;  %3614 = vmatprep.mubr.bf16.mxu1 %v6271_v8 }
 0x266   : > { %v2160_v5 = vadd.f32 %v5438_v59, %v5326_v36 }
 0x267   : > { %v5440_v1 = vpop.f32.mrf.mxu1 }
 0x268   : > { %v5441_v48 = vadd.f32 %v5440_v1, %v5439_v3  ;;  %5834 = vmatmul.mubr.msk.f32.gmra.mxu0 %vm2192_vm0, %v2160_v5  ;;  %v6212_v3 = vld [vmem:[%s6938_s22 + $0x460] ss:$16 sps:$4 sm:$0xff]   ;;  %v6220_v5 = vld [vmem:[%s6938_s22 + $0x484] ss:$16 sps:$4 sm:$0xff]  }
 0x269   : > { %v5442_v12 = vpop.f32.mrf.mxu1 }
 0x26a   : > { %v2165_v32 = vadd.f32 %v5441_v48, %v5329_v37 }
 0x26b   : > { %v5443_v0 = vpop.f32.mrf.mxu1 }
 0x26c   : > { %v5444_v54 = vadd.f32 %v5443_v0, %v5442_v12  ;;  %5836 = vmatprep.mubr.msk.f32.mxu0 %vm2192_vm0, %v2165_v32  ;;  %3615 = vmatmul.mubr.bf16.gmra.mxu1 %v6269_v34  ;;  %v6218_v34 = vld [vmem:[%s6938_s22 + $0x480] ss:$16 sps:$4 sm:$0xff]  }
 0x26d   : > { %v5445_v18 = vpop.f32.mrf.mxu1  ;;  %3622 = vmatprep.mubr.bf16.mxu1 %v6277_v29 }
 0x26e   : > { %v2168_v43 = vadd.f32 %v5444_v54, %v5332_v38  ;;  %v6224_v38 = vld [vmem:[%s6938_s22 + $0x4a0] ss:$16 sps:$4 sm:$0xff]  }
 0x26f   : > { %v5446_v4 = vpop.f32.mrf.mxu1 }
 0x270   : > { %v5447_v39 = vadd.f32 %v5446_v4, %v5445_v18  ;;  %5837 = vmatmul.mubr.msk.f32.gmra.mxu0 %vm2192_vm0, %v2168_v43  ;;  %v6232_v18 = vld [vmem:[%s6938_s22 + $0x4c4] ss:$16 sps:$4 sm:$0xff]  }
 0x271   : > { %v5448_v27 = vpop.f32.mrf.mxu1 }
 0x272   : > { %v2173_v63 = vadd.f32 %v5447_v39, %v5335_v7  ;;  %v6230_v39 = vld [vmem:[%s6938_s22 + $0x4c0] ss:$16 sps:$4 sm:$0xff]  }
 0x273   : > { %v5449_v10 = vpop.f32.mrf.mxu1 }
 0x274   : > { %v5450_v41 = vadd.f32 %v5449_v10, %v5448_v27  ;;  %5839 = vmatprep.mubr.msk.f32.mxu0 %vm2192_vm0, %v2173_v63  ;;  %3623 = vmatmul.mubr.bf16.gmra.mxu1 %v6275_v52  ;;  %v6238_v52 = vld [vmem:[%s6938_s22 + $0x4e4] ss:$16 sps:$4 sm:$0xff]   ;;  %v6236_v63 = vld [vmem:[%s6938_s22 + $0x4e0] ss:$16 sps:$4 sm:$0xff]  }
 0x275   : > { %v5451_v20 = vpop.f32.mrf.mxu1  ;;  %3630 = vmatprep.mubr.bf16.mxu1 %v6283_v49  ;;  %v6244_v10 = vld [vmem:[%s6938_s22 + $0x504] ss:$16 sps:$4 sm:$0xff]  }
 0x276   : > { %v2176_v45 = vadd.f32 %v5450_v41, %v5338_v62 }
 0x277   : > { %v5452_v30 = vpop.f32.mrf.mxu1 }
 0x278   : > { %v5453_v13 = vadd.f32 %v5452_v30, %v5451_v20  ;;  %5840 = vmatmul.mubr.msk.f32.gmra.mxu0 %vm2192_vm0, %v2176_v45  ;;  %v6250_v20 = vld [vmem:[%s6938_s22 + $0x524] ss:$16 sps:$4 sm:$0xff]  }
 0x279   : > { %v5454_v9 = vpop.f32.mrf.mxu1 }
 0x27a   : > { %v2181_v35 = vadd.f32 %v5453_v13, %v5341_v11  ;;  %v6248_v11 = vld [vmem:[%s6938_s22 + $0x520] ss:$16 sps:$4 sm:$0xff]  }
 0x27b   : > { %v5455_v33 = vpop.f32.mrf.mxu1 }
 0x27c   : > { %v5456_v23 = vadd.f32 %v5455_v33, %v5454_v9  ;;  %5842 = vmatprep.mubr.msk.f32.mxu0 %vm2192_vm0, %v2181_v35  ;;  %3631 = vmatmul.mubr.bf16.gmra.mxu1 %v6281_v61  ;;  %v6256_v61 = vld [vmem:[%s6938_s22 + $0x544] ss:$16 sps:$4 sm:$0xff]   ;;  %v6254_v33 = vld [vmem:[%s6938_s22 + $0x540] ss:$16 sps:$4 sm:$0xff]  }
 0x27d   : > { %v8153_v15 = vpop.f32.mrf.mxu1  ;;  %v4969_v35 = vld [vmem:[%s8966_s2 + $0x40] sm:$0xff] }
 0x27e   : > { %v2184_v24 = vadd.f32 %v5456_v23, %v5344_v44  ;;  %v6262_v23 = vld [vmem:[%s6938_s22 + $0x564] ss:$16 sps:$4 sm:$0xff]  }
 0x27f   : > { %v8156_v16 = vpop.f32.mrf.mxu1 }
 0x280   : > { %5843 = vmatmul.mubr.msk.f32.gmra.mxu0 %vm2192_vm0, %v2184_v24  ;;  %v6260_v24 = vld [vmem:[%s6938_s22 + $0x560] ss:$16 sps:$4 sm:$0xff]  }
 0x281   : > { %v8160_v60 = vpop.f32.mrf.mxu1  ;;  %3349 = vmatprep.mubr.bf16.mxu0 %v6196_v19 }
 0x283   : > { %v8163_v46 = vpop.f32.mrf.mxu1 }
 0x284   : > { %3350 = vmatmul.mubr.bf16.vlgmr.msra.gmra.mxu0 %v6194_v50 }
 0x285   : > { %v8165_v53 = vpop.f32.mrf.mxu1  ;;  %3357 = vmatprep.mubr.bf16.mxu0 %v6202_v28  ;;  %5902 = vmatpush3.msra.mxu0 %v4972_v22  ;;  %v6268_v28 = vld [vmem:[%s6938_s22 + $0x584] ss:$16 sps:$4 sm:$0xff]  }
 0x286   : > { %5903 = vmatprep.subr.mxu0 %v4971_v47 }
 0x287   : > { %v8167_v25 = vpop.f32.mrf.mxu1  ;;  %5904 = vmatpush3.msra.mxu0 %v4971_v47 }
 0x288   : > { %5905 = vmatprep.subr.mxu0 %v4970_v6 }
 0x289   : > { %v8170_v17 = vpop.f32.mrf.mxu1  ;;  %5906 = vmatpush3.msra.mxu0 %v4970_v6  ;;  %v6284_v6 = vld [vmem:[%s6938_s22 + $0x5e0] ss:$16 sps:$4 sm:$0xff]  }
 0x28a   : > { %5907 = vmatprep.subr.mxu0 %v4969_v35 }
 0x28b   : > { %v8176_v57 = vpop.f32.mrf.mxu1  ;;  %5908 = vmatpush3.msra.mxu0 %v4969_v35 }
 0x28c   : > { %3358 = vmatmul.mubr.bf16.gmra.mxu0 %v6200_v2 }
 0x28d   : > { %v8178_v14 = vpop.f32.mrf.mxu1  ;;  %3365 = vmatprep.mubr.bf16.mxu0 %v6208_v21  ;;  %v6266_v21 = vld [vmem:[%s6938_s22 + $0x580] ss:$16 sps:$4 sm:$0xff]  }
 0x28e   : > { %9016 = vst [vmem:[#allocation11_spill] sm:$0xff] %v8178_v14 }
 0x28f   : > { %v8180_v40 = vpop.f32.mrf.mxu1 }
 0x290   : > { %9017 = vst [vmem:[#allocation12_spill] sm:$0xff] %v8180_v40 }
 0x291   : > { %v8183_v58 = vpop.f32.mrf.mxu1 }
 0x292   : > { %9018 = vst [vmem:[#allocation13_spill] sm:$0xff] %v8183_v58 }
 0x293   : > { %v8186_v8 = vpop.f32.mrf.mxu1 }
 0x294   : > { %9019 = vst [vmem:[#allocation14_spill] sm:$0xff] %v8186_v8  ;;  %3366 = vmatmul.mubr.bf16.gmra.mxu0 %v6206_v31  ;;  %v6274_v31 = vld [vmem:[%s6938_s22 + $0x5a4] ss:$16 sps:$4 sm:$0xff]  }
 0x295   : > { %v8188_v36 = vpop.f32.mrf.mxu1  ;;  %3373 = vmatprep.mubr.bf16.mxu0 %v6214_v26 }
 0x296   : > { %9020 = vst [vmem:[#allocation15_spill] sm:$0xff] %v8188_v36 }
 0x297   : > { %v8190_v59 = vpop.f32.mrf.mxu1 }
 0x298   : > { %9021 = vst [vmem:[#allocation16_spill] sm:$0xff] %v8190_v59 }
 0x299   : > { %v8193_v55 = vpop.f32.mrf.mxu1 }
 0x29a   : > { %9022 = vst [vmem:[#allocation17_spill] sm:$0xff] %v8193_v55 }
 0x29b   : > { %v8196_v1 = vpop.f32.mrf.mxu1 }
 0x29c   : > { %9023 = vst [vmem:[#allocation18_spill] sm:$0xff] %v8196_v1  ;;  %3374 = vmatmul.mubr.bf16.gmra.mxu0 %v6212_v3 }
 0x29d   : > { %v8198_v37 = vpop.f32.mrf.mxu1  ;;  %3381 = vmatprep.mubr.bf16.mxu0 %v6220_v5  ;;  %v6272_v5 = vld [vmem:[%s6938_s22 + $0x5a0] ss:$16 sps:$4 sm:$0xff]  }
 0x29e   : > { %9024 = vst [vmem:[#allocation19_spill] sm:$0xff] %v8198_v37 }
 0x29f   : > { %v8200_v48 = vpop.f32.mrf.mxu1 }
 0x2a0   : > { %9025 = vst [vmem:[#allocation20_spill] sm:$0xff] %v8200_v48 }
 0x2a1   : > { %v8203_v12 = vpop.f32.mrf.mxu1 }
 0x2a2   : > { %9026 = vst [vmem:[#allocation21_spill] sm:$0xff] %v8203_v12 }
 0x2a3   : > { %v8206_v32 = vpop.f32.mrf.mxu1 }
 0x2a4   : > { %9027 = vst [vmem:[#allocation22_spill] sm:$0xff] %v8206_v32  ;;  %3382 = vmatmul.mubr.bf16.gmra.mxu0 %v6218_v34 }
 0x2a5   : > { %v8208_v0 = vpop.f32.mrf.mxu1  ;;  %3389 = vmatprep.mubr.bf16.mxu0 %v6226_v42  ;;  %v6280_v42 = vld [vmem:[%s6938_s22 + $0x5c4] ss:$16 sps:$4 sm:$0xff]  }
 0x2a6   : > { %9028 = vst [vmem:[#allocation23_spill] sm:$0xff] %v8208_v0 }
 0x2a7   : > { %v8210_v29 = vpop.f32.mrf.mxu1 }
 0x2a8   : > { %9029 = vst [vmem:[#allocation24_spill] sm:$0xff] %v8210_v29 }
 0x2a9   : > { %v8213_v54 = vpop.f32.mrf.mxu1 }
 0x2aa   : > { %9030 = vst [vmem:[#allocation25_spill] sm:$0xff] %v8213_v54 }
 0x2ab   : > { %v8219_v43 = vpop.f32.mrf.mxu1 }
 0x2ac   : > { %9031 = vst [vmem:[#allocation26_spill] sm:$0xff] %v8219_v43  ;;  %3390 = vmatmul.mubr.bf16.gmra.mxu0 %v6224_v38 }
 0x2ad   : > { %v8221_v4 = vpop.f32.mrf.mxu1  ;;  %3397 = vmatprep.mubr.bf16.mxu0 %v6232_v18 }
 0x2ae   : > { %9032 = vst [vmem:[#allocation3_spill] sm:$0xff] %v8221_v4 }
 0x2af   : > { %v8223_v7 = vpop.f32.mrf.mxu1 }
 0x2b0   : > { %9033 = vst [vmem:[#allocation4_spill] sm:$0xff] %v8223_v7 }
 0x2b1   : > { %v8227_v27 = vpop.f32.mrf.mxu1 }
 0x2b2   : > { %9034 = vst [vmem:[#allocation5_spill] sm:$0xff] %v8227_v27 }
 0x2b3   : > { %v8229_v56 = vpop.f32.mrf.mxu1 }
 0x2b4   : > { %3398 = vmatmul.mubr.bf16.gmra.mxu0 %v6230_v39  ;;  %9035 = vst [vmem:[#allocation6_spill] sm:$0xff] %v8229_v56 }
 0x2b5   : > { %3405 = vmatprep.mubr.bf16.mxu0 %v6238_v52  ;;  %v6278_v52 = vld [vmem:[%s6938_s22 + $0x5c0] ss:$16 sps:$4 sm:$0xff]  }
 0x2b8   : > { %v8233_v49 = vpop.f32.mrf.mxu1 }
 0x2b9   : > { %9036 = vst [vmem:[#allocation7_spill] sm:$0xff] %v8233_v49 }
 0x2ba   : > { %v8235_v62 = vpop.f32.mrf.mxu1 }
 0x2bb   : > { %9037 = vst [vmem:[#allocation8_spill] sm:$0xff] %v8235_v62 }
 0x2bc   : > { %3406 = vmatmul.mubr.bf16.gmra.mxu0 %v6236_v63 }
 0x2bd   : > { %3413 = vmatprep.mubr.bf16.mxu0 %v6244_v10  ;;  %v6286_v10 = vld [vmem:[%s6938_s22 + $0x5e4] ss:$16 sps:$4 sm:$0xff]   ;;  %s4451_s22 = sshll.u32 %s4443_s15, 5 }
 0x2be   : > { %p571_p8 = scmp.lt.s32.totalorder %s4451_s22, 63 }
 0x2c0   : > { %v8237_v41 = vpop.f32.mrf.mxu1  ;;  %s9114_s22 = smov (!%p571_p8, %s4451_s22), 63 }
 0x2c1   : > { %9038 = vst [vmem:[#allocation9_spill] sm:$0xff] %v8237_v41  ;;  %s4452_s10 = sshll.u32 %s9114_s22, 3 }
 0x2c2   : > { %v8241_v45 = vpop.f32.mrf.mxu1  ;;  %s8856_s18 = scalar_lea.vmem %s8967_s3, %s4452_s10 }
 0x2c3   : > { %9039 = vst [vmem:[#allocation10_spill] sm:$0xff] %v8241_v45 }
 0x2c4   : > { %3414 = vmatmul.mubr.bf16.gmra.mxu0 %v6242_v51  ;;  %v8243_v30 = vpop.f32.mrf.mxu1 }
 0x2c5   : > { %3421 = vmatprep.mubr.bf16.mxu0 %v6250_v20 }
 0x2c6   : > { %v8246_v13 = vpop.f32.mrf.mxu1 }
 0x2c8   : > { %v8252_v9 = vpop.f32.mrf.mxu1  ;;  %v8275_v3 = vpop.f32.mrf.mxu0 }
 0x2ca   : > { %v8258_v44 = vpop.f32.mrf.mxu1  ;;  %v8281_v38 = vpop.f32.mrf.mxu0 }
 0x2cc   : > { %3422 = vmatmul.mubr.bf16.gmra.mxu0 %v6248_v11  ;;  %v8261_v19 = vpop.f32.mrf.mxu1 }
 0x2cd   : > { %3429 = vmatprep.mubr.bf16.mxu0 %v6256_v61 }
 0x2ce   : > { %v8264_v50 = vpop.f32.mrf.mxu1 }
 0x2d0   : > { %v8267_v2 = vpop.f32.mrf.mxu1  ;;  %v8283_v18 = vpop.f32.mrf.mxu0 }
 0x2d2   : > { %v8270_v22 = vpop.f32.mrf.mxu1  ;;  %v8287_v39 = vpop.f32.mrf.mxu0 }
 0x2d4   : > { %3430 = vmatmul.mubr.bf16.gmra.mxu0 %v6254_v33  ;;  %v8273_v26 = vpop.f32.mrf.mxu1 }
 0x2d5   : > { %3437 = vmatprep.mubr.bf16.mxu0 %v6262_v23 }
 0x2d6   : > { %v8278_v34 = vpop.f32.mrf.mxu1 }
 0x2d8   : > { %v8285_v47 = vpop.f32.mrf.mxu1  ;;  %v8293_v51 = vpop.f32.mrf.mxu0 }
 0x2da   : > { %v8290_v63 = vpop.f32.mrf.mxu1  ;;  %v8297_v11 = vpop.f32.mrf.mxu0 }
 0x2dc   : > { %3438 = vmatmul.mubr.bf16.gmra.mxu0 %v6260_v24  ;;  %v8295_v20 = vpop.f32.mrf.mxu1 }
 0x2dd   : > { %3445 = vmatprep.mubr.bf16.mxu0 %v6268_v28 }
 0x2de   : > { %v8302_v35 = vpop.f32.mrf.mxu1 }
 0x2e0   : > { %v8299_v61 = vpop.f32.mrf.mxu0  ;;  %v8306_v23 = vpop.f32.mrf.mxu1 }
 0x2e2   : > { %v8304_v33 = vpop.f32.mrf.mxu0  ;;  %v8310_v28 = vpop.f32.mrf.mxu1 }
 0x2e4   : > { %3446 = vmatmul.mubr.bf16.gmra.mxu0 %v6266_v21 }
 0x2e5   : > { %3453 = vmatprep.mubr.bf16.mxu0 %v6274_v31 }
 0x2e8   : > { %v8308_v24 = vpop.f32.mrf.mxu0 }
 0x2ea   : > { %v8312_v21 = vpop.f32.mrf.mxu0 }
 0x2eb   : > { %9040 = vst [vmem:[#allocation27_spill] sm:$0xff] %v8312_v21 }
 0x2ec   : > { %3454 = vmatmul.mubr.bf16.gmra.mxu0 %v6272_v5  ;;  %v8316_v5 = vpop.f32.mrf.mxu1 }
 0x2ed   : > { %3461 = vmatprep.mubr.bf16.mxu0 %v6280_v42 }
 0x2f0   : > { %v8314_v31 = vpop.f32.mrf.mxu0 }
 0x2f1   : > { %9041 = vst [vmem:[#allocation28_spill] sm:$0xff] %v8314_v31 }
 0x2f2   : > { %v8318_v42 = vpop.f32.mrf.mxu0 }
 0x2f3   : > { %9042 = vst [vmem:[#allocation29_spill] sm:$0xff] %v8318_v42 }
 0x2f4   : > { %3462 = vmatmul.mubr.bf16.gmra.mxu0 %v6278_v52  ;;  %v8320_v52 = vpop.f32.mrf.mxu1 }
 0x2f5   : > { %3469 = vmatprep.mubr.bf16.mxu0 %v6286_v10 }
 0x2f6   : > { %v8324_v45 = vpop.f32.mrf.mxu1 }
 0x2f8   : > { %v8322_v10 = vpop.f32.mrf.mxu0  ;;  %v8330_v62 = vpop.f32.mrf.mxu1 }
 0x2f9   : > { %9043 = vst [vmem:[#allocation30_spill] sm:$0xff] %v8322_v10 }
 0x2fa   : > { %v8334_v56 = vpop.f32.mrf.mxu1 }
 0x2fc   : > { %3470 = vmatmul.mubr.bf16.gmra.mxu0 %v6284_v6  ;;  %v8326_v6 = vpop.f32.mrf.mxu0  ;;  %v8338_v7 = vpop.f32.mrf.mxu1 }
 0x2fd   : > { %9044 = vst [vmem:[#allocation31_spill] sm:$0xff] %v8326_v6 }
 0x2fe   : > { %v8344_v54 = vpop.f32.mrf.mxu1 }
 0x300   : > { %v8328_v41 = vpop.f32.mrf.mxu0  ;;  %v8348_v0 = vpop.f32.mrf.mxu1 }
 0x301   : > { %9045 = vst [vmem:[#allocation32_spill] sm:$0xff] %v8328_v41 }
 0x302   : > { %v8332_v49 = vpop.f32.mrf.mxu0  ;;  %v8352_v12 = vpop.f32.mrf.mxu1 }
 0x303   : > { %9046 = vst [vmem:[#allocation33_spill] sm:$0xff] %v8332_v49 }
 0x308   : > { %v8336_v27 = vpop.f32.mrf.mxu0 }
 0x309   : > { %9047 = vst [vmem:[#allocation34_spill] sm:$0xff] %v8336_v27  ;;  %v8358_v27 = vpop.f32.mrf.mxu1 }
 0x30a   : > { %v8340_v4 = vpop.f32.mrf.mxu0 }
 0x30b   : > { %9048 = vst [vmem:[#allocation35_spill] sm:$0xff] %v8340_v4  ;;  %v8362_v4 = vpop.f32.mrf.mxu1 }
 0x30d   : > { %v8366_v49 = vpop.f32.mrf.mxu1 }
 0x310   : > { %v8342_v43 = vpop.f32.mrf.mxu0 }
 0x311   : > { %9049 = vst [vmem:[#allocation36_spill] sm:$0xff] %v8342_v43 }
 0x312   : > { %v8346_v29 = vpop.f32.mrf.mxu0 }
 0x313   : > { %9050 = vst [vmem:[#allocation37_spill] sm:$0xff] %v8346_v29 }
 0x318   : > { %v8350_v32 = vpop.f32.mrf.mxu0 }
 0x319   : > { %9051 = vst [vmem:[#allocation38_spill] sm:$0xff] %v8350_v32  ;;  %v8372_v32 = vpop.f32.mrf.mxu1 }
 0x31a   : > { %v8354_v48 = vpop.f32.mrf.mxu0 }
 0x31b   : > { %9052 = vst [vmem:[#allocation39_spill] sm:$0xff] %v8354_v48  ;;  %v8376_v48 = vpop.f32.mrf.mxu1 }
 0x31d   : > { %v8380_v59 = vpop.f32.mrf.mxu1 }
 0x320   : > { %v8356_v37 = vpop.f32.mrf.mxu0 }
 0x321   : > { %9053 = vst [vmem:[#allocation40_spill] sm:$0xff] %v8356_v37 }
 0x322   : > { %v8360_v1 = vpop.f32.mrf.mxu0 }
 0x323   : > { %9054 = vst [vmem:[#allocation41_spill] sm:$0xff] %v8360_v1 }
 0x328   : > { %v8364_v43 = vpop.f32.mrf.mxu0 }
 0x329   : > { %9055 = vst [vmem:[#allocation42_spill] sm:$0xff] %v8364_v43  ;;  %v8386_v43 = vpop.f32.mrf.mxu1 }
 0x32a   : > { %v8368_v29 = vpop.f32.mrf.mxu0 }
 0x32b   : > { %9056 = vst [vmem:[#allocation43_spill] sm:$0xff] %v8368_v29 }
 0x330   : > { %v8370_v55 = vpop.f32.mrf.mxu0 }
 0x331   : > { %9057 = vst [vmem:[#allocation44_spill] sm:$0xff] %v8370_v55  ;;  %v8390_v55 = vpop.f32.mrf.mxu1 }
 0x332   : > { %v8374_v41 = vpop.f32.mrf.mxu0 }
 0x333   : > { %9058 = vst [vmem:[#allocation45_spill] sm:$0xff] %v8374_v41  ;;  %v5659_v41 = vadd.f32 %v8246_v13, %v8243_v30  ;;  %v5665_v30 = vadd.f32 %v8264_v50, %v8261_v19 }
 0x338   : > { %v8378_v37 = vpop.f32.mrf.mxu0 }
 0x339   : > { %9059 = vst [vmem:[#allocation46_spill] sm:$0xff] %v8378_v37  ;;  %v8394_v37 = vpop.f32.mrf.mxu1 }
 0x33a   : > { %v8382_v1 = vpop.f32.mrf.mxu0 }
 0x33b   : > { %9060 = vst [vmem:[#allocation47_spill] sm:$0xff] %v8382_v1  ;;  %v8399_v40 = vpop.f32.mrf.mxu1 }
 0x340   : > { %v8384_v6 = vpop.f32.mrf.mxu0 }
 0x341   : > { %9061 = vst [vmem:[#allocation48_spill] sm:$0xff] %v8384_v6  ;;  %v5662_v6 = vadd.f32 %v8258_v44, %v8252_v9  ;;  %v5668_v9 = vadd.f32 %v8270_v22, %v8267_v2  ;;  %v5674_v2 = vadd.f32 %v8290_v63, %v8285_v47  ;;  %v5680_v47 = vadd.f32 %v8310_v28, %v8306_v23 }
 0x342   : > { %v8388_v36 = vpop.f32.mrf.mxu0  ;;  %v5686_v23 = vadd.f32 %v8330_v62, %v8324_v45  ;;  %v5692_v62 = vadd.f32 %v8348_v0, %v8344_v54  ;;  %v5698_v0 = vadd.f32 %v8366_v49, %v8362_v4  ;;  %v5704_v4 = vadd.f32 %v8386_v43, %v8380_v59 }
 0x343   : > { %9062 = vst [vmem:[#allocation49_spill] sm:$0xff] %v8388_v36 }
 0x344   : > { %v5545_v29 = vpop.f32.mrf.mxu0 }
 0x346   : > { %v5546_v10 = vpop.f32.mrf.mxu0 }
 0x347   : > { %v5547_v8 = vadd.f32 %v5546_v10, %v5545_v29 }
 0x348   : > { %v5548_v42 = vpop.f32.mrf.mxu0 }
 0x349   : > { %v3513_v58 = vadd.f32 %v5659_v41, %v5547_v8  ;;  %v8404_v8 = vpop.f32.mrf.mxu1 }
 0x34a   : > { %v5549_v31 = vpop.f32.mrf.mxu0  ;;  %v5710_v59 = vadd.f32 %v8404_v8, %v8399_v40 }
 0x34b   : > { %v5550_v1 = vadd.f32 %v5549_v31, %v5548_v42  ;;  %5909 = vmatprep.mubr.msk.f32.mxu0 %vm2192_vm0, %v3513_v58 }
 0x34c   : > { %v5551_v36 = vpop.f32.mrf.mxu0 }
 0x34d   : > { %v3516_v21 = vadd.f32 %v5662_v6, %v5550_v1  ;;  %v8409_v1 = vpop.f32.mrf.mxu1 }
 0x34e   : > { %v5552_v14 = vpop.f32.mrf.mxu0 }
 0x34f   : > { %v5553_v29 = vadd.f32 %v5552_v14, %v5551_v36  ;;  %5910 = vmatmul.mubr.msk.f32.vlgmr.msra.gmra.mxu0 %vm2192_vm0, %v3516_v21  ;;  %v5671_v14 = vadd.f32 %v8278_v34, %v8273_v26  ;;  %v8414_v50 = vpop.f32.mrf.mxu1  ;;  %v5677_v26 = vadd.f32 %v8302_v35, %v8295_v20  ;;  %v5683_v20 = vadd.f32 %v8320_v52, %v8316_v5 }
 0x350   : > { %v5554_v13 = vpop.f32.mrf.mxu0  ;;  %v5689_v5 = vadd.f32 %v8338_v7, %v8334_v56  ;;  %v5695_v7 = vadd.f32 %v8358_v27, %v8352_v12  ;;  %v5701_v12 = vadd.f32 %v8376_v48, %v8372_v32  ;;  %v5707_v48 = vadd.f32 %v8394_v37, %v8390_v55 }
 0x351   : > { %v3521_v41 = vadd.f32 %v5665_v30, %v5553_v29  ;;  %v8419_v29 = vpop.f32.mrf.mxu1  ;;  %v5713_v55 = vadd.f32 %v8414_v50, %v8409_v1 }
 0x352   : > { %v5555_v10 = vpop.f32.mrf.mxu0 }
 0x353   : > { %v5556_v58 = vadd.f32 %v5555_v10, %v5554_v13  ;;  %5912 = vmatprep.mubr.msk.f32.mxu0 %vm2192_vm0, %v3521_v41 }
 0x354   : > { %v5557_v44 = vpop.f32.mrf.mxu0 }
 0x355   : > { %v3524_v31 = vadd.f32 %v5668_v9, %v5556_v58  ;;  %v8424_v9 = vpop.f32.mrf.mxu1 }
 0x356   : > { %v5558_v42 = vpop.f32.mrf.mxu0  ;;  %v5716_v40 = vadd.f32 %v8424_v9, %v8419_v29 }
 0x357   : > { %v5559_v36 = vadd.f32 %v5558_v42, %v5557_v44  ;;  %5913 = vmatmul.mubr.msk.f32.gmra.mxu0 %vm2192_vm0, %v3524_v31  ;;  %v8429_v42 = vpop.f32.mrf.mxu1 }
 0x358   : > { %v5560_v19 = vpop.f32.mrf.mxu0 }
 0x359   : > { %v3529_v21 = vadd.f32 %v5671_v14, %v5559_v36 }
 0x35a   : > { %v5561_v6 = vpop.f32.mrf.mxu0 }
 0x35b   : > { %v5562_v22 = vadd.f32 %v5561_v6, %v5560_v19  ;;  %5915 = vmatprep.mubr.msk.f32.mxu0 %vm2192_vm0, %v3529_v21  ;;  %v8434_v21 = vpop.f32.mrf.mxu1 }
 0x35c   : > { %v5563_v30 = vpop.f32.mrf.mxu0  ;;  %v5719_v1 = vadd.f32 %v8434_v21, %v8429_v42 }
 0x35d   : > { %v3532_v13 = vadd.f32 %v5674_v2, %v5562_v22 }
 0x35e   : > { %v5564_v41 = vpop.f32.mrf.mxu0 }
 0x35f   : > { %v5565_v34 = vadd.f32 %v5564_v41, %v5563_v30  ;;  %5916 = vmatmul.mubr.msk.f32.gmra.mxu0 %vm2192_vm0, %v3532_v13  ;;  %v8439_v30 = vpop.f32.mrf.mxu1 }
 0x360   : > { %v5566_v10 = vpop.f32.mrf.mxu0 }
 0x361   : > { %v3537_v58 = vadd.f32 %v5677_v26, %v5565_v34  ;;  %v8444_v34 = vpop.f32.mrf.mxu1 }
 0x362   : > { %v5567_v44 = vpop.f32.mrf.mxu0  ;;  %v5722_v29 = vadd.f32 %v8444_v34, %v8439_v30 }
 0x363   : > { %v5568_v63 = vadd.f32 %v5567_v44, %v5566_v10  ;;  %5918 = vmatprep.mubr.msk.f32.mxu0 %vm2192_vm0, %v3537_v58 }
 0x364   : > { %v5569_v31 = vpop.f32.mrf.mxu0 }
 0x365   : > { %v3540_v14 = vadd.f32 %v5680_v47, %v5568_v63  ;;  %v8449_v47 = vpop.f32.mrf.mxu1 }
 0x366   : > { %v5570_v36 = vpop.f32.mrf.mxu0 }
 0x367   : > { %v5571_v35 = vadd.f32 %v5570_v36, %v5569_v31  ;;  %5919 = vmatmul.mubr.msk.f32.gmra.mxu0 %vm2192_vm0, %v3540_v14  ;;  %v8454_v36 = vpop.f32.mrf.mxu1 }
 0x368   : > { %v5572_v19 = vpop.f32.mrf.mxu0  ;;  %v5725_v42 = vadd.f32 %v8454_v36, %v8449_v47 }
 0x369   : > { %v3545_v6 = vadd.f32 %v5683_v20, %v5571_v35 }
 0x36a   : > { %v5573_v2 = vpop.f32.mrf.mxu0 }
 0x36b   : > { %v5574_v28 = vadd.f32 %v5573_v2, %v5572_v19  ;;  %5921 = vmatprep.mubr.msk.f32.mxu0 %vm2192_vm0, %v3545_v6  ;;  %v8459_v6 = vpop.f32.mrf.mxu1 }
 0x36c   : > { %v5575_v22 = vpop.f32.mrf.mxu0 }
 0x36d   : > { %v3548_v13 = vadd.f32 %v5686_v23, %v5574_v28 }
 0x36e   : > { %v5576_v41 = vpop.f32.mrf.mxu0 }
 0x36f   : > { %v5577_v52 = vadd.f32 %v5576_v41, %v5575_v22  ;;  %5922 = vmatmul.mubr.msk.f32.gmra.mxu0 %vm2192_vm0, %v3548_v13  ;;  %v5727_v22 = vpop.f32.mrf.mxu1 }
 0x370   : > { %v5578_v26 = vpop.f32.mrf.mxu0 }
 0x371   : > { %v3553_v10 = vadd.f32 %v5689_v5, %v5577_v52  ;;  %v5729_v52 = vpop.f32.mrf.mxu1 }
 0x372   : > { %v5579_v58 = vpop.f32.mrf.mxu0 }
 0x373   : > { %v5580_v45 = vadd.f32 %v5579_v58, %v5578_v26  ;;  %5924 = vmatprep.mubr.msk.f32.mxu0 %vm2192_vm0, %v3553_v10 }
 0x374   : > { %v5581_v44 = vpop.f32.mrf.mxu0 }
 0x375   : > { %v3556_v63 = vadd.f32 %v5692_v62, %v5580_v45  ;;  %v5730_v62 = vpop.f32.mrf.mxu1 }
 0x376   : > { %v5582_v31 = vpop.f32.mrf.mxu0 }
 0x377   : > { %v5583_v56 = vadd.f32 %v5582_v31, %v5581_v44  ;;  %5925 = vmatmul.mubr.msk.f32.gmra.mxu0 %vm2192_vm0, %v3556_v63  ;;  %v5732_v31 = vpop.f32.mrf.mxu1 }
 0x378   : > { %v5584_v14 = vpop.f32.mrf.mxu0 }
 0x379   : > { %v3561_v20 = vadd.f32 %v5695_v7, %v5583_v56 }
 0x37a   : > { %v5585_v35 = vpop.f32.mrf.mxu0 }
 0x37b   : > { %v5586_v54 = vadd.f32 %v5585_v35, %v5584_v14  ;;  %5927 = vmatprep.mubr.msk.f32.mxu0 %vm2192_vm0, %v3561_v20  ;;  %v5733_v20 = vpop.f32.mrf.mxu1 }
 0x37c   : > { %v5587_v19 = vpop.f32.mrf.mxu0 }
 0x37d   : > { %v3564_v2 = vadd.f32 %v5698_v0, %v5586_v54 }
 0x37e   : > { %v5588_v23 = vpop.f32.mrf.mxu0 }
 0x37f   : > { %v5589_v27 = vadd.f32 %v5588_v23, %v5587_v19  ;;  %5928 = vmatmul.mubr.msk.f32.gmra.mxu0 %vm2192_vm0, %v3564_v2  ;;  %v5735_v19 = vpop.f32.mrf.mxu1 }
 0x380   : > { %v5590_v28 = vpop.f32.mrf.mxu0 }
 0x381   : > { %v3569_v13 = vadd.f32 %v5701_v12, %v5589_v27  ;;  %v5736_v27 = vpop.f32.mrf.mxu1 }
 0x382   : > { %v5591_v41 = vpop.f32.mrf.mxu0 }
 0x383   : > { %v5592_v49 = vadd.f32 %v5591_v41, %v5590_v28  ;;  %5930 = vmatprep.mubr.msk.f32.mxu0 %vm2192_vm0, %v3569_v13 }
 0x384   : > { %v5593_v5 = vpop.f32.mrf.mxu0 }
 0x385   : > { %v3572_v26 = vadd.f32 %v5704_v4, %v5592_v49  ;;  %v5738_v4 = vpop.f32.mrf.mxu1 }
 0x386   : > { %v5594_v10 = vpop.f32.mrf.mxu0 }
 0x387   : > { %v5595_v32 = vadd.f32 %v5594_v10, %v5593_v5  ;;  %5931 = vmatmul.mubr.msk.f32.gmra.mxu0 %vm2192_vm0, %v3572_v26  ;;  %v5739_v10 = vpop.f32.mrf.mxu1 }
 0x388   : > { %v5596_v58 = vpop.f32.mrf.mxu0 }
 0x389   : > { %v3577_v45 = vadd.f32 %v5707_v48, %v5595_v32 }
 0x38a   : > { %v5597_v44 = vpop.f32.mrf.mxu0 }
 0x38b   : > { %v5598_v43 = vadd.f32 %v5597_v44, %v5596_v58  ;;  %5933 = vmatprep.mubr.msk.f32.mxu0 %vm2192_vm0, %v3577_v45  ;;  %v5728_v58 = vadd.f32 %v5727_v22, %v8459_v6  ;;  %v5741_v45 = vpop.f32.mrf.mxu1 }
 0x38c   : > { %v5599_v63 = vpop.f32.mrf.mxu0 }
 0x38d   : > { %v3580_v7 = vadd.f32 %v5710_v59, %v5598_v43  ;;  %v5731_v43 = vadd.f32 %v5730_v62, %v5729_v52  ;;  %v5742_v36 = vpop.f32.mrf.mxu1 }
 0x38e   : > { %v5600_v56 = vpop.f32.mrf.mxu0 }
 0x38f   : > { %v5601_v37 = vadd.f32 %v5600_v56, %v5599_v63  ;;  %5934 = vmatmul.mubr.msk.f32.gmra.mxu0 %vm2192_vm0, %v3580_v7  ;;  %v5744_v22 = vpop.f32.mrf.mxu1 }
 0x390   : > { %v5602_v14 = vpop.f32.mrf.mxu0 }
 0x391   : > { %v3585_v35 = vadd.f32 %v5713_v55, %v5601_v37  ;;  %v5734_v55 = vadd.f32 %v5733_v20, %v5732_v31  ;;  %v5745_v62 = vpop.f32.mrf.mxu1 }
 0x392   : > { %v5603_v0 = vpop.f32.mrf.mxu0 }
 0x393   : > { %v5604_v8 = vadd.f32 %v5603_v0, %v5602_v14  ;;  %5936 = vmatprep.mubr.msk.f32.mxu0 %vm2192_vm0, %v3585_v35  ;;  %v5737_v0 = vadd.f32 %v5736_v27, %v5735_v19  ;;  %v5747_v20 = vpop.f32.mrf.mxu1 }
 0x394   : > { %v5605_v54 = vpop.f32.mrf.mxu0 }
 0x395   : > { %v3588_v2 = vadd.f32 %v5716_v40, %v5604_v8  ;;  %v5748_v27 = vpop.f32.mrf.mxu1 }
 0x396   : > { %v5606_v23 = vpop.f32.mrf.mxu0 }
 0x397   : > { %v5607_v50 = vadd.f32 %v5606_v23, %v5605_v54  ;;  %5937 = vmatmul.mubr.msk.f32.gmra.mxu0 %vm2192_vm0, %v3588_v2  ;;  %v5740_v2 = vadd.f32 %v5739_v10, %v5738_v4  ;;  %v5750_v4 = vpop.f32.mrf.mxu1 }
 0x398   : > { %v5608_v12 = vpop.f32.mrf.mxu0 }
 0x399   : > { %v3593_v28 = vadd.f32 %v5719_v1, %v5607_v50  ;;  %v5751_v10 = vpop.f32.mrf.mxu1 }
 0x39a   : > { %v5609_v13 = vpop.f32.mrf.mxu0 }
 0x39b   : > { %v5610_v9 = vadd.f32 %v5609_v13, %v5608_v12  ;;  %5939 = vmatprep.mubr.msk.f32.mxu0 %vm2192_vm0, %v3593_v28  ;;  %v5743_v12 = vadd.f32 %v5742_v36, %v5741_v45 }
 0x39c   : > { %v5611_v41 = vpop.f32.mrf.mxu0 }
 0x39d   : > { %v3596_v49 = vadd.f32 %v5722_v29, %v5610_v9  ;;  %v5746_v9 = vadd.f32 %v5745_v62, %v5744_v22 }
 0x39e   : > { %v5612_v5 = vpop.f32.mrf.mxu0 }
 0x39f   : > { %v5613_v21 = vadd.f32 %v5612_v5, %v5611_v41  ;;  %5940 = vmatmul.mubr.msk.f32.gmra.mxu0 %vm2192_vm0, %v3596_v49 }
 0x3a0   : > { %v5614_v26 = vpop.f32.mrf.mxu0 }
 0x3a1   : > { %v3601_v48 = vadd.f32 %v5725_v42, %v5613_v21  ;;  %v5749_v21 = vadd.f32 %v5748_v27, %v5747_v20 }
 0x3a2   : > { %v5615_v32 = vpop.f32.mrf.mxu0 }
 0x3a3   : > { %v5616_v30 = vadd.f32 %v5615_v32, %v5614_v26  ;;  %5942 = vmatprep.mubr.msk.f32.mxu0 %vm2192_vm0, %v3601_v48 }
 0x3a4   : > { %v5617_v34 = vpop.f32.mrf.mxu0 }
 0x3a5   : > { %v3604_v44 = vadd.f32 %v5728_v58, %v5616_v30  ;;  %v5752_v30 = vadd.f32 %v5751_v10, %v5750_v4 }
 0x3a6   : > { %v5618_v59 = vpop.f32.mrf.mxu0 }
 0x3a7   : > { %v5619_v63 = vadd.f32 %v5618_v59, %v5617_v34  ;;  %5943 = vmatmul.mubr.msk.f32.gmra.mxu0 %vm2192_vm0, %v3604_v44  ;;  %v2682_v44 = vadd.f32 %v8153_v15, %v8275_v3 }
 0x3a8   : > { %v5620_v47 = vpop.f32.mrf.mxu0 }
 0x3a9   : > { %v3609_v7 = vadd.f32 %v5731_v43, %v5619_v63  ;;  %v2677_v43 = vadd.f32 %v8156_v16, %v8281_v38  ;;  %v2687_v16 = vadd.f32 %v8163_v46, %v8287_v39  ;;  %v2697_v46 = vadd.f32 %v8167_v25, %v8297_v11 }
 0x3aa   : > { %v5621_v56 = vpop.f32.mrf.mxu0  ;;  %v2707_v25 = vadd.f32 %v8176_v57, %v8304_v33 }
 0x3ab   : > { %v5622_v37 = vadd.f32 %v5621_v56, %v5620_v47  ;;  %5945 = vmatprep.mubr.msk.f32.mxu0 %vm2192_vm0, %v3609_v7  ;;  %v2692_v56 = vadd.f32 %v8160_v60, %v8283_v18  ;;  %v2702_v60 = vadd.f32 %v8165_v53, %v8293_v51  ;;  %v2712_v51 = vadd.f32 %v8170_v17, %v8299_v61 }
 0x3ac   : > { %v5623_v6 = vpop.f32.mrf.mxu0 }
 0x3ad   : > { %v3612_v14 = vadd.f32 %v5734_v55, %v5622_v37 }
 0x3ae   : > { %v5624_v35 = vpop.f32.mrf.mxu0 }
 0x3af   : > { %v5625_v40 = vadd.f32 %v5624_v35, %v5623_v6  ;;  %5946 = vmatmul.mubr.msk.f32.gmra.mxu0 %vm2192_vm0, %v3612_v14 }
 0x3b0   : > { %v5626_v52 = vpop.f32.mrf.mxu0 }
 0x3b1   : > { %v3617_v8 = vadd.f32 %v5737_v0, %v5625_v40 }
 0x3b2   : > { %v5627_v54 = vpop.f32.mrf.mxu0 }
 0x3b3   : > { %v5628_v23 = vadd.f32 %v5627_v54, %v5626_v52  ;;  %5948 = vmatprep.mubr.msk.f32.mxu0 %vm2192_vm0, %v3617_v8 }
 0x3b4   : > { %v5629_v31 = vpop.f32.mrf.mxu0 }
 0x3b5   : > { %v3620_v1 = vadd.f32 %v5740_v2, %v5628_v23  ;;  %v9063_v2 = vld [vmem:[#allocation11_spill] sm:$0xff] }
 0x3b6   : > { %v5630_v50 = vpop.f32.mrf.mxu0  ;;  %v2722_v17 = vadd.f32 %v9063_v2, %v8308_v24  ;;  %v9064_v23 = vld [vmem:[#allocation27_spill] sm:$0xff] }
 0x3b7   : > { %v5631_v28 = vadd.f32 %v5630_v50, %v5629_v31  ;;  %5949 = vmatmul.mubr.msk.f32.gmra.mxu0 %vm2192_vm0, %v3620_v1  ;;  %v9065_v31 = vld [vmem:[#allocation12_spill] sm:$0xff] }
 0x3b8   : > { %v5632_v19 = vpop.f32.mrf.mxu0  ;;  %v2717_v57 = vadd.f32 %v9065_v31, %v9064_v23  ;;  %v9082_v23 = vld [vmem:[#allocation36_spill] sm:$0xff]  ;;  %v9083_v31 = vld [vmem:[#allocation21_spill] sm:$0xff] }
 0x3b9   : > { %v3625_v13 = vadd.f32 %v5743_v12, %v5631_v28  ;;  %v9066_v28 = vld [vmem:[#allocation28_spill] sm:$0xff] }
 0x3ba   : > { %v5633_v29 = vpop.f32.mrf.mxu0 }
 0x3bb   : > { %v5634_v41 = vadd.f32 %v5633_v29, %v5632_v19  ;;  %5951 = vmatprep.mubr.msk.f32.mxu0 %vm2192_vm0, %v3625_v13  ;;  %v9067_v19 = vld [vmem:[#allocation13_spill] sm:$0xff]  ;;  %v9069_v29 = vld [vmem:[#allocation14_spill] sm:$0xff] }
 0x3bc   : > { %v5635_v49 = vpop.f32.mrf.mxu0  ;;  %v2732_v24 = vadd.f32 %v9067_v19, %v9066_v28  ;;  %v9068_v13 = vld [vmem:[#allocation29_spill] sm:$0xff] }
 0x3bd   : > { %v3628_v5 = vadd.f32 %v5746_v9, %v5634_v41  ;;  %v2727_v9 = vadd.f32 %v9069_v29, %v9068_v13 }
 0x3be   : > { %v5636_v42 = vpop.f32.mrf.mxu0 }
 0x3bf   : > { %v5637_v26 = vadd.f32 %v5636_v42, %v5635_v49  ;;  %5952 = vmatmul.mubr.msk.f32.gmra.mxu0 %vm2192_vm0, %v3628_v5 }
 0x3c0   : > { %v5638_v48 = vpop.f32.mrf.mxu0 }
 0x3c1   : > { %v3633_v32 = vadd.f32 %v5749_v21, %v5637_v26  ;;  %v9070_v21 = vld [vmem:[#allocation30_spill] sm:$0xff]  ;;  %v9071_v26 = vld [vmem:[#allocation15_spill] sm:$0xff] }
 0x3c2   : > { %v5639_v58 = vpop.f32.mrf.mxu0  ;;  %v2742_v10 = vadd.f32 %v9071_v26, %v9070_v21  ;;  %v9088_v21 = vld [vmem:[#allocation39_spill] sm:$0xff]  ;;  %v9089_v26 = vld [vmem:[#allocation24_spill] sm:$0xff] }
 0x3c3   : > { %v5640_v34 = vadd.f32 %v5639_v58, %v5638_v48  ;;  %5954 = vmatprep.mubr.msk.f32.mxu0 %vm2192_vm0, %v3633_v32  ;;  %v9072_v32 = vld [vmem:[#allocation31_spill] sm:$0xff]  ;;  %v9073_v58 = vld [vmem:[#allocation16_spill] sm:$0xff] }
 0x3c5   : > { %v3636_v45 = vadd.f32 %v5752_v30, %v5640_v34  ;;  %v2737_v30 = vadd.f32 %v9073_v58, %v9072_v32 }
 0x3c7   : > { %5955 = vmatmul.mubr.msk.f32.gmra.mxu0 %vm2192_vm0, %v3636_v45 }
 0x40f   : > { %v5911_v59 = vpop.f32.mrf.mxu0 }
 0x410   : > { %v8503_v63 = vadd.f32 %v5911_v59, %v2682_v44 }
 0x411   : > { %v3806_v47 = vpop.f32.mrf.mxu0 }
 0x412   : > { %v8505_v36 = vadd.f32 %v3806_v47, %v2677_v43  ;;  %v4000_v7 = vsel %vm2192_vm0, %v8503_v63, -inf  ;;  %v9074_v47 = vld [vmem:[#allocation32_spill] sm:$0xff] }
 0x413   : > { %4001 = vmax.xlane.f32.xlu0 %v4000_v7  ;;  %v9075_v7 = vld [vmem:[#allocation17_spill] sm:$0xff] }
 0x414   : > { %v3997_v55 = vsel %vm2192_vm0, %v8505_v36, -inf }
 0x417   : > { %v5914_v15 = vpop.f32.mrf.mxu0  ;;  %3998 = vmax.xlane.f32.xlu0 %v3997_v55 }
 0x418   : > { %v8515_v3 = vadd.f32 %v5914_v15, %v2692_v56  ;;  %v2752_v56 = vadd.f32 %v9075_v7, %v9074_v47  ;;  %v9076_v15 = vld [vmem:[#allocation33_spill] sm:$0xff] }
 0x419   : > { %v3816_v38 = vpop.f32.mrf.mxu0 }
 0x41a   : > { %v8517_v37 = vadd.f32 %v3816_v38, %v2687_v16  ;;  %v4006_v6 = vsel %vm2192_vm0, %v8515_v3, -inf  ;;  %v9077_v16 = vld [vmem:[#allocation18_spill] sm:$0xff] }
 0x41b   : > { %4007 = vmax.xlane.f32.xlu1 %v4006_v6  ;;  %v2747_v38 = vadd.f32 %v9077_v16, %v9076_v15 }
 0x41c   : > { %v4003_v18 = vsel %vm2192_vm0, %v8517_v37, -inf }
 0x41f   : > { %v5917_v22 = vpop.f32.mrf.mxu0  ;;  %4004 = vmax.xlane.f32.xlu1 %v4003_v18 }
 0x420   : > { %v8527_v39 = vadd.f32 %v5917_v22, %v2702_v60 }
 0x421   : > { %v3826_v14 = vpop.f32.mrf.mxu0 }
 0x422   : > { %v8529_v35 = vadd.f32 %v3826_v14, %v2697_v46  ;;  %v4012_v0 = vsel %vm2192_vm0, %v8527_v39, -inf  ;;  %v9078_v14 = vld [vmem:[#allocation34_spill] sm:$0xff] }
 0x423   : > { %4013 = vmax.xlane.f32.xlu1 %v4012_v0  ;;  %v9079_v0 = vld [vmem:[#allocation19_spill] sm:$0xff] }
 0x424   : > { %v4009_v53 = vsel %vm2192_vm0, %v8529_v35, -inf }
 0x425   : > { %4010 = vmax.xlane.f32.xlu0 %v4009_v53  ;;  %v2762_v53 = vadd.f32 %v9079_v0, %v9078_v14  ;;  %v9094_v14 = vld [vmem:[#allocation42_spill] sm:$0xff]  ;;  %v9095_v0 = vld [vmem:[#allocation3_spill] sm:$0xff] }
 0x427   : > { %v5920_v40 = vpop.f32.mrf.mxu0 }
 0x428   : > { %v8539_v11 = vadd.f32 %v5920_v40, %v2712_v51  ;;  %v9080_v40 = vld [vmem:[#allocation35_spill] sm:$0xff] }
 0x429   : > { %v3836_v52 = vpop.f32.mrf.mxu0 }
 0x42a   : > { %v8541_v62 = vadd.f32 %v3836_v52, %v2707_v25  ;;  %v4018_v8 = vsel %vm2192_vm0, %v8539_v11, -inf  ;;  %v9081_v25 = vld [vmem:[#allocation20_spill] sm:$0xff] }
 0x42b   : > { %4019 = vmax.xlane.f32.xlu1 %v4018_v8  ;;  %v2757_v52 = vadd.f32 %v9081_v25, %v9080_v40  ;;  %v9096_v40 = vld [vmem:[#allocation43_spill] sm:$0xff]  ;;  %v9097_v25 = vld [vmem:[#allocation4_spill] sm:$0xff] }
 0x42c   : > { %v4015_v54 = vsel %vm2192_vm0, %v8541_v62, -inf }
 0x42d   : > { %4016 = vmax.xlane.f32.xlu0 %v4015_v54 }
 0x42f   : > { %v5923_v61 = vpop.f32.mrf.mxu0 }
 0x430   : > { %v8551_v33 = vadd.f32 %v5923_v61, %v2722_v17 }
 0x431   : > { %v3846_v20 = vpop.f32.mrf.mxu0 }
 0x432   : > { %v8553_v1 = vadd.f32 %v3846_v20, %v2717_v57  ;;  %v4024_v50 = vsel %vm2192_vm0, %v8551_v33, -inf  ;;  %v2772_v57 = vadd.f32 %v9083_v31, %v9082_v23 }
 0x433   : > { %4025 = vmax.xlane.f32.xlu1 %v4024_v50  ;;  %v9084_v50 = vld [vmem:[#allocation37_spill] sm:$0xff] }
 0x434   : > { %v4021_v12 = vsel %vm2192_vm0, %v8553_v1, -inf }
 0x435   : > { %4022 = vmax.xlane.f32.xlu0 %v4021_v12  ;;  %v9085_v12 = vld [vmem:[#allocation22_spill] sm:$0xff] }
 0x436   : > { %v2767_v28 = vadd.f32 %v9085_v12, %v9084_v50 }
 0x437   : > { %v5926_v27 = vpop.f32.mrf.mxu0 }
 0x438   : > { %v8563_v41 = vadd.f32 %v5926_v27, %v2732_v24 }
 0x439   : > { %v3856_v4 = vpop.f32.mrf.mxu0 }
 0x43a   : > { %v8565_v49 = vadd.f32 %v3856_v4, %v2727_v9  ;;  %v4030_v5 = vsel %vm2192_vm0, %v8563_v41, -inf  ;;  %v9086_v9 = vld [vmem:[#allocation38_spill] sm:$0xff]  ;;  %v9087_v4 = vld [vmem:[#allocation23_spill] sm:$0xff] }
 0x43b   : > { %4031 = vmax.xlane.f32.xlu1 %v4030_v5  ;;  %v2782_v5 = vadd.f32 %v9087_v4, %v9086_v9 }
 0x43c   : > { %v4027_v42 = vsel %vm2192_vm0, %v8565_v49, -inf }
 0x43d   : > { %4028 = vmax.xlane.f32.xlu0 %v4027_v42 }
 0x43f   : > { %v5929_v48 = vpop.f32.mrf.mxu0 }
 0x440   : > { %v8575_v34 = vadd.f32 %v5929_v48, %v2742_v10  ;;  %v2777_v10 = vadd.f32 %v9089_v26, %v9088_v21  ;;  %v9102_v21 = vld [vmem:[#allocation46_spill] sm:$0xff]  ;;  %v9103_v26 = vld [vmem:[#allocation7_spill] sm:$0xff] }
 0x441   : > { %v3866_v45 = vpop.f32.mrf.mxu0 }
 0x442   : > { %v8577_v44 = vadd.f32 %v3866_v45, %v2737_v30  ;;  %v4036_v59 = vsel %vm2192_vm0, %v8575_v34, -inf }
 0x443   : > { %4037 = vmax.xlane.f32.xlu1 %v4036_v59  ;;  %v9090_v59 = vld [vmem:[#allocation40_spill] sm:$0xff] }
 0x444   : > { %v4033_v43 = vsel %vm2192_vm0, %v8577_v44, -inf }
 0x445   : > { %4034 = vmax.xlane.f32.xlu0 %v4033_v43  ;;  %v9091_v43 = vld [vmem:[#allocation25_spill] sm:$0xff] }
 0x446   : > { %v2792_v47 = vadd.f32 %v9091_v43, %v9090_v59 }
 0x447   : > { %v5932_v55 = vpop.f32.mrf.mxu0 }
 0x448   : > { %v8587_v6 = vadd.f32 %v5932_v55, %v2752_v56  ;;  %v9092_v56 = vld [vmem:[#allocation41_spill] sm:$0xff]  ;;  %v9093_v55 = vld [vmem:[#allocation26_spill] sm:$0xff] }
 0x449   : > { %v3876_v60 = vpop.f32.mrf.mxu0  ;;  %v2787_v15 = vadd.f32 %v9093_v55, %v9092_v56 }
 0x44a   : > { %v8589_v18 = vadd.f32 %v3876_v60, %v2747_v38  ;;  %v4042_v22 = vsel %vm2192_vm0, %v8587_v6, -inf }
 0x44b   : > { %4043 = vmax.xlane.f32.xlu1 %v4042_v22 }
 0x44c   : > { %v4039_v46 = vsel %vm2192_vm0, %v8589_v18, -inf }
 0x44d   : > { %4040 = vmax.xlane.f32.xlu0 %v4039_v46 }
 0x44f   : > { %v5935_v51 = vpop.f32.mrf.mxu0 }
 0x450   : > { %v8599_v8 = vadd.f32 %v5935_v51, %v2762_v53  ;;  %v2802_v53 = vadd.f32 %v9095_v0, %v9094_v14  ;;  %v9108_v14 = vld [vmem:[#allocation49_spill] sm:$0xff]  ;;  %v9109_v0 = vld [vmem:[#allocation10_spill] sm:$0xff] }
 0x451   : > { %v3886_v54 = vpop.f32.mrf.mxu0 }
 0x452   : > { %v8601_v2 = vadd.f32 %v3886_v54, %v2757_v52  ;;  %v4048_v17 = vsel %vm2192_vm0, %v8599_v8, -inf  ;;  %v2797_v52 = vadd.f32 %v9097_v25, %v9096_v40 }
 0x453   : > { %4049 = vmax.xlane.f32.xlu1 %v4048_v17 }
 0x454   : > { %v4045_v61 = vsel %vm2192_vm0, %v8601_v2, -inf }
 0x455   : > { %4046 = vmax.xlane.f32.xlu0 %v4045_v61 }
 0x457   : > { %v5938_v20 = vpop.f32.mrf.mxu0 }
 0x458   : > { %v8611_v19 = vadd.f32 %v5938_v20, %v2772_v57  ;;  %v9098_v57 = vld [vmem:[#allocation44_spill] sm:$0xff]  ;;  %v9099_v20 = vld [vmem:[#allocation5_spill] sm:$0xff] }
 0x459   : > { %v3896_v24 = vpop.f32.mrf.mxu0  ;;  %v2812_v50 = vadd.f32 %v9099_v20, %v9098_v57 }
 0x45a   : > { %v8613_v27 = vadd.f32 %v3896_v24, %v2767_v28  ;;  %v4054_v13 = vsel %vm2192_vm0, %v8611_v19, -inf  ;;  %v9100_v28 = vld [vmem:[#allocation45_spill] sm:$0xff]  ;;  %v9101_v24 = vld [vmem:[#allocation6_spill] sm:$0xff] }
 0x45b   : > { %4055 = vmax.xlane.f32.xlu1 %v4054_v13  ;;  %v2807_v13 = vadd.f32 %v9101_v24, %v9100_v28 }
 0x45c   : > { %v4051_v29 = vsel %vm2192_vm0, %v8613_v27, -inf }
 0x45d   : > { %4052 = vmax.xlane.f32.xlu0 %v4051_v29 }
 0x45f   : > { %v5941_v42 = vpop.f32.mrf.mxu0 }
 0x460   : > { %v8623_v48 = vadd.f32 %v5941_v42, %v2782_v5 }
 0x461   : > { %v3906_v32 = vpop.f32.mrf.mxu0 }
 0x462   : > { %v8625_v58 = vadd.f32 %v3906_v32, %v2777_v10  ;;  %v4060_v30 = vsel %vm2192_vm0, %v8623_v48, -inf  ;;  %v2822_v10 = vadd.f32 %v9103_v26, %v9102_v21 }
 0x463   : > { %4061 = vmax.xlane.f32.xlu1 %v4060_v30  ;;  %v9104_v30 = vld [vmem:[#allocation47_spill] sm:$0xff] }
 0x464   : > { %v4057_v45 = vsel %vm2192_vm0, %v8625_v58, -inf }
 0x465   : > { %4058 = vmax.xlane.f32.xlu0 %v4057_v45  ;;  %v9105_v45 = vld [vmem:[#allocation8_spill] sm:$0xff] }
 0x466   : > { %v2817_v59 = vadd.f32 %v9105_v45, %v9104_v30 }
 0x467   : > { %v5944_v7 = vpop.f32.mrf.mxu0 }
 0x468   : > { %v8635_v16 = vadd.f32 %v5944_v7, %v2792_v47 }
 0x469   : > { %v3916_v38 = vpop.f32.mrf.mxu0 }
 0x46a   : > { %v8637_v60 = vadd.f32 %v3916_v38, %v2787_v15  ;;  %v4066_v22 = vsel %vm2192_vm0, %v8635_v16, -inf  ;;  %v9106_v15 = vld [vmem:[#allocation48_spill] sm:$0xff]  ;;  %v9107_v38 = vld [vmem:[#allocation9_spill] sm:$0xff] }
 0x46b   : > { %4067 = vmax.xlane.f32.xlu1 %v4066_v22  ;;  %v2832_v22 = vadd.f32 %v9107_v38, %v9106_v15 }
 0x46c   : > { %v4063_v46 = vsel %vm2192_vm0, %v8637_v60, -inf }
 0x46d   : > { %4064 = vmax.xlane.f32.xlu0 %v4063_v46 }
 0x46f   : > { %v5947_v51 = vpop.f32.mrf.mxu0 }
 0x470   : > { %v8647_v54 = vadd.f32 %v5947_v51, %v2802_v53  ;;  %v2827_v53 = vadd.f32 %v9109_v0, %v9108_v14 }
 0x471   : > { %v3926_v17 = vpop.f32.mrf.mxu0 }
 0x472   : > { %v8649_v61 = vadd.f32 %v3926_v17, %v2797_v52  ;;  %v4072_v23 = vsel %vm2192_vm0, %v8647_v54, -inf }
 0x473   : > { %4073 = vmax.xlane.f32.xlu1 %v4072_v23 }
 0x474   : > { %v4069_v31 = vsel %vm2192_vm0, %v8649_v61, -inf }
 0x475   : > { %4070 = vmax.xlane.f32.xlu0 %v4069_v31 }
 0x477   : > { %v5950_v12 = vpop.f32.mrf.mxu0 }
 0x478   : > { %v8659_v29 = vadd.f32 %v5950_v12, %v2812_v50 }
 0x479   : > { %v3936_v9 = vpop.f32.mrf.mxu0 }
 0x47a   : > { %v8661_v4 = vadd.f32 %v3936_v9, %v2807_v13  ;;  %v4078_v5 = vsel %vm2192_vm0, %v8659_v29, -inf }
 0x47b   : > { %4079 = vmax.xlane.f32.xlu1 %v4078_v5 }
 0x47c   : > { %v4075_v42 = vsel %vm2192_vm0, %v8661_v4, -inf }
 0x47d   : > { %4076 = vmax.xlane.f32.xlu0 %v4075_v42 }
 0x47f   : > { %v5953_v32 = vpop.f32.mrf.mxu0 }
 0x480   : > { %v8671_v43 = vadd.f32 %v5953_v32, %v2822_v10 }
 0x481   : > { %v3946_v47 = vpop.f32.mrf.mxu0 }
 0x482   : > { %v8673_v7 = vadd.f32 %v3946_v47, %v2817_v59  ;;  %v4084_v56 = vsel %vm2192_vm0, %v8671_v43, -inf }
 0x483   : > { %4085 = vmax.xlane.f32.xlu1 %v4084_v56 }
 0x484   : > { %v4081_v55 = vsel %vm2192_vm0, %v8673_v7, -inf }
 0x485   : > { %4082 = vmax.xlane.f32.xlu0 %v4081_v55 }
 0x487   : > { %v5956_v46 = vpop.f32.mrf.mxu0 }
 0x488   : > { %v8683_v51 = vadd.f32 %v5956_v46, %v2832_v22 }
 0x489   : > { %v3956_v40 = vpop.f32.mrf.mxu0 }
 0x48a   : > { %v8685_v25 = vadd.f32 %v3956_v40, %v2827_v53  ;;  %v4090_v52 = vsel %vm2192_vm0, %v8683_v51, -inf }
 0x48b   : > { %4091 = vmax.xlane.f32.xlu1 %v4090_v52 }
 0x48c   : > { %v4087_v17 = vsel %vm2192_vm0, %v8685_v25, -inf }
 0x48d   : > { %4088 = vmax.xlane.f32.xlu0 %v4087_v17 }
 0x49c   : > { %v4002_v23 = vpop.xlane.xlu0 %4001 }
 0x49d   : > { %v4094_v31 = vsub.f32 %v8503_v63, %v4002_v23 }
 0x49f   : > { %v4127_v57 = vmul.f32 1.442695, %v4094_v31 }
 0x4a0   : > { %v3999_v20 = vpop.xlane.xlu0 %3998 }
 0x4a1   : > { %6287 = vpow2.f32 %v4127_v57  ;;  %v4093_v50 = vsub.f32 %v8505_v36, %v3999_v20 }
 0x4a3   : > { %v4125_v12 = vmul.f32 1.442695, %v4093_v50 }
 0x4a4   : > { %v4008_v28 = vpop.xlane.xlu1 %4007 }
 0x4a5   : > { %6289 = vpow2.f32 %v4125_v12  ;;  %v4096_v24 = vsub.f32 %v8515_v3, %v4008_v28 }
 0x4a7   : > { %v4131_v13 = vmul.f32 1.442695, %v4096_v24 }
 0x4a8   : > { %v4005_v9 = vpop.xlane.xlu1 %4004 }
 0x4a9   : > { %6291 = vpow2.f32 %v4131_v13  ;;  %v4095_v5 = vsub.f32 %v8517_v37, %v4005_v9 }
 0x4ab   : > { %v4129_v42 = vmul.f32 1.442695, %v4095_v5 }
 0x4ac   : > { %v4014_v21 = vpop.xlane.xlu1 %4013 }
 0x4ad   : > { %6293 = vpow2.f32 %v4129_v42  ;;  %v4098_v63 = vsub.f32 %v8527_v39, %v4014_v21 }
 0x4ae   : > { %v8696_v26 = vpop.eup %6287  ;;  %v4011_v10 = vpop.xlane.xlu0 %4010 }
 0x4af   : > { %v4135_v32 = vmul.f32 1.442695, %v4098_v63  ;;  %v4097_v36 = vsub.f32 %v8529_v35, %v4011_v10  ;;  %v4192_v30 = vsel %vm2192_vm0, %v8696_v26, 0.0 }
 0x4b0   : > { %4193 = vadd.xlane.f32.xlu1 %v4192_v30 }
 0x4b1   : > { %6295 = vpow2.f32 %v4135_v32  ;;  %v4133_v3 = vmul.f32 1.442695, %v4097_v36 }
 0x4b2   : > { %v8701_v45 = vpop.eup %6289 }
 0x4b3   : > { %6297 = vpow2.f32 %v4133_v3  ;;  %v4189_v37 = vsel %vm2192_vm0, %v8701_v45, 0.0 }
 0x4b4   : > { %v4020_v59 = vpop.xlane.xlu1 %4019  ;;  %4190 = vadd.xlane.f32.xlu0 %v4189_v37 }
 0x4b5   : > { %v4100_v39 = vsub.f32 %v8539_v11, %v4020_v59 }
 0x4b6   : > { %v8706_v47 = vpop.eup %6291  ;;  %v4017_v56 = vpop.xlane.xlu0 %4016 }
 0x4b7   : > { %v4139_v35 = vmul.f32 1.442695, %v4100_v39  ;;  %v4099_v55 = vsub.f32 %v8541_v62, %v4017_v56  ;;  %v4198_v15 = vsel %vm2192_vm0, %v8706_v47, 0.0 }
 0x4b8   : > { %4199 = vadd.xlane.f32.xlu1 %v4198_v15 }
 0x4b9   : > { %6299 = vpow2.f32 %v4139_v35  ;;  %v4137_v38 = vmul.f32 1.442695, %v4099_v55 }
 0x4ba   : > { %v8711_v22 = vpop.eup %6293 }
 0x4bb   : > { %6301 = vpow2.f32 %v4137_v38  ;;  %v4195_v46 = vsel %vm2192_vm0, %v8711_v22, 0.0 }
 0x4bc   : > { %v4026_v14 = vpop.xlane.xlu1 %4025  ;;  %4196 = vadd.xlane.f32.xlu0 %v4195_v46 }
 0x4bd   : > { %v4102_v11 = vsub.f32 %v8551_v33, %v4026_v14 }
 0x4be   : > { %v8716_v0 = vpop.eup %6295  ;;  %v4023_v53 = vpop.xlane.xlu0 %4022 }
 0x4bf   : > { %v4143_v62 = vmul.f32 1.442695, %v4102_v11  ;;  %v4101_v40 = vsub.f32 %v8553_v1, %v4023_v53  ;;  %v4204_v52 = vsel %vm2192_vm0, %v8716_v0, 0.0 }
 0x4c0   : > { %v8721_v17 = vpop.eup %6297  ;;  %4205 = vadd.xlane.f32.xlu1 %v4204_v52 }
 0x4c1   : > { %6303 = vpow2.f32 %v4143_v62  ;;  %v4141_v23 = vmul.f32 1.442695, %v4101_v40  ;;  %v4201_v31 = vsel %vm2192_vm0, %v8721_v17, 0.0 }
 0x4c2   : > { %4202 = vadd.xlane.f32.xlu0 %v4201_v31 }
 0x4c3   : > { %6305 = vpow2.f32 %v4141_v23 }
 0x4c4   : > { %v4032_v33 = vpop.xlane.xlu1 %4031 }
 0x4c5   : > { %v4104_v57 = vsub.f32 %v8563_v41, %v4032_v33 }
 0x4c6   : > { %v8726_v20 = vpop.eup %6299  ;;  %v4029_v50 = vpop.xlane.xlu0 %4028 }
 0x4c7   : > { %v4147_v1 = vmul.f32 1.442695, %v4104_v57  ;;  %v4103_v12 = vsub.f32 %v8565_v49, %v4029_v50  ;;  %v4210_v28 = vsel %vm2192_vm0, %v8726_v20, 0.0 }
 0x4c8   : > { %v8731_v24 = vpop.eup %6301  ;;  %4211 = vadd.xlane.f32.xlu1 %v4210_v28 }
 0x4c9   : > { %6307 = vpow2.f32 %v4147_v1  ;;  %v4145_v13 = vmul.f32 1.442695, %v4103_v12  ;;  %v4207_v9 = vsel %vm2192_vm0, %v8731_v24, 0.0 }
 0x4ca   : > { %4208 = vadd.xlane.f32.xlu0 %v4207_v9 }
 0x4cb   : > { %6309 = vpow2.f32 %v4145_v13 }
 0x4cc   : > { %v4038_v41 = vpop.xlane.xlu1 %4037 }
 0x4cd   : > { %v4106_v5 = vsub.f32 %v8575_v34, %v4038_v41 }
 0x4ce   : > { %v8736_v42 = vpop.eup %6303  ;;  %v4035_v21 = vpop.xlane.xlu0 %4034 }
 0x4cf   : > { %v4151_v49 = vmul.f32 1.442695, %v4106_v5  ;;  %v4105_v63 = vsub.f32 %v8577_v44, %v4035_v21  ;;  %v4216_v10 = vsel %vm2192_vm0, %v8736_v42, 0.0 }
 0x4d0   : > { %v8741_v32 = vpop.eup %6305  ;;  %4217 = vadd.xlane.f32.xlu1 %v4216_v10 }
 0x4d1   : > { %6311 = vpow2.f32 %v4151_v49  ;;  %v4149_v36 = vmul.f32 1.442695, %v4105_v63  ;;  %v4213_v30 = vsel %vm2192_vm0, %v8741_v32, 0.0 }
 0x4d2   : > { %4214 = vadd.xlane.f32.xlu0 %v4213_v30 }
 0x4d3   : > { %6313 = vpow2.f32 %v4149_v36 }
 0x4d4   : > { %v4044_v34 = vpop.xlane.xlu1 %4043 }
 0x4d5   : > { %v4108_v3 = vsub.f32 %v8587_v6, %v4044_v34 }
 0x4d6   : > { %v8746_v37 = vpop.eup %6307  ;;  %v4041_v59 = vpop.xlane.xlu0 %4040 }
 0x4d7   : > { %v4155_v44 = vmul.f32 1.442695, %v4108_v3  ;;  %v4107_v39 = vsub.f32 %v8589_v18, %v4041_v59  ;;  %v4222_v56 = vsel %vm2192_vm0, %v8746_v37, 0.0 }
 0x4d8   : > { %v8751_v35 = vpop.eup %6309  ;;  %4223 = vadd.xlane.f32.xlu1 %v4222_v56 }
 0x4d9   : > { %6315 = vpow2.f32 %v4155_v44  ;;  %v4153_v55 = vmul.f32 1.442695, %v4107_v39  ;;  %v4219_v15 = vsel %vm2192_vm0, %v8751_v35, 0.0 }
 0x4da   : > { %4220 = vadd.xlane.f32.xlu0 %v4219_v15 }
 0x4db   : > { %6317 = vpow2.f32 %v4153_v55 }
 0x4dc   : > { %v4050_v6 = vpop.xlane.xlu1 %4049 }
 0x4dd   : > { %v4110_v38 = vsub.f32 %v8599_v8, %v4050_v6 }
 0x4de   : > { %v8756_v46 = vpop.eup %6311  ;;  %v4047_v14 = vpop.xlane.xlu0 %4046 }
 0x4df   : > { %v4159_v18 = vmul.f32 1.442695, %v4110_v38  ;;  %v4109_v11 = vsub.f32 %v8601_v2, %v4047_v14  ;;  %v4228_v53 = vsel %vm2192_vm0, %v8756_v46, 0.0 }
 0x4e0   : > { %v8761_v62 = vpop.eup %6313  ;;  %4229 = vadd.xlane.f32.xlu1 %v4228_v53 }
 0x4e1   : > { %6319 = vpow2.f32 %v4159_v18  ;;  %v4157_v40 = vmul.f32 1.442695, %v4109_v11  ;;  %v4225_v52 = vsel %vm2192_vm0, %v8761_v62, 0.0 }
 0x4e2   : > { %4226 = vadd.xlane.f32.xlu0 %v4225_v52 }
 0x4e3   : > { %6321 = vpow2.f32 %v4157_v40 }
 0x4e4   : > { %v4056_v8 = vpop.xlane.xlu1 %4055 }
 0x4e5   : > { %v4112_v23 = vsub.f32 %v8611_v19, %v4056_v8 }
 0x4e6   : > { %v8766_v31 = vpop.eup %6315  ;;  %v4053_v33 = vpop.xlane.xlu0 %4052 }
 0x4e7   : > { %v4163_v2 = vmul.f32 1.442695, %v4112_v23  ;;  %v4111_v57 = vsub.f32 %v8613_v27, %v4053_v33  ;;  %v4234_v50 = vsel %vm2192_vm0, %v8766_v31, 0.0 }
 0x4e8   : > { %v8771_v1 = vpop.eup %6317  ;;  %4235 = vadd.xlane.f32.xlu1 %v4234_v50 }
 0x4e9   : > { %6323 = vpow2.f32 %v4163_v2  ;;  %v4161_v12 = vmul.f32 1.442695, %v4111_v57  ;;  %v4231_v28 = vsel %vm2192_vm0, %v8771_v1, 0.0 }
 0x4ea   : > { %4232 = vadd.xlane.f32.xlu0 %v4231_v28 }
 0x4eb   : > { %6325 = vpow2.f32 %v4161_v12 }
 0x4ec   : > { %v4062_v19 = vpop.xlane.xlu1 %4061 }
 0x4ed   : > { %v4114_v13 = vsub.f32 %v8623_v48, %v4062_v19 }
 0x4ee   : > { %v8776_v9 = vpop.eup %6319  ;;  %v4059_v41 = vpop.xlane.xlu0 %4058 }
 0x4ef   : > { %v4167_v27 = vmul.f32 1.442695, %v4114_v13  ;;  %v4113_v5 = vsub.f32 %v8625_v58, %v4059_v41  ;;  %v4240_v21 = vsel %vm2192_vm0, %v8776_v9, 0.0 }
 0x4f0   : > { %v8781_v49 = vpop.eup %6321  ;;  %4241 = vadd.xlane.f32.xlu1 %v4240_v21 }
 0x4f1   : > { %6327 = vpow2.f32 %v4167_v27  ;;  %v4165_v63 = vmul.f32 1.442695, %v4113_v5  ;;  %v4237_v10 = vsel %vm2192_vm0, %v8781_v49, 0.0 }
 0x4f2   : > { %4238 = vadd.xlane.f32.xlu0 %v4237_v10 }
 0x4f3   : > { %6329 = vpow2.f32 %v4165_v63 }
 0x4f4   : > { %v4068_v48 = vpop.xlane.xlu1 %4067 }
 0x4f5   : > { %v4116_v36 = vsub.f32 %v8635_v16, %v4068_v48 }
 0x4f6   : > { %v8786_v30 = vpop.eup %6323  ;;  %v4065_v34 = vpop.xlane.xlu0 %4064 }
 0x4f7   : > { %v4171_v58 = vmul.f32 1.442695, %v4116_v36  ;;  %v4115_v3 = vsub.f32 %v8637_v60, %v4065_v34  ;;  %v4246_v59 = vsel %vm2192_vm0, %v8786_v30, 0.0 }
 0x4f8   : > { %v8791_v44 = vpop.eup %6325  ;;  %4247 = vadd.xlane.f32.xlu1 %v4246_v59 }
 0x4f9   : > { %6331 = vpow2.f32 %v4171_v58  ;;  %v4169_v39 = vmul.f32 1.442695, %v4115_v3  ;;  %v4243_v56 = vsel %vm2192_vm0, %v8791_v44, 0.0 }
 0x4fa   : > { %4244 = vadd.xlane.f32.xlu0 %v4243_v56 }
 0x4fb   : > { %6333 = vpow2.f32 %v4169_v39 }
 0x4fc   : > { %v4074_v16 = vpop.xlane.xlu1 %4073 }
 0x4fd   : > { %v4118_v55 = vsub.f32 %v8647_v54, %v4074_v16 }
 0x4fe   : > { %v8796_v15 = vpop.eup %6327  ;;  %v4071_v6 = vpop.xlane.xlu0 %4070 }
 0x4ff   : > { %v4175_v60 = vmul.f32 1.442695, %v4118_v55  ;;  %v4117_v38 = vsub.f32 %v8649_v61, %v4071_v6  ;;  %v4252_v14 = vsel %vm2192_vm0, %v8796_v15, 0.0 }
 0x500   : > { %v8801_v18 = vpop.eup %6329  ;;  %4253 = vadd.xlane.f32.xlu1 %v4252_v14 }
 0x501   : > { %6335 = vpow2.f32 %v4175_v60  ;;  %v4173_v11 = vmul.f32 1.442695, %v4117_v38  ;;  %v4249_v53 = vsel %vm2192_vm0, %v8801_v18, 0.0 }
 0x502   : > { %4250 = vadd.xlane.f32.xlu0 %v4249_v53 }
 0x503   : > { %6337 = vpow2.f32 %v4173_v11 }
 0x504   : > { %v4080_v54 = vpop.xlane.xlu1 %4079 }
 0x505   : > { %v4120_v40 = vsub.f32 %v8659_v29, %v4080_v54 }
 0x506   : > { %v8806_v52 = vpop.eup %6331  ;;  %v4077_v8 = vpop.xlane.xlu0 %4076 }
 0x507   : > { %v4179_v61 = vmul.f32 1.442695, %v4120_v40  ;;  %v4119_v23 = vsub.f32 %v8661_v4, %v4077_v8  ;;  %v4258_v33 = vsel %vm2192_vm0, %v8806_v52, 0.0 }
 0x508   : > { %v8811_v2 = vpop.eup %6333  ;;  %4259 = vadd.xlane.f32.xlu1 %v4258_v33 }
 0x509   : > { %6339 = vpow2.f32 %v4179_v61  ;;  %v4177_v57 = vmul.f32 1.442695, %v4119_v23  ;;  %v4255_v50 = vsel %vm2192_vm0, %v8811_v2, 0.0 }
 0x50a   : > { %4256 = vadd.xlane.f32.xlu0 %v4255_v50 }
 0x50b   : > { %6341 = vpow2.f32 %v4177_v57 }
 0x50c   : > { %v4086_v29 = vpop.xlane.xlu1 %4085 }
 0x50d   : > { %v4122_v12 = vsub.f32 %v8671_v43, %v4086_v29 }
 0x50e   : > { %v8816_v28 = vpop.eup %6335  ;;  %v4083_v19 = vpop.xlane.xlu0 %4082 }
 0x50f   : > { %v4183_v4 = vmul.f32 1.442695, %v4122_v12  ;;  %v4121_v13 = vsub.f32 %v8673_v7, %v4083_v19  ;;  %v4264_v41 = vsel %vm2192_vm0, %v8816_v28, 0.0 }
 0x510   : > { %v8821_v27 = vpop.eup %6337  ;;  %4265 = vadd.xlane.f32.xlu1 %v4264_v41 }
 0x511   : > { %6343 = vpow2.f32 %v4183_v4  ;;  %v4181_v5 = vmul.f32 1.442695, %v4121_v13  ;;  %v4261_v21 = vsel %vm2192_vm0, %v8821_v27, 0.0 }
 0x512   : > { %4262 = vadd.xlane.f32.xlu0 %v4261_v21 }
 0x513   : > { %6345 = vpow2.f32 %v4181_v5 }
 0x514   : > { %v4092_v43 = vpop.xlane.xlu1 %4091 }
 0x515   : > { %v4124_v63 = vsub.f32 %v8683_v51, %v4092_v43 }
 0x516   : > { %v8826_v10 = vpop.eup %6339  ;;  %v4089_v48 = vpop.xlane.xlu0 %4088 }
 0x517   : > { %v4187_v7 = vmul.f32 1.442695, %v4124_v63  ;;  %v4123_v36 = vsub.f32 %v8685_v25, %v4089_v48  ;;  %v4270_v34 = vsel %vm2192_vm0, %v8826_v10, 0.0 }
 0x518   : > { %v8831_v58 = vpop.eup %6341  ;;  %4271 = vadd.xlane.f32.xlu1 %v4270_v34 }
 0x519   : > { %6347 = vpow2.f32 %v4187_v7  ;;  %v4185_v3 = vmul.f32 1.442695, %v4123_v36  ;;  %v4267_v59 = vsel %vm2192_vm0, %v8831_v58, 0.0 }
 0x51a   : > { %4268 = vadd.xlane.f32.xlu0 %v4267_v59 }
 0x51b   : > { %6349 = vpow2.f32 %v4185_v3 }
 0x51e   : > { %v8835_v51 = vpop.eup %6343 }
 0x51f   : > { %v4276_v39 = vsel %vm2192_vm0, %v8835_v51, 0.0 }
 0x520   : > { %v8839_v25 = vpop.eup %6345  ;;  %4277 = vadd.xlane.f32.xlu1 %v4276_v39 }
 0x521   : > { %v4273_v56 = vsel %vm2192_vm0, %v8839_v25, 0.0 }
 0x522   : > { %4274 = vadd.xlane.f32.xlu0 %v4273_v56 }
 0x526   : > { %v8843_v16 = vpop.eup %6347 }
 0x527   : > { %v4282_v55 = vsel %vm2192_vm0, %v8843_v16, 0.0 }
 0x528   : > { %v8847_v6 = vpop.eup %6349  ;;  %4283 = vadd.xlane.f32.xlu1 %v4282_v55 }
 0x529   : > { %v4279_v60 = vsel %vm2192_vm0, %v8847_v6, 0.0 }
 0x52a   : > { %4280 = vadd.xlane.f32.xlu0 %v4279_v60 }
 0x539   : > { %v4194_v38 = vpop.xlane.xlu1 %4193 }
 0x53a   : > { %6351 = vrcp.f32 %v4194_v38 }
 0x53d   : > { %v4191_v14 = vpop.xlane.xlu0 %4190 }
 0x53e   : > { %6353 = vrcp.f32 %v4191_v14 }
 0x541   : > { %v4200_v11 = vpop.xlane.xlu1 %4199 }
 0x542   : > { %6355 = vrcp.f32 %v4200_v11 }
 0x545   : > { %v4197_v53 = vpop.xlane.xlu0 %4196 }
 0x546   : > { %6357 = vrcp.f32 %v4197_v53 }
 0x547   : > { %v6352_v54 = vpop.eup %6351 }
 0x548   : > { %v4288_v40 = vmul.f32 %v6352_v54, %v8696_v26 }
 0x549   : > { %v4206_v8 = vpop.xlane.xlu1 %4205 }
 0x54a   : > { %4350 = vst.msk [vmem:[%s8856_s18 + $0x8] sm:$0xff] %vm2192_vm0, %v4288_v40  ;;  %6359 = vrcp.f32 %v4206_v8 }
 0x54b   : > { %v6354_v61 = vpop.eup %6353  ;;  %v4203_v23 = vpop.xlane.xlu0 %4202 }
 0x54c   : > { %v4286_v33 = vmul.f32 %v6354_v61, %v8701_v45  ;;  %6361 = vrcp.f32 %v4203_v23 }
 0x54e   : > { %4349 = vst.msk [vmem:[%s8856_s18] sm:$0xff] %vm2192_vm0, %v4286_v33 }
 0x54f   : > { %v6356_v57 = vpop.eup %6355 }
 0x550   : > { %v4292_v50 = vmul.f32 %v6356_v57, %v8706_v47 }
 0x551   : > { %v4212_v29 = vpop.xlane.xlu1 %4211 }
 0x552   : > { %4352 = vst.msk [vmem:[%s8856_s18 + $0x18] sm:$0xff] %vm2192_vm0, %v4292_v50  ;;  %6363 = vrcp.f32 %v4212_v29 }
 0x553   : > { %v6358_v26 = vpop.eup %6357  ;;  %v4209_v12 = vpop.xlane.xlu0 %4208 }
 0x554   : > { %v4290_v19 = vmul.f32 %v6358_v26, %v8711_v22  ;;  %6365 = vrcp.f32 %v4209_v12 }
 0x556   : > { %4351 = vst.msk [vmem:[%s8856_s18 + $0x10] sm:$0xff] %vm2192_vm0, %v4290_v19 }
 0x557   : > { %v6360_v45 = vpop.eup %6359 }
 0x558   : > { %v4296_v4 = vmul.f32 %v6360_v45, %v8716_v0 }
 0x559   : > { %v6362_v13 = vpop.eup %6361  ;;  %v4218_v41 = vpop.xlane.xlu1 %4217 }
 0x55a   : > { %4354 = vst.msk [vmem:[%s8856_s18 + $0x28] sm:$0xff] %vm2192_vm0, %v4296_v4  ;;  %v4294_v47 = vmul.f32 %v6362_v13, %v8721_v17  ;;  %6367 = vrcp.f32 %v4218_v41 }
 0x55b   : > { %v4215_v5 = vpop.xlane.xlu0 %4214 }
 0x55c   : > { %4353 = vst.msk [vmem:[%s8856_s18 + $0x20] sm:$0xff] %vm2192_vm0, %v4294_v47  ;;  %6369 = vrcp.f32 %v4215_v5 }
 0x55f   : > { %v6364_v22 = vpop.eup %6363 }
 0x560   : > { %v4300_v21 = vmul.f32 %v6364_v22, %v8726_v20 }
 0x561   : > { %v6366_v43 = vpop.eup %6365  ;;  %v4224_v63 = vpop.xlane.xlu1 %4223 }
 0x562   : > { %4356 = vst.msk [vmem:[%s8856_s18 + $0x38] sm:$0xff] %vm2192_vm0, %v4300_v21  ;;  %v4298_v0 = vmul.f32 %v6366_v43, %v8731_v24  ;;  %6371 = vrcp.f32 %v4224_v63 }
 0x563   : > { %v4221_v48 = vpop.xlane.xlu0 %4220 }
 0x564   : > { %4355 = vst.msk [vmem:[%s8856_s18 + $0x30] sm:$0xff] %vm2192_vm0, %v4298_v0  ;;  %6373 = vrcp.f32 %v4221_v48 }
 0x567   : > { %v6368_v17 = vpop.eup %6367 }
 0x568   : > { %v4304_v7 = vmul.f32 %v6368_v17, %v8736_v42 }
 0x569   : > { %v6370_v36 = vpop.eup %6369  ;;  %v4230_v34 = vpop.xlane.xlu1 %4229 }
 0x56a   : > { %4358 = vst.msk [vmem:[%s8856_s18 + $0x48] sm:$0xff] %vm2192_vm0, %v4304_v7  ;;  %v4302_v20 = vmul.f32 %v6370_v36, %v8741_v32  ;;  %6375 = vrcp.f32 %v4230_v34 }
 0x56b   : > { %v4227_v3 = vpop.xlane.xlu0 %4226 }
 0x56c   : > { %4357 = vst.msk [vmem:[%s8856_s18 + $0x40] sm:$0xff] %vm2192_vm0, %v4302_v20  ;;  %6377 = vrcp.f32 %v4227_v3 }
 0x56f   : > { %v6372_v24 = vpop.eup %6371 }
 0x570   : > { %v4308_v59 = vmul.f32 %v6372_v24, %v8746_v37 }
 0x571   : > { %v6374_v39 = vpop.eup %6373  ;;  %v4236_v56 = vpop.xlane.xlu1 %4235 }
 0x572   : > { %4360 = vst.msk [vmem:[%s8856_s18 + $0x58] sm:$0xff] %vm2192_vm0, %v4308_v59  ;;  %v4306_v42 = vmul.f32 %v6374_v39, %v8751_v35  ;;  %6379 = vrcp.f32 %v4236_v56 }
 0x573   : > { %v4233_v55 = vpop.xlane.xlu0 %4232 }
 0x574   : > { %4359 = vst.msk [vmem:[%s8856_s18 + $0x50] sm:$0xff] %vm2192_vm0, %v4306_v42  ;;  %6381 = vrcp.f32 %v4233_v55 }
 0x577   : > { %v6376_v32 = vpop.eup %6375 }
 0x578   : > { %v4312_v60 = vmul.f32 %v6376_v32, %v8756_v46 }
 0x579   : > { %v6378_v38 = vpop.eup %6377  ;;  %v4242_v14 = vpop.xlane.xlu1 %4241 }
 0x57a   : > { %4362 = vst.msk [vmem:[%s8856_s18 + $0x68] sm:$0xff] %vm2192_vm0, %v4312_v60  ;;  %v4310_v37 = vmul.f32 %v6378_v38, %v8761_v62  ;;  %6383 = vrcp.f32 %v4242_v14 }
 0x57b   : > { %v4239_v11 = vpop.xlane.xlu0 %4238 }
 0x57c   : > { %4361 = vst.msk [vmem:[%s8856_s18 + $0x60] sm:$0xff] %vm2192_vm0, %v4310_v37  ;;  %6385 = vrcp.f32 %v4239_v11 }
 0x57f   : > { %v6380_v35 = vpop.eup %6379 }
 0x580   : > { %v4316_v53 = vmul.f32 %v6380_v35, %v8766_v31 }
 0x581   : > { %v6382_v54 = vpop.eup %6381  ;;  %v4248_v40 = vpop.xlane.xlu1 %4247 }
 0x582   : > { %4364 = vst.msk [vmem:[%s8856_s18 + $0x78] sm:$0xff] %vm2192_vm0, %v4316_v53  ;;  %v4314_v46 = vmul.f32 %v6382_v54, %v8771_v1  ;;  %6387 = vrcp.f32 %v4248_v40 }
 0x583   : > { %v4245_v8 = vpop.xlane.xlu0 %4244 }
 0x584   : > { %4363 = vst.msk [vmem:[%s8856_s18 + $0x70] sm:$0xff] %vm2192_vm0, %v4314_v46  ;;  %6389 = vrcp.f32 %v4245_v8 }
 0x587   : > { %v6384_v62 = vpop.eup %6383 }
 0x588   : > { %v4320_v61 = vmul.f32 %v6384_v62, %v8776_v9 }
 0x589   : > { %v6386_v23 = vpop.eup %6385  ;;  %v4254_v33 = vpop.xlane.xlu1 %4253 }
 0x58a   : > { %4366 = vst.msk [vmem:[%s8856_s18 + $0x88] sm:$0xff] %vm2192_vm0, %v4320_v61  ;;  %v4318_v31 = vmul.f32 %v6386_v23, %v8781_v49  ;;  %6391 = vrcp.f32 %v4254_v33 }
 0x58b   : > { %v4251_v57 = vpop.xlane.xlu0 %4250 }
 0x58c   : > { %4365 = vst.msk [vmem:[%s8856_s18 + $0x80] sm:$0xff] %vm2192_vm0, %v4318_v31  ;;  %6393 = vrcp.f32 %v4251_v57 }
 0x58f   : > { %v6388_v1 = vpop.eup %6387 }
 0x590   : > { %v4324_v50 = vmul.f32 %v6388_v1, %v8786_v30 }
 0x591   : > { %v6390_v29 = vpop.eup %6389  ;;  %v4260_v26 = vpop.xlane.xlu1 %4259 }
 0x592   : > { %4368 = vst.msk [vmem:[%s8856_s18 + $0x98] sm:$0xff] %vm2192_vm0, %v4324_v50  ;;  %v4322_v9 = vmul.f32 %v6390_v29, %v8791_v44  ;;  %6395 = vrcp.f32 %v4260_v26 }
 0x593   : > { %v4257_v12 = vpop.xlane.xlu0 %4256 }
 0x594   : > { %4367 = vst.msk [vmem:[%s8856_s18 + $0x90] sm:$0xff] %vm2192_vm0, %v4322_v9  ;;  %6397 = vrcp.f32 %v4257_v12 }
 0x597   : > { %v6392_v49 = vpop.eup %6391 }
 0x598   : > { %v4328_v19 = vmul.f32 %v6392_v49, %v8796_v15 }
 0x599   : > { %v6394_v45 = vpop.eup %6393  ;;  %v4266_v4 = vpop.xlane.xlu1 %4265 }
 0x59a   : > { %4370 = vst.msk [vmem:[%s8856_s18 + $0xa8] sm:$0xff] %vm2192_vm0, %v4328_v19  ;;  %v4326_v30 = vmul.f32 %v6394_v45, %v8801_v18  ;;  %6399 = vrcp.f32 %v4266_v4 }
 0x59b   : > { %v4263_v13 = vpop.xlane.xlu0 %4262 }
 0x59c   : > { %4369 = vst.msk [vmem:[%s8856_s18 + $0xa0] sm:$0xff] %vm2192_vm0, %v4326_v30  ;;  %6401 = vrcp.f32 %v4263_v13 }
 0x59f   : > { %v6396_v44 = vpop.eup %6395 }
 0x5a0   : > { %v4332_v41 = vmul.f32 %v6396_v44, %v8806_v52 }
 0x5a1   : > { %v6398_v47 = vpop.eup %6397  ;;  %v4272_v5 = vpop.xlane.xlu1 %4271 }
 0x5a2   : > { %4372 = vst.msk [vmem:[%s8856_s18 + $0xb8] sm:$0xff] %vm2192_vm0, %v4332_v41  ;;  %v4330_v15 = vmul.f32 %v6398_v47, %v8811_v2  ;;  %6403 = vrcp.f32 %v4272_v5 }
 0x5a3   : > { %v4269_v22 = vpop.xlane.xlu0 %4268 }
 0x5a4   : > { %4371 = vst.msk [vmem:[%s8856_s18 + $0xb0] sm:$0xff] %vm2192_vm0, %v4330_v15  ;;  %6405 = vrcp.f32 %v4269_v22 }
 0x5a7   : > { %v6400_v18 = vpop.eup %6399 }
 0x5a8   : > { %v4336_v21 = vmul.f32 %v6400_v18, %v8816_v28 }
 0x5a9   : > { %v6402_v43 = vpop.eup %6401  ;;  %v4278_v63 = vpop.xlane.xlu1 %4277 }
 0x5aa   : > { %4374 = vst.msk [vmem:[%s8856_s18 + $0xc8] sm:$0xff] %vm2192_vm0, %v4336_v21  ;;  %v4334_v52 = vmul.f32 %v6402_v43, %v8821_v27  ;;  %6407 = vrcp.f32 %v4278_v63 }
 0x5ab   : > { %v4275_v0 = vpop.xlane.xlu0 %4274 }
 0x5ac   : > { %4373 = vst.msk [vmem:[%s8856_s18 + $0xc0] sm:$0xff] %vm2192_vm0, %v4334_v52  ;;  %6409 = vrcp.f32 %v4275_v0 }
 0x5af   : > { %v6404_v2 = vpop.eup %6403 }
 0x5b0   : > { %v4340_v48 = vmul.f32 %v6404_v2, %v8826_v10 }
 0x5b1   : > { %v6406_v17 = vpop.eup %6405  ;;  %v4284_v7 = vpop.xlane.xlu1 %4283 }
 0x5b2   : > { %4376 = vst.msk [vmem:[%s8856_s18 + $0xd8] sm:$0xff] %vm2192_vm0, %v4340_v48  ;;  %v4338_v28 = vmul.f32 %v6406_v17, %v8831_v58  ;;  %6411 = vrcp.f32 %v4284_v7 }
 0x5b3   : > { %v4281_v27 = vpop.xlane.xlu0 %4280 }
 0x5b4   : > { %4375 = vst.msk [vmem:[%s8856_s18 + $0xd0] sm:$0xff] %vm2192_vm0, %v4338_v28  ;;  %6413 = vrcp.f32 %v4281_v27 }
 0x5b7   : > { %v6408_v36 = vpop.eup %6407 }
 0x5b8   : > { %v4344_v34 = vmul.f32 %v6408_v36, %v8835_v51 }
 0x5b9   : > { %v6410_v20 = vpop.eup %6409 }
 0x5ba   : > { %4378 = vst.msk [vmem:[%s8856_s18 + $0xe8] sm:$0xff] %vm2192_vm0, %v4344_v34  ;;  %v4342_v10 = vmul.f32 %v6410_v20, %v8839_v25 }
 0x5bc   : > { %4377 = vst.msk [vmem:[%s8856_s18 + $0xe0] sm:$0xff] %vm2192_vm0, %v4342_v10 }
 0x5bf   : > { %v6412_v3 = vpop.eup %6411 }
 0x5c0   : > { %v4348_v24 = vmul.f32 %v6412_v3, %v8843_v16 }
 0x5c1   : > { %v6414_v58 = vpop.eup %6413 }
 0x5c2   : > { %4380 = vst.msk [vmem:[%s8856_s18 + $0xf8] sm:$0xff] %vm2192_vm0, %v4348_v24  ;;  %v4346_v59 = vmul.f32 %v6414_v58, %v8847_v6 }
 0x5c4   : > { %4379 = vst.msk [vmem:[%s8856_s18 + $0xf0] sm:$0xff] %vm2192_vm0, %v4346_v59 }
 0x5c5 PF: > { %p10_p9 = scmp.ge.s32.totalorder %s6476_s16, 4   ;;  %s9110_s12 = smov %s6433_s13 }
 0x5c6   : > { %s9111_s13 = smov %s6485_s19  ;;  %s9112_s14 = smov %s6476_s16 }
 0x5c7   :  { %12 = sbr.rel (!%p10_p9) target bundleno = 2 (0x2), region = 96 }

// kernel: gae_forward.7
= control target key start
LH: loop header
LB: loop body
LE: loop exit
PB: predicated region body
PF: predicated region fallthrough
CT: control target
= control target key end

     0   :  { %s2173_s12 = smov 0   ;;  %s2175_s13 = smov 0   ;;  %s2614_s0 = inlined_call_operand.vmem [shape: bf16[1,512,512], index: 0, kind: input, shape index: {}]   ;;  %s2615_s1 = inlined_call_operand.vmem [shape: f32[1,512,32], index: 1, kind: input, shape index: {}]   ;;  %s2616_s2 = inlined_call_operand.vmem [shape: f32[1,32,32], index: 2, kind: input, shape index: {}]   ;;  %s2617_s3 = inlined_call_operand.vmem [shape: f32[1,512,32], index: 3, kind: output, shape index: {}]  }
   0x1   :  { %s2177_s14 = smov 0  }
   0x2 LB: > { %s22_s15 = sadd.s32 1, %s2147_s13  ;;  %p1572_p0 = scmp.ge.s32.totalorder %s2151_s14, 1  ;;  %s2151_s14 = sphi %s2177_s14, %s13_s14   ;;  %s2147_s13 = sphi %s2175_s13, %s2619_s13   ;;  %s2143_s12 = sphi %s2173_s12, %s2618_s12  }
   0x3   : > { %p23_p1 = scmp.ge.s32.totalorder %s22_s15, 2  ;;  %p179_p2 = scmp.lt.s32.totalorder %s2151_s14, 3 }
   0x5   : > { %s2621_s15 = smov (%p23_p1, %s22_s15), 0  ;;  %p180_p3 = pnand %p1572_p0, %p179_p2 }
   0x6   : > { %s1573_s22 = sshll.u32 (!%p180_p3), %s2143_s12, 5 }
   0x7   : > { %183 = sbr.rel (%p180_p3) target bundleno = 600 (0x258), region = 32  ;;  %p225_p4 = scmp.lt.s32.totalorder (!%p180_p3), %s1573_s22, 63 }
   0xc   : > { %v348_v0 = vld [vmem:[%s2615_s1 + $0xf0] sm:$0xff]  ;;  %v349_v1 = vld [vmem:[%s2615_s1 + $0xf8] sm:$0xff]  ;;  %v346_v5 = vld [vmem:[%s2615_s1 + $0xe0] sm:$0xff]  ;;  %s2623_s22 = smov (!%p225_p4, %s1573_s22), 63  ;;  %vm1060_vm0 = vcmask 261120  }
   0xd   : > { %v332_v2 = vld [vmem:[%s2615_s1 + $0x70] sm:$0xff]  ;;  %v401_v3 = vpack.c.bf16 %v349_v1, %v348_v0  ;;  %v333_v4 = vld [vmem:[%s2615_s1 + $0x78] sm:$0xff]  ;;  %v347_v6 = vld [vmem:[%s2615_s1 + $0xe8] sm:$0xff]  ;;  %s1676_s17 = sshll.u32 %s2623_s22, 4 }
   0xe   : > { %v393_v7 = vpack.c.bf16 %v333_v4, %v332_v2  ;;  %v400_v8 = vpack.c.bf16 %v347_v6, %v346_v5  ;;  %v330_v9 = vld [vmem:[%s2615_s1 + $0x60] sm:$0xff]  ;;  %v331_v10 = vld [vmem:[%s2615_s1 + $0x68] sm:$0xff]  ;;  %v344_v11 = vld [vmem:[%s2615_s1 + $0xd0] sm:$0xff]  ;;  %s2239_s25 = scalar_lea.vmem %s2614_s0, %s1676_s17 }
   0xf   : > { %1993 = vmatprep.subr.bf16.mxu1 %v401_v3  ;;  %v345_v12 = vld [vmem:[%s2615_s1 + $0xd8] sm:$0xff]  ;;  %1677 = vmatprep.subr.bf16.mxu0 %v401_v3  ;;  %v392_v13 = vpack.c.bf16 %v331_v10, %v330_v9  ;;  %v328_v15 = vld [vmem:[%s2615_s1 + $0x50] sm:$0xff]  ;;  %v342_v17 = vld [vmem:[%s2615_s1 + $0xc0] sm:$0xff] }
  0x10   : > { %2001 = vmatpush3.bf16.msra.mxu1 %v393_v7  ;;  %1678 = vmatpush3.bf16.msra.mxu0 %v393_v7  ;;  %v399_v14 = vpack.c.bf16 %v345_v12, %v344_v11  ;;  %v329_v16 = vld [vmem:[%s2615_s1 + $0x58] sm:$0xff]  ;;  %v343_v18 = vld [vmem:[%s2615_s1 + $0xc8] sm:$0xff]  ;;  %v326_v21 = vld [vmem:[%s2615_s1 + $0x40] sm:$0xff] }
  0x11   : > { %1994 = vmatprep.subr.bf16.mxu1 %v400_v8  ;;  %1679 = vmatprep.subr.bf16.mxu0 %v400_v8  ;;  %v391_v19 = vpack.c.bf16 %v329_v16, %v328_v15  ;;  %v398_v20 = vpack.c.bf16 %v343_v18, %v342_v17  ;;  %v327_v22 = vld [vmem:[%s2615_s1 + $0x48] sm:$0xff]  ;;  %v340_v23 = vld [vmem:[%s2615_s1 + $0xb0] sm:$0xff]  ;;  %v341_v24 = vld [vmem:[%s2615_s1 + $0xb8] sm:$0xff] }
  0x12   : > { %v2035_v25 = vld [vmem:[%s2239_s25 + $0x184] ss:$16 sps:$4 sm:$0xff]   ;;  %v390_v26 = vpack.c.bf16 %v327_v22, %v326_v21  ;;  %v397_v27 = vpack.c.bf16 %v341_v24, %v340_v23  ;;  %v325_v29 = vld [vmem:[%s2615_s1 + $0x38] sm:$0xff]  ;;  %v339_v31 = vld [vmem:[%s2615_s1 + $0xa8] sm:$0xff] }
  0x13   : > { %v324_v28 = vld [vmem:[%s2615_s1 + $0x30] sm:$0xff]  ;;  %866 = vmatprep.mubr.bf16.mxu1 %v2035_v25  ;;  %v338_v30 = vld [vmem:[%s2615_s1 + $0xa0] sm:$0xff]  ;;  %v323_v35 = vld [vmem:[%s2615_s1 + $0x28] sm:$0xff] }
  0x14   : > { %2002 = vmatpush3.bf16.msra.mxu1 %v392_v13  ;;  %1680 = vmatpush3.bf16.msra.mxu0 %v392_v13  ;;  %v389_v32 = vpack.c.bf16 %v325_v29, %v324_v28  ;;  %v396_v33 = vpack.c.bf16 %v339_v31, %v338_v30  ;;  %v322_v34 = vld [vmem:[%s2615_s1 + $0x20] sm:$0xff]  ;;  %v336_v36 = vld [vmem:[%s2615_s1 + $0x90] sm:$0xff]  ;;  %v337_v37 = vld [vmem:[%s2615_s1 + $0x98] sm:$0xff] }
  0x15   : > { %1995 = vmatprep.subr.bf16.mxu1 %v399_v14  ;;  %1681 = vmatprep.subr.bf16.mxu0 %v399_v14  ;;  %v388_v38 = vpack.c.bf16 %v323_v35, %v322_v34  ;;  %v395_v39 = vpack.c.bf16 %v337_v37, %v336_v36  ;;  %v320_v40 = vld [vmem:[%s2615_s1 + $0x10] sm:$0xff]  ;;  %v321_v41 = vld [vmem:[%s2615_s1 + $0x18] sm:$0xff]  ;;  %v334_v42 = vld [vmem:[%s2615_s1 + $0x80] sm:$0xff] }
  0x16   : > { %v335_v43 = vld [vmem:[%s2615_s1 + $0x88] sm:$0xff]  ;;  %v387_v44 = vpack.c.bf16 %v321_v41, %v320_v40  ;;  %v318_v46 = vld [vmem:[%s2615_s1] sm:$0xff]  ;;  %v380_v48 = vld [vmem:[%s2615_s1 + $0x1f0] sm:$0xff] }
  0x17   : > { %v394_v45 = vpack.c.bf16 %v335_v43, %v334_v42  ;;  %v319_v47 = vld [vmem:[%s2615_s1 + $0x8] sm:$0xff]  ;;  %v381_v49 = vld [vmem:[%s2615_s1 + $0x1f8] sm:$0xff]  ;;  %v364_v50 = vld [vmem:[%s2615_s1 + $0x170] sm:$0xff] }
  0x18   : > { %2003 = vmatpush3.bf16.msra.mxu1 %v391_v19  ;;  %1682 = vmatpush3.bf16.msra.mxu0 %v391_v19  ;;  %v2047_v51 = vld [vmem:[%s2239_s25 + $0x4] ss:$16 sps:$4 sm:$0xff]   ;;  %v386_v52 = vpack.c.bf16 %v319_v47, %v318_v46  ;;  %v365_v53 = vld [vmem:[%s2615_s1 + $0x178] sm:$0xff]  ;;  %v2033_v54 = vld [vmem:[%s2239_s25 + $0x180] ss:$16 sps:$4 sm:$0xff]   ;;  %v417_v55 = vpack.c.bf16 %v381_v49, %v380_v48 }
  0x19   : > { %1996 = vmatprep.subr.bf16.mxu1 %v398_v20  ;;  %1683 = vmatprep.subr.bf16.mxu0 %v398_v20  ;;  %v378_v56 = vld [vmem:[%s2615_s1 + $0x1e0] sm:$0xff]  ;;  %v379_v57 = vld [vmem:[%s2615_s1 + $0x1e8] sm:$0xff]  ;;  %v409_v61 = vpack.c.bf16 %v365_v53, %v364_v50  ;;  %v376_v1 = vld [vmem:[%s2615_s1 + $0x1d0] sm:$0xff] }
  0x1a   : > { %770 = vmatprep.mubr.bf16.mxu0 %v2047_v51  ;;  %v362_v58 = vld [vmem:[%s2615_s1 + $0x160] sm:$0xff]  ;;  %v363_v59 = vld [vmem:[%s2615_s1 + $0x168] sm:$0xff]  ;;  %v416_v63 = vpack.c.bf16 %v379_v57, %v378_v56  ;;  %v377_v2 = vld [vmem:[%s2615_s1 + $0x1d8] sm:$0xff] }
  0x1b   : > { %v2045_v60 = vld [vmem:[%s2239_s25] ss:$16 sps:$4 sm:$0xff]   ;;  %v2036_v62 = vld [vmem:[%s2239_s25 + $0x1a4] ss:$16 sps:$4 sm:$0xff]   ;;  %v408_v3 = vpack.c.bf16 %v363_v59, %v362_v58  ;;  %v361_v5 = vld [vmem:[%s2615_s1 + $0x158] sm:$0xff]  ;;  %v415_v7 = vpack.c.bf16 %v377_v2, %v376_v1 }
  0x1c   : > { %2004 = vmatpush3.bf16.msra.mxu1 %v390_v26  ;;  %1684 = vmatpush3.bf16.msra.mxu0 %v390_v26  ;;  %v2051_v0 = vld [vmem:[%s2239_s25 + $0x24] ss:$16 sps:$4 sm:$0xff]   ;;  %v2038_v6 = vld [vmem:[%s2239_s25 + $0x1a0] ss:$16 sps:$4 sm:$0xff]   ;;  %v375_v9 = vld [vmem:[%s2615_s1 + $0x1c8] sm:$0xff] }
  0x1d   : > { %1997 = vmatprep.subr.bf16.mxu1 %v397_v27  ;;  %1685 = vmatprep.subr.bf16.mxu0 %v397_v27  ;;  %v360_v4 = vld [vmem:[%s2615_s1 + $0x150] sm:$0xff]  ;;  %v374_v8 = vld [vmem:[%s2615_s1 + $0x1c0] sm:$0xff]  ;;  %v359_v11 = vld [vmem:[%s2615_s1 + $0x148] sm:$0xff] }
  0x1e   : > { %v358_v10 = vld [vmem:[%s2615_s1 + $0x140] sm:$0xff]  ;;  %v407_v13 = vpack.c.bf16 %v361_v5, %v360_v4  ;;  %v414_v15 = vpack.c.bf16 %v375_v9, %v374_v8  ;;  %v372_v17 = vld [vmem:[%s2615_s1 + $0x1b0] sm:$0xff]  ;;  %v373_v18 = vld [vmem:[%s2615_s1 + $0x1b8] sm:$0xff] }
  0x1f   : > { %v2055_v12 = vld [vmem:[%s2239_s25 + $0x20] ss:$16 sps:$4 sm:$0xff]   ;;  %v2039_v14 = vld [vmem:[%s2239_s25 + $0x1c4] ss:$16 sps:$4 sm:$0xff]   ;;  %v406_v19 = vpack.c.bf16 %v359_v11, %v358_v10  ;;  %v357_v21 = vld [vmem:[%s2615_s1 + $0x138] sm:$0xff]  ;;  %v413_v23 = vpack.c.bf16 %v373_v18, %v372_v17 }
  0x20   : > { %2005 = vmatpush3.bf16.msra.mxu1 %v389_v32  ;;  %1686 = vmatpush3.bf16.msra.mxu0 %v389_v32  ;;  %v2057_v16 = vld [vmem:[%s2239_s25 + $0x44] ss:$16 sps:$4 sm:$0xff]   ;;  %v2041_v22 = vld [vmem:[%s2239_s25 + $0x1c0] ss:$16 sps:$4 sm:$0xff]   ;;  %v371_v25 = vld [vmem:[%s2615_s1 + $0x1a8] sm:$0xff] }
  0x21   : > { %1998 = vmatprep.subr.bf16.mxu1 %v396_v33  ;;  %1687 = vmatprep.subr.bf16.mxu0 %v396_v33  ;;  %v356_v20 = vld [vmem:[%s2615_s1 + $0x130] sm:$0xff]  ;;  %v370_v24 = vld [vmem:[%s2615_s1 + $0x1a0] sm:$0xff]  ;;  %v355_v27 = vld [vmem:[%s2615_s1 + $0x128] sm:$0xff] }
  0x22   : > { %v354_v26 = vld [vmem:[%s2615_s1 + $0x120] sm:$0xff]  ;;  %v405_v29 = vpack.c.bf16 %v357_v21, %v356_v20  ;;  %v412_v31 = vpack.c.bf16 %v371_v25, %v370_v24  ;;  %v368_v33 = vld [vmem:[%s2615_s1 + $0x190] sm:$0xff]  ;;  %v369_v34 = vld [vmem:[%s2615_s1 + $0x198] sm:$0xff] }
  0x23   : > { %v2061_v28 = vld [vmem:[%s2239_s25 + $0x40] ss:$16 sps:$4 sm:$0xff]   ;;  %v2042_v30 = vld [vmem:[%s2239_s25 + $0x1e4] ss:$16 sps:$4 sm:$0xff]   ;;  %v404_v35 = vpack.c.bf16 %v355_v27, %v354_v26  ;;  %v353_v37 = vld [vmem:[%s2615_s1 + $0x118] sm:$0xff] }
  0x24   : > { %2006 = vmatpush3.bf16.msra.mxu1 %v388_v38  ;;  %1688 = vmatpush3.bf16.msra.mxu0 %v388_v38  ;;  %v2063_v32 = vld [vmem:[%s2239_s25 + $0x64] ss:$16 sps:$4 sm:$0xff]   ;;  %v2044_v38 = vld [vmem:[%s2239_s25 + $0x1e0] ss:$16 sps:$4 sm:$0xff]   ;;  %v367_v41 = vld [vmem:[%s2615_s1 + $0x188] sm:$0xff] }
  0x25   : > { %1999 = vmatprep.subr.bf16.mxu1 %v395_v39  ;;  %1689 = vmatprep.subr.bf16.mxu0 %v395_v39  ;;  %v352_v36 = vld [vmem:[%s2615_s1 + $0x110] sm:$0xff]  ;;  %v411_v39 = vpack.c.bf16 %v369_v34, %v368_v33  ;;  %v366_v40 = vld [vmem:[%s2615_s1 + $0x180] sm:$0xff]  ;;  %v351_v43 = vld [vmem:[%s2615_s1 + $0x108] sm:$0xff] }
  0x26   : > { %v350_v42 = vld [vmem:[%s2615_s1 + $0x100] sm:$0xff]  ;;  %v2050_v46 = vld [vmem:[%s2239_s25 + $0xc] ss:$16 sps:$4 sm:$0xff]   ;;  %v410_v47 = vpack.c.bf16 %v367_v41, %v366_v40  ;;  %v2048_v50 = vld [vmem:[%s2239_s25 + $0x8] ss:$16 sps:$4 sm:$0xff]  }
  0x27   : > { %v2069_v48 = vld [vmem:[%s2239_s25 + $0x84] ss:$16 sps:$4 sm:$0xff]   ;;  %v402_v49 = vpack.c.bf16 %v351_v43, %v350_v42  ;;  %v2073_v51 = vld [vmem:[%s2239_s25 + $0x80] ss:$16 sps:$4 sm:$0xff]   ;;  %v2059_v56 = vld [vmem:[%s2239_s25 + $0x4c] ss:$16 sps:$4 sm:$0xff]  }
  0x28   : > { %2007 = vmatpush3.bf16.msra.mxu1 %v387_v44  ;;  %1690 = vmatpush3.bf16.msra.mxu0 %v387_v44  ;;  %v2067_v44 = vld [vmem:[%s2239_s25 + $0x60] ss:$16 sps:$4 sm:$0xff]   ;;  %v2075_v53 = vld [vmem:[%s2239_s25 + $0xa4] ss:$16 sps:$4 sm:$0xff]   ;;  %v2062_v58 = vld [vmem:[%s2239_s25 + $0x48] ss:$16 sps:$4 sm:$0xff]  }
  0x29   : > { %2000 = vmatprep.subr.bf16.mxu1 %v394_v45  ;;  %1691 = vmatprep.subr.bf16.mxu0 %v394_v45  ;;  %v403_v45 = vpack.c.bf16 %v353_v37, %v352_v36  ;;  %v2081_v57 = vld [vmem:[%s2239_s25 + $0xc4] ss:$16 sps:$4 sm:$0xff]   ;;  %v2085_v59 = vld [vmem:[%s2239_s25 + $0xc0] ss:$16 sps:$4 sm:$0xff]   ;;  %v2074_v2 = vld [vmem:[%s2239_s25 + $0x88] ss:$16 sps:$4 sm:$0xff]  }
  0x2a   : > { %v2093_v1 = vld [vmem:[%s2239_s25 + $0x104] ss:$16 sps:$4 sm:$0xff]   ;;  %v2077_v4 = vld [vmem:[%s2239_s25 + $0xac] ss:$16 sps:$4 sm:$0xff]   ;;  %v2086_v11 = vld [vmem:[%s2239_s25 + $0xc8] ss:$16 sps:$4 sm:$0xff]  }
  0x2b   : > { %v2099_v5 = vld [vmem:[%s2239_s25 + $0x124] ss:$16 sps:$4 sm:$0xff]   ;;  %v2083_v8 = vld [vmem:[%s2239_s25 + $0xcc] ss:$16 sps:$4 sm:$0xff]   ;;  %v2098_v18 = vld [vmem:[%s2239_s25 + $0x108] ss:$16 sps:$4 sm:$0xff]  }
  0x2c   : > { %2008 = vmatpush3.bf16.msra.mxu1 %v386_v52  ;;  %1692 = vmatpush3.bf16.msra.mxu0 %v386_v52  ;;  %v2053_v52 = vld [vmem:[%s2239_s25 + $0x2c] ss:$16 sps:$4 sm:$0xff]   ;;  %v2105_v9 = vld [vmem:[%s2239_s25 + $0x144] ss:$16 sps:$4 sm:$0xff]   ;;  %v2104_v21 = vld [vmem:[%s2239_s25 + $0x128] ss:$16 sps:$4 sm:$0xff]  }
  0x2d   : > { %1789 = vmatprep.subr.bf16.mxu1 %v417_v55  ;;  %v2079_v55 = vld [vmem:[%s2239_s25 + $0xa0] ss:$16 sps:$4 sm:$0xff]   ;;  %v385_v10 = vld [vmem:[%s2616_s2 + $0x18] sm:$0xff] }
  0x2e   : > { %1937 = vmatprep.subr.mxu0 %v385_v10  ;;  %v2095_v17 = vld [vmem:[%s2239_s25 + $0x10c] ss:$16 sps:$4 sm:$0xff]   ;;  %v384_v20 = vld [vmem:[%s2616_s2 + $0x10] sm:$0xff]  ;;  %v382_v24 = vld [vmem:[%s2616_s2] sm:$0xff] }
  0x2f   : > { %867 = vmatmul.mubr.bf16.vlgmr.msra.gmra.mxu1 %v2033_v54  ;;  %771 = vmatmul.mubr.bf16.vlgmr.msra.gmra.mxu0 %v2045_v60  ;;  %v2056_v54 = vld [vmem:[%s2239_s25 + $0x28] ss:$16 sps:$4 sm:$0xff]   ;;  %v2065_v60 = vld [vmem:[%s2239_s25 + $0x6c] ss:$16 sps:$4 sm:$0xff]  }
  0x30   : > { %1790 = vmatpush3.bf16.msra.mxu1 %v409_v61  ;;  %874 = vmatprep.mubr.bf16.mxu1 %v2036_v62  ;;  %v2087_v61 = vld [vmem:[%s2239_s25 + $0xe4] ss:$16 sps:$4 sm:$0xff]   ;;  %v2068_v62 = vld [vmem:[%s2239_s25 + $0x68] ss:$16 sps:$4 sm:$0xff]   ;;  %v2113_v26 = vld [vmem:[%s2239_s25 + $0x16c] ss:$16 sps:$4 sm:$0xff]  }
  0x31   : > { %1791 = vmatprep.subr.bf16.mxu1 %v416_v63  ;;  %778 = vmatprep.mubr.bf16.mxu0 %v2051_v0  ;;  %v2091_v63 = vld [vmem:[%s2239_s25 + $0xe0] ss:$16 sps:$4 sm:$0xff]   ;;  %v2071_v0 = vld [vmem:[%s2239_s25 + $0x8c] ss:$16 sps:$4 sm:$0xff]   ;;  %v2110_v25 = vld [vmem:[%s2239_s25 + $0x148] ss:$16 sps:$4 sm:$0xff]  }
  0x32   : > { %1938 = vmatpush3.msra.mxu0 %v385_v10  ;;  %v2116_v27 = vld [vmem:[%s2239_s25 + $0x168] ss:$16 sps:$4 sm:$0xff]   ;;  %v2126_v34 = vld [vmem:[%s2239_s25 + $0x1ec] ss:$16 sps:$4 sm:$0xff]  }
  0x33   : > { %1939 = vmatprep.subr.mxu0 %v384_v20  ;;  %v2125_v33 = vld [vmem:[%s2239_s25 + $0x1c8] ss:$16 sps:$4 sm:$0xff]  }
  0x34   : > { %1792 = vmatpush3.bf16.msra.mxu1 %v408_v3  ;;  %v2097_v3 = vld [vmem:[%s2239_s25 + $0x100] ss:$16 sps:$4 sm:$0xff]   ;;  %1940 = vmatpush3.msra.mxu0 %v384_v20 }
  0x35   : > { %1793 = vmatprep.subr.bf16.mxu1 %v415_v7  ;;  %v2103_v7 = vld [vmem:[%s2239_s25 + $0x120] ss:$16 sps:$4 sm:$0xff]  }
  0x37   : > { %875 = vmatmul.mubr.bf16.gmra.mxu1 %v2038_v6  ;;  %779 = vmatmul.mubr.bf16.gmra.mxu0 %v2055_v12  ;;  %v2080_v6 = vld [vmem:[%s2239_s25 + $0xa8] ss:$16 sps:$4 sm:$0xff]   ;;  %v2109_v12 = vld [vmem:[%s2239_s25 + $0x140] ss:$16 sps:$4 sm:$0xff]  }
  0x38   : > { %1794 = vmatpush3.bf16.msra.mxu1 %v407_v13  ;;  %882 = vmatprep.mubr.bf16.mxu1 %v2039_v14  ;;  %v2089_v13 = vld [vmem:[%s2239_s25 + $0xec] ss:$16 sps:$4 sm:$0xff]   ;;  %v2111_v14 = vld [vmem:[%s2239_s25 + $0x164] ss:$16 sps:$4 sm:$0xff]  }
  0x39   : > { %1795 = vmatprep.subr.bf16.mxu1 %v414_v15  ;;  %786 = vmatprep.mubr.bf16.mxu0 %v2057_v16  ;;  %v2092_v15 = vld [vmem:[%s2239_s25 + $0xe8] ss:$16 sps:$4 sm:$0xff]   ;;  %v2115_v16 = vld [vmem:[%s2239_s25 + $0x160] ss:$16 sps:$4 sm:$0xff]  }
  0x3c   : > { %1796 = vmatpush3.bf16.msra.mxu1 %v406_v19  ;;  %v2101_v19 = vld [vmem:[%s2239_s25 + $0x12c] ss:$16 sps:$4 sm:$0xff]  }
  0x3d   : > { %1797 = vmatprep.subr.bf16.mxu1 %v413_v23  ;;  %v383_v23 = vld [vmem:[%s2616_s2 + $0x8] sm:$0xff] }
  0x3e   : > { %1941 = vmatprep.subr.mxu0 %v383_v23 }
  0x3f   : > { %883 = vmatmul.mubr.bf16.gmra.mxu1 %v2041_v22  ;;  %787 = vmatmul.mubr.bf16.gmra.mxu0 %v2061_v28  ;;  %v2107_v22 = vld [vmem:[%s2239_s25 + $0x14c] ss:$16 sps:$4 sm:$0xff]  }
  0x40   : > { %1798 = vmatpush3.bf16.msra.mxu1 %v405_v29  ;;  %890 = vmatprep.mubr.bf16.mxu1 %v2042_v30  ;;  %v2117_v28 = vld [vmem:[%s2239_s25 + $0x18c] ss:$16 sps:$4 sm:$0xff]   ;;  %v2119_v29 = vld [vmem:[%s2239_s25 + $0x188] ss:$16 sps:$4 sm:$0xff]  }
  0x41   : > { %1799 = vmatprep.subr.bf16.mxu1 %v412_v31  ;;  %794 = vmatprep.mubr.bf16.mxu0 %v2063_v32  ;;  %v2120_v30 = vld [vmem:[%s2239_s25 + $0x1ac] ss:$16 sps:$4 sm:$0xff]   ;;  %v2122_v31 = vld [vmem:[%s2239_s25 + $0x1a8] ss:$16 sps:$4 sm:$0xff]  }
  0x42   : > { %1942 = vmatpush3.msra.mxu0 %v383_v23  ;;  %v2123_v32 = vld [vmem:[%s2239_s25 + $0x1cc] ss:$16 sps:$4 sm:$0xff]  }
  0x43   : > { %1943 = vmatprep.subr.mxu0 %v382_v24 }
  0x44   : > { %1800 = vmatpush3.bf16.msra.mxu1 %v404_v35  ;;  %1944 = vmatpush3.msra.mxu0 %v382_v24  ;;  %v2128_v35 = vld [vmem:[%s2239_s25 + $0x1e8] ss:$16 sps:$4 sm:$0xff]   ;;  %s1577_s25 = sshll.u32 %s2623_s22, 3 }
  0x45   : > { %1801 = vmatprep.subr.bf16.mxu1 %v411_v39  ;;  %s2539_s26 = scalar_lea.vmem %s2617_s3, %s1577_s25 }
  0x47   : > { %891 = vmatmul.mubr.bf16.gmra.mxu1 %v2044_v38  ;;  %795 = vmatmul.mubr.bf16.gmra.mxu0 %v2067_v44 }
  0x48   : > { %1802 = vmatpush3.bf16.msra.mxu1 %v403_v45  ;;  %931 = vmatprep.mubr.bf16.mxu1 %v2050_v46 }
  0x49   : > { %1803 = vmatprep.subr.bf16.mxu1 %v410_v47  ;;  %802 = vmatprep.mubr.bf16.mxu0 %v2069_v48 }
  0x4c   : > { %1804 = vmatpush3.bf16.msra.mxu1 %v402_v49 }
  0x4f   : > { %932 = vmatmul.mubr.bf16.vlgmr.msra.gmra.mxu1 %v2048_v50  ;;  %803 = vmatmul.mubr.bf16.gmra.mxu0 %v2073_v51 }
  0x50   : > { %939 = vmatprep.mubr.bf16.mxu1 %v2053_v52  ;;  %810 = vmatprep.mubr.bf16.mxu0 %v2075_v53 }
  0x57   : > { %940 = vmatmul.mubr.bf16.gmra.mxu1 %v2056_v54  ;;  %811 = vmatmul.mubr.bf16.gmra.mxu0 %v2079_v55 }
  0x58   : > { %947 = vmatprep.mubr.bf16.mxu1 %v2059_v56  ;;  %818 = vmatprep.mubr.bf16.mxu0 %v2081_v57 }
  0x5f   : > { %948 = vmatmul.mubr.bf16.gmra.mxu1 %v2062_v58  ;;  %819 = vmatmul.mubr.bf16.gmra.mxu0 %v2085_v59 }
  0x60   : > { %955 = vmatprep.mubr.bf16.mxu1 %v2065_v60  ;;  %826 = vmatprep.mubr.bf16.mxu0 %v2087_v61 }
  0x67   : > { %956 = vmatmul.mubr.bf16.gmra.mxu1 %v2068_v62  ;;  %827 = vmatmul.mubr.bf16.gmra.mxu0 %v2091_v63 }
  0x68   : > { %963 = vmatprep.mubr.bf16.mxu1 %v2071_v0  ;;  %834 = vmatprep.mubr.bf16.mxu0 %v2093_v1 }
  0x6f   : > { %964 = vmatmul.mubr.bf16.gmra.mxu1 %v2074_v2  ;;  %835 = vmatmul.mubr.bf16.gmra.mxu0 %v2097_v3 }
  0x70   : > { %971 = vmatprep.mubr.bf16.mxu1 %v2077_v4  ;;  %842 = vmatprep.mubr.bf16.mxu0 %v2099_v5 }
  0x77   : > { %972 = vmatmul.mubr.bf16.gmra.mxu1 %v2080_v6  ;;  %843 = vmatmul.mubr.bf16.gmra.mxu0 %v2103_v7 }
  0x78   : > { %979 = vmatprep.mubr.bf16.mxu1 %v2083_v8  ;;  %850 = vmatprep.mubr.bf16.mxu0 %v2105_v9 }
  0x7f   : > { %980 = vmatmul.mubr.bf16.gmra.mxu1 %v2086_v11  ;;  %851 = vmatmul.mubr.bf16.gmra.mxu0 %v2109_v12 }
  0x80   : > { %987 = vmatprep.mubr.bf16.mxu1 %v2089_v13  ;;  %858 = vmatprep.mubr.bf16.mxu0 %v2111_v14 }
  0x87   : > { %988 = vmatmul.mubr.bf16.gmra.mxu1 %v2092_v15  ;;  %859 = vmatmul.mubr.bf16.gmra.mxu0 %v2115_v16 }
  0x88   : > { %995 = vmatprep.mubr.bf16.mxu1 %v2095_v17 }
  0x8f   : > { %996 = vmatmul.mubr.bf16.gmra.mxu1 %v2098_v18 }
  0x90   : > { %1003 = vmatprep.mubr.bf16.mxu1 %v2101_v19 }
  0x97   : > { %1004 = vmatmul.mubr.bf16.gmra.mxu1 %v2104_v21 }
  0x98   : > { %1011 = vmatprep.mubr.bf16.mxu1 %v2107_v22 }
  0x9f   : > { %1012 = vmatmul.mubr.bf16.gmra.mxu1 %v2110_v25 }
  0xa0   : > { %1019 = vmatprep.mubr.bf16.mxu1 %v2113_v26 }
  0xa7   : > { %1020 = vmatmul.mubr.bf16.gmra.mxu1 %v2116_v27 }
  0xa8   : > { %1027 = vmatprep.mubr.bf16.mxu1 %v2117_v28 }
  0xaf   : > { %1028 = vmatmul.mubr.bf16.gmra.mxu1 %v2119_v29 }
  0xb0   : > { %1035 = vmatprep.mubr.bf16.mxu1 %v2120_v30 }
  0xb7   : > { %1036 = vmatmul.mubr.bf16.gmra.mxu1 %v2122_v31 }
  0xb8   : > { %1043 = vmatprep.mubr.bf16.mxu1 %v2123_v32 }
  0xbf   : > { %1044 = vmatmul.mubr.bf16.gmra.mxu1 %v2125_v33 }
  0xc0   : > { %1051 = vmatprep.mubr.bf16.mxu1 %v2126_v34 }
  0xc7   : > { %1052 = vmatmul.mubr.bf16.gmra.mxu1 %v2128_v35 }
  0xef   : > { %v1765_v36 = vpop.f32.mrf.mxu1  ;;  %v1693_v37 = vpop.f32.mrf.mxu0 }
  0xf1   : > { %v1766_v38 = vpop.f32.mrf.mxu1  ;;  %v1694_v39 = vpop.f32.mrf.mxu0 }
  0xf2   : > { %v2467_v40 = vadd.f32 %v1766_v38, %v1765_v36  ;;  %v1695_v14 = vadd.f32 %v1694_v39, %v1693_v37 }
  0xf3   : > { %v1768_v41 = vpop.f32.mrf.mxu1  ;;  %v1696_v42 = vpop.f32.mrf.mxu0 }
  0xf5   : > { %v1769_v43 = vpop.f32.mrf.mxu1  ;;  %v1697_v44 = vpop.f32.mrf.mxu0 }
  0xf6   : > { %v2469_v45 = vadd.f32 %v1769_v43, %v1768_v41  ;;  %v1698_v21 = vadd.f32 %v1697_v44, %v1696_v42 }
  0xf7   : > { %v1771_v46 = vpop.f32.mrf.mxu1  ;;  %v1699_v47 = vpop.f32.mrf.mxu0 }
  0xf9   : > { %v1772_v48 = vpop.f32.mrf.mxu1  ;;  %v1700_v49 = vpop.f32.mrf.mxu0 }
  0xfa   : > { %v2471_v50 = vadd.f32 %v1772_v48, %v1771_v46  ;;  %v1701_v28 = vadd.f32 %v1700_v49, %v1699_v47 }
  0xfb   : > { %v1774_v51 = vpop.f32.mrf.mxu1  ;;  %v1702_v52 = vpop.f32.mrf.mxu0 }
  0xfd   : > { %v1775_v53 = vpop.f32.mrf.mxu1  ;;  %v1703_v54 = vpop.f32.mrf.mxu0 }
  0xfe   : > { %v2473_v55 = vadd.f32 %v1775_v53, %v1774_v51  ;;  %v1704_v35 = vadd.f32 %v1703_v54, %v1702_v52 }
  0xff   : > { %v1777_v56 = vpop.f32.mrf.mxu1  ;;  %v1705_v57 = vpop.f32.mrf.mxu0 }
 0x101   : > { %v1778_v58 = vpop.f32.mrf.mxu1  ;;  %v1706_v59 = vpop.f32.mrf.mxu0 }
 0x102   : > { %v2475_v60 = vadd.f32 %v1778_v58, %v1777_v56  ;;  %v1707_v43 = vadd.f32 %v1706_v59, %v1705_v57 }
 0x103   : > { %v1780_v61 = vpop.f32.mrf.mxu1  ;;  %v1708_v62 = vpop.f32.mrf.mxu0 }
 0x105   : > { %v1781_v63 = vpop.f32.mrf.mxu1  ;;  %v1709_v0 = vpop.f32.mrf.mxu0 }
 0x106   : > { %v2477_v1 = vadd.f32 %v1781_v63, %v1780_v61  ;;  %v1710_v53 = vadd.f32 %v1709_v0, %v1708_v62 }
 0x107   : > { %v1783_v2 = vpop.f32.mrf.mxu1  ;;  %v1711_v3 = vpop.f32.mrf.mxu0 }
 0x109   : > { %v1784_v4 = vpop.f32.mrf.mxu1  ;;  %v1712_v5 = vpop.f32.mrf.mxu0 }
 0x10a   : > { %v2479_v6 = vadd.f32 %v1784_v4, %v1783_v2  ;;  %v1713_v2 = vadd.f32 %v1712_v5, %v1711_v3 }
 0x10b   : > { %v1786_v7 = vpop.f32.mrf.mxu1  ;;  %v1714_v8 = vpop.f32.mrf.mxu0 }
 0x10d   : > { %v1787_v9 = vpop.f32.mrf.mxu1  ;;  %v1715_v10 = vpop.f32.mrf.mxu0 }
 0x10e   : > { %v2481_v11 = vadd.f32 %v1787_v9, %v1786_v7 }
 0x10f   : > { %v1805_v12 = vpop.f32.mrf.mxu1  ;;  %v2483_v13 = vpop.f32.mrf.mxu0 }
 0x111   : > { %v1806_v15 = vpop.f32.mrf.mxu1  ;;  %v1718_v16 = vpop.f32.mrf.mxu0 }
 0x112   : > { %v1807_v17 = vadd.f32 %v1806_v15, %v1805_v12 }
 0x113   : > { %v1808_v18 = vpop.f32.mrf.mxu1  ;;  %v2485_v19 = vpop.f32.mrf.mxu0 }
 0x114   : > { %v934_v20 = vadd.f32 %v1807_v17, %v1695_v14  ;;  %v1716_v14 = vadd.f32 %v1715_v10, %v1714_v8 }
 0x115   : > { %v1809_v22 = vpop.f32.mrf.mxu1  ;;  %v1721_v23 = vpop.f32.mrf.mxu0 }
 0x116   : > { %v1810_v24 = vadd.f32 %v1809_v22, %v1808_v18  ;;  %1945 = vmatprep.mubr.msk.f32.mxu0 %vm1060_vm0, %v934_v20 }
 0x117   : > { %v1811_v25 = vpop.f32.mrf.mxu1  ;;  %v2488_v26 = vpop.f32.mrf.mxu0 }
 0x118   : > { %v937_v27 = vadd.f32 %v1810_v24, %v1698_v21  ;;  %v1719_v21 = vadd.f32 %v1718_v16, %v2483_v13 }
 0x119   : > { %v1812_v29 = vpop.f32.mrf.mxu1  ;;  %v1724_v30 = vpop.f32.mrf.mxu0 }
 0x11a   : > { %v1813_v31 = vadd.f32 %v1812_v29, %v1811_v25  ;;  %1946 = vmatmul.mubr.msk.f32.vlgmr.msra.gmra.mxu0 %vm1060_vm0, %v937_v27  ;;  %v1722_v27 = vadd.f32 %v1721_v23, %v2485_v19 }
 0x11b   : > { %v1814_v32 = vpop.f32.mrf.mxu1  ;;  %v2491_v33 = vpop.f32.mrf.mxu0 }
 0x11c   : > { %v942_v34 = vadd.f32 %v1813_v31, %v1701_v28 }
 0x11d   : > { %v1815_v36 = vpop.f32.mrf.mxu1  ;;  %v1727_v37 = vpop.f32.mrf.mxu0 }
 0x11e   : > { %v1816_v38 = vadd.f32 %v1815_v36, %v1814_v32  ;;  %1948 = vmatprep.mubr.msk.f32.mxu0 %vm1060_vm0, %v942_v34  ;;  %v1725_v32 = vadd.f32 %v1724_v30, %v2488_v26 }
 0x11f   : > { %v1817_v39 = vpop.f32.mrf.mxu1  ;;  %v1729_v41 = vpop.f32.mrf.mxu0 }
 0x120   : > { %v945_v42 = vadd.f32 %v1816_v38, %v1704_v35  ;;  %v1728_v38 = vadd.f32 %v1727_v37, %v2491_v33 }
 0x121   : > { %v1818_v44 = vpop.f32.mrf.mxu1  ;;  %v1730_v46 = vpop.f32.mrf.mxu0 }
 0x122   : > { %v1819_v47 = vadd.f32 %v1818_v44, %v1817_v39  ;;  %1949 = vmatmul.mubr.msk.f32.gmra.mxu0 %vm1060_vm0, %v945_v42  ;;  %v1731_v44 = vadd.f32 %v1730_v46, %v1729_v41 }
 0x123   : > { %v1820_v48 = vpop.f32.mrf.mxu1  ;;  %v1732_v49 = vpop.f32.mrf.mxu0 }
 0x124   : > { %v950_v51 = vadd.f32 %v1819_v47, %v1707_v43 }
 0x125   : > { %v1821_v56 = vpop.f32.mrf.mxu1  ;;  %v1733_v52 = vpop.f32.mrf.mxu0 }
 0x126   : > { %v1822_v54 = vadd.f32 %v1821_v56, %v1820_v48  ;;  %1951 = vmatprep.mubr.msk.f32.mxu0 %vm1060_vm0, %v950_v51 }
 0x127   : > { %v1823_v58 = vpop.f32.mrf.mxu1  ;;  %v1735_v61 = vpop.f32.mrf.mxu0 }
 0x128   : > { %v953_v63 = vadd.f32 %v1822_v54, %v1710_v53  ;;  %v1734_v53 = vadd.f32 %v1733_v52, %v1732_v49 }
 0x129   : > { %v1824_v4 = vpop.f32.mrf.mxu1  ;;  %v1736_v57 = vpop.f32.mrf.mxu0 }
 0x12a   : > { %v1825_v59 = vadd.f32 %v1824_v4, %v1823_v58  ;;  %1952 = vmatmul.mubr.msk.f32.gmra.mxu0 %vm1060_vm0, %v953_v63  ;;  %v1737_v63 = vadd.f32 %v1736_v57, %v1735_v61 }
 0x12b   : > { %v1826_v7 = vpop.f32.mrf.mxu1  ;;  %v1738_v9 = vpop.f32.mrf.mxu0 }
 0x12c   : > { %v958_v12 = vadd.f32 %v1825_v59, %v1713_v2 }
 0x12d   : > { %v1827_v15 = vpop.f32.mrf.mxu1  ;;  %v1739_v62 = vpop.f32.mrf.mxu0 }
 0x12e   : > { %v1828_v0 = vadd.f32 %v1827_v15, %v1826_v7  ;;  %1954 = vmatprep.mubr.msk.f32.mxu0 %vm1060_vm0, %v958_v12  ;;  %v1740_v7 = vadd.f32 %v1739_v62, %v1738_v9 }
 0x12f   : > { %v1829_v17 = vpop.f32.mrf.mxu1  ;;  %v1741_v18 = vpop.f32.mrf.mxu0 }
 0x130   : > { %v961_v20 = vadd.f32 %v1828_v0, %v1716_v14 }
 0x131   : > { %v1830_v3 = vpop.f32.mrf.mxu1  ;;  %v1742_v5 = vpop.f32.mrf.mxu0 }
 0x132   : > { %v1831_v22 = vadd.f32 %v1830_v3, %v1829_v17  ;;  %1955 = vmatmul.mubr.msk.f32.gmra.mxu0 %vm1060_vm0, %v961_v20  ;;  %v1743_v0 = vadd.f32 %v1742_v5, %v1741_v18 }
 0x133   : > { %v1832_v24 = vpop.f32.mrf.mxu1  ;;  %v1744_v10 = vpop.f32.mrf.mxu0 }
 0x134   : > { %v966_v25 = vadd.f32 %v1831_v22, %v1719_v21 }
 0x135   : > { %v1833_v8 = vpop.f32.mrf.mxu1  ;;  %v1745_v13 = vpop.f32.mrf.mxu0 }
 0x136   : > { %v1834_v28 = vadd.f32 %v1833_v8, %v1832_v24  ;;  %1957 = vmatprep.mubr.msk.f32.mxu0 %vm1060_vm0, %v966_v25  ;;  %v1746_v3 = vadd.f32 %v1745_v13, %v1744_v10 }
 0x137   : > { %v1835_v29 = vpop.f32.mrf.mxu1  ;;  %v1747_v19 = vpop.f32.mrf.mxu0 }
 0x138   : > { %v969_v31 = vadd.f32 %v1834_v28, %v1722_v27 }
 0x139   : > { %v1836_v34 = vpop.f32.mrf.mxu1  ;;  %v1748_v48 = vpop.f32.mrf.mxu0 }
 0x13a   : > { %v1837_v16 = vadd.f32 %v1836_v34, %v1835_v29  ;;  %1958 = vmatmul.mubr.msk.f32.gmra.mxu0 %vm1060_vm0, %v969_v31  ;;  %v1749_v27 = vadd.f32 %v1748_v48, %v1747_v19 }
 0x13b   : > { %v1838_v35 = vpop.f32.mrf.mxu1  ;;  %v1750_v54 = vpop.f32.mrf.mxu0 }
 0x13c   : > { %v974_v36 = vadd.f32 %v1837_v16, %v1725_v32 }
 0x13d   : > { %v1839_v39 = vpop.f32.mrf.mxu1  ;;  %v1751_v4 = vpop.f32.mrf.mxu0 }
 0x13e   : > { %v1840_v23 = vadd.f32 %v1839_v39, %v1838_v35  ;;  %1960 = vmatprep.mubr.msk.f32.mxu0 %vm1060_vm0, %v974_v36  ;;  %v1752_v31 = vadd.f32 %v1751_v4, %v1750_v54 }
 0x13f   : > { %v1841_v42 = vpop.f32.mrf.mxu1  ;;  %v1753_v14 = vpop.f32.mrf.mxu0 }
 0x140   : > { %v977_v43 = vadd.f32 %v1840_v23, %v1728_v38 }
 0x141   : > { %v1842_v47 = vpop.f32.mrf.mxu1  ;;  %v1754_v20 = vpop.f32.mrf.mxu0 }
 0x142   : > { %v1843_v26 = vadd.f32 %v1842_v47, %v1841_v42  ;;  %1961 = vmatmul.mubr.msk.f32.gmra.mxu0 %vm1060_vm0, %v977_v43  ;;  %v1755_v35 = vadd.f32 %v1754_v20, %v1753_v14 }
 0x143   : > { %v1844_v30 = vpop.f32.mrf.mxu1  ;;  %v1756_v24 = vpop.f32.mrf.mxu0 }
 0x144   : > { %v982_v51 = vadd.f32 %v1843_v26, %v1731_v44 }
 0x145   : > { %v1845_v56 = vpop.f32.mrf.mxu1  ;;  %v1757_v28 = vpop.f32.mrf.mxu0 }
 0x146   : > { %v1846_v58 = vadd.f32 %v1845_v56, %v1844_v30  ;;  %1963 = vmatprep.mubr.msk.f32.mxu0 %vm1060_vm0, %v982_v51  ;;  %v1758_v42 = vadd.f32 %v1757_v28, %v1756_v24 }
 0x147   : > { %v1847_v33 = vpop.f32.mrf.mxu1  ;;  %v1759_v34 = vpop.f32.mrf.mxu0 }
 0x148   : > { %v985_v37 = vadd.f32 %v1846_v58, %v1734_v53 }
 0x149   : > { %v1848_v2 = vpop.f32.mrf.mxu1  ;;  %v1760_v38 = vpop.f32.mrf.mxu0 }
 0x14a   : > { %v1849_v59 = vadd.f32 %v1848_v2, %v1847_v33  ;;  %1964 = vmatmul.mubr.msk.f32.gmra.mxu0 %vm1060_vm0, %v985_v37  ;;  %v1761_v30 = vadd.f32 %v1760_v38, %v1759_v34 }
 0x14b   : > { %v1850_v41 = vpop.f32.mrf.mxu1  ;;  %v1762_v44 = vpop.f32.mrf.mxu0 }
 0x14c   : > { %v990_v46 = vadd.f32 %v1849_v59, %v1737_v63 }
 0x14d   : > { %v1851_v12 = vpop.f32.mrf.mxu1  ;;  %v1763_v53 = vpop.f32.mrf.mxu0 }
 0x14e   : > { %v1852_v15 = vadd.f32 %v1851_v12, %v1850_v41  ;;  %1966 = vmatprep.mubr.msk.f32.mxu0 %vm1060_vm0, %v990_v46  ;;  %v1764_v33 = vadd.f32 %v1763_v53, %v1762_v44 }
 0x14f   : > { %v1853_v49 = vpop.f32.mrf.mxu1 }
 0x150   : > { %v993_v52 = vadd.f32 %v1852_v15, %v1740_v7 }
 0x151   : > { %v1854_v17 = vpop.f32.mrf.mxu1 }
 0x152   : > { %v1855_v21 = vadd.f32 %v1854_v17, %v1853_v49  ;;  %1967 = vmatmul.mubr.msk.f32.gmra.mxu0 %vm1060_vm0, %v993_v52 }
 0x153   : > { %v1856_v61 = vpop.f32.mrf.mxu1 }
 0x154   : > { %v998_v57 = vadd.f32 %v1855_v21, %v1743_v0 }
 0x155   : > { %v1857_v22 = vpop.f32.mrf.mxu1 }
 0x156   : > { %v1858_v25 = vadd.f32 %v1857_v22, %v1856_v61  ;;  %1969 = vmatprep.mubr.msk.f32.mxu0 %vm1060_vm0, %v998_v57 }
 0x157   : > { %v1859_v9 = vpop.f32.mrf.mxu1 }
 0x158   : > { %v1001_v62 = vadd.f32 %v1858_v25, %v1746_v3 }
 0x159   : > { %v1860_v8 = vpop.f32.mrf.mxu1 }
 0x15a   : > { %v1861_v29 = vadd.f32 %v1860_v8, %v1859_v9  ;;  %1970 = vmatmul.mubr.msk.f32.gmra.mxu0 %vm1060_vm0, %v1001_v62 }
 0x15b   : > { %v1862_v18 = vpop.f32.mrf.mxu1 }
 0x15c   : > { %v1006_v5 = vadd.f32 %v1861_v29, %v1749_v27 }
 0x15d   : > { %v1863_v32 = vpop.f32.mrf.mxu1 }
 0x15e   : > { %v1864_v16 = vadd.f32 %v1863_v32, %v1862_v18  ;;  %1972 = vmatprep.mubr.msk.f32.mxu0 %vm1060_vm0, %v1006_v5 }
 0x15f   : > { %v1865_v10 = vpop.f32.mrf.mxu1 }
 0x160   : > { %v1009_v13 = vadd.f32 %v1864_v16, %v1752_v31 }
 0x161   : > { %v1866_v36 = vpop.f32.mrf.mxu1 }
 0x162   : > { %v1867_v39 = vadd.f32 %v1866_v36, %v1865_v10  ;;  %1973 = vmatmul.mubr.msk.f32.gmra.mxu0 %vm1060_vm0, %v1009_v13 }
 0x163   : > { %v1868_v19 = vpop.f32.mrf.mxu1 }
 0x164   : > { %v1014_v23 = vadd.f32 %v1867_v39, %v1755_v35 }
 0x165   : > { %v1869_v43 = vpop.f32.mrf.mxu1 }
 0x166   : > { %v1870_v47 = vadd.f32 %v1869_v43, %v1868_v19  ;;  %1975 = vmatprep.mubr.msk.f32.mxu0 %vm1060_vm0, %v1014_v23 }
 0x167   : > { %v1871_v48 = vpop.f32.mrf.mxu1 }
 0x168   : > { %v1017_v26 = vadd.f32 %v1870_v47, %v1758_v42 }
 0x169   : > { %v1872_v51 = vpop.f32.mrf.mxu1 }
 0x16a   : > { %v1873_v56 = vadd.f32 %v1872_v51, %v1871_v48  ;;  %1976 = vmatmul.mubr.msk.f32.gmra.mxu0 %vm1060_vm0, %v1017_v26 }
 0x16b   : > { %v1874_v54 = vpop.f32.mrf.mxu1 }
 0x16c   : > { %v1022_v58 = vadd.f32 %v1873_v56, %v1761_v30 }
 0x16d   : > { %v1875_v37 = vpop.f32.mrf.mxu1 }
 0x16e   : > { %v1876_v63 = vadd.f32 %v1875_v37, %v1874_v54  ;;  %1978 = vmatprep.mubr.msk.f32.mxu0 %vm1060_vm0, %v1022_v58 }
 0x16f   : > { %v1877_v2 = vpop.f32.mrf.mxu1 }
 0x170   : > { %v1025_v4 = vadd.f32 %v1876_v63, %v1764_v33 }
 0x171   : > { %v1878_v59 = vpop.f32.mrf.mxu1 }
 0x172   : > { %v1879_v41 = vadd.f32 %v1878_v59, %v1877_v2  ;;  %1979 = vmatmul.mubr.msk.f32.gmra.mxu0 %vm1060_vm0, %v1025_v4 }
 0x173   : > { %v1880_v46 = vpop.f32.mrf.mxu1 }
 0x174   : > { %v1030_v7 = vadd.f32 %v1879_v41, %v2467_v40 }
 0x175   : > { %v1881_v12 = vpop.f32.mrf.mxu1 }
 0x176   : > { %v1882_v14 = vadd.f32 %v1881_v12, %v1880_v46  ;;  %1981 = vmatprep.mubr.msk.f32.mxu0 %vm1060_vm0, %v1030_v7 }
 0x177   : > { %v1883_v15 = vpop.f32.mrf.mxu1 }
 0x178   : > { %v1033_v49 = vadd.f32 %v1882_v14, %v2469_v45 }
 0x179   : > { %v1884_v52 = vpop.f32.mrf.mxu1 }
 0x17a   : > { %v1885_v0 = vadd.f32 %v1884_v52, %v1883_v15  ;;  %1982 = vmatmul.mubr.msk.f32.gmra.mxu0 %vm1060_vm0, %v1033_v49 }
 0x17b   : > { %v1886_v17 = vpop.f32.mrf.mxu1 }
 0x17c   : > { %v1038_v20 = vadd.f32 %v1885_v0, %v2471_v50 }
 0x17d   : > { %v1887_v21 = vpop.f32.mrf.mxu1 }
 0x17e   : > { %v1888_v61 = vadd.f32 %v1887_v21, %v1886_v17  ;;  %1984 = vmatprep.mubr.msk.f32.mxu0 %vm1060_vm0, %v1038_v20 }
 0x17f   : > { %v1889_v57 = vpop.f32.mrf.mxu1 }
 0x180   : > { %v1041_v40 = vadd.f32 %v1888_v61, %v2473_v55 }
 0x181   : > { %v1890_v3 = vpop.f32.mrf.mxu1 }
 0x182   : > { %v1891_v22 = vadd.f32 %v1890_v3, %v1889_v57  ;;  %1985 = vmatmul.mubr.msk.f32.gmra.mxu0 %vm1060_vm0, %v1041_v40 }
 0x183   : > { %v1892_v24 = vpop.f32.mrf.mxu1 }
 0x184   : > { %v1046_v45 = vadd.f32 %v1891_v22, %v2475_v60 }
 0x185   : > { %v1893_v25 = vpop.f32.mrf.mxu1 }
 0x186   : > { %v1894_v9 = vadd.f32 %v1893_v25, %v1892_v24  ;;  %1987 = vmatprep.mubr.msk.f32.mxu0 %vm1060_vm0, %v1046_v45 }
 0x187   : > { %v1895_v50 = vpop.f32.mrf.mxu1 }
 0x188   : > { %v1049_v62 = vadd.f32 %v1894_v9, %v2477_v1 }
 0x189   : > { %v1896_v27 = vpop.f32.mrf.mxu1 }
 0x18a   : > { %v1897_v8 = vadd.f32 %v1896_v27, %v1895_v50  ;;  %1988 = vmatmul.mubr.msk.f32.gmra.mxu0 %vm1060_vm0, %v1049_v62 }
 0x18b   : > { %v1898_v55 = vpop.f32.mrf.mxu1 }
 0x18c   : > { %v1054_v28 = vadd.f32 %v1897_v8, %v2479_v6 }
 0x18d   : > { %v1899_v29 = vpop.f32.mrf.mxu1 }
 0x18e   : > { %v1900_v18 = vadd.f32 %v1899_v29, %v1898_v55  ;;  %1990 = vmatprep.mubr.msk.f32.mxu0 %vm1060_vm0, %v1054_v28 }
 0x190   : > { %v1057_v60 = vadd.f32 %v1900_v18, %v2481_v11 }
 0x192   : > { %1991 = vmatmul.mubr.msk.f32.gmra.mxu0 %vm1060_vm0, %v1057_v60 }
 0x1da   : > { %v1947_v1 = vpop.f32.mrf.mxu0 }
 0x1db   : > { %v1383_v6 = vmax.f32 %v1947_v1, 0.0 }
 0x1dc   : > { %v1223_v5 = vpop.f32.mrf.mxu0 }
 0x1dd   : > { %1415 = vst.msk [vmem:[%s2539_s26 + $0x8] sm:$0xff] %vm1060_vm0, %v1383_v6  ;;  %v1382_v11 = vmax.f32 %v1223_v5, 0.0 }
 0x1df   : > { %1414 = vst.msk [vmem:[%s2539_s26] sm:$0xff] %vm1060_vm0, %v1382_v11 }
 0x1e2   : > { %v1950_v31 = vpop.f32.mrf.mxu0 }
 0x1e3   : > { %v1385_v32 = vmax.f32 %v1950_v31, 0.0 }
 0x1e4   : > { %v1233_v34 = vpop.f32.mrf.mxu0 }
 0x1e5   : > { %1417 = vst.msk [vmem:[%s2539_s26 + $0x18] sm:$0xff] %vm1060_vm0, %v1385_v32  ;;  %v1384_v16 = vmax.f32 %v1233_v34, 0.0 }
 0x1e7   : > { %1416 = vst.msk [vmem:[%s2539_s26 + $0x10] sm:$0xff] %vm1060_vm0, %v1384_v16 }
 0x1ea   : > { %v1953_v10 = vpop.f32.mrf.mxu0 }
 0x1eb   : > { %v1387_v13 = vmax.f32 %v1953_v10, 0.0 }
 0x1ec   : > { %v1243_v35 = vpop.f32.mrf.mxu0 }
 0x1ed   : > { %1419 = vst.msk [vmem:[%s2539_s26 + $0x28] sm:$0xff] %vm1060_vm0, %v1387_v13  ;;  %v1386_v36 = vmax.f32 %v1243_v35, 0.0 }
 0x1ef   : > { %1418 = vst.msk [vmem:[%s2539_s26 + $0x20] sm:$0xff] %vm1060_vm0, %v1386_v36 }
 0x1f2   : > { %v1956_v38 = vpop.f32.mrf.mxu0 }
 0x1f3   : > { %v1389_v39 = vmax.f32 %v1956_v38, 0.0 }
 0x1f4   : > { %v1253_v19 = vpop.f32.mrf.mxu0 }
 0x1f5   : > { %1421 = vst.msk [vmem:[%s2539_s26 + $0x38] sm:$0xff] %vm1060_vm0, %v1389_v39  ;;  %v1388_v23 = vmax.f32 %v1253_v19, 0.0 }
 0x1f7   : > { %1420 = vst.msk [vmem:[%s2539_s26 + $0x30] sm:$0xff] %vm1060_vm0, %v1388_v23 }
 0x1fa   : > { %v1959_v42 = vpop.f32.mrf.mxu0 }
 0x1fb   : > { %v1391_v43 = vmax.f32 %v1959_v42, 0.0 }
 0x1fc   : > { %v1263_v44 = vpop.f32.mrf.mxu0 }
 0x1fd   : > { %1423 = vst.msk [vmem:[%s2539_s26 + $0x48] sm:$0xff] %vm1060_vm0, %v1391_v43  ;;  %v1390_v47 = vmax.f32 %v1263_v44, 0.0 }
 0x1ff   : > { %1422 = vst.msk [vmem:[%s2539_s26 + $0x40] sm:$0xff] %vm1060_vm0, %v1390_v47 }
 0x202   : > { %v1962_v48 = vpop.f32.mrf.mxu0 }
 0x203   : > { %v1393_v26 = vmax.f32 %v1962_v48, 0.0 }
 0x204   : > { %v1273_v30 = vpop.f32.mrf.mxu0 }
 0x205   : > { %1425 = vst.msk [vmem:[%s2539_s26 + $0x58] sm:$0xff] %vm1060_vm0, %v1393_v26  ;;  %v1392_v51 = vmax.f32 %v1273_v30, 0.0 }
 0x207   : > { %1424 = vst.msk [vmem:[%s2539_s26 + $0x50] sm:$0xff] %vm1060_vm0, %v1392_v51 }
 0x20a   : > { %v1965_v53 = vpop.f32.mrf.mxu0 }
 0x20b   : > { %v1395_v56 = vmax.f32 %v1965_v53, 0.0 }
 0x20c   : > { %v1283_v54 = vpop.f32.mrf.mxu0 }
 0x20d   : > { %1427 = vst.msk [vmem:[%s2539_s26 + $0x68] sm:$0xff] %vm1060_vm0, %v1395_v56  ;;  %v1394_v58 = vmax.f32 %v1283_v54, 0.0 }
 0x20f   : > { %1426 = vst.msk [vmem:[%s2539_s26 + $0x60] sm:$0xff] %vm1060_vm0, %v1394_v58 }
 0x212   : > { %v1968_v33 = vpop.f32.mrf.mxu0 }
 0x213   : > { %v1397_v37 = vmax.f32 %v1968_v33, 0.0 }
 0x214   : > { %v1293_v63 = vpop.f32.mrf.mxu0 }
 0x215   : > { %1429 = vst.msk [vmem:[%s2539_s26 + $0x78] sm:$0xff] %vm1060_vm0, %v1397_v37  ;;  %v1396_v2 = vmax.f32 %v1293_v63, 0.0 }
 0x217   : > { %1428 = vst.msk [vmem:[%s2539_s26 + $0x70] sm:$0xff] %vm1060_vm0, %v1396_v2 }
 0x21a   : > { %v1971_v4 = vpop.f32.mrf.mxu0 }
 0x21b   : > { %v1399_v59 = vmax.f32 %v1971_v4, 0.0 }
 0x21c   : > { %v1303_v41 = vpop.f32.mrf.mxu0 }
 0x21d   : > { %1431 = vst.msk [vmem:[%s2539_s26 + $0x88] sm:$0xff] %vm1060_vm0, %v1399_v59  ;;  %v1398_v46 = vmax.f32 %v1303_v41, 0.0 }
 0x21f   : > { %1430 = vst.msk [vmem:[%s2539_s26 + $0x80] sm:$0xff] %vm1060_vm0, %v1398_v46 }
 0x222   : > { %v1974_v7 = vpop.f32.mrf.mxu0 }
 0x223   : > { %v1401_v12 = vmax.f32 %v1974_v7, 0.0 }
 0x224   : > { %v1313_v14 = vpop.f32.mrf.mxu0 }
 0x225   : > { %1433 = vst.msk [vmem:[%s2539_s26 + $0x98] sm:$0xff] %vm1060_vm0, %v1401_v12  ;;  %v1400_v15 = vmax.f32 %v1313_v14, 0.0 }
 0x227   : > { %1432 = vst.msk [vmem:[%s2539_s26 + $0x90] sm:$0xff] %vm1060_vm0, %v1400_v15 }
 0x22a   : > { %v1977_v49 = vpop.f32.mrf.mxu0 }
 0x22b   : > { %v1403_v52 = vmax.f32 %v1977_v49, 0.0 }
 0x22c   : > { %v1323_v0 = vpop.f32.mrf.mxu0 }
 0x22d   : > { %1435 = vst.msk [vmem:[%s2539_s26 + $0xa8] sm:$0xff] %vm1060_vm0, %v1403_v52  ;;  %v1402_v17 = vmax.f32 %v1323_v0, 0.0 }
 0x22f   : > { %1434 = vst.msk [vmem:[%s2539_s26 + $0xa0] sm:$0xff] %vm1060_vm0, %v1402_v17 }
 0x232   : > { %v1980_v20 = vpop.f32.mrf.mxu0 }
 0x233   : > { %v1405_v21 = vmax.f32 %v1980_v20, 0.0 }
 0x234   : > { %v1333_v61 = vpop.f32.mrf.mxu0 }
 0x235   : > { %1437 = vst.msk [vmem:[%s2539_s26 + $0xb8] sm:$0xff] %vm1060_vm0, %v1405_v21  ;;  %v1404_v57 = vmax.f32 %v1333_v61, 0.0 }
 0x237   : > { %1436 = vst.msk [vmem:[%s2539_s26 + $0xb0] sm:$0xff] %vm1060_vm0, %v1404_v57 }
 0x23a   : > { %v1983_v40 = vpop.f32.mrf.mxu0 }
 0x23b   : > { %v1407_v3 = vmax.f32 %v1983_v40, 0.0 }
 0x23c   : > { %v1343_v22 = vpop.f32.mrf.mxu0 }
 0x23d   : > { %1439 = vst.msk [vmem:[%s2539_s26 + $0xc8] sm:$0xff] %vm1060_vm0, %v1407_v3  ;;  %v1406_v24 = vmax.f32 %v1343_v22, 0.0 }
 0x23f   : > { %1438 = vst.msk [vmem:[%s2539_s26 + $0xc0] sm:$0xff] %vm1060_vm0, %v1406_v24 }
 0x242   : > { %v1986_v45 = vpop.f32.mrf.mxu0 }
 0x243   : > { %v1409_v25 = vmax.f32 %v1986_v45, 0.0 }
 0x244   : > { %v1353_v9 = vpop.f32.mrf.mxu0 }
 0x245   : > { %1441 = vst.msk [vmem:[%s2539_s26 + $0xd8] sm:$0xff] %vm1060_vm0, %v1409_v25  ;;  %v1408_v50 = vmax.f32 %v1353_v9, 0.0 }
 0x247   : > { %1440 = vst.msk [vmem:[%s2539_s26 + $0xd0] sm:$0xff] %vm1060_vm0, %v1408_v50 }
 0x24a   : > { %v1989_v62 = vpop.f32.mrf.mxu0 }
 0x24b   : > { %v1411_v27 = vmax.f32 %v1989_v62, 0.0 }
 0x24c   : > { %v1363_v8 = vpop.f32.mrf.mxu0 }
 0x24d   : > { %1443 = vst.msk [vmem:[%s2539_s26 + $0xe8] sm:$0xff] %vm1060_vm0, %v1411_v27  ;;  %v1410_v55 = vmax.f32 %v1363_v8, 0.0 }
 0x24f   : > { %1442 = vst.msk [vmem:[%s2539_s26 + $0xe0] sm:$0xff] %vm1060_vm0, %v1410_v55 }
 0x252   : > { %v1992_v28 = vpop.f32.mrf.mxu0 }
 0x253   : > { %v1413_v29 = vmax.f32 %v1992_v28, 0.0 }
 0x254   : > { %v1373_v18 = vpop.f32.mrf.mxu0 }
 0x255   : > { %1445 = vst.msk [vmem:[%s2539_s26 + $0xf8] sm:$0xff] %vm1060_vm0, %v1413_v29  ;;  %v1412_v60 = vmax.f32 %v1373_v18, 0.0 }
 0x257   : > { %1444 = vst.msk [vmem:[%s2539_s26 + $0xf0] sm:$0xff] %vm1060_vm0, %v1412_v60 }
 0x258 PF: > { %s13_s14 = sadd.s32 1, %s2151_s14   ;;  %s2618_s12 = smov %s2147_s13 }
 0x259   : > { %p10_p5 = scmp.ge.s32.totalorder %s13_s14, 4   ;;  %s2619_s13 = smov %s2621_s15 }
 0x25b   :  { %12 = sbr.rel (!%p10_p5) target bundleno = 2 (0x2), region = 68 }

// kernel: gae_forward.8
= control target key start
LH: loop header
LB: loop body
LE: loop exit
PB: predicated region body
PF: predicated region fallthrough
CT: control target
= control target key end

     0   :  { %s2502_s12 = smov 0   ;;  %s2504_s13 = smov 0   ;;  %s3068_s0 = inlined_call_operand.vmem [shape: bf16[1,512,512], index: 0, kind: input, shape index: {}]   ;;  %s3069_s1 = inlined_call_operand.vmem [shape: f32[1,512,32], index: 1, kind: input, shape index: {}]   ;;  %s3070_s2 = inlined_call_operand.vmem [shape: f32[1,32,16], index: 2, kind: input, shape index: {}]   ;;  %s3071_s3 = inlined_call_operand.vmem [shape: f32[1,512,16], index: 3, kind: output, shape index: {}]  }
   0x1   :  { %s2506_s14 = smov 0  }
   0x2 LB: > { %s22_s15 = sadd.s32 1, %s2476_s13  ;;  %p1797_p0 = scmp.ge.s32.totalorder %s2480_s14, 1  ;;  %s2480_s14 = sphi %s2506_s14, %s13_s14   ;;  %s2476_s13 = sphi %s2504_s13, %s3109_s13   ;;  %s2472_s12 = sphi %s2502_s12, %s3108_s12  }
   0x3   : > { %p23_p1 = scmp.ge.s32.totalorder %s22_s15, 2  ;;  %p179_p2 = scmp.lt.s32.totalorder %s2480_s14, 3 }
   0x5   : > { %s3111_s15 = smov (%p23_p1, %s22_s15), 0  ;;  %p180_p3 = pnand %p1797_p0, %p179_p2 }
   0x7   : > { %183 = sbr.rel (%p180_p3) target bundleno = 635 (0x27b), region = 32 }
   0xc   : > { %v385_v0 = vld [vmem:[%s3070_s2 + $0x18] sm:$0xff]  ;;  %v384_v1 = vld [vmem:[%s3070_s2 + $0x10] sm:$0xff]  ;;  %v383_v2 = vld [vmem:[%s3070_s2 + $0x8] sm:$0xff]  ;;  %vm386_vm0 = vcmask 261120   ;;  %s1798_s10 = sshll.u32 %s2472_s12, 5  ;;  %vm1638_vm1 = vcmask 130048  }
   0xd   : > { %2226 = vmatprep.subr.mxu0 %v385_v0  ;;  %2330 = vmatprep.subr.mxu1 %v385_v0  ;;  %v382_v3 = vld [vmem:[%s3070_s2] sm:$0xff]  ;;  %v319_v6 = vld [vmem:[%s3069_s1 + $0x8] sm:$0xff]  ;;  %v320_v8 = vld [vmem:[%s3069_s1 + $0x10] sm:$0xff]  ;;  %p225_p4 = scmp.lt.s32.totalorder %s1798_s10, 63 }
   0xe   : > { %2227 = vmatpush3.msra.mxu0 %v385_v0  ;;  %2334 = vmatpush3.msra.mxu1 %v385_v0  ;;  %v318_v4 = vld [vmem:[%s3069_s1] sm:$0xff]  ;;  %v351_v7 = vld [vmem:[%s3069_s1 + $0x108] sm:$0xff]  ;;  %v352_v9 = vld [vmem:[%s3069_s1 + $0x110] sm:$0xff] }
   0xf   : > { %2228 = vmatprep.subr.mxu0 %v384_v1  ;;  %2331 = vmatprep.subr.mxu1 %v384_v1  ;;  %v350_v5 = vld [vmem:[%s3069_s1 + $0x100] sm:$0xff]  ;;  %v321_v10 = vld [vmem:[%s3069_s1 + $0x18] sm:$0xff]  ;;  %v323_v14 = vld [vmem:[%s3069_s1 + $0x28] sm:$0xff]  ;;  %s3113_s10 = smov (!%p225_p4, %s1798_s10), 63 }
  0x10   : > { %2229 = vmatpush3.msra.mxu0 %v384_v1  ;;  %2335 = vmatpush3.msra.mxu1 %v384_v1  ;;  %v353_v11 = vld [vmem:[%s3069_s1 + $0x118] sm:$0xff]  ;;  %v322_v12 = vld [vmem:[%s3069_s1 + $0x20] sm:$0xff]  ;;  %v355_v15 = vld [vmem:[%s3069_s1 + $0x128] sm:$0xff]  ;;  %s1933_s11 = sshll.u32 %s3113_s10, 4  ;;  %s1802_s12 = sshll.u32 %s3113_s10, 3 }
  0x11   : > { %2230 = vmatprep.subr.mxu0 %v383_v2  ;;  %2332 = vmatprep.subr.mxu1 %v383_v2  ;;  %v354_v13 = vld [vmem:[%s3069_s1 + $0x120] sm:$0xff]  ;;  %v324_v16 = vld [vmem:[%s3069_s1 + $0x30] sm:$0xff]  ;;  %v325_v18 = vld [vmem:[%s3069_s1 + $0x38] sm:$0xff]  ;;  %s2797_s18 = scalar_lea.vmem %s3068_s0, %s1933_s11  ;;  %s2993_s21 = scalar_lea.vmem %s3071_s3, %s1802_s12 }
  0x12   : > { %2231 = vmatpush3.msra.mxu0 %v383_v2  ;;  %2336 = vmatpush3.msra.mxu1 %v383_v2  ;;  %v356_v17 = vld [vmem:[%s3069_s1 + $0x130] sm:$0xff]  ;;  %v357_v19 = vld [vmem:[%s3069_s1 + $0x138] sm:$0xff]  ;;  %v326_v20 = vld [vmem:[%s3069_s1 + $0x40] sm:$0xff] }
  0x13   : > { %2232 = vmatprep.subr.mxu0 %v382_v3  ;;  %2333 = vmatprep.subr.mxu1 %v382_v3  ;;  %v358_v21 = vld [vmem:[%s3069_s1 + $0x140] sm:$0xff]  ;;  %v327_v22 = vld [vmem:[%s3069_s1 + $0x48] sm:$0xff]  ;;  %v328_v24 = vld [vmem:[%s3069_s1 + $0x50] sm:$0xff] }
  0x14   : > { %2233 = vmatpush3.msra.mxu0 %v382_v3  ;;  %2337 = vmatpush3.msra.mxu1 %v382_v3  ;;  %v359_v23 = vld [vmem:[%s3069_s1 + $0x148] sm:$0xff]  ;;  %v360_v25 = vld [vmem:[%s3069_s1 + $0x150] sm:$0xff]  ;;  %v329_v26 = vld [vmem:[%s3069_s1 + $0x58] sm:$0xff] }
  0x15   : > { %2234 = vmatprep.mubr.msk.f32.mxu0 %vm386_vm0, %v318_v4  ;;  %2282 = vmatprep.mubr.msk.f32.mxu1 %vm386_vm0, %v350_v5  ;;  %v361_v27 = vld [vmem:[%s3069_s1 + $0x158] sm:$0xff]  ;;  %v330_v28 = vld [vmem:[%s3069_s1 + $0x60] sm:$0xff]  ;;  %v331_v30 = vld [vmem:[%s3069_s1 + $0x68] sm:$0xff] }
  0x16   : > { %2235 = vmatmul.mubr.msk.f32.vlgmr.msra.gmra.mxu0 %vm386_vm0, %v319_v6  ;;  %2283 = vmatmul.mubr.msk.f32.vlgmr.msra.gmra.mxu1 %vm386_vm0, %v351_v7  ;;  %v362_v29 = vld [vmem:[%s3069_s1 + $0x160] sm:$0xff]  ;;  %v363_v31 = vld [vmem:[%s3069_s1 + $0x168] sm:$0xff]  ;;  %v332_v32 = vld [vmem:[%s3069_s1 + $0x70] sm:$0xff] }
  0x17   : > { %2237 = vmatprep.mubr.msk.f32.mxu0 %vm386_vm0, %v320_v8  ;;  %2285 = vmatprep.mubr.msk.f32.mxu1 %vm386_vm0, %v352_v9  ;;  %v364_v33 = vld [vmem:[%s3069_s1 + $0x170] sm:$0xff]  ;;  %v333_v34 = vld [vmem:[%s3069_s1 + $0x78] sm:$0xff]  ;;  %v334_v36 = vld [vmem:[%s3069_s1 + $0x80] sm:$0xff] }
  0x18   : > { %v365_v35 = vld [vmem:[%s3069_s1 + $0x178] sm:$0xff]  ;;  %v366_v37 = vld [vmem:[%s3069_s1 + $0x180] sm:$0xff]  ;;  %v335_v38 = vld [vmem:[%s3069_s1 + $0x88] sm:$0xff] }
  0x19   : > { %v367_v39 = vld [vmem:[%s3069_s1 + $0x188] sm:$0xff]  ;;  %v336_v40 = vld [vmem:[%s3069_s1 + $0x90] sm:$0xff]  ;;  %v337_v42 = vld [vmem:[%s3069_s1 + $0x98] sm:$0xff] }
  0x1a   : > { %2238 = vmatmul.mubr.msk.f32.gmra.mxu0 %vm386_vm0, %v321_v10  ;;  %2286 = vmatmul.mubr.msk.f32.gmra.mxu1 %vm386_vm0, %v353_v11  ;;  %v368_v41 = vld [vmem:[%s3069_s1 + $0x190] sm:$0xff]  ;;  %v369_v43 = vld [vmem:[%s3069_s1 + $0x198] sm:$0xff]  ;;  %v338_v44 = vld [vmem:[%s3069_s1 + $0xa0] sm:$0xff] }
  0x1b   : > { %2240 = vmatprep.mubr.msk.f32.mxu0 %vm386_vm0, %v322_v12  ;;  %2288 = vmatprep.mubr.msk.f32.mxu1 %vm386_vm0, %v354_v13  ;;  %v370_v45 = vld [vmem:[%s3069_s1 + $0x1a0] sm:$0xff]  ;;  %v339_v46 = vld [vmem:[%s3069_s1 + $0xa8] sm:$0xff]  ;;  %v340_v48 = vld [vmem:[%s3069_s1 + $0xb0] sm:$0xff] }
  0x1c   : > { %v371_v47 = vld [vmem:[%s3069_s1 + $0x1a8] sm:$0xff]  ;;  %v372_v49 = vld [vmem:[%s3069_s1 + $0x1b0] sm:$0xff]  ;;  %v341_v50 = vld [vmem:[%s3069_s1 + $0xb8] sm:$0xff] }
  0x1d   : > { %v373_v51 = vld [vmem:[%s3069_s1 + $0x1b8] sm:$0xff]  ;;  %v342_v52 = vld [vmem:[%s3069_s1 + $0xc0] sm:$0xff]  ;;  %v343_v54 = vld [vmem:[%s3069_s1 + $0xc8] sm:$0xff] }
  0x1e   : > { %2241 = vmatmul.mubr.msk.f32.gmra.mxu0 %vm386_vm0, %v323_v14  ;;  %2289 = vmatmul.mubr.msk.f32.gmra.mxu1 %vm386_vm0, %v355_v15  ;;  %v374_v53 = vld [vmem:[%s3069_s1 + $0x1c0] sm:$0xff]  ;;  %v375_v55 = vld [vmem:[%s3069_s1 + $0x1c8] sm:$0xff]  ;;  %v344_v56 = vld [vmem:[%s3069_s1 + $0xd0] sm:$0xff] }
  0x1f   : > { %2243 = vmatprep.mubr.msk.f32.mxu0 %vm386_vm0, %v324_v16  ;;  %2291 = vmatprep.mubr.msk.f32.mxu1 %vm386_vm0, %v356_v17  ;;  %v376_v57 = vld [vmem:[%s3069_s1 + $0x1d0] sm:$0xff]  ;;  %v345_v58 = vld [vmem:[%s3069_s1 + $0xd8] sm:$0xff]  ;;  %v346_v60 = vld [vmem:[%s3069_s1 + $0xe0] sm:$0xff] }
  0x20   : > { %v377_v59 = vld [vmem:[%s3069_s1 + $0x1d8] sm:$0xff]  ;;  %v378_v61 = vld [vmem:[%s3069_s1 + $0x1e0] sm:$0xff]  ;;  %v347_v62 = vld [vmem:[%s3069_s1 + $0xe8] sm:$0xff] }
  0x21   : > { %v379_v63 = vld [vmem:[%s3069_s1 + $0x1e8] sm:$0xff]  ;;  %v348_v0 = vld [vmem:[%s3069_s1 + $0xf0] sm:$0xff]  ;;  %v349_v2 = vld [vmem:[%s3069_s1 + $0xf8] sm:$0xff] }
  0x22   : > { %2244 = vmatmul.mubr.msk.f32.gmra.mxu0 %vm386_vm0, %v325_v18  ;;  %2292 = vmatmul.mubr.msk.f32.gmra.mxu1 %vm386_vm0, %v357_v19  ;;  %v380_v1 = vld [vmem:[%s3069_s1 + $0x1f0] sm:$0xff]  ;;  %v381_v3 = vld [vmem:[%s3069_s1 + $0x1f8] sm:$0xff] }
  0x23   : > { %2246 = vmatprep.mubr.msk.f32.mxu0 %vm386_vm0, %v326_v20  ;;  %2294 = vmatprep.mubr.msk.f32.mxu1 %vm386_vm0, %v358_v21  ;;  %v2364_v4 = vld [vmem:[%s2797_s18 + $0x4] ss:$16 sps:$4 sm:$0xff]   ;;  %v2367_v5 = vld [vmem:[%s2797_s18 + $0xc] ss:$16 sps:$4 sm:$0xff]  }
  0x26   : > { %2247 = vmatmul.mubr.msk.f32.gmra.mxu0 %vm386_vm0, %v327_v22  ;;  %2295 = vmatmul.mubr.msk.f32.gmra.mxu1 %vm386_vm0, %v359_v23 }
  0x27   : > { %2249 = vmatprep.mubr.msk.f32.mxu0 %vm386_vm0, %v328_v24  ;;  %2297 = vmatprep.mubr.msk.f32.mxu1 %vm386_vm0, %v360_v25 }
  0x2a   : > { %2250 = vmatmul.mubr.msk.f32.gmra.mxu0 %vm386_vm0, %v329_v26  ;;  %2298 = vmatmul.mubr.msk.f32.gmra.mxu1 %vm386_vm0, %v361_v27 }
  0x2b   : > { %2252 = vmatprep.mubr.msk.f32.mxu0 %vm386_vm0, %v330_v28  ;;  %2300 = vmatprep.mubr.msk.f32.mxu1 %vm386_vm0, %v362_v29 }
  0x2e   : > { %2253 = vmatmul.mubr.msk.f32.gmra.mxu0 %vm386_vm0, %v331_v30  ;;  %2301 = vmatmul.mubr.msk.f32.gmra.mxu1 %vm386_vm0, %v363_v31 }
  0x2f   : > { %2255 = vmatprep.mubr.msk.f32.mxu0 %vm386_vm0, %v332_v32  ;;  %2303 = vmatprep.mubr.msk.f32.mxu1 %vm386_vm0, %v364_v33 }
  0x32   : > { %2256 = vmatmul.mubr.msk.f32.gmra.mxu0 %vm386_vm0, %v333_v34  ;;  %2304 = vmatmul.mubr.msk.f32.gmra.mxu1 %vm386_vm0, %v365_v35 }
  0x33   : > { %2258 = vmatprep.mubr.msk.f32.mxu0 %vm386_vm0, %v334_v36  ;;  %2306 = vmatprep.mubr.msk.f32.mxu1 %vm386_vm0, %v366_v37 }
  0x36   : > { %2259 = vmatmul.mubr.msk.f32.gmra.mxu0 %vm386_vm0, %v335_v38  ;;  %2307 = vmatmul.mubr.msk.f32.gmra.mxu1 %vm386_vm0, %v367_v39 }
  0x37   : > { %2261 = vmatprep.mubr.msk.f32.mxu0 %vm386_vm0, %v336_v40  ;;  %2309 = vmatprep.mubr.msk.f32.mxu1 %vm386_vm0, %v368_v41 }
  0x3a   : > { %2262 = vmatmul.mubr.msk.f32.gmra.mxu0 %vm386_vm0, %v337_v42  ;;  %2310 = vmatmul.mubr.msk.f32.gmra.mxu1 %vm386_vm0, %v369_v43 }
  0x3b   : > { %2264 = vmatprep.mubr.msk.f32.mxu0 %vm386_vm0, %v338_v44  ;;  %2312 = vmatprep.mubr.msk.f32.mxu1 %vm386_vm0, %v370_v45 }
  0x3e   : > { %2265 = vmatmul.mubr.msk.f32.gmra.mxu0 %vm386_vm0, %v339_v46  ;;  %2313 = vmatmul.mubr.msk.f32.gmra.mxu1 %vm386_vm0, %v371_v47 }
  0x3f   : > { %2267 = vmatprep.mubr.msk.f32.mxu0 %vm386_vm0, %v340_v48  ;;  %2315 = vmatprep.mubr.msk.f32.mxu1 %vm386_vm0, %v372_v49 }
  0x42   : > { %2268 = vmatmul.mubr.msk.f32.gmra.mxu0 %vm386_vm0, %v341_v50  ;;  %2316 = vmatmul.mubr.msk.f32.gmra.mxu1 %vm386_vm0, %v373_v51 }
  0x43   : > { %2270 = vmatprep.mubr.msk.f32.mxu0 %vm386_vm0, %v342_v52  ;;  %2318 = vmatprep.mubr.msk.f32.mxu1 %vm386_vm0, %v374_v53 }
  0x46   : > { %2271 = vmatmul.mubr.msk.f32.gmra.mxu0 %vm386_vm0, %v343_v54  ;;  %2319 = vmatmul.mubr.msk.f32.gmra.mxu1 %vm386_vm0, %v375_v55 }
  0x47   : > { %2273 = vmatprep.mubr.msk.f32.mxu0 %vm386_vm0, %v344_v56  ;;  %2321 = vmatprep.mubr.msk.f32.mxu1 %vm386_vm0, %v376_v57 }
  0x4a   : > { %2274 = vmatmul.mubr.msk.f32.gmra.mxu0 %vm386_vm0, %v345_v58  ;;  %2322 = vmatmul.mubr.msk.f32.gmra.mxu1 %vm386_vm0, %v377_v59 }
  0x4b   : > { %2276 = vmatprep.mubr.msk.f32.mxu0 %vm386_vm0, %v346_v60  ;;  %2324 = vmatprep.mubr.msk.f32.mxu1 %vm386_vm0, %v378_v61 }
  0x4e   : > { %2277 = vmatmul.mubr.msk.f32.gmra.mxu0 %vm386_vm0, %v347_v62  ;;  %2325 = vmatmul.mubr.msk.f32.gmra.mxu1 %vm386_vm0, %v379_v63 }
  0x4f   : > { %2279 = vmatprep.mubr.msk.f32.mxu0 %vm386_vm0, %v348_v0  ;;  %2327 = vmatprep.mubr.msk.f32.mxu1 %vm386_vm0, %v380_v1 }
  0x52   : > { %2280 = vmatmul.mubr.msk.f32.gmra.mxu0 %vm386_vm0, %v349_v2  ;;  %2328 = vmatmul.mubr.msk.f32.gmra.mxu1 %vm386_vm0, %v381_v3 }
  0x53   : > { %1348 = vmatprep.mubr.bf16.mxu1 %v2364_v4  ;;  %1509 = vmatprep.mubr.bf16.mxu0 %v2367_v5 }
  0xd6   : > { %v2801_v6 = vpop.f32.mrf.mxu0  ;;  %v2803_v7 = vpop.f32.mrf.mxu1 }
  0xd7   : > { %3080 = vst [vmem:[#allocation2_spill] sm:$0xff] %v2801_v6  ;;  %3081 = vst [vmem:[#allocation3_spill] sm:$0xff] %v2803_v7 }
  0xd8   : > { %v2805_v8 = vpop.f32.mrf.mxu0  ;;  %v2807_v9 = vpop.f32.mrf.mxu1 }
  0xd9   : > { %3082 = vst [vmem:[#allocation4_spill] sm:$0xff] %v2805_v8  ;;  %3083 = vst [vmem:[#allocation5_spill] sm:$0xff] %v2807_v9 }
  0xda   : > { %v2813_v12 = vpop.f32.mrf.mxu0  ;;  %v2815_v13 = vpop.f32.mrf.mxu1 }
  0xdb   : > { %3084 = vst [vmem:[#allocation6_spill] sm:$0xff] %v2813_v12  ;;  %3085 = vst [vmem:[#allocation7_spill] sm:$0xff] %v2815_v13 }
  0xdc   : > { %v2817_v14 = vpop.f32.mrf.mxu0  ;;  %v2819_v15 = vpop.f32.mrf.mxu1 }
  0xdd   : > { %3086 = vst [vmem:[#allocation8_spill] sm:$0xff] %v2817_v14  ;;  %3087 = vst [vmem:[#allocation9_spill] sm:$0xff] %v2819_v15 }
  0xde   : > { %v2825_v18 = vpop.f32.mrf.mxu0  ;;  %v2827_v19 = vpop.f32.mrf.mxu1 }
  0xe0   : > { %v2829_v20 = vpop.f32.mrf.mxu0  ;;  %v2831_v21 = vpop.f32.mrf.mxu1 }
  0xe2   : > { %v2837_v24 = vpop.f32.mrf.mxu0  ;;  %v2839_v25 = vpop.f32.mrf.mxu1 }
  0xe4   : > { %v2841_v26 = vpop.f32.mrf.mxu0  ;;  %v2843_v27 = vpop.f32.mrf.mxu1 }
  0xe6   : > { %v2849_v30 = vpop.f32.mrf.mxu0  ;;  %v2851_v31 = vpop.f32.mrf.mxu1 }
  0xe8   : > { %v2853_v32 = vpop.f32.mrf.mxu0  ;;  %v2855_v33 = vpop.f32.mrf.mxu1 }
  0xea   : > { %v2857_v34 = vpop.f32.mrf.mxu0  ;;  %v2859_v35 = vpop.f32.mrf.mxu1 }
  0xec   : > { %v2861_v36 = vpop.f32.mrf.mxu0  ;;  %v2863_v37 = vpop.f32.mrf.mxu1 }
  0xee   : > { %v2254_v38 = vpop.f32.mrf.mxu0  ;;  %v2302_v39 = vpop.f32.mrf.mxu1 }
  0xf0   : > { %v705_v40 = vpop.f32.mrf.mxu0  ;;  %v865_v41 = vpop.f32.mrf.mxu1 }
  0xf1   : > { %v970_v14 = vpack.c.bf16 %v2254_v38, %v705_v40  ;;  %v986_v12 = vpack.c.bf16 %v2302_v39, %v865_v41  ;;  %v3106_v38 = vld [vmem:[#allocation5_spill] sm:$0xff]  ;;  %v2368_v40 = vld [vmem:[%s2797_s18 + $0x24] ss:$16 sps:$4 sm:$0xff]  }
  0xf2   : > { %v2257_v42 = vpop.f32.mrf.mxu0  ;;  %v2305_v43 = vpop.f32.mrf.mxu1  ;;  %v2370_v41 = vld [vmem:[%s2797_s18 + $0x2c] ss:$16 sps:$4 sm:$0xff]  }
  0xf4   : > { %v715_v44 = vpop.f32.mrf.mxu0  ;;  %v875_v45 = vpop.f32.mrf.mxu1 }
  0xf5   : > { %v971_v8 = vpack.c.bf16 %v2257_v42, %v715_v44  ;;  %v987_v6 = vpack.c.bf16 %v2305_v43, %v875_v45  ;;  %v2372_v42 = vld [vmem:[%s2797_s18 + $0x20] ss:$16 sps:$4 sm:$0xff]   ;;  %v2373_v43 = vld [vmem:[%s2797_s18 + $0x28] ss:$16 sps:$4 sm:$0xff]   ;;  %v2374_v44 = vld [vmem:[%s2797_s18 + $0x44] ss:$16 sps:$4 sm:$0xff]  }
  0xf6   : > { %v2865_v46 = vpop.f32.mrf.mxu0  ;;  %v2867_v47 = vpop.f32.mrf.mxu1  ;;  %v2376_v45 = vld [vmem:[%s2797_s18 + $0x4c] ss:$16 sps:$4 sm:$0xff]  }
  0xf7   : > { %3088 = vst [vmem:[#allocation10_spill] sm:$0xff] %v2867_v47 }
  0xf8   : > { %v2869_v48 = vpop.f32.mrf.mxu0  ;;  %v2871_v49 = vpop.f32.mrf.mxu1 }
  0xf9   : > { %3089 = vst [vmem:[#allocation11_spill] sm:$0xff] %v2871_v49 }
  0xfa   : > { %v2873_v50 = vpop.f32.mrf.mxu0  ;;  %v2875_v51 = vpop.f32.mrf.mxu1 }
  0xfc   : > { %v2877_v52 = vpop.f32.mrf.mxu0  ;;  %v2879_v53 = vpop.f32.mrf.mxu1 }
  0xfe   : > { %v2881_v54 = vpop.f32.mrf.mxu0  ;;  %v2883_v55 = vpop.f32.mrf.mxu1 }
 0x100   : > { %v745_v56 = vpop.f32.mrf.mxu0  ;;  %v905_v57 = vpop.f32.mrf.mxu1 }
 0x102   : > { %v2269_v58 = vpop.f32.mrf.mxu0  ;;  %v2317_v59 = vpop.f32.mrf.mxu1 }
 0x104   : > { %v755_v60 = vpop.f32.mrf.mxu0  ;;  %v915_v61 = vpop.f32.mrf.mxu1 }
 0x106   : > { %v2272_v62 = vpop.f32.mrf.mxu0  ;;  %v2320_v63 = vpop.f32.mrf.mxu1 }
 0x108   : > { %v765_v0 = vpop.f32.mrf.mxu0  ;;  %v925_v1 = vpop.f32.mrf.mxu1 }
 0x10a   : > { %v2275_v2 = vpop.f32.mrf.mxu0  ;;  %v2323_v3 = vpop.f32.mrf.mxu1 }
 0x10c   : > { %v775_v4 = vpop.f32.mrf.mxu0  ;;  %v935_v5 = vpop.f32.mrf.mxu1 }
 0x10d   : > { %v977_v47 = vpack.c.bf16 %v2275_v2, %v775_v4  ;;  %v993_v49 = vpack.c.bf16 %v2323_v3, %v935_v5  ;;  %v2408_v2 = vld [vmem:[%s2797_s18 + $0xe0] ss:$16 sps:$4 sm:$0xff]   ;;  %v2409_v3 = vld [vmem:[%s2797_s18 + $0xe8] ss:$16 sps:$4 sm:$0xff]   ;;  %v2410_v4 = vld [vmem:[%s2797_s18 + $0x104] ss:$16 sps:$4 sm:$0xff]  }
 0x10e   : > { %v2278_v11 = vpop.f32.mrf.mxu0  ;;  %v2326_v10 = vpop.f32.mrf.mxu1  ;;  %v2412_v5 = vld [vmem:[%s2797_s18 + $0x10c] ss:$16 sps:$4 sm:$0xff]  }
 0x110   : > { %v785_v17 = vpop.f32.mrf.mxu0  ;;  %v945_v16 = vpop.f32.mrf.mxu1 }
 0x111   : > { %v978_v15 = vpack.c.bf16 %v2278_v11, %v785_v17  ;;  %v994_v13 = vpack.c.bf16 %v2326_v10, %v945_v16  ;;  %v985_v10 = vpack.c.bf16 %v2859_v35, %v2863_v37  ;;  %v975_v11 = vpack.c.bf16 %v2269_v58, %v755_v60  ;;  %v3103_v35 = vld [vmem:[#allocation4_spill] sm:$0xff]  ;;  %v3105_v37 = vld [vmem:[#allocation3_spill] sm:$0xff] }
 0x112   : > { %v2281_v23 = vpop.f32.mrf.mxu0  ;;  %v2329_v22 = vpop.f32.mrf.mxu1  ;;  %v3091_v16 = vpack.c.bf16 %v2839_v25, %v2843_v27  ;;  %v973_v17 = vpack.c.bf16 %v2873_v50, %v2877_v52  ;;  %v972_v25 = vpack.c.bf16 %v2865_v46, %v2869_v48  ;;  %v3095_v27 = vld [vmem:[#allocation10_spill] sm:$0xff]  ;;  %v3107_v39 = vpack.c.bf16 %v3105_v37, %v3106_v38 }
 0x113   : > { %v2378_v46 = vld [vmem:[%s2797_s18 + $0x40] ss:$16 sps:$4 sm:$0xff]   ;;  %v2380_v48 = vld [vmem:[%s2797_s18 + $0x64] ss:$16 sps:$4 sm:$0xff]  }
 0x114   : > { %v795_v29 = vpop.f32.mrf.mxu0  ;;  %v955_v28 = vpop.f32.mrf.mxu1  ;;  %v2384_v50 = vld [vmem:[%s2797_s18 + $0x60] ss:$16 sps:$4 sm:$0xff]   ;;  %v2386_v52 = vld [vmem:[%s2797_s18 + $0x84] ss:$16 sps:$4 sm:$0xff]  }
 0x115   : > { %v979_v9 = vpack.c.bf16 %v2281_v23, %v795_v29  ;;  %v995_v7 = vpack.c.bf16 %v2329_v22, %v955_v28  ;;  %v969_v22 = vpack.c.bf16 %v2857_v34, %v2861_v36  ;;  %v989_v23 = vpack.c.bf16 %v2875_v51, %v2879_v53  ;;  %v3102_v34 = vld [vmem:[#allocation2_spill] sm:$0xff]  ;;  %v2385_v51 = vld [vmem:[%s2797_s18 + $0x68] ss:$16 sps:$4 sm:$0xff]   ;;  %v2388_v53 = vld [vmem:[%s2797_s18 + $0x8c] ss:$16 sps:$4 sm:$0xff]  }
 0x116   : > { %v3092_v28 = vpack.c.bf16 %v2825_v18, %v2829_v20  ;;  %v3099_v18 = vld [vmem:[#allocation7_spill] sm:$0xff]  ;;  %v3100_v20 = vld [vmem:[#allocation9_spill] sm:$0xff]  ;;  %v3104_v36 = vpack.c.bf16 %v3102_v34, %v3103_v35  ;;  %v2396_v58 = vld [vmem:[%s2797_s18 + $0xa0] ss:$16 sps:$4 sm:$0xff]  }
 0x117   : > { %2002 = vmatprep.subr.bf16.mxu1 %v979_v9  ;;  %2114 = vmatprep.subr.bf16.mxu0 %v995_v7  ;;  %v976_v9 = vpack.c.bf16 %v2272_v62, %v765_v0  ;;  %v992_v7 = vpack.c.bf16 %v2320_v63, %v925_v1  ;;  %v2398_v60 = vld [vmem:[%s2797_s18 + $0xc4] ss:$16 sps:$4 sm:$0xff]   ;;  %v2402_v62 = vld [vmem:[%s2797_s18 + $0xc0] ss:$16 sps:$4 sm:$0xff]   ;;  %v2403_v63 = vld [vmem:[%s2797_s18 + $0xc8] ss:$16 sps:$4 sm:$0xff]  }
 0x118   : > { %2003 = vmatpush3.bf16.msra.mxu1 %v971_v8  ;;  %2115 = vmatpush3.bf16.msra.mxu0 %v987_v6  ;;  %v968_v6 = vpack.c.bf16 %v2849_v30, %v2853_v32  ;;  %v984_v8 = vpack.c.bf16 %v2851_v31, %v2855_v33  ;;  %v3096_v30 = vld [vmem:[#allocation6_spill] sm:$0xff]  ;;  %v3097_v31 = vld [vmem:[#allocation8_spill] sm:$0xff]  ;;  %v3101_v33 = vpack.c.bf16 %v3099_v18, %v3100_v20  ;;  %v2406_v1 = vld [vmem:[%s2797_s18 + $0xec] ss:$16 sps:$4 sm:$0xff]  }
 0x119   : > { %2004 = vmatprep.subr.bf16.mxu1 %v978_v15  ;;  %2116 = vmatprep.subr.bf16.mxu0 %v994_v13  ;;  %v974_v13 = vpack.c.bf16 %v2881_v54, %v745_v56  ;;  %v3090_v15 = vpack.c.bf16 %v2837_v24, %v2841_v26  ;;  %v3093_v24 = vpack.c.bf16 %v2827_v19, %v2831_v21  ;;  %v3094_v26 = vld [vmem:[#allocation11_spill] sm:$0xff]  ;;  %v2362_v19 = vld [vmem:[%s2797_s18] ss:$16 sps:$4 sm:$0xff]   ;;  %v2392_v56 = vld [vmem:[%s2797_s18 + $0xa4] ss:$16 sps:$4 sm:$0xff]  }
 0x11a   : > { %v988_v29 = vpack.c.bf16 %v3095_v27, %v3094_v26  ;;  %v3098_v32 = vpack.c.bf16 %v3096_v30, %v3097_v31  ;;  %v2365_v21 = vld [vmem:[%s2797_s18 + $0x8] ss:$16 sps:$4 sm:$0xff]   ;;  %v2390_v54 = vld [vmem:[%s2797_s18 + $0x80] ss:$16 sps:$4 sm:$0xff]   ;;  %v2404_v0 = vld [vmem:[%s2797_s18 + $0xe4] ss:$16 sps:$4 sm:$0xff]  }
 0x11b   : > { %v2439_v26 = vld [vmem:[%s2797_s18 + $0x188] ss:$16 sps:$4 sm:$0xff]   ;;  %v2440_v27 = vld [vmem:[%s2797_s18 + $0x1a4] ss:$16 sps:$4 sm:$0xff]   ;;  %v2444_v30 = vld [vmem:[%s2797_s18 + $0x1a0] ss:$16 sps:$4 sm:$0xff]  }
 0x11c   : > { %2005 = vmatpush3.bf16.msra.mxu1 %v970_v14  ;;  %2117 = vmatpush3.bf16.msra.mxu0 %v986_v12  ;;  %v991_v12 = vpack.c.bf16 %v2317_v59, %v915_v61  ;;  %v990_v14 = vpack.c.bf16 %v2883_v55, %v905_v57  ;;  %v2391_v55 = vld [vmem:[%s2797_s18 + $0x88] ss:$16 sps:$4 sm:$0xff]   ;;  %v2394_v57 = vld [vmem:[%s2797_s18 + $0xac] ss:$16 sps:$4 sm:$0xff]   ;;  %v2450_v20 = vld [vmem:[%s2797_s18 + $0x1c0] ss:$16 sps:$4 sm:$0xff]  }
 0x11d   : > { %2006 = vmatprep.subr.bf16.mxu1 %v977_v47  ;;  %2118 = vmatprep.subr.bf16.mxu0 %v993_v49  ;;  %v2379_v47 = vld [vmem:[%s2797_s18 + $0x48] ss:$16 sps:$4 sm:$0xff]   ;;  %v2382_v49 = vld [vmem:[%s2797_s18 + $0x6c] ss:$16 sps:$4 sm:$0xff]   ;;  %v2456_v34 = vld [vmem:[%s2797_s18 + $0x1e0] ss:$16 sps:$4 sm:$0xff]  }
 0x11e   : > { %v2397_v59 = vld [vmem:[%s2797_s18 + $0xa8] ss:$16 sps:$4 sm:$0xff]   ;;  %v2400_v61 = vld [vmem:[%s2797_s18 + $0xcc] ss:$16 sps:$4 sm:$0xff]  }
 0x11f   : > { %v2445_v31 = vld [vmem:[%s2797_s18 + $0x1a8] ss:$16 sps:$4 sm:$0xff]   ;;  %v2448_v18 = vld [vmem:[%s2797_s18 + $0x1cc] ss:$16 sps:$4 sm:$0xff]  }
 0x120   : > { %2007 = vmatpush3.bf16.msra.mxu1 %v969_v22  ;;  %2119 = vmatpush3.bf16.msra.mxu0 %v985_v10  ;;  %v2414_v22 = vld [vmem:[%s2797_s18 + $0x100] ss:$16 sps:$4 sm:$0xff]   ;;  %v2415_v10 = vld [vmem:[%s2797_s18 + $0x108] ss:$16 sps:$4 sm:$0xff]  }
 0x121   : > { %2008 = vmatprep.subr.bf16.mxu1 %v976_v9  ;;  %2120 = vmatprep.subr.bf16.mxu0 %v992_v7  ;;  %v2416_v9 = vld [vmem:[%s2797_s18 + $0x124] ss:$16 sps:$4 sm:$0xff]   ;;  %v2418_v7 = vld [vmem:[%s2797_s18 + $0x12c] ss:$16 sps:$4 sm:$0xff]   ;;  %v2457_v35 = vld [vmem:[%s2797_s18 + $0x1e8] ss:$16 sps:$4 sm:$0xff]  }
 0x124   : > { %2009 = vmatpush3.bf16.msra.mxu1 %v968_v6  ;;  %2121 = vmatpush3.bf16.msra.mxu0 %v984_v8  ;;  %v2420_v6 = vld [vmem:[%s2797_s18 + $0x120] ss:$16 sps:$4 sm:$0xff]   ;;  %v2421_v8 = vld [vmem:[%s2797_s18 + $0x128] ss:$16 sps:$4 sm:$0xff]  }
 0x125   : > { %2010 = vmatprep.subr.bf16.mxu1 %v975_v11  ;;  %2122 = vmatprep.subr.bf16.mxu0 %v991_v12  ;;  %v2422_v11 = vld [vmem:[%s2797_s18 + $0x144] ss:$16 sps:$4 sm:$0xff]   ;;  %v2424_v12 = vld [vmem:[%s2797_s18 + $0x14c] ss:$16 sps:$4 sm:$0xff]  }
 0x128   : > { %2011 = vmatpush3.bf16.msra.mxu1 %v3090_v15  ;;  %2123 = vmatpush3.bf16.msra.mxu0 %v3091_v16  ;;  %v2428_v15 = vld [vmem:[%s2797_s18 + $0x164] ss:$16 sps:$4 sm:$0xff]   ;;  %v2430_v16 = vld [vmem:[%s2797_s18 + $0x16c] ss:$16 sps:$4 sm:$0xff]  }
 0x129   : > { %2012 = vmatprep.subr.bf16.mxu1 %v974_v13  ;;  %2124 = vmatprep.subr.bf16.mxu0 %v990_v14  ;;  %v2426_v13 = vld [vmem:[%s2797_s18 + $0x140] ss:$16 sps:$4 sm:$0xff]   ;;  %v2427_v14 = vld [vmem:[%s2797_s18 + $0x148] ss:$16 sps:$4 sm:$0xff]  }
 0x12c   : > { %2013 = vmatpush3.bf16.msra.mxu1 %v3092_v28  ;;  %2125 = vmatpush3.bf16.msra.mxu0 %v3093_v24  ;;  %v2434_v28 = vld [vmem:[%s2797_s18 + $0x184] ss:$16 sps:$4 sm:$0xff]   ;;  %v2436_v24 = vld [vmem:[%s2797_s18 + $0x18c] ss:$16 sps:$4 sm:$0xff]  }
 0x12d   : > { %2014 = vmatprep.subr.bf16.mxu1 %v973_v17  ;;  %2126 = vmatprep.subr.bf16.mxu0 %v989_v23  ;;  %v2432_v17 = vld [vmem:[%s2797_s18 + $0x160] ss:$16 sps:$4 sm:$0xff]   ;;  %v2433_v23 = vld [vmem:[%s2797_s18 + $0x168] ss:$16 sps:$4 sm:$0xff]  }
 0x130   : > { %2015 = vmatpush3.bf16.msra.mxu1 %v3098_v32  ;;  %2127 = vmatpush3.bf16.msra.mxu0 %v3101_v33  ;;  %v2446_v32 = vld [vmem:[%s2797_s18 + $0x1c4] ss:$16 sps:$4 sm:$0xff]   ;;  %v2451_v33 = vld [vmem:[%s2797_s18 + $0x1c8] ss:$16 sps:$4 sm:$0xff]  }
 0x131   : > { %2016 = vmatprep.subr.bf16.mxu1 %v972_v25  ;;  %2128 = vmatprep.subr.bf16.mxu0 %v988_v29  ;;  %v2438_v25 = vld [vmem:[%s2797_s18 + $0x180] ss:$16 sps:$4 sm:$0xff]   ;;  %v2442_v29 = vld [vmem:[%s2797_s18 + $0x1ac] ss:$16 sps:$4 sm:$0xff]  }
 0x134   : > { %2017 = vmatpush3.bf16.msra.mxu1 %v3104_v36  ;;  %2129 = vmatpush3.bf16.msra.mxu0 %v3107_v39 }
 0x137   : > { %1349 = vmatmul.mubr.bf16.vlgmr.msra.gmra.mxu1 %v2362_v19  ;;  %1510 = vmatmul.mubr.bf16.vlgmr.msra.gmra.mxu0 %v2365_v21  ;;  %v2452_v19 = vld [vmem:[%s2797_s18 + $0x1e4] ss:$16 sps:$4 sm:$0xff]   ;;  %v2454_v21 = vld [vmem:[%s2797_s18 + $0x1ec] ss:$16 sps:$4 sm:$0xff]  }
 0x138   : > { %1356 = vmatprep.mubr.bf16.mxu1 %v2368_v40  ;;  %1517 = vmatprep.mubr.bf16.mxu0 %v2370_v41 }
 0x13f   : > { %1357 = vmatmul.mubr.bf16.gmra.mxu1 %v2372_v42  ;;  %1518 = vmatmul.mubr.bf16.gmra.mxu0 %v2373_v43 }
 0x140   : > { %1364 = vmatprep.mubr.bf16.mxu1 %v2374_v44  ;;  %1525 = vmatprep.mubr.bf16.mxu0 %v2376_v45 }
 0x147   : > { %1365 = vmatmul.mubr.bf16.gmra.mxu1 %v2378_v46  ;;  %1526 = vmatmul.mubr.bf16.gmra.mxu0 %v2379_v47 }
 0x148   : > { %1372 = vmatprep.mubr.bf16.mxu1 %v2380_v48  ;;  %1533 = vmatprep.mubr.bf16.mxu0 %v2382_v49 }
 0x14f   : > { %1373 = vmatmul.mubr.bf16.gmra.mxu1 %v2384_v50  ;;  %1534 = vmatmul.mubr.bf16.gmra.mxu0 %v2385_v51 }
 0x150   : > { %1380 = vmatprep.mubr.bf16.mxu1 %v2386_v52  ;;  %1541 = vmatprep.mubr.bf16.mxu0 %v2388_v53 }
 0x157   : > { %1381 = vmatmul.mubr.bf16.gmra.mxu1 %v2390_v54  ;;  %1542 = vmatmul.mubr.bf16.gmra.mxu0 %v2391_v55 }
 0x158   : > { %1388 = vmatprep.mubr.bf16.mxu1 %v2392_v56  ;;  %1549 = vmatprep.mubr.bf16.mxu0 %v2394_v57 }
 0x15f   : > { %1389 = vmatmul.mubr.bf16.gmra.mxu1 %v2396_v58  ;;  %1550 = vmatmul.mubr.bf16.gmra.mxu0 %v2397_v59 }
 0x160   : > { %1396 = vmatprep.mubr.bf16.mxu1 %v2398_v60  ;;  %1557 = vmatprep.mubr.bf16.mxu0 %v2400_v61 }
 0x167   : > { %1397 = vmatmul.mubr.bf16.gmra.mxu1 %v2402_v62  ;;  %1558 = vmatmul.mubr.bf16.gmra.mxu0 %v2403_v63 }
 0x168   : > { %1404 = vmatprep.mubr.bf16.mxu1 %v2404_v0  ;;  %1565 = vmatprep.mubr.bf16.mxu0 %v2406_v1 }
 0x16f   : > { %1405 = vmatmul.mubr.bf16.gmra.mxu1 %v2408_v2  ;;  %1566 = vmatmul.mubr.bf16.gmra.mxu0 %v2409_v3 }
 0x170   : > { %1412 = vmatprep.mubr.bf16.mxu1 %v2410_v4  ;;  %1573 = vmatprep.mubr.bf16.mxu0 %v2412_v5 }
 0x177   : > { %1413 = vmatmul.mubr.bf16.gmra.mxu1 %v2414_v22  ;;  %1574 = vmatmul.mubr.bf16.gmra.mxu0 %v2415_v10 }
 0x178   : > { %1420 = vmatprep.mubr.bf16.mxu1 %v2416_v9  ;;  %1581 = vmatprep.mubr.bf16.mxu0 %v2418_v7 }
 0x17f   : > { %1421 = vmatmul.mubr.bf16.gmra.mxu1 %v2420_v6  ;;  %1582 = vmatmul.mubr.bf16.gmra.mxu0 %v2421_v8 }
 0x180   : > { %1428 = vmatprep.mubr.bf16.mxu1 %v2422_v11  ;;  %1589 = vmatprep.mubr.bf16.mxu0 %v2424_v12 }
 0x187   : > { %1429 = vmatmul.mubr.bf16.gmra.mxu1 %v2426_v13  ;;  %1590 = vmatmul.mubr.bf16.gmra.mxu0 %v2427_v14 }
 0x188   : > { %1436 = vmatprep.mubr.bf16.mxu1 %v2428_v15  ;;  %1597 = vmatprep.mubr.bf16.mxu0 %v2430_v16 }
 0x18f   : > { %1437 = vmatmul.mubr.bf16.gmra.mxu1 %v2432_v17  ;;  %1598 = vmatmul.mubr.bf16.gmra.mxu0 %v2433_v23 }
 0x190   : > { %1444 = vmatprep.mubr.bf16.mxu1 %v2434_v28  ;;  %1605 = vmatprep.mubr.bf16.mxu0 %v2436_v24 }
 0x197   : > { %1445 = vmatmul.mubr.bf16.gmra.mxu1 %v2438_v25  ;;  %1606 = vmatmul.mubr.bf16.gmra.mxu0 %v2439_v26 }
 0x198   : > { %1452 = vmatprep.mubr.bf16.mxu1 %v2440_v27  ;;  %1613 = vmatprep.mubr.bf16.mxu0 %v2442_v29 }
 0x19f   : > { %1453 = vmatmul.mubr.bf16.gmra.mxu1 %v2444_v30  ;;  %1614 = vmatmul.mubr.bf16.gmra.mxu0 %v2445_v31 }
 0x1a0   : > { %1460 = vmatprep.mubr.bf16.mxu1 %v2446_v32  ;;  %1621 = vmatprep.mubr.bf16.mxu0 %v2448_v18 }
 0x1a7   : > { %1461 = vmatmul.mubr.bf16.gmra.mxu1 %v2450_v20  ;;  %1622 = vmatmul.mubr.bf16.gmra.mxu0 %v2451_v33 }
 0x1a8   : > { %1468 = vmatprep.mubr.bf16.mxu1 %v2452_v19  ;;  %1629 = vmatprep.mubr.bf16.mxu0 %v2454_v21 }
 0x1af   : > { %1469 = vmatmul.mubr.bf16.gmra.mxu1 %v2456_v34  ;;  %1630 = vmatmul.mubr.bf16.gmra.mxu0 %v2457_v35 }
 0x1f7   : > { %v2018_v36 = vpop.f32.mrf.mxu1  ;;  %v2130_v37 = vpop.f32.mrf.mxu0 }
 0x1f9   : > { %v2019_v38 = vpop.f32.mrf.mxu1  ;;  %v2131_v39 = vpop.f32.mrf.mxu0 }
 0x1fa   : > { %v2020_v40 = vadd.f32 %v2019_v38, %v2018_v36  ;;  %v2132_v41 = vadd.f32 %v2131_v39, %v2130_v37 }
 0x1fb   : > { %v2021_v42 = vpop.f32.mrf.mxu1  ;;  %v2133_v43 = vpop.f32.mrf.mxu0 }
 0x1fc   : > { %v1512_v44 = vadd.f32 %v2132_v41, %v2020_v40 }
 0x1fd   : > { %v2022_v45 = vpop.f32.mrf.mxu1  ;;  %v2134_v46 = vpop.f32.mrf.mxu0 }
 0x1fe   : > { %1639 = vst.msk [vmem:[%s2993_s21] sm:$0xff] %vm1638_vm1, %v1512_v44  ;;  %v2023_v47 = vadd.f32 %v2022_v45, %v2021_v42  ;;  %v2135_v48 = vadd.f32 %v2134_v46, %v2133_v43 }
 0x1ff   : > { %v2024_v49 = vpop.f32.mrf.mxu1  ;;  %v2136_v50 = vpop.f32.mrf.mxu0 }
 0x200   : > { %v1515_v51 = vadd.f32 %v2135_v48, %v2023_v47 }
 0x201   : > { %v2025_v52 = vpop.f32.mrf.mxu1  ;;  %v2137_v53 = vpop.f32.mrf.mxu0 }
 0x202   : > { %1640 = vst.msk [vmem:[%s2993_s21 + $0x8] sm:$0xff] %vm1638_vm1, %v1515_v51  ;;  %v2026_v54 = vadd.f32 %v2025_v52, %v2024_v49  ;;  %v2138_v55 = vadd.f32 %v2137_v53, %v2136_v50 }
 0x203   : > { %v2027_v56 = vpop.f32.mrf.mxu1  ;;  %v2139_v57 = vpop.f32.mrf.mxu0 }
 0x204   : > { %v1520_v58 = vadd.f32 %v2138_v55, %v2026_v54 }
 0x205   : > { %v2028_v59 = vpop.f32.mrf.mxu1  ;;  %v2140_v60 = vpop.f32.mrf.mxu0 }
 0x206   : > { %1641 = vst.msk [vmem:[%s2993_s21 + $0x10] sm:$0xff] %vm1638_vm1, %v1520_v58  ;;  %v2029_v61 = vadd.f32 %v2028_v59, %v2027_v56  ;;  %v2141_v62 = vadd.f32 %v2140_v60, %v2139_v57 }
 0x207   : > { %v2030_v63 = vpop.f32.mrf.mxu1  ;;  %v2142_v0 = vpop.f32.mrf.mxu0 }
 0x208   : > { %v1523_v1 = vadd.f32 %v2141_v62, %v2029_v61 }
 0x209   : > { %v2031_v2 = vpop.f32.mrf.mxu1  ;;  %v2143_v3 = vpop.f32.mrf.mxu0 }
 0x20a   : > { %1642 = vst.msk [vmem:[%s2993_s21 + $0x18] sm:$0xff] %vm1638_vm1, %v1523_v1  ;;  %v2032_v4 = vadd.f32 %v2031_v2, %v2030_v63  ;;  %v2144_v5 = vadd.f32 %v2143_v3, %v2142_v0 }
 0x20b   : > { %v2033_v22 = vpop.f32.mrf.mxu1  ;;  %v2145_v10 = vpop.f32.mrf.mxu0 }
 0x20c   : > { %v1528_v9 = vadd.f32 %v2144_v5, %v2032_v4 }
 0x20d   : > { %v2034_v7 = vpop.f32.mrf.mxu1  ;;  %v2146_v6 = vpop.f32.mrf.mxu0 }
 0x20e   : > { %1643 = vst.msk [vmem:[%s2993_s21 + $0x20] sm:$0xff] %vm1638_vm1, %v1528_v9  ;;  %v2035_v8 = vadd.f32 %v2034_v7, %v2033_v22  ;;  %v2147_v11 = vadd.f32 %v2146_v6, %v2145_v10 }
 0x20f   : > { %v2036_v12 = vpop.f32.mrf.mxu1  ;;  %v2148_v13 = vpop.f32.mrf.mxu0 }
 0x210   : > { %v1531_v14 = vadd.f32 %v2147_v11, %v2035_v8 }
 0x211   : > { %v2037_v15 = vpop.f32.mrf.mxu1  ;;  %v2149_v16 = vpop.f32.mrf.mxu0 }
 0x212   : > { %1644 = vst.msk [vmem:[%s2993_s21 + $0x28] sm:$0xff] %vm1638_vm1, %v1531_v14  ;;  %v2038_v17 = vadd.f32 %v2037_v15, %v2036_v12  ;;  %v2150_v23 = vadd.f32 %v2149_v16, %v2148_v13 }
 0x213   : > { %v2039_v28 = vpop.f32.mrf.mxu1  ;;  %v2151_v24 = vpop.f32.mrf.mxu0 }
 0x214   : > { %v1536_v25 = vadd.f32 %v2150_v23, %v2038_v17 }
 0x215   : > { %v2040_v26 = vpop.f32.mrf.mxu1  ;;  %v2152_v27 = vpop.f32.mrf.mxu0 }
 0x216   : > { %1645 = vst.msk [vmem:[%s2993_s21 + $0x30] sm:$0xff] %vm1638_vm1, %v1536_v25  ;;  %v2041_v29 = vadd.f32 %v2040_v26, %v2039_v28  ;;  %v2153_v30 = vadd.f32 %v2152_v27, %v2151_v24 }
 0x217   : > { %v2042_v31 = vpop.f32.mrf.mxu1  ;;  %v2154_v32 = vpop.f32.mrf.mxu0 }
 0x218   : > { %v1539_v18 = vadd.f32 %v2153_v30, %v2041_v29 }
 0x219   : > { %v2043_v20 = vpop.f32.mrf.mxu1  ;;  %v2155_v33 = vpop.f32.mrf.mxu0 }
 0x21a   : > { %1646 = vst.msk [vmem:[%s2993_s21 + $0x38] sm:$0xff] %vm1638_vm1, %v1539_v18  ;;  %v2044_v19 = vadd.f32 %v2043_v20, %v2042_v31  ;;  %v2156_v21 = vadd.f32 %v2155_v33, %v2154_v32 }
 0x21b   : > { %v2045_v34 = vpop.f32.mrf.mxu1  ;;  %v2157_v35 = vpop.f32.mrf.mxu0 }
 0x21c   : > { %v1544_v36 = vadd.f32 %v2156_v21, %v2044_v19 }
 0x21d   : > { %v2046_v37 = vpop.f32.mrf.mxu1  ;;  %v2158_v38 = vpop.f32.mrf.mxu0 }
 0x21e   : > { %1647 = vst.msk [vmem:[%s2993_s21 + $0x40] sm:$0xff] %vm1638_vm1, %v1544_v36  ;;  %v2047_v39 = vadd.f32 %v2046_v37, %v2045_v34  ;;  %v2159_v40 = vadd.f32 %v2158_v38, %v2157_v35 }
 0x21f   : > { %v2048_v41 = vpop.f32.mrf.mxu1  ;;  %v2160_v42 = vpop.f32.mrf.mxu0 }
 0x220   : > { %v1547_v43 = vadd.f32 %v2159_v40, %v2047_v39 }
 0x221   : > { %v2049_v44 = vpop.f32.mrf.mxu1  ;;  %v2161_v45 = vpop.f32.mrf.mxu0 }
 0x222   : > { %1648 = vst.msk [vmem:[%s2993_s21 + $0x48] sm:$0xff] %vm1638_vm1, %v1547_v43  ;;  %v2050_v46 = vadd.f32 %v2049_v44, %v2048_v41  ;;  %v2162_v47 = vadd.f32 %v2161_v45, %v2160_v42 }
 0x223   : > { %v2051_v48 = vpop.f32.mrf.mxu1  ;;  %v2163_v49 = vpop.f32.mrf.mxu0 }
 0x224   : > { %v1552_v50 = vadd.f32 %v2162_v47, %v2050_v46 }
 0x225   : > { %v2052_v51 = vpop.f32.mrf.mxu1  ;;  %v2164_v52 = vpop.f32.mrf.mxu0 }
 0x226   : > { %1649 = vst.msk [vmem:[%s2993_s21 + $0x50] sm:$0xff] %vm1638_vm1, %v1552_v50  ;;  %v2053_v53 = vadd.f32 %v2052_v51, %v2051_v48  ;;  %v2165_v54 = vadd.f32 %v2164_v52, %v2163_v49 }
 0x227   : > { %v2054_v55 = vpop.f32.mrf.mxu1  ;;  %v2166_v56 = vpop.f32.mrf.mxu0 }
 0x228   : > { %v1555_v57 = vadd.f32 %v2165_v54, %v2053_v53 }
 0x229   : > { %v2055_v58 = vpop.f32.mrf.mxu1  ;;  %v2167_v59 = vpop.f32.mrf.mxu0 }
 0x22a   : > { %1650 = vst.msk [vmem:[%s2993_s21 + $0x58] sm:$0xff] %vm1638_vm1, %v1555_v57  ;;  %v2056_v60 = vadd.f32 %v2055_v58, %v2054_v55  ;;  %v2168_v61 = vadd.f32 %v2167_v59, %v2166_v56 }
 0x22b   : > { %v2057_v62 = vpop.f32.mrf.mxu1  ;;  %v2169_v63 = vpop.f32.mrf.mxu0 }
 0x22c   : > { %v1560_v0 = vadd.f32 %v2168_v61, %v2056_v60 }
 0x22d   : > { %v2058_v1 = vpop.f32.mrf.mxu1  ;;  %v2170_v2 = vpop.f32.mrf.mxu0 }
 0x22e   : > { %1651 = vst.msk [vmem:[%s2993_s21 + $0x60] sm:$0xff] %vm1638_vm1, %v1560_v0  ;;  %v2059_v3 = vadd.f32 %v2058_v1, %v2057_v62  ;;  %v2171_v4 = vadd.f32 %v2170_v2, %v2169_v63 }
 0x22f   : > { %v2060_v5 = vpop.f32.mrf.mxu1  ;;  %v2172_v22 = vpop.f32.mrf.mxu0 }
 0x230   : > { %v1563_v10 = vadd.f32 %v2171_v4, %v2059_v3 }
 0x231   : > { %v2061_v9 = vpop.f32.mrf.mxu1  ;;  %v2173_v7 = vpop.f32.mrf.mxu0 }
 0x232   : > { %1652 = vst.msk [vmem:[%s2993_s21 + $0x68] sm:$0xff] %vm1638_vm1, %v1563_v10  ;;  %v2062_v6 = vadd.f32 %v2061_v9, %v2060_v5  ;;  %v2174_v8 = vadd.f32 %v2173_v7, %v2172_v22 }
 0x233   : > { %v2063_v11 = vpop.f32.mrf.mxu1  ;;  %v2175_v12 = vpop.f32.mrf.mxu0 }
 0x234   : > { %v1568_v13 = vadd.f32 %v2174_v8, %v2062_v6 }
 0x235   : > { %v2064_v14 = vpop.f32.mrf.mxu1  ;;  %v2176_v15 = vpop.f32.mrf.mxu0 }
 0x236   : > { %1653 = vst.msk [vmem:[%s2993_s21 + $0x70] sm:$0xff] %vm1638_vm1, %v1568_v13  ;;  %v2065_v16 = vadd.f32 %v2064_v14, %v2063_v11  ;;  %v2177_v17 = vadd.f32 %v2176_v15, %v2175_v12 }
 0x237   : > { %v2066_v23 = vpop.f32.mrf.mxu1  ;;  %v2178_v28 = vpop.f32.mrf.mxu0 }
 0x238   : > { %v1571_v24 = vadd.f32 %v2177_v17, %v2065_v16 }
 0x239   : > { %v2067_v25 = vpop.f32.mrf.mxu1  ;;  %v2179_v26 = vpop.f32.mrf.mxu0 }
 0x23a   : > { %1654 = vst.msk [vmem:[%s2993_s21 + $0x78] sm:$0xff] %vm1638_vm1, %v1571_v24  ;;  %v2068_v27 = vadd.f32 %v2067_v25, %v2066_v23  ;;  %v2180_v29 = vadd.f32 %v2179_v26, %v2178_v28 }
 0x23b   : > { %v2069_v30 = vpop.f32.mrf.mxu1  ;;  %v2181_v31 = vpop.f32.mrf.mxu0 }
 0x23c   : > { %v1576_v32 = vadd.f32 %v2180_v29, %v2068_v27 }
 0x23d   : > { %v2070_v18 = vpop.f32.mrf.mxu1  ;;  %v2182_v20 = vpop.f32.mrf.mxu0 }
 0x23e   : > { %1655 = vst.msk [vmem:[%s2993_s21 + $0x80] sm:$0xff] %vm1638_vm1, %v1576_v32  ;;  %v2071_v33 = vadd.f32 %v2070_v18, %v2069_v30  ;;  %v2183_v19 = vadd.f32 %v2182_v20, %v2181_v31 }
 0x23f   : > { %v2072_v21 = vpop.f32.mrf.mxu1  ;;  %v2184_v34 = vpop.f32.mrf.mxu0 }
 0x240   : > { %v1579_v35 = vadd.f32 %v2183_v19, %v2071_v33 }
 0x241   : > { %v2073_v36 = vpop.f32.mrf.mxu1  ;;  %v2185_v37 = vpop.f32.mrf.mxu0 }
 0x242   : > { %1656 = vst.msk [vmem:[%s2993_s21 + $0x88] sm:$0xff] %vm1638_vm1, %v1579_v35  ;;  %v2074_v38 = vadd.f32 %v2073_v36, %v2072_v21  ;;  %v2186_v39 = vadd.f32 %v2185_v37, %v2184_v34 }
 0x243   : > { %v2075_v40 = vpop.f32.mrf.mxu1  ;;  %v2187_v41 = vpop.f32.mrf.mxu0 }
 0x244   : > { %v1584_v42 = vadd.f32 %v2186_v39, %v2074_v38 }
 0x245   : > { %v2076_v43 = vpop.f32.mrf.mxu1  ;;  %v2188_v44 = vpop.f32.mrf.mxu0 }
 0x246   : > { %1657 = vst.msk [vmem:[%s2993_s21 + $0x90] sm:$0xff] %vm1638_vm1, %v1584_v42  ;;  %v2077_v45 = vadd.f32 %v2076_v43, %v2075_v40  ;;  %v2189_v46 = vadd.f32 %v2188_v44, %v2187_v41 }
 0x247   : > { %v2078_v47 = vpop.f32.mrf.mxu1  ;;  %v2190_v48 = vpop.f32.mrf.mxu0 }
 0x248   : > { %v1587_v49 = vadd.f32 %v2189_v46, %v2077_v45 }
 0x249   : > { %v2079_v50 = vpop.f32.mrf.mxu1  ;;  %v2191_v51 = vpop.f32.mrf.mxu0 }
 0x24a   : > { %1658 = vst.msk [vmem:[%s2993_s21 + $0x98] sm:$0xff] %vm1638_vm1, %v1587_v49  ;;  %v2080_v52 = vadd.f32 %v2079_v50, %v2078_v47  ;;  %v2192_v53 = vadd.f32 %v2191_v51, %v2190_v48 }
 0x24b   : > { %v2081_v54 = vpop.f32.mrf.mxu1  ;;  %v2193_v55 = vpop.f32.mrf.mxu0 }
 0x24c   : > { %v1592_v56 = vadd.f32 %v2192_v53, %v2080_v52 }
 0x24d   : > { %v2082_v57 = vpop.f32.mrf.mxu1  ;;  %v2194_v58 = vpop.f32.mrf.mxu0 }
 0x24e   : > { %1659 = vst.msk [vmem:[%s2993_s21 + $0xa0] sm:$0xff] %vm1638_vm1, %v1592_v56  ;;  %v2083_v59 = vadd.f32 %v2082_v57, %v2081_v54  ;;  %v2195_v60 = vadd.f32 %v2194_v58, %v2193_v55 }
 0x24f   : > { %v2084_v61 = vpop.f32.mrf.mxu1  ;;  %v2196_v62 = vpop.f32.mrf.mxu0 }
 0x250   : > { %v1595_v63 = vadd.f32 %v2195_v60, %v2083_v59 }
 0x251   : > { %v2085_v0 = vpop.f32.mrf.mxu1  ;;  %v2197_v1 = vpop.f32.mrf.mxu0 }
 0x252   : > { %1660 = vst.msk [vmem:[%s2993_s21 + $0xa8] sm:$0xff] %vm1638_vm1, %v1595_v63  ;;  %v2086_v2 = vadd.f32 %v2085_v0, %v2084_v61  ;;  %v2198_v3 = vadd.f32 %v2197_v1, %v2196_v62 }
 0x253   : > { %v2087_v4 = vpop.f32.mrf.mxu1  ;;  %v2199_v5 = vpop.f32.mrf.mxu0 }
 0x254   : > { %v1600_v22 = vadd.f32 %v2198_v3, %v2086_v2 }
 0x255   : > { %v2088_v10 = vpop.f32.mrf.mxu1  ;;  %v2200_v9 = vpop.f32.mrf.mxu0 }
 0x256   : > { %1661 = vst.msk [vmem:[%s2993_s21 + $0xb0] sm:$0xff] %vm1638_vm1, %v1600_v22  ;;  %v2089_v7 = vadd.f32 %v2088_v10, %v2087_v4  ;;  %v2201_v6 = vadd.f32 %v2200_v9, %v2199_v5 }
 0x257   : > { %v2090_v8 = vpop.f32.mrf.mxu1  ;;  %v2202_v11 = vpop.f32.mrf.mxu0 }
 0x258   : > { %v1603_v12 = vadd.f32 %v2201_v6, %v2089_v7 }
 0x259   : > { %v2091_v13 = vpop.f32.mrf.mxu1  ;;  %v2203_v14 = vpop.f32.mrf.mxu0 }
 0x25a   : > { %1662 = vst.msk [vmem:[%s2993_s21 + $0xb8] sm:$0xff] %vm1638_vm1, %v1603_v12  ;;  %v2092_v15 = vadd.f32 %v2091_v13, %v2090_v8  ;;  %v2204_v16 = vadd.f32 %v2203_v14, %v2202_v11 }
 0x25b   : > { %v2093_v17 = vpop.f32.mrf.mxu1  ;;  %v2205_v23 = vpop.f32.mrf.mxu0 }
 0x25c   : > { %v1608_v28 = vadd.f32 %v2204_v16, %v2092_v15 }
 0x25d   : > { %v2094_v24 = vpop.f32.mrf.mxu1  ;;  %v2206_v25 = vpop.f32.mrf.mxu0 }
 0x25e   : > { %1663 = vst.msk [vmem:[%s2993_s21 + $0xc0] sm:$0xff] %vm1638_vm1, %v1608_v28  ;;  %v2095_v26 = vadd.f32 %v2094_v24, %v2093_v17  ;;  %v2207_v27 = vadd.f32 %v2206_v25, %v2205_v23 }
 0x25f   : > { %v2096_v29 = vpop.f32.mrf.mxu1  ;;  %v2208_v30 = vpop.f32.mrf.mxu0 }
 0x260   : > { %v1611_v31 = vadd.f32 %v2207_v27, %v2095_v26 }
 0x261   : > { %v2097_v32 = vpop.f32.mrf.mxu1  ;;  %v2209_v18 = vpop.f32.mrf.mxu0 }
 0x262   : > { %1664 = vst.msk [vmem:[%s2993_s21 + $0xc8] sm:$0xff] %vm1638_vm1, %v1611_v31  ;;  %v2098_v20 = vadd.f32 %v2097_v32, %v2096_v29  ;;  %v2210_v33 = vadd.f32 %v2209_v18, %v2208_v30 }
 0x263   : > { %v2099_v19 = vpop.f32.mrf.mxu1  ;;  %v2211_v21 = vpop.f32.mrf.mxu0 }
 0x264   : > { %v1616_v34 = vadd.f32 %v2210_v33, %v2098_v20 }
 0x265   : > { %v2100_v35 = vpop.f32.mrf.mxu1  ;;  %v2212_v36 = vpop.f32.mrf.mxu0 }
 0x266   : > { %1665 = vst.msk [vmem:[%s2993_s21 + $0xd0] sm:$0xff] %vm1638_vm1, %v1616_v34  ;;  %v2101_v37 = vadd.f32 %v2100_v35, %v2099_v19  ;;  %v2213_v38 = vadd.f32 %v2212_v36, %v2211_v21 }
 0x267   : > { %v2102_v39 = vpop.f32.mrf.mxu1  ;;  %v2214_v40 = vpop.f32.mrf.mxu0 }
 0x268   : > { %v1619_v41 = vadd.f32 %v2213_v38, %v2101_v37 }
 0x269   : > { %v2103_v42 = vpop.f32.mrf.mxu1  ;;  %v2215_v43 = vpop.f32.mrf.mxu0 }
 0x26a   : > { %1666 = vst.msk [vmem:[%s2993_s21 + $0xd8] sm:$0xff] %vm1638_vm1, %v1619_v41  ;;  %v2104_v44 = vadd.f32 %v2103_v42, %v2102_v39  ;;  %v2216_v45 = vadd.f32 %v2215_v43, %v2214_v40 }
 0x26b   : > { %v2105_v46 = vpop.f32.mrf.mxu1  ;;  %v2217_v47 = vpop.f32.mrf.mxu0 }
 0x26c   : > { %v1624_v48 = vadd.f32 %v2216_v45, %v2104_v44 }
 0x26d   : > { %v2106_v49 = vpop.f32.mrf.mxu1  ;;  %v2218_v50 = vpop.f32.mrf.mxu0 }
 0x26e   : > { %1667 = vst.msk [vmem:[%s2993_s21 + $0xe0] sm:$0xff] %vm1638_vm1, %v1624_v48  ;;  %v2107_v51 = vadd.f32 %v2106_v49, %v2105_v46  ;;  %v2219_v52 = vadd.f32 %v2218_v50, %v2217_v47 }
 0x26f   : > { %v2108_v53 = vpop.f32.mrf.mxu1  ;;  %v2220_v54 = vpop.f32.mrf.mxu0 }
 0x270   : > { %v1627_v55 = vadd.f32 %v2219_v52, %v2107_v51 }
 0x271   : > { %v2109_v56 = vpop.f32.mrf.mxu1  ;;  %v2221_v57 = vpop.f32.mrf.mxu0 }
 0x272   : > { %1668 = vst.msk [vmem:[%s2993_s21 + $0xe8] sm:$0xff] %vm1638_vm1, %v1627_v55  ;;  %v2110_v58 = vadd.f32 %v2109_v56, %v2108_v53  ;;  %v2222_v59 = vadd.f32 %v2221_v57, %v2220_v54 }
 0x273   : > { %v2111_v60 = vpop.f32.mrf.mxu1  ;;  %v2223_v61 = vpop.f32.mrf.mxu0 }
 0x274   : > { %v1632_v62 = vadd.f32 %v2222_v59, %v2110_v58 }
 0x275   : > { %v2112_v63 = vpop.f32.mrf.mxu1  ;;  %v2224_v0 = vpop.f32.mrf.mxu0 }
 0x276   : > { %1669 = vst.msk [vmem:[%s2993_s21 + $0xf0] sm:$0xff] %vm1638_vm1, %v1632_v62  ;;  %v2113_v1 = vadd.f32 %v2112_v63, %v2111_v60  ;;  %v2225_v2 = vadd.f32 %v2224_v0, %v2223_v61 }
 0x278   : > { %v1635_v3 = vadd.f32 %v2225_v2, %v2113_v1 }
 0x27a   : > { %1670 = vst.msk [vmem:[%s2993_s21 + $0xf8] sm:$0xff] %vm1638_vm1, %v1635_v3 }
 0x27b PF: > { %s13_s14 = sadd.s32 1, %s2480_s14   ;;  %s3108_s12 = smov %s2476_s13 }
 0x27c   : > { %p10_p5 = scmp.ge.s32.totalorder %s13_s14, 4   ;;  %s3109_s13 = smov %s3111_s15 }
 0x27e   :  { %12 = sbr.rel (!%p10_p5) target bundleno = 2 (0x2), region = 68 }

// kernel: gae_forward.9
= control target key start
LH: loop header
LB: loop body
LE: loop exit
PB: predicated region body
PF: predicated region fallthrough
CT: control target
= control target key end

     0   :  { %s1096_s9 = smov 0   ;;  %s1433_s0 = inlined_call_operand.vmem [shape: f32[512,16], index: 0, kind: input, shape index: {}]   ;;  %s1434_s1 = inlined_call_operand.vmem [shape: f32[16,512], index: 1, kind: input, shape index: {}]   ;;  %s1435_s2 = inlined_call_operand.vmem [shape: f32[512,512], index: 2, kind: output, shape index: {}]  }
   0x1 LB: > { %s986_s10 = sadd.s32 4294967295, %s1078_s9   ;;  %p990_p0 = scmp.ge.s32.totalorder %s1078_s9, 1  ;;  %s1078_s9 = sphi %s1096_s9, %s12_s9  }
   0x2   : > { %p113_p1 = scmp.lt.s32.totalorder %s1078_s9, 3 }
   0x4   : > { %p114_p2 = pnand %p990_p0, %p113_p1 }
   0x5   : > { %s991_s17 = sshll.u32 (!%p114_p2), %s986_s10, 5 }
   0x6   : > { %117 = sbr.rel (%p114_p2) target bundleno = 337 (0x151), region = 28  ;;  %p137_p3 = scmp.lt.s32.totalorder (!%p114_p2), %s991_s17, 63 }
   0xb   : > { %v186_v0 = vld [vmem:[%s1434_s1 + $0x28] sm:$0xff]  ;;  %v188_v1 = vld [vmem:[%s1434_s1 + $0x38] sm:$0xff]  ;;  %v185_v2 = vld [vmem:[%s1434_s1 + $0x20] sm:$0xff]  ;;  %s1437_s17 = smov (!%p137_p3, %s991_s17), 63  ;;  %v1080_v8 = vmov 0.0   ;;  %vm189_vm0 = vcmask 130048  }
   0xc   : > { %314 = vmatprep.subr.mxu0 %v186_v0  ;;  %571 = vmatprep.subr.mxu1 %v188_v1  ;;  %v187_v3 = vld [vmem:[%s1434_s1 + $0x30] sm:$0xff]  ;;  %v182_v4 = vld [vmem:[%s1434_s1 + $0x8] sm:$0xff]  ;;  %v184_v5 = vld [vmem:[%s1434_s1 + $0x18] sm:$0xff]  ;;  %s992_s28 = sshll.u32 %s1437_s17, 3  ;;  %s1062_s4 = sshll.u32 %s1437_s17, 5 }
   0xd   : > { %315 = vmatpush1.msra.mxu0 %v185_v2  ;;  %572 = vmatpush1.msra.mxu1 %v187_v3  ;;  %v181_v6 = vld [vmem:[%s1434_s1] sm:$0xff]  ;;  %v183_v7 = vld [vmem:[%s1434_s1 + $0x10] sm:$0xff]  ;;  %s1136_s3 = scalar_lea.vmem %s1433_s0, %s992_s28  ;;  %s1300_s7 = scalar_lea.vmem %s1435_s2, %s1062_s4 }
   0xe   : > { %316 = vmatprep.subr.mxu0 %v182_v4  ;;  %573 = vmatprep.subr.mxu1 %v184_v5  ;;  %v149_v9 = vld [vmem:[%s1136_s3] sm:$0xff]  ;;  %v150_v10 = vld [vmem:[%s1136_s3 + $0x8] sm:$0xff]  ;;  %v151_v11 = vld [vmem:[%s1136_s3 + $0x10] sm:$0xff] }
   0xf   : > { %317 = vmatpush1.msra.mxu0 %v181_v6  ;;  %350 = vmatprep.mubr.f32.mxu0 %v1080_v8  ;;  %v152_v12 = vld [vmem:[%s1136_s3 + $0x18] sm:$0xff]  ;;  %v153_v13 = vld [vmem:[%s1136_s3 + $0x20] sm:$0xff]  ;;  %v154_v14 = vld [vmem:[%s1136_s3 + $0x28] sm:$0xff] }
  0x10   : > { %574 = vmatpush1.msra.mxu1 %v183_v7  ;;  %607 = vmatprep.mubr.f32.mxu1 %v1080_v8  ;;  %v155_v15 = vld [vmem:[%s1136_s3 + $0x30] sm:$0xff]  ;;  %v156_v16 = vld [vmem:[%s1136_s3 + $0x38] sm:$0xff]  ;;  %v157_v17 = vld [vmem:[%s1136_s3 + $0x40] sm:$0xff] }
  0x11   : > { %996 = vmatmul.mubr.msk.f32.vlgmr.msra.gmra.mxu0 %vm189_vm0, %v149_v9  ;;  %1028 = vmatmul.mubr.msk.f32.vlgmr.msra.gmra.mxu1 %vm189_vm0, %v149_v9  ;;  %v158_v18 = vld [vmem:[%s1136_s3 + $0x48] sm:$0xff]  ;;  %v159_v19 = vld [vmem:[%s1136_s3 + $0x50] sm:$0xff]  ;;  %v160_v20 = vld [vmem:[%s1136_s3 + $0x58] sm:$0xff] }
  0x12   : > { %356 = vmatprep.mubr.f32.mxu0 %v1080_v8  ;;  %613 = vmatprep.mubr.f32.mxu1 %v1080_v8  ;;  %v161_v21 = vld [vmem:[%s1136_s3 + $0x60] sm:$0xff]  ;;  %v162_v22 = vld [vmem:[%s1136_s3 + $0x68] sm:$0xff]  ;;  %v163_v23 = vld [vmem:[%s1136_s3 + $0x70] sm:$0xff] }
  0x13   : > { %v164_v24 = vld [vmem:[%s1136_s3 + $0x78] sm:$0xff]  ;;  %v165_v25 = vld [vmem:[%s1136_s3 + $0x80] sm:$0xff]  ;;  %v166_v26 = vld [vmem:[%s1136_s3 + $0x88] sm:$0xff] }
  0x14   : > { %v167_v27 = vld [vmem:[%s1136_s3 + $0x90] sm:$0xff]  ;;  %v168_v28 = vld [vmem:[%s1136_s3 + $0x98] sm:$0xff]  ;;  %v169_v29 = vld [vmem:[%s1136_s3 + $0xa0] sm:$0xff] }
  0x15   : > { %997 = vmatmul.mubr.msk.f32.gmra.mxu0 %vm189_vm0, %v150_v10  ;;  %1029 = vmatmul.mubr.msk.f32.gmra.mxu1 %vm189_vm0, %v150_v10  ;;  %v170_v30 = vld [vmem:[%s1136_s3 + $0xa8] sm:$0xff]  ;;  %v171_v31 = vld [vmem:[%s1136_s3 + $0xb0] sm:$0xff]  ;;  %v172_v32 = vld [vmem:[%s1136_s3 + $0xb8] sm:$0xff] }
  0x16   : > { %362 = vmatprep.mubr.f32.mxu0 %v1080_v8  ;;  %619 = vmatprep.mubr.f32.mxu1 %v1080_v8  ;;  %v173_v33 = vld [vmem:[%s1136_s3 + $0xc0] sm:$0xff]  ;;  %v174_v34 = vld [vmem:[%s1136_s3 + $0xc8] sm:$0xff]  ;;  %v175_v35 = vld [vmem:[%s1136_s3 + $0xd0] sm:$0xff] }
  0x17   : > { %v176_v36 = vld [vmem:[%s1136_s3 + $0xd8] sm:$0xff]  ;;  %v177_v37 = vld [vmem:[%s1136_s3 + $0xe0] sm:$0xff]  ;;  %v178_v38 = vld [vmem:[%s1136_s3 + $0xe8] sm:$0xff] }
  0x18   : > { %v179_v39 = vld [vmem:[%s1136_s3 + $0xf0] sm:$0xff]  ;;  %v180_v40 = vld [vmem:[%s1136_s3 + $0xf8] sm:$0xff] }
  0x19   : > { %998 = vmatmul.mubr.msk.f32.gmra.mxu0 %vm189_vm0, %v151_v11  ;;  %1030 = vmatmul.mubr.msk.f32.gmra.mxu1 %vm189_vm0, %v151_v11 }
  0x1a   : > { %368 = vmatprep.mubr.f32.mxu0 %v1080_v8  ;;  %625 = vmatprep.mubr.f32.mxu1 %v1080_v8 }
  0x1d   : > { %999 = vmatmul.mubr.msk.f32.gmra.mxu0 %vm189_vm0, %v152_v12  ;;  %1031 = vmatmul.mubr.msk.f32.gmra.mxu1 %vm189_vm0, %v152_v12 }
  0x1e   : > { %374 = vmatprep.mubr.f32.mxu0 %v1080_v8  ;;  %631 = vmatprep.mubr.f32.mxu1 %v1080_v8 }
  0x21   : > { %1000 = vmatmul.mubr.msk.f32.gmra.mxu0 %vm189_vm0, %v153_v13  ;;  %1032 = vmatmul.mubr.msk.f32.gmra.mxu1 %vm189_vm0, %v153_v13 }
  0x22   : > { %380 = vmatprep.mubr.f32.mxu0 %v1080_v8  ;;  %637 = vmatprep.mubr.f32.mxu1 %v1080_v8 }
  0x25   : > { %1001 = vmatmul.mubr.msk.f32.gmra.mxu0 %vm189_vm0, %v154_v14  ;;  %1033 = vmatmul.mubr.msk.f32.gmra.mxu1 %vm189_vm0, %v154_v14 }
  0x26   : > { %386 = vmatprep.mubr.f32.mxu0 %v1080_v8  ;;  %643 = vmatprep.mubr.f32.mxu1 %v1080_v8 }
  0x29   : > { %1002 = vmatmul.mubr.msk.f32.gmra.mxu0 %vm189_vm0, %v155_v15  ;;  %1034 = vmatmul.mubr.msk.f32.gmra.mxu1 %vm189_vm0, %v155_v15 }
  0x2a   : > { %392 = vmatprep.mubr.f32.mxu0 %v1080_v8  ;;  %649 = vmatprep.mubr.f32.mxu1 %v1080_v8 }
  0x2d   : > { %1003 = vmatmul.mubr.msk.f32.gmra.mxu0 %vm189_vm0, %v156_v16  ;;  %1035 = vmatmul.mubr.msk.f32.gmra.mxu1 %vm189_vm0, %v156_v16 }
  0x2e   : > { %398 = vmatprep.mubr.f32.mxu0 %v1080_v8  ;;  %655 = vmatprep.mubr.f32.mxu1 %v1080_v8 }
  0x31   : > { %1004 = vmatmul.mubr.msk.f32.gmra.mxu0 %vm189_vm0, %v157_v17  ;;  %1036 = vmatmul.mubr.msk.f32.gmra.mxu1 %vm189_vm0, %v157_v17 }
  0x32   : > { %404 = vmatprep.mubr.f32.mxu0 %v1080_v8  ;;  %661 = vmatprep.mubr.f32.mxu1 %v1080_v8 }
  0x35   : > { %1005 = vmatmul.mubr.msk.f32.gmra.mxu0 %vm189_vm0, %v158_v18  ;;  %1037 = vmatmul.mubr.msk.f32.gmra.mxu1 %vm189_vm0, %v158_v18 }
  0x36   : > { %410 = vmatprep.mubr.f32.mxu0 %v1080_v8  ;;  %667 = vmatprep.mubr.f32.mxu1 %v1080_v8 }
  0x39   : > { %1006 = vmatmul.mubr.msk.f32.gmra.mxu0 %vm189_vm0, %v159_v19  ;;  %1038 = vmatmul.mubr.msk.f32.gmra.mxu1 %vm189_vm0, %v159_v19 }
  0x3a   : > { %416 = vmatprep.mubr.f32.mxu0 %v1080_v8  ;;  %673 = vmatprep.mubr.f32.mxu1 %v1080_v8 }
  0x3d   : > { %1007 = vmatmul.mubr.msk.f32.gmra.mxu0 %vm189_vm0, %v160_v20  ;;  %1039 = vmatmul.mubr.msk.f32.gmra.mxu1 %vm189_vm0, %v160_v20 }
  0x3e   : > { %422 = vmatprep.mubr.f32.mxu0 %v1080_v8  ;;  %679 = vmatprep.mubr.f32.mxu1 %v1080_v8 }
  0x41   : > { %1008 = vmatmul.mubr.msk.f32.gmra.mxu0 %vm189_vm0, %v161_v21  ;;  %1040 = vmatmul.mubr.msk.f32.gmra.mxu1 %vm189_vm0, %v161_v21 }
  0x42   : > { %428 = vmatprep.mubr.f32.mxu0 %v1080_v8  ;;  %685 = vmatprep.mubr.f32.mxu1 %v1080_v8 }
  0x45   : > { %1009 = vmatmul.mubr.msk.f32.gmra.mxu0 %vm189_vm0, %v162_v22  ;;  %1041 = vmatmul.mubr.msk.f32.gmra.mxu1 %vm189_vm0, %v162_v22 }
  0x46   : > { %434 = vmatprep.mubr.f32.mxu0 %v1080_v8  ;;  %691 = vmatprep.mubr.f32.mxu1 %v1080_v8 }
  0x49   : > { %1010 = vmatmul.mubr.msk.f32.gmra.mxu0 %vm189_vm0, %v163_v23  ;;  %1042 = vmatmul.mubr.msk.f32.gmra.mxu1 %vm189_vm0, %v163_v23 }
  0x4a   : > { %440 = vmatprep.mubr.f32.mxu0 %v1080_v8  ;;  %697 = vmatprep.mubr.f32.mxu1 %v1080_v8 }
  0x4d   : > { %1011 = vmatmul.mubr.msk.f32.gmra.mxu0 %vm189_vm0, %v164_v24  ;;  %1043 = vmatmul.mubr.msk.f32.gmra.mxu1 %vm189_vm0, %v164_v24 }
  0x4e   : > { %446 = vmatprep.mubr.f32.mxu0 %v1080_v8  ;;  %703 = vmatprep.mubr.f32.mxu1 %v1080_v8 }
  0x51   : > { %1012 = vmatmul.mubr.msk.f32.gmra.mxu0 %vm189_vm0, %v165_v25  ;;  %1044 = vmatmul.mubr.msk.f32.gmra.mxu1 %vm189_vm0, %v165_v25 }
  0x52   : > { %452 = vmatprep.mubr.f32.mxu0 %v1080_v8  ;;  %709 = vmatprep.mubr.f32.mxu1 %v1080_v8 }
  0x55   : > { %1013 = vmatmul.mubr.msk.f32.gmra.mxu0 %vm189_vm0, %v166_v26  ;;  %1045 = vmatmul.mubr.msk.f32.gmra.mxu1 %vm189_vm0, %v166_v26 }
  0x56   : > { %458 = vmatprep.mubr.f32.mxu0 %v1080_v8  ;;  %715 = vmatprep.mubr.f32.mxu1 %v1080_v8 }
  0x59   : > { %1014 = vmatmul.mubr.msk.f32.gmra.mxu0 %vm189_vm0, %v167_v27  ;;  %1046 = vmatmul.mubr.msk.f32.gmra.mxu1 %vm189_vm0, %v167_v27 }
  0x5a   : > { %464 = vmatprep.mubr.f32.mxu0 %v1080_v8  ;;  %721 = vmatprep.mubr.f32.mxu1 %v1080_v8 }
  0x5d   : > { %1015 = vmatmul.mubr.msk.f32.gmra.mxu0 %vm189_vm0, %v168_v28  ;;  %1047 = vmatmul.mubr.msk.f32.gmra.mxu1 %vm189_vm0, %v168_v28 }
  0x5e   : > { %470 = vmatprep.mubr.f32.mxu0 %v1080_v8  ;;  %727 = vmatprep.mubr.f32.mxu1 %v1080_v8 }
  0x61   : > { %1016 = vmatmul.mubr.msk.f32.gmra.mxu0 %vm189_vm0, %v169_v29  ;;  %1048 = vmatmul.mubr.msk.f32.gmra.mxu1 %vm189_vm0, %v169_v29 }
  0x62   : > { %476 = vmatprep.mubr.f32.mxu0 %v1080_v8  ;;  %733 = vmatprep.mubr.f32.mxu1 %v1080_v8 }
  0x65   : > { %1017 = vmatmul.mubr.msk.f32.gmra.mxu0 %vm189_vm0, %v170_v30  ;;  %1049 = vmatmul.mubr.msk.f32.gmra.mxu1 %vm189_vm0, %v170_v30 }
  0x66   : > { %482 = vmatprep.mubr.f32.mxu0 %v1080_v8  ;;  %739 = vmatprep.mubr.f32.mxu1 %v1080_v8 }
  0x69   : > { %1018 = vmatmul.mubr.msk.f32.gmra.mxu0 %vm189_vm0, %v171_v31  ;;  %1050 = vmatmul.mubr.msk.f32.gmra.mxu1 %vm189_vm0, %v171_v31 }
  0x6a   : > { %488 = vmatprep.mubr.f32.mxu0 %v1080_v8  ;;  %745 = vmatprep.mubr.f32.mxu1 %v1080_v8 }
  0x6d   : > { %1019 = vmatmul.mubr.msk.f32.gmra.mxu0 %vm189_vm0, %v172_v32  ;;  %1051 = vmatmul.mubr.msk.f32.gmra.mxu1 %vm189_vm0, %v172_v32 }
  0x6e   : > { %494 = vmatprep.mubr.f32.mxu0 %v1080_v8  ;;  %751 = vmatprep.mubr.f32.mxu1 %v1080_v8 }
  0x71   : > { %1020 = vmatmul.mubr.msk.f32.gmra.mxu0 %vm189_vm0, %v173_v33  ;;  %1052 = vmatmul.mubr.msk.f32.gmra.mxu1 %vm189_vm0, %v173_v33 }
  0x72   : > { %500 = vmatprep.mubr.f32.mxu0 %v1080_v8  ;;  %757 = vmatprep.mubr.f32.mxu1 %v1080_v8 }
  0x75   : > { %1021 = vmatmul.mubr.msk.f32.gmra.mxu0 %vm189_vm0, %v174_v34  ;;  %1053 = vmatmul.mubr.msk.f32.gmra.mxu1 %vm189_vm0, %v174_v34 }
  0x76   : > { %506 = vmatprep.mubr.f32.mxu0 %v1080_v8  ;;  %763 = vmatprep.mubr.f32.mxu1 %v1080_v8 }
  0x79   : > { %1022 = vmatmul.mubr.msk.f32.gmra.mxu0 %vm189_vm0, %v175_v35  ;;  %1054 = vmatmul.mubr.msk.f32.gmra.mxu1 %vm189_vm0, %v175_v35 }
  0x7a   : > { %512 = vmatprep.mubr.f32.mxu0 %v1080_v8  ;;  %769 = vmatprep.mubr.f32.mxu1 %v1080_v8 }
  0x7d   : > { %1023 = vmatmul.mubr.msk.f32.gmra.mxu0 %vm189_vm0, %v176_v36  ;;  %1055 = vmatmul.mubr.msk.f32.gmra.mxu1 %vm189_vm0, %v176_v36 }
  0x7e   : > { %518 = vmatprep.mubr.f32.mxu0 %v1080_v8  ;;  %775 = vmatprep.mubr.f32.mxu1 %v1080_v8 }
  0x81   : > { %1024 = vmatmul.mubr.msk.f32.gmra.mxu0 %vm189_vm0, %v177_v37  ;;  %1056 = vmatmul.mubr.msk.f32.gmra.mxu1 %vm189_vm0, %v177_v37 }
  0x82   : > { %524 = vmatprep.mubr.f32.mxu0 %v1080_v8  ;;  %781 = vmatprep.mubr.f32.mxu1 %v1080_v8 }
  0x85   : > { %1025 = vmatmul.mubr.msk.f32.gmra.mxu0 %vm189_vm0, %v178_v38  ;;  %1057 = vmatmul.mubr.msk.f32.gmra.mxu1 %vm189_vm0, %v178_v38 }
  0x86   : > { %530 = vmatprep.mubr.f32.mxu0 %v1080_v8  ;;  %787 = vmatprep.mubr.f32.mxu1 %v1080_v8 }
  0x89   : > { %1026 = vmatmul.mubr.msk.f32.gmra.mxu0 %vm189_vm0, %v179_v39  ;;  %1058 = vmatmul.mubr.msk.f32.gmra.mxu1 %vm189_vm0, %v179_v39 }
  0x8a   : > { %536 = vmatprep.mubr.f32.mxu0 %v1080_v8  ;;  %793 = vmatprep.mubr.f32.mxu1 %v1080_v8 }
  0x8d   : > { %1027 = vmatmul.mubr.msk.f32.gmra.mxu0 %vm189_vm0, %v180_v40  ;;  %1059 = vmatmul.mubr.msk.f32.gmra.mxu1 %vm189_vm0, %v180_v40 }
  0xd1   : > { %v352_v41 = vpop.f32.mrf.mxu0  ;;  %v609_v42 = vpop.f32.mrf.mxu1 }
  0xd2   : > { %800 = vst [vmem:[%s1300_s7] sm:$0xff] %v352_v41  ;;  %802 = vst [vmem:[%s1300_s7 + $0x10] sm:$0xff] %v609_v42 }
  0xd3   : > { %v354_v43 = vpop.f32.mrf.mxu0  ;;  %v611_v44 = vpop.f32.mrf.mxu1 }
  0xd4   : > { %801 = vst [vmem:[%s1300_s7 + $0x8] sm:$0xff] %v354_v43  ;;  %803 = vst [vmem:[%s1300_s7 + $0x18] sm:$0xff] %v611_v44 }
  0xd5   : > { %v358_v45 = vpop.f32.mrf.mxu0  ;;  %v615_v46 = vpop.f32.mrf.mxu1 }
  0xd6   : > { %804 = vst [vmem:[%s1300_s7 + $0x20] sm:$0xff] %v358_v45  ;;  %806 = vst [vmem:[%s1300_s7 + $0x30] sm:$0xff] %v615_v46 }
  0xd7   : > { %v360_v47 = vpop.f32.mrf.mxu0  ;;  %v617_v48 = vpop.f32.mrf.mxu1 }
  0xd8   : > { %805 = vst [vmem:[%s1300_s7 + $0x28] sm:$0xff] %v360_v47  ;;  %807 = vst [vmem:[%s1300_s7 + $0x38] sm:$0xff] %v617_v48 }
  0xd9   : > { %v364_v49 = vpop.f32.mrf.mxu0  ;;  %v621_v50 = vpop.f32.mrf.mxu1 }
  0xda   : > { %808 = vst [vmem:[%s1300_s7 + $0x40] sm:$0xff] %v364_v49  ;;  %810 = vst [vmem:[%s1300_s7 + $0x50] sm:$0xff] %v621_v50 }
  0xdb   : > { %v366_v51 = vpop.f32.mrf.mxu0  ;;  %v623_v52 = vpop.f32.mrf.mxu1 }
  0xdc   : > { %809 = vst [vmem:[%s1300_s7 + $0x48] sm:$0xff] %v366_v51  ;;  %811 = vst [vmem:[%s1300_s7 + $0x58] sm:$0xff] %v623_v52 }
  0xdd   : > { %v370_v53 = vpop.f32.mrf.mxu0  ;;  %v627_v54 = vpop.f32.mrf.mxu1 }
  0xde   : > { %812 = vst [vmem:[%s1300_s7 + $0x60] sm:$0xff] %v370_v53  ;;  %814 = vst [vmem:[%s1300_s7 + $0x70] sm:$0xff] %v627_v54 }
  0xdf   : > { %v372_v55 = vpop.f32.mrf.mxu0  ;;  %v629_v56 = vpop.f32.mrf.mxu1 }
  0xe0   : > { %813 = vst [vmem:[%s1300_s7 + $0x68] sm:$0xff] %v372_v55  ;;  %815 = vst [vmem:[%s1300_s7 + $0x78] sm:$0xff] %v629_v56 }
  0xe1   : > { %v376_v57 = vpop.f32.mrf.mxu0  ;;  %v633_v58 = vpop.f32.mrf.mxu1 }
  0xe2   : > { %816 = vst [vmem:[%s1300_s7 + $0x80] sm:$0xff] %v376_v57  ;;  %818 = vst [vmem:[%s1300_s7 + $0x90] sm:$0xff] %v633_v58 }
  0xe3   : > { %v378_v59 = vpop.f32.mrf.mxu0  ;;  %v635_v60 = vpop.f32.mrf.mxu1 }
  0xe4   : > { %817 = vst [vmem:[%s1300_s7 + $0x88] sm:$0xff] %v378_v59  ;;  %819 = vst [vmem:[%s1300_s7 + $0x98] sm:$0xff] %v635_v60 }
  0xe5   : > { %v382_v61 = vpop.f32.mrf.mxu0  ;;  %v639_v62 = vpop.f32.mrf.mxu1 }
  0xe6   : > { %820 = vst [vmem:[%s1300_s7 + $0xa0] sm:$0xff] %v382_v61  ;;  %822 = vst [vmem:[%s1300_s7 + $0xb0] sm:$0xff] %v639_v62 }
  0xe7   : > { %v384_v63 = vpop.f32.mrf.mxu0  ;;  %v641_v0 = vpop.f32.mrf.mxu1 }
  0xe8   : > { %821 = vst [vmem:[%s1300_s7 + $0xa8] sm:$0xff] %v384_v63  ;;  %823 = vst [vmem:[%s1300_s7 + $0xb8] sm:$0xff] %v641_v0 }
  0xe9   : > { %v388_v1 = vpop.f32.mrf.mxu0  ;;  %v645_v2 = vpop.f32.mrf.mxu1 }
  0xea   : > { %824 = vst [vmem:[%s1300_s7 + $0xc0] sm:$0xff] %v388_v1  ;;  %826 = vst [vmem:[%s1300_s7 + $0xd0] sm:$0xff] %v645_v2 }
  0xeb   : > { %v390_v3 = vpop.f32.mrf.mxu0  ;;  %v647_v4 = vpop.f32.mrf.mxu1 }
  0xec   : > { %825 = vst [vmem:[%s1300_s7 + $0xc8] sm:$0xff] %v390_v3  ;;  %827 = vst [vmem:[%s1300_s7 + $0xd8] sm:$0xff] %v647_v4 }
  0xed   : > { %v394_v5 = vpop.f32.mrf.mxu0  ;;  %v651_v6 = vpop.f32.mrf.mxu1 }
  0xee   : > { %828 = vst [vmem:[%s1300_s7 + $0xe0] sm:$0xff] %v394_v5  ;;  %830 = vst [vmem:[%s1300_s7 + $0xf0] sm:$0xff] %v651_v6 }
  0xef   : > { %v396_v7 = vpop.f32.mrf.mxu0  ;;  %v653_v8 = vpop.f32.mrf.mxu1 }
  0xf0   : > { %829 = vst [vmem:[%s1300_s7 + $0xe8] sm:$0xff] %v396_v7  ;;  %831 = vst [vmem:[%s1300_s7 + $0xf8] sm:$0xff] %v653_v8 }
  0xf1   : > { %v400_v9 = vpop.f32.mrf.mxu0  ;;  %v657_v10 = vpop.f32.mrf.mxu1 }
  0xf2   : > { %832 = vst [vmem:[%s1300_s7 + $0x100] sm:$0xff] %v400_v9  ;;  %834 = vst [vmem:[%s1300_s7 + $0x110] sm:$0xff] %v657_v10 }
  0xf3   : > { %v402_v11 = vpop.f32.mrf.mxu0  ;;  %v659_v12 = vpop.f32.mrf.mxu1 }
  0xf4   : > { %833 = vst [vmem:[%s1300_s7 + $0x108] sm:$0xff] %v402_v11  ;;  %835 = vst [vmem:[%s1300_s7 + $0x118] sm:$0xff] %v659_v12 }
  0xf5   : > { %v406_v13 = vpop.f32.mrf.mxu0  ;;  %v663_v14 = vpop.f32.mrf.mxu1 }
  0xf6   : > { %836 = vst [vmem:[%s1300_s7 + $0x120] sm:$0xff] %v406_v13  ;;  %838 = vst [vmem:[%s1300_s7 + $0x130] sm:$0xff] %v663_v14 }
  0xf7   : > { %v408_v15 = vpop.f32.mrf.mxu0  ;;  %v665_v16 = vpop.f32.mrf.mxu1 }
  0xf8   : > { %837 = vst [vmem:[%s1300_s7 + $0x128] sm:$0xff] %v408_v15  ;;  %839 = vst [vmem:[%s1300_s7 + $0x138] sm:$0xff] %v665_v16 }
  0xf9   : > { %v412_v17 = vpop.f32.mrf.mxu0  ;;  %v669_v18 = vpop.f32.mrf.mxu1 }
  0xfa   : > { %840 = vst [vmem:[%s1300_s7 + $0x140] sm:$0xff] %v412_v17  ;;  %842 = vst [vmem:[%s1300_s7 + $0x150] sm:$0xff] %v669_v18 }
  0xfb   : > { %v414_v19 = vpop.f32.mrf.mxu0  ;;  %v671_v20 = vpop.f32.mrf.mxu1 }
  0xfc   : > { %841 = vst [vmem:[%s1300_s7 + $0x148] sm:$0xff] %v414_v19  ;;  %843 = vst [vmem:[%s1300_s7 + $0x158] sm:$0xff] %v671_v20 }
  0xfd   : > { %v418_v21 = vpop.f32.mrf.mxu0  ;;  %v675_v22 = vpop.f32.mrf.mxu1 }
  0xfe   : > { %844 = vst [vmem:[%s1300_s7 + $0x160] sm:$0xff] %v418_v21  ;;  %846 = vst [vmem:[%s1300_s7 + $0x170] sm:$0xff] %v675_v22 }
  0xff   : > { %v420_v23 = vpop.f32.mrf.mxu0  ;;  %v677_v24 = vpop.f32.mrf.mxu1 }
 0x100   : > { %845 = vst [vmem:[%s1300_s7 + $0x168] sm:$0xff] %v420_v23  ;;  %847 = vst [vmem:[%s1300_s7 + $0x178] sm:$0xff] %v677_v24 }
 0x101   : > { %v424_v25 = vpop.f32.mrf.mxu0  ;;  %v681_v26 = vpop.f32.mrf.mxu1 }
 0x102   : > { %848 = vst [vmem:[%s1300_s7 + $0x180] sm:$0xff] %v424_v25  ;;  %850 = vst [vmem:[%s1300_s7 + $0x190] sm:$0xff] %v681_v26 }
 0x103   : > { %v426_v27 = vpop.f32.mrf.mxu0  ;;  %v683_v28 = vpop.f32.mrf.mxu1 }
 0x104   : > { %849 = vst [vmem:[%s1300_s7 + $0x188] sm:$0xff] %v426_v27  ;;  %851 = vst [vmem:[%s1300_s7 + $0x198] sm:$0xff] %v683_v28 }
 0x105   : > { %v430_v29 = vpop.f32.mrf.mxu0  ;;  %v687_v30 = vpop.f32.mrf.mxu1 }
 0x106   : > { %852 = vst [vmem:[%s1300_s7 + $0x1a0] sm:$0xff] %v430_v29  ;;  %854 = vst [vmem:[%s1300_s7 + $0x1b0] sm:$0xff] %v687_v30 }
 0x107   : > { %v432_v31 = vpop.f32.mrf.mxu0  ;;  %v689_v32 = vpop.f32.mrf.mxu1 }
 0x108   : > { %853 = vst [vmem:[%s1300_s7 + $0x1a8] sm:$0xff] %v432_v31  ;;  %855 = vst [vmem:[%s1300_s7 + $0x1b8] sm:$0xff] %v689_v32 }
 0x109   : > { %v436_v33 = vpop.f32.mrf.mxu0  ;;  %v693_v34 = vpop.f32.mrf.mxu1 }
 0x10a   : > { %856 = vst [vmem:[%s1300_s7 + $0x1c0] sm:$0xff] %v436_v33  ;;  %858 = vst [vmem:[%s1300_s7 + $0x1d0] sm:$0xff] %v693_v34 }
 0x10b   : > { %v438_v35 = vpop.f32.mrf.mxu0  ;;  %v695_v36 = vpop.f32.mrf.mxu1 }
 0x10c   : > { %857 = vst [vmem:[%s1300_s7 + $0x1c8] sm:$0xff] %v438_v35  ;;  %859 = vst [vmem:[%s1300_s7 + $0x1d8] sm:$0xff] %v695_v36 }
 0x10d   : > { %v442_v37 = vpop.f32.mrf.mxu0  ;;  %v699_v38 = vpop.f32.mrf.mxu1 }
 0x10e   : > { %860 = vst [vmem:[%s1300_s7 + $0x1e0] sm:$0xff] %v442_v37  ;;  %862 = vst [vmem:[%s1300_s7 + $0x1f0] sm:$0xff] %v699_v38 }
 0x10f   : > { %v444_v39 = vpop.f32.mrf.mxu0  ;;  %v701_v40 = vpop.f32.mrf.mxu1 }
 0x110   : > { %861 = vst [vmem:[%s1300_s7 + $0x1e8] sm:$0xff] %v444_v39  ;;  %863 = vst [vmem:[%s1300_s7 + $0x1f8] sm:$0xff] %v701_v40 }
 0x111   : > { %v448_v41 = vpop.f32.mrf.mxu0  ;;  %v705_v42 = vpop.f32.mrf.mxu1 }
 0x112   : > { %864 = vst [vmem:[%s1300_s7 + $0x200] sm:$0xff] %v448_v41  ;;  %866 = vst [vmem:[%s1300_s7 + $0x210] sm:$0xff] %v705_v42 }
 0x113   : > { %v450_v43 = vpop.f32.mrf.mxu0  ;;  %v707_v44 = vpop.f32.mrf.mxu1 }
 0x114   : > { %865 = vst [vmem:[%s1300_s7 + $0x208] sm:$0xff] %v450_v43  ;;  %867 = vst [vmem:[%s1300_s7 + $0x218] sm:$0xff] %v707_v44 }
 0x115   : > { %v454_v45 = vpop.f32.mrf.mxu0  ;;  %v711_v46 = vpop.f32.mrf.mxu1 }
 0x116   : > { %868 = vst [vmem:[%s1300_s7 + $0x220] sm:$0xff] %v454_v45  ;;  %870 = vst [vmem:[%s1300_s7 + $0x230] sm:$0xff] %v711_v46 }
 0x117   : > { %v456_v47 = vpop.f32.mrf.mxu0  ;;  %v713_v48 = vpop.f32.mrf.mxu1 }
 0x118   : > { %869 = vst [vmem:[%s1300_s7 + $0x228] sm:$0xff] %v456_v47  ;;  %871 = vst [vmem:[%s1300_s7 + $0x238] sm:$0xff] %v713_v48 }
 0x119   : > { %v460_v49 = vpop.f32.mrf.mxu0  ;;  %v717_v50 = vpop.f32.mrf.mxu1 }
 0x11a   : > { %872 = vst [vmem:[%s1300_s7 + $0x240] sm:$0xff] %v460_v49  ;;  %874 = vst [vmem:[%s1300_s7 + $0x250] sm:$0xff] %v717_v50 }
 0x11b   : > { %v462_v51 = vpop.f32.mrf.mxu0  ;;  %v719_v52 = vpop.f32.mrf.mxu1 }
 0x11c   : > { %873 = vst [vmem:[%s1300_s7 + $0x248] sm:$0xff] %v462_v51  ;;  %875 = vst [vmem:[%s1300_s7 + $0x258] sm:$0xff] %v719_v52 }
 0x11d   : > { %v466_v53 = vpop.f32.mrf.mxu0  ;;  %v723_v54 = vpop.f32.mrf.mxu1 }
 0x11e   : > { %876 = vst [vmem:[%s1300_s7 + $0x260] sm:$0xff] %v466_v53  ;;  %878 = vst [vmem:[%s1300_s7 + $0x270] sm:$0xff] %v723_v54 }
 0x11f   : > { %v468_v55 = vpop.f32.mrf.mxu0  ;;  %v725_v56 = vpop.f32.mrf.mxu1 }
 0x120   : > { %877 = vst [vmem:[%s1300_s7 + $0x268] sm:$0xff] %v468_v55  ;;  %879 = vst [vmem:[%s1300_s7 + $0x278] sm:$0xff] %v725_v56 }
 0x121   : > { %v472_v57 = vpop.f32.mrf.mxu0  ;;  %v729_v58 = vpop.f32.mrf.mxu1 }
 0x122   : > { %880 = vst [vmem:[%s1300_s7 + $0x280] sm:$0xff] %v472_v57  ;;  %882 = vst [vmem:[%s1300_s7 + $0x290] sm:$0xff] %v729_v58 }
 0x123   : > { %v474_v59 = vpop.f32.mrf.mxu0  ;;  %v731_v60 = vpop.f32.mrf.mxu1 }
 0x124   : > { %881 = vst [vmem:[%s1300_s7 + $0x288] sm:$0xff] %v474_v59  ;;  %883 = vst [vmem:[%s1300_s7 + $0x298] sm:$0xff] %v731_v60 }
 0x125   : > { %v478_v61 = vpop.f32.mrf.mxu0  ;;  %v735_v62 = vpop.f32.mrf.mxu1 }
 0x126   : > { %884 = vst [vmem:[%s1300_s7 + $0x2a0] sm:$0xff] %v478_v61  ;;  %886 = vst [vmem:[%s1300_s7 + $0x2b0] sm:$0xff] %v735_v62 }
 0x127   : > { %v480_v63 = vpop.f32.mrf.mxu0  ;;  %v737_v0 = vpop.f32.mrf.mxu1 }
 0x128   : > { %885 = vst [vmem:[%s1300_s7 + $0x2a8] sm:$0xff] %v480_v63  ;;  %887 = vst [vmem:[%s1300_s7 + $0x2b8] sm:$0xff] %v737_v0 }
 0x129   : > { %v484_v1 = vpop.f32.mrf.mxu0  ;;  %v741_v2 = vpop.f32.mrf.mxu1 }
 0x12a   : > { %888 = vst [vmem:[%s1300_s7 + $0x2c0] sm:$0xff] %v484_v1  ;;  %890 = vst [vmem:[%s1300_s7 + $0x2d0] sm:$0xff] %v741_v2 }
 0x12b   : > { %v486_v3 = vpop.f32.mrf.mxu0  ;;  %v743_v4 = vpop.f32.mrf.mxu1 }
 0x12c   : > { %889 = vst [vmem:[%s1300_s7 + $0x2c8] sm:$0xff] %v486_v3  ;;  %891 = vst [vmem:[%s1300_s7 + $0x2d8] sm:$0xff] %v743_v4 }
 0x12d   : > { %v490_v5 = vpop.f32.mrf.mxu0  ;;  %v747_v6 = vpop.f32.mrf.mxu1 }
 0x12e   : > { %892 = vst [vmem:[%s1300_s7 + $0x2e0] sm:$0xff] %v490_v5  ;;  %894 = vst [vmem:[%s1300_s7 + $0x2f0] sm:$0xff] %v747_v6 }
 0x12f   : > { %v492_v7 = vpop.f32.mrf.mxu0  ;;  %v749_v8 = vpop.f32.mrf.mxu1 }
 0x130   : > { %893 = vst [vmem:[%s1300_s7 + $0x2e8] sm:$0xff] %v492_v7  ;;  %895 = vst [vmem:[%s1300_s7 + $0x2f8] sm:$0xff] %v749_v8 }
 0x131   : > { %v496_v9 = vpop.f32.mrf.mxu0  ;;  %v753_v10 = vpop.f32.mrf.mxu1 }
 0x132   : > { %896 = vst [vmem:[%s1300_s7 + $0x300] sm:$0xff] %v496_v9  ;;  %898 = vst [vmem:[%s1300_s7 + $0x310] sm:$0xff] %v753_v10 }
 0x133   : > { %v498_v11 = vpop.f32.mrf.mxu0  ;;  %v755_v12 = vpop.f32.mrf.mxu1 }
 0x134   : > { %897 = vst [vmem:[%s1300_s7 + $0x308] sm:$0xff] %v498_v11  ;;  %899 = vst [vmem:[%s1300_s7 + $0x318] sm:$0xff] %v755_v12 }
 0x135   : > { %v502_v13 = vpop.f32.mrf.mxu0  ;;  %v759_v14 = vpop.f32.mrf.mxu1 }
 0x136   : > { %900 = vst [vmem:[%s1300_s7 + $0x320] sm:$0xff] %v502_v13  ;;  %902 = vst [vmem:[%s1300_s7 + $0x330] sm:$0xff] %v759_v14 }
 0x137   : > { %v504_v15 = vpop.f32.mrf.mxu0  ;;  %v761_v16 = vpop.f32.mrf.mxu1 }
 0x138   : > { %901 = vst [vmem:[%s1300_s7 + $0x328] sm:$0xff] %v504_v15  ;;  %903 = vst [vmem:[%s1300_s7 + $0x338] sm:$0xff] %v761_v16 }
 0x139   : > { %v508_v17 = vpop.f32.mrf.mxu0  ;;  %v765_v18 = vpop.f32.mrf.mxu1 }
 0x13a   : > { %904 = vst [vmem:[%s1300_s7 + $0x340] sm:$0xff] %v508_v17  ;;  %906 = vst [vmem:[%s1300_s7 + $0x350] sm:$0xff] %v765_v18 }
 0x13b   : > { %v510_v19 = vpop.f32.mrf.mxu0  ;;  %v767_v20 = vpop.f32.mrf.mxu1 }
 0x13c   : > { %905 = vst [vmem:[%s1300_s7 + $0x348] sm:$0xff] %v510_v19  ;;  %907 = vst [vmem:[%s1300_s7 + $0x358] sm:$0xff] %v767_v20 }
 0x13d   : > { %v514_v21 = vpop.f32.mrf.mxu0  ;;  %v771_v22 = vpop.f32.mrf.mxu1 }
 0x13e   : > { %908 = vst [vmem:[%s1300_s7 + $0x360] sm:$0xff] %v514_v21  ;;  %910 = vst [vmem:[%s1300_s7 + $0x370] sm:$0xff] %v771_v22 }
 0x13f   : > { %v516_v23 = vpop.f32.mrf.mxu0  ;;  %v773_v24 = vpop.f32.mrf.mxu1 }
 0x140   : > { %909 = vst [vmem:[%s1300_s7 + $0x368] sm:$0xff] %v516_v23  ;;  %911 = vst [vmem:[%s1300_s7 + $0x378] sm:$0xff] %v773_v24 }
 0x141   : > { %v520_v25 = vpop.f32.mrf.mxu0  ;;  %v777_v26 = vpop.f32.mrf.mxu1 }
 0x142   : > { %912 = vst [vmem:[%s1300_s7 + $0x380] sm:$0xff] %v520_v25  ;;  %914 = vst [vmem:[%s1300_s7 + $0x390] sm:$0xff] %v777_v26 }
 0x143   : > { %v522_v27 = vpop.f32.mrf.mxu0  ;;  %v779_v28 = vpop.f32.mrf.mxu1 }
 0x144   : > { %913 = vst [vmem:[%s1300_s7 + $0x388] sm:$0xff] %v522_v27  ;;  %915 = vst [vmem:[%s1300_s7 + $0x398] sm:$0xff] %v779_v28 }
 0x145   : > { %v526_v29 = vpop.f32.mrf.mxu0  ;;  %v783_v30 = vpop.f32.mrf.mxu1 }
 0x146   : > { %916 = vst [vmem:[%s1300_s7 + $0x3a0] sm:$0xff] %v526_v29  ;;  %918 = vst [vmem:[%s1300_s7 + $0x3b0] sm:$0xff] %v783_v30 }
 0x147   : > { %v528_v31 = vpop.f32.mrf.mxu0  ;;  %v785_v32 = vpop.f32.mrf.mxu1 }
 0x148   : > { %917 = vst [vmem:[%s1300_s7 + $0x3a8] sm:$0xff] %v528_v31  ;;  %919 = vst [vmem:[%s1300_s7 + $0x3b8] sm:$0xff] %v785_v32 }
 0x149   : > { %v532_v33 = vpop.f32.mrf.mxu0  ;;  %v789_v34 = vpop.f32.mrf.mxu1 }
 0x14a   : > { %920 = vst [vmem:[%s1300_s7 + $0x3c0] sm:$0xff] %v532_v33  ;;  %922 = vst [vmem:[%s1300_s7 + $0x3d0] sm:$0xff] %v789_v34 }
 0x14b   : > { %v534_v35 = vpop.f32.mrf.mxu0  ;;  %v791_v36 = vpop.f32.mrf.mxu1 }
 0x14c   : > { %921 = vst [vmem:[%s1300_s7 + $0x3c8] sm:$0xff] %v534_v35  ;;  %923 = vst [vmem:[%s1300_s7 + $0x3d8] sm:$0xff] %v791_v36 }
 0x14d   : > { %v538_v37 = vpop.f32.mrf.mxu0  ;;  %v795_v38 = vpop.f32.mrf.mxu1 }
 0x14e   : > { %924 = vst [vmem:[%s1300_s7 + $0x3e0] sm:$0xff] %v538_v37  ;;  %926 = vst [vmem:[%s1300_s7 + $0x3f0] sm:$0xff] %v795_v38 }
 0x14f   : > { %v540_v39 = vpop.f32.mrf.mxu0  ;;  %v797_v40 = vpop.f32.mrf.mxu1 }
 0x150   : > { %925 = vst [vmem:[%s1300_s7 + $0x3e8] sm:$0xff] %v540_v39  ;;  %927 = vst [vmem:[%s1300_s7 + $0x3f8] sm:$0xff] %v797_v40 }
 0x151 PF: > { %s12_s9 = sadd.s32 1, %s1078_s9  }
 0x152   : > { %p9_p4 = scmp.ge.s32.totalorder %s12_s9, 4  }
 0x154   :  { %11 = sbr.rel (!%p9_p4) target bundleno = 1 (0x1), region = 58 }

</bundles_post_ra>
